<compile_context>
chip_gen: v6e
topology: v6e:2x2x1
jax: 0.10.0
libtpu: 0.0.40
codegen_flags: <defaults>
</compile_context>

<pallas_src>
import functools

import jax
import jax.numpy as jnp
from jax.experimental import pallas as pl
from jax.experimental.pallas import tpu as pltpu


# ---------------------------------------------------------------------------
# Kernels
# ---------------------------------------------------------------------------

def _head_fused_kernel(x_ref, w_ref, b_ref, o_ref):
    """Fused AdaptiveAvgPool2d(1) + Flatten + Linear as one MXU matmul.

    x_ref: (TB, C*HW)    lane-dense feature tile (native dtype, no up-cast)
    w_ref: (C*HW, NPAD)  HW-expanded weight^T pre-scaled by 1/(H*W), zero-padded lanes
    b_ref: (1, NPAD)     bias (f32), zero-padded lanes
    o_ref: (TB, NPAD)    lane-dense f32 output tile
    """
    out = jnp.dot(x_ref[...], w_ref[...], preferred_element_type=jnp.float32)
    o_ref[...] = (out + b_ref[...]).astype(o_ref.dtype)


def _head_twostage_kernel(x_ref, w_ref, b_ref, o_ref):
    """Fallback for wide classifier heads: spatial sum-reduce, then small matmul.

    x_ref: (TB, C, HW); w_ref: (C, NPAD) pre-scaled by 1/HW; b_ref: (1, NPAD).
    """
    pooled = jnp.sum(x_ref[...].astype(jnp.float32), axis=-1)        # (TB, C)
    out = jnp.dot(pooled, w_ref[...], preferred_element_type=jnp.float32)
    o_ref[...] = (out + b_ref[...]).astype(o_ref.dtype)


# ---------------------------------------------------------------------------
# Tiling helpers
# ---------------------------------------------------------------------------

def _target_block_bytes():
    """Per-block streaming target.  Bigger on v7x-class chips (3.2 TB/s HBM makes the
    per-block DMA short relative to the ~0.35us/step overhead)."""
    try:
        if pltpu.get_tpu_info().vmem_capacity_bytes <= (64 << 20):   # v7x-class TC
            return 8 << 20
    except Exception:
        pass
    return 4 << 20


def _choose_block_b(B, bytes_per_sample, target_bytes, sublane_align, min_tiles=2):
    """Largest sublane-aligned batch tile whose streamed x block is <= target_bytes,
    capped so large batches give >= min_tiles grid steps (keeps both v7x TCs busy)."""
    tb = max(1, int(target_bytes) // int(bytes_per_sample))
    if B >= 2 * sublane_align:
        tb = min(tb, pl.cdiv(B, min_tiles))
    if tb >= B or B <= sublane_align:
        return B                           # full-batch block: always a legal shape
    tb = max(sublane_align, (tb // sublane_align) * sublane_align)
    return min(tb, B)


# ---------------------------------------------------------------------------
# Wrapper
# ---------------------------------------------------------------------------

def efficientnet_head(features_nchw, weight, bias, *, block_b=None, fuse=None):
    """Classifier head of the `efficientnet` module:
         AdaptiveAvgPool2d(1) -> Flatten -> Linear(320, num_class)
       applied to the (B, 320, H, W) feature map produced by the truncated backbone.
       Returns (B, num_class) float32.

       For steady-state serving, wrap in jax.jit (done in __main__) or precompute the
       padded/expanded weight once per checkpoint instead of per call.
    """
    B, C, H, W = features_nchw.shape
    HW = H * W
    num_class, c_in = weight.shape
    assert c_in == C, "nn.Linear in-features must match the feature channels"

    NPAD = pl.cdiv(num_class, 128) * 128          # lane-dense classifier width
    x_dtype = features_nchw.dtype
    itemsize = jnp.dtype(x_dtype).itemsize
    sublane_align = 8 * max(1, 4 // itemsize)     # 8 for f32, 16 for bf16

    # Fuse pool+linear into one matmul unless the HW-expanded weight would be too big.
    if fuse is None:
        fuse = (NPAD <= 256) and (C * HW * NPAD * itemsize <= (16 << 20))

    inv_hw = 1.0 / float(HW)
    w_t = weight.T.astype(jnp.float32) * inv_hw                       # (C, num_class)
    b_pad = jnp.zeros((1, NPAD), jnp.float32).at[0, :num_class].set(
        bias.astype(jnp.float32))

    per_sample = C * HW * itemsize
    TB = block_b if block_b is not None else _choose_block_b(
        B, per_sample, _target_block_bytes(), sublane_align)
    grid = (pl.cdiv(B, TB),)

    if fuse:
        # Lane-dense flattening: (B, C, H, W) -> (B, C*HW), a free contiguous view.
        x_in = features_nchw.reshape(B, C * HW)
        # Expand the scaled weight over the spatial axis:
        #   w_exp[c*HW + hw, n] = weight[n, c] / HW
        # Kept in the feature dtype so bf16 features hit the MXU directly.
        w_exp = jnp.repeat(w_t, HW, axis=0)                           # (C*HW, num_class)
        w_pad = jnp.zeros((C * HW, NPAD), x_dtype).at[:, :num_class].set(
            w_exp.astype(x_dtype))
        kernel = _head_fused_kernel
        in_specs = [
            # feature tiles stream (double-buffered) over the batch axis
            pl.BlockSpec((TB, C * HW), lambda i: (i, 0)),
            # classifier params stay VMEM-resident across all tiles
            pl.BlockSpec((C * HW, NPAD), lambda i: (0, 0)),
            pl.BlockSpec((1, NPAD), lambda i: (0, 0)),
        ]
        w_bytes = C * HW * NPAD * itemsize
    else:
        x_in = features_nchw.reshape(B, C, HW)
        w_pad = jnp.zeros((C, NPAD), jnp.float32).at[:, :num_class].set(w_t)
        kernel = _head_twostage_kernel
        in_specs = [
            pl.BlockSpec((TB, C, HW), lambda i: (i, 0, 0)),
            pl.BlockSpec((C, NPAD), lambda i: (0, 0)),
            pl.BlockSpec((1, NPAD), lambda i: (0, 0)),
        ]
        w_bytes = C * NPAD * 4

    # Explicit VMEM budget: double-buffered x/out blocks + (conservatively 2x) weight + slack.
    x_block_bytes = TB * per_sample
    out_block_bytes = TB * NPAD * 4
    vmem_limit = 2 * x_block_bytes + 2 * out_block_bytes + 2 * w_bytes + 2 * NPAD * 4 + (4 << 20)
    vmem_limit = int(min(max(vmem_limit, 16 << 20), 64 << 20))

    out_padded = pl.pallas_call(
        kernel,
        out_shape=jax.ShapeDtypeStruct((B, NPAD), jnp.float32),
        grid_spec=pltpu.PrefetchScalarGridSpec(
            num_scalar_prefetch=0,
            grid=grid,
            in_specs=in_specs,
            out_specs=pl.BlockSpec((TB, NPAD), lambda i: (i, 0)),
        ),
        compiler_params=pltpu.CompilerParams(
            dimension_semantics=("parallel",),    # batch tiles independent -> 2 TCs on v7x
            vmem_limit_bytes=vmem_limit),
    )(x_in, w_pad, b_pad)

    return out_padded[:, :num_class]


def _reference(features_nchw, weight, bias):
    pooled = jnp.mean(features_nchw.astype(jnp.float32), axis=(2, 3))
    return pooled @ weight.T.astype(jnp.float32) + bias.astype(jnp.float32)


if __name__ == "__main__":
    key = jax.random.PRNGKey(0)
    k_x, k_w, k_b = jax.random.split(key, 3)

    # Feature map the truncated EfficientNet backbone emits (320 channels);
    # classifier is nn.Linear(320, num_class=4).
    B, C, H, W = 2, 320, 8, 8
    num_class = 4

    x = jax.random.normal(k_x, (B, C, H, W), dtype=jnp.float32)
    weight = jax.random.normal(k_w, (num_class, C), dtype=jnp.float32) * 0.05
    bias = jax.random.normal(k_b, (num_class,), dtype=jnp.float32) * 0.05

    ref = _reference(x, weight, bias)

    # 1) Primary: fused pool+linear, f32 features.
    head = jax.jit(efficientnet_head)
    out = jax.block_until_ready(head(x, weight, bias))
    assert out.shape == (B, num_class)
    assert jnp.allclose(out, ref, atol=1e-4, rtol=1e-4), "fused head mismatch"

    # 2) Ragged batch (B not a multiple of the block) exercises masked output writeback.
    xr = jax.random.normal(k_x, (10, C, H, W), dtype=jnp.float32)
    out_r = jax.block_until_ready(
        jax.jit(functools.partial(efficientnet_head, block_b=8))(xr, weight, bias))
    assert jnp.allclose(out_r, _reference(xr, weight, bias), atol=1e-4, rtol=1e-4), \
        "ragged-batch mismatch"

    # 3) bf16 features straight to the MXU (no f32 up-cast of the tile).
    xb = jax.random.normal(k_x, (16, C, H, W), dtype=jnp.bfloat16)
    out_b = jax.block_until_ready(jax.jit(efficientnet_head)(xb, weight, bias))
    assert jnp.allclose(out_b, _reference(xb, weight, bias), atol=2e-2, rtol=2e-2), \
        "bf16 mismatch"

    # 4) Two-stage fallback path (used when the classifier head is too wide to fuse).
    out_ts = jax.block_until_ready(
        jax.jit(functools.partial(efficientnet_head, fuse=False))(x, weight, bias))
    assert jnp.allclose(out_ts, ref, atol=1e-4, rtol=1e-4), "two-stage mismatch"

    print("KERNEL_OK")
</pallas_src>

<mosaic_0001>
module attributes {stable_mosaic.version = 11 : i64} {
  func.func @_head_fused_kernel(%arg0: i32, %arg1: memref<2x20480xf32, #tpu.memory_space<vmem>>, %arg2: memref<20480x128xf32, #tpu.memory_space<vmem>>, %arg3: memref<1x128xf32, #tpu.memory_space<vmem>>, %arg4: memref<2x128xf32, #tpu.memory_space<vmem>>) attributes {dimension_semantics = [#tpu.dimension_semantics<parallel>], iteration_bounds = array<i64: 1>, scalar_prefetch = 0 : i64, scratch_operands = 0 : i64, tpu.core_type = #tpu.core_type<tc>, window_params = [{transform_indices = @transform_0, window_bounds = array<i64: 2, 20480>}, {pipeline_mode = #tpu.pipeline_mode<synchronous>, transform_indices = @transform_1, window_bounds = array<i64: 20480, 128>}, {pipeline_mode = #tpu.pipeline_mode<synchronous>, transform_indices = @transform_2, window_bounds = array<i64: 1, 128>}, {transform_indices = @transform_3, window_bounds = array<i64: 2, 128>}]} {
    %c0 = arith.constant 0 : index
    %c0_0 = arith.constant 0 : index
    %0 = vector.load %arg1[%c0, %c0_0] : memref<2x20480xf32, #tpu.memory_space<vmem>>, vector<2x20480xf32>
    %c0_1 = arith.constant 0 : index
    %c0_2 = arith.constant 0 : index
    %1 = vector.load %arg2[%c0_1, %c0_2] : memref<20480x128xf32, #tpu.memory_space<vmem>>, vector<20480x128xf32>
    %cst = arith.constant dense<0.000000e+00> : vector<2x128xf32>
    %2 = tpu.matmul %0, %1, %cst {dimension_numbers = #tpu.dot_dimension_numbers<[1], [0], [0], [1], [0, 0, 1, 1], [], []>} : vector<2x20480xf32>, vector<20480x128xf32>, vector<2x128xf32> -> vector<2x128xf32>
    %c0_3 = arith.constant 0 : index
    %c0_4 = arith.constant 0 : index
    %3 = vector.load %arg3[%c0_3, %c0_4] : memref<1x128xf32, #tpu.memory_space<vmem>>, vector<1x128xf32>
    %4 = vector.broadcast %3 : vector<1x128xf32> to vector<2x128xf32>
    %5 = arith.addf %2, %4 : vector<2x128xf32>
    %c0_5 = arith.constant 0 : index
    %c0_6 = arith.constant 0 : index
    %6 = vector.load %arg4[%c0_5, %c0_6] : memref<2x128xf32, #tpu.memory_space<vmem>>, vector<2x128xf32>
    tpu.vector_store %arg4[%c0_5, %c0_6], %5 {strides = array<i32>} : memref<2x128xf32, #tpu.memory_space<vmem>>, vector<2x128xf32>,
    return
  }
  func.func @transform_0(%arg0: i32) -> (i32, i32) {
    %c0_i32 = arith.constant 0 : i32
    %c0_i32_0 = arith.constant 0 : i32
    return %arg0, %c0_i32 : i32, i32
  }
  func.func @transform_1(%arg0: i32) -> (i32, i32) {
    %c0_i32 = arith.constant 0 : i32
    %c0_i32_0 = arith.constant 0 : i32
    %c0_i32_1 = arith.constant 0 : i32
    return %c0_i32, %c0_i32_0 : i32, i32
  }
  func.func @transform_2(%arg0: i32) -> (i32, i32) {
    %c0_i32 = arith.constant 0 : i32
    %c0_i32_0 = arith.constant 0 : i32
    %c0_i32_1 = arith.constant 0 : i32
    return %c0_i32, %c0_i32_0 : i32, i32
  }
  func.func @transform_3(%arg0: i32) -> (i32, i32) {
    %c0_i32 = arith.constant 0 : i32
    %c0_i32_0 = arith.constant 0 : i32
    return %arg0, %c0_i32 : i32, i32
  }
}

</mosaic_0001>

<bundles_post_ra>
// kernel: efficientnet_head.1
= control target key start
LH: loop header
LB: loop body
LE: loop exit
PB: predicated region body
PF: predicated region fallthrough
CT: control target
= control target key end

     0   :  { %v11982_v30 = vmov 1983009808   ;;  %v2666_v32 = vlaneseq  ;;  %s19892_s0 = inlined_call_operand.vmem [shape: f32[2,20480], index: 0, kind: input, shape index: {}]   ;;  %s19893_s1 = inlined_call_operand.vmem [shape: f32[20480,128], index: 1, kind: input, shape index: {}]   ;;  %s19894_s2 = inlined_call_operand.vmem [shape: f32[1,128], index: 2, kind: input, shape index: {}]   ;;  %s19895_s3 = inlined_call_operand.hbm [shape: f32[2,128], index: 3, kind: output, shape index: {}]  }
   0x1   :  { %v86_v0 = vld [vmem:[%s19893_s1 + $0xf8] sm:$0xff]  ;;  %v85_v4 = vld [vmem:[%s19893_s1 + $0xf0] sm:$0xff]  ;;  %v84_v8 = vld [vmem:[%s19893_s1 + $0xe8] sm:$0xff]  ;;  %v2664_v31 = vunpack.c.l.s4 %v11982_v30 }
   0x2   :  { %v118_v1 = vld [vmem:[%s19893_s1 + $0x1f8] sm:$0xff]  ;;  %9118 = vmatprep.subr.mxu0 %v86_v0  ;;  %v117_v5 = vld [vmem:[%s19893_s1 + $0x1f0] sm:$0xff]  ;;  %v116_v9 = vld [vmem:[%s19893_s1 + $0x1e8] sm:$0xff]  ;;  %v2667_v42 = vshrl.u32 %v2666_v32, 7 }
   0x3   :  { %v70_v2 = vld [vmem:[%s19893_s1 + $0x78] sm:$0xff]  ;;  %9153 = vmatprep.subr.mxu1 %v118_v1  ;;  %v69_v6 = vld [vmem:[%s19893_s1 + $0x70] sm:$0xff]  ;;  %v68_v10 = vld [vmem:[%s19893_s1 + $0x68] sm:$0xff]  ;;  %v2665_v41 = vunpack.c.0.s8 %v2664_v31 }
   0x4   :  { %v102_v3 = vld [vmem:[%s19893_s1 + $0x178] sm:$0xff]  ;;  %9119 = vmatpush3.msra.mxu0 %v70_v2  ;;  %v101_v7 = vld [vmem:[%s19893_s1 + $0x170] sm:$0xff]  ;;  %v100_v11 = vld [vmem:[%s19893_s1 + $0x168] sm:$0xff] }
   0x5   :  { %9154 = vmatpush3.msra.mxu1 %v102_v3  ;;  %9120 = vmatprep.subr.mxu0 %v85_v4  ;;  %v83_v12 = vld [vmem:[%s19893_s1 + $0xe0] sm:$0xff]  ;;  %v82_v16 = vld [vmem:[%s19893_s1 + $0xd8] sm:$0xff]  ;;  %v81_v20 = vld [vmem:[%s19893_s1 + $0xd0] sm:$0xff]  ;;  %v12142_v51 = vsub.s32 %v2665_v41, %v2667_v42 }
   0x6   :  { %9155 = vmatprep.subr.mxu1 %v117_v5  ;;  %9121 = vmatpush3.msra.mxu0 %v69_v6  ;;  %v115_v13 = vld [vmem:[%s19893_s1 + $0x1e0] sm:$0xff]  ;;  %v114_v17 = vld [vmem:[%s19893_s1 + $0x1d8] sm:$0xff]  ;;  %v113_v21 = vld [vmem:[%s19893_s1 + $0x1d0] sm:$0xff] }
   0x7   :  { %9156 = vmatpush3.msra.mxu1 %v101_v7  ;;  %9122 = vmatprep.subr.mxu0 %v84_v8  ;;  %v67_v14 = vld [vmem:[%s19893_s1 + $0x60] sm:$0xff]  ;;  %v66_v18 = vld [vmem:[%s19893_s1 + $0x58] sm:$0xff]  ;;  %v65_v22 = vld [vmem:[%s19893_s1 + $0x50] sm:$0xff] }
   0x8   :  { %9157 = vmatprep.subr.mxu1 %v116_v9  ;;  %v99_v15 = vld [vmem:[%s19893_s1 + $0x160] sm:$0xff]  ;;  %9123 = vmatpush3.msra.mxu0 %v68_v10  ;;  %v98_v19 = vld [vmem:[%s19893_s1 + $0x158] sm:$0xff]  ;;  %v97_v23 = vld [vmem:[%s19893_s1 + $0x150] sm:$0xff] }
   0x9   :  { %9158 = vmatpush3.msra.mxu1 %v100_v11  ;;  %9124 = vmatprep.subr.mxu0 %v83_v12  ;;  %v80_v24 = vld [vmem:[%s19893_s1 + $0xc8] sm:$0xff]  ;;  %v79_v28 = vld [vmem:[%s19893_s1 + $0xc0] sm:$0xff]  ;;  %v78_v35 = vld [vmem:[%s19893_s1 + $0xb8] sm:$0xff] }
   0xa   :  { %9159 = vmatprep.subr.mxu1 %v115_v13  ;;  %9125 = vmatpush3.msra.mxu0 %v67_v14  ;;  %v112_v25 = vld [vmem:[%s19893_s1 + $0x1c8] sm:$0xff]  ;;  %v111_v29 = vld [vmem:[%s19893_s1 + $0x1c0] sm:$0xff]  ;;  %v110_v36 = vld [vmem:[%s19893_s1 + $0x1b8] sm:$0xff] }
   0xb   :  { %9160 = vmatpush3.msra.mxu1 %v99_v15  ;;  %9126 = vmatprep.subr.mxu0 %v82_v16  ;;  %v64_v26 = vld [vmem:[%s19893_s1 + $0x48] sm:$0xff]  ;;  %v63_v33 = vld [vmem:[%s19893_s1 + $0x40] sm:$0xff]  ;;  %v62_v37 = vld [vmem:[%s19893_s1 + $0x38] sm:$0xff] }
   0xc   :  { %9161 = vmatprep.subr.mxu1 %v114_v17  ;;  %9127 = vmatpush3.msra.mxu0 %v66_v18  ;;  %v96_v27 = vld [vmem:[%s19893_s1 + $0x148] sm:$0xff]  ;;  %v95_v34 = vld [vmem:[%s19893_s1 + $0x140] sm:$0xff]  ;;  %v94_v38 = vld [vmem:[%s19893_s1 + $0x138] sm:$0xff] }
   0xd   :  { %9162 = vmatpush3.msra.mxu1 %v98_v19  ;;  %9128 = vmatprep.subr.mxu0 %v81_v20  ;;  %v77_v39 = vld [vmem:[%s19893_s1 + $0xb0] sm:$0xff]  ;;  %v76_v45 = vld [vmem:[%s19893_s1 + $0xa8] sm:$0xff]  ;;  %v75_v49 = vld [vmem:[%s19893_s1 + $0xa0] sm:$0xff] }
   0xe   :  { %9163 = vmatprep.subr.mxu1 %v113_v21  ;;  %9129 = vmatpush3.msra.mxu0 %v65_v22  ;;  %v109_v40 = vld [vmem:[%s19893_s1 + $0x1b0] sm:$0xff]  ;;  %v108_v46 = vld [vmem:[%s19893_s1 + $0x1a8] sm:$0xff]  ;;  %v107_v50 = vld [vmem:[%s19893_s1 + $0x1a0] sm:$0xff] }
   0xf   :  { %9164 = vmatpush3.msra.mxu1 %v97_v23  ;;  %9130 = vmatprep.subr.mxu0 %v80_v24  ;;  %v61_v43 = vld [vmem:[%s19893_s1 + $0x30] sm:$0xff]  ;;  %v60_v47 = vld [vmem:[%s19893_s1 + $0x28] sm:$0xff]  ;;  %v59_v52 = vld [vmem:[%s19893_s1 + $0x20] sm:$0xff] }
  0x10   :  { %9165 = vmatprep.subr.mxu1 %v112_v25  ;;  %9131 = vmatpush3.msra.mxu0 %v64_v26  ;;  %v93_v44 = vld [vmem:[%s19893_s1 + $0x130] sm:$0xff]  ;;  %v92_v48 = vld [vmem:[%s19893_s1 + $0x128] sm:$0xff]  ;;  %v91_v53 = vld [vmem:[%s19893_s1 + $0x120] sm:$0xff] }
  0x11   :  { %9166 = vmatpush3.msra.mxu1 %v96_v27  ;;  %9132 = vmatprep.subr.mxu0 %v79_v28  ;;  %v15_v54 = vld [vmem:[%s19892_s0] sm:$0xff]  ;;  %v74_v55 = vld [vmem:[%s19893_s1 + $0x98] sm:$0xff]  ;;  %v73_v60 = vld [vmem:[%s19893_s1 + $0x90] sm:$0xff] }
  0x12   :  { %9167 = vmatprep.subr.mxu1 %v111_v29  ;;  %9133 = vmatpush3.msra.mxu0 %v63_v33  ;;  %v106_v56 = vld [vmem:[%s19893_s1 + $0x198] sm:$0xff]  ;;  %v2662_v57 = vcombine.high %v15_v54, %v15_v54  ;;  %v105_v61 = vld [vmem:[%s19893_s1 + $0x190] sm:$0xff]  ;;  %v2669_v62 = vrot.slane %v15_v54, %v12142_v51  ;;  %v72_v1 = vld [vmem:[%s19893_s1 + $0x88] sm:$0xff] }
  0x13   :  { %9168 = vmatpush3.msra.mxu1 %v95_v34  ;;  %9134 = vmatprep.subr.mxu0 %v78_v35  ;;  %v58_v58 = vld [vmem:[%s19893_s1 + $0x18] sm:$0xff]  ;;  %v57_v63 = vld [vmem:[%s19893_s1 + $0x10] sm:$0xff]  ;;  %v104_v2 = vld [vmem:[%s19893_s1 + $0x188] sm:$0xff] }
  0x14   :  { %9169 = vmatprep.subr.mxu1 %v110_v36  ;;  %9135 = vmatpush3.msra.mxu0 %v62_v37  ;;  %v90_v59 = vld [vmem:[%s19893_s1 + $0x118] sm:$0xff]  ;;  %v89_v0 = vld [vmem:[%s19893_s1 + $0x110] sm:$0xff]  ;;  %v2676_v3 = vrot.slane %v2662_v57, %v12142_v51  ;;  %v56_v4 = vld [vmem:[%s19893_s1 + $0x8] sm:$0xff]  ;;  %v2677_v8 = vcombine.high %v2669_v62, %v2669_v62 }
  0x15   :  { %9170 = vmatpush3.msra.mxu1 %v94_v38  ;;  %9136 = vmatprep.subr.mxu0 %v77_v39  ;;  %v88_v5 = vld [vmem:[%s19893_s1 + $0x108] sm:$0xff]  ;;  %v71_v6 = vld [vmem:[%s19893_s1 + $0x80] sm:$0xff]  ;;  %v150_v12 = vld [vmem:[%s19893_s1 + $0x2f8] sm:$0xff] }
  0x16   :  { %9171 = vmatprep.subr.mxu1 %v109_v40  ;;  %9137 = vmatpush3.msra.mxu0 %v61_v43  ;;  %v103_v7 = vld [vmem:[%s19893_s1 + $0x180] sm:$0xff]  ;;  %v2678_v11 = vcombine.high %v2676_v3, %v2676_v3  ;;  %v182_v13 = vld [vmem:[%s19893_s1 + $0x3f8] sm:$0xff]  ;;  %v149_v16 = vld [vmem:[%s19893_s1 + $0x2f0] sm:$0xff] }
  0x17   :  { %9172 = vmatpush3.msra.mxu1 %v93_v44  ;;  %9138 = vmatprep.subr.mxu0 %v76_v45  ;;  %v55_v9 = vld [vmem:[%s19893_s1] sm:$0xff]  ;;  %v134_v14 = vld [vmem:[%s19893_s1 + $0x278] sm:$0xff]  ;;  %v181_v17 = vld [vmem:[%s19893_s1 + $0x3f0] sm:$0xff] }
  0x18   :  { %9173 = vmatprep.subr.mxu1 %v108_v46  ;;  %9139 = vmatpush3.msra.mxu0 %v60_v47  ;;  %v87_v10 = vld [vmem:[%s19893_s1 + $0x100] sm:$0xff]  ;;  %v166_v15 = vld [vmem:[%s19893_s1 + $0x378] sm:$0xff]  ;;  %v133_v18 = vld [vmem:[%s19893_s1 + $0x270] sm:$0xff] }
  0x19   :  { %9174 = vmatpush3.msra.mxu1 %v92_v48  ;;  %9140 = vmatprep.subr.mxu0 %v75_v49  ;;  %v165_v19 = vld [vmem:[%s19893_s1 + $0x370] sm:$0xff]  ;;  %v148_v20 = vld [vmem:[%s19893_s1 + $0x2e8] sm:$0xff]  ;;  %v147_v24 = vld [vmem:[%s19893_s1 + $0x2e0] sm:$0xff] }
  0x1a   :  { %9175 = vmatprep.subr.mxu1 %v107_v50  ;;  %9141 = vmatpush3.msra.mxu0 %v59_v52  ;;  %v180_v21 = vld [vmem:[%s19893_s1 + $0x3e8] sm:$0xff]  ;;  %v179_v25 = vld [vmem:[%s19893_s1 + $0x3e0] sm:$0xff]  ;;  %v146_v28 = vld [vmem:[%s19893_s1 + $0x2d8] sm:$0xff] }
  0x1b   :  { %9176 = vmatpush3.msra.mxu1 %v91_v53  ;;  %9142 = vmatprep.subr.mxu0 %v74_v55  ;;  %v132_v22 = vld [vmem:[%s19893_s1 + $0x268] sm:$0xff]  ;;  %v131_v26 = vld [vmem:[%s19893_s1 + $0x260] sm:$0xff]  ;;  %v178_v29 = vld [vmem:[%s19893_s1 + $0x3d8] sm:$0xff] }
  0x1c   :  { %9177 = vmatprep.subr.mxu1 %v106_v56  ;;  %9143 = vmatpush3.msra.mxu0 %v58_v58  ;;  %v164_v23 = vld [vmem:[%s19893_s1 + $0x368] sm:$0xff]  ;;  %v163_v27 = vld [vmem:[%s19893_s1 + $0x360] sm:$0xff]  ;;  %v130_v30 = vld [vmem:[%s19893_s1 + $0x258] sm:$0xff] }
  0x1d   :  { %9178 = vmatpush3.msra.mxu1 %v90_v59  ;;  %9144 = vmatprep.subr.mxu0 %v73_v60  ;;  %v162_v31 = vld [vmem:[%s19893_s1 + $0x358] sm:$0xff]  ;;  %v145_v32 = vld [vmem:[%s19893_s1 + $0x2d0] sm:$0xff]  ;;  %v144_v36 = vld [vmem:[%s19893_s1 + $0x2c8] sm:$0xff] }
  0x1e   :  { %9179 = vmatprep.subr.mxu1 %v105_v61  ;;  %9145 = vmatpush3.msra.mxu0 %v57_v63  ;;  %v177_v33 = vld [vmem:[%s19893_s1 + $0x3d0] sm:$0xff]  ;;  %v176_v37 = vld [vmem:[%s19893_s1 + $0x3c8] sm:$0xff]  ;;  %v143_v40 = vld [vmem:[%s19893_s1 + $0x2c0] sm:$0xff] }
  0x1f   :  { %9180 = vmatpush3.msra.mxu1 %v89_v0  ;;  %9146 = vmatprep.subr.mxu0 %v72_v1  ;;  %v129_v34 = vld [vmem:[%s19893_s1 + $0x250] sm:$0xff]  ;;  %v128_v38 = vld [vmem:[%s19893_s1 + $0x248] sm:$0xff]  ;;  %v175_v41 = vld [vmem:[%s19893_s1 + $0x3c0] sm:$0xff] }
  0x20   :  { %9181 = vmatprep.subr.mxu1 %v104_v2  ;;  %9147 = vmatpush3.msra.mxu0 %v56_v4  ;;  %v161_v35 = vld [vmem:[%s19893_s1 + $0x350] sm:$0xff]  ;;  %v160_v39 = vld [vmem:[%s19893_s1 + $0x348] sm:$0xff]  ;;  %v127_v42 = vld [vmem:[%s19893_s1 + $0x240] sm:$0xff] }
  0x21   :  { %9182 = vmatpush3.msra.mxu1 %v88_v5  ;;  %9148 = vmatprep.subr.mxu0 %v71_v6  ;;  %v159_v43 = vld [vmem:[%s19893_s1 + $0x340] sm:$0xff]  ;;  %v142_v44 = vld [vmem:[%s19893_s1 + $0x2b8] sm:$0xff]  ;;  %v141_v48 = vld [vmem:[%s19893_s1 + $0x2b0] sm:$0xff] }
  0x22   :  { %9183 = vmatprep.subr.mxu1 %v103_v7  ;;  %9149 = vmatpush3.msra.mxu0 %v55_v9  ;;  %v174_v45 = vld [vmem:[%s19893_s1 + $0x3b8] sm:$0xff]  ;;  %v173_v49 = vld [vmem:[%s19893_s1 + $0x3b0] sm:$0xff]  ;;  %v140_v53 = vld [vmem:[%s19893_s1 + $0x2a8] sm:$0xff] }
  0x23   :  { %3566 = vmatprep.mubr.f32.mxu0 %v2677_v8  ;;  %9184 = vmatpush3.msra.mxu1 %v87_v10  ;;  %v126_v46 = vld [vmem:[%s19893_s1 + $0x238] sm:$0xff]  ;;  %v125_v50 = vld [vmem:[%s19893_s1 + $0x230] sm:$0xff]  ;;  %v172_v54 = vld [vmem:[%s19893_s1 + $0x3a8] sm:$0xff] }
  0x24   :  { %3567 = vmatmul.mubr.f32.vlgmr.msra.gmra.mxu0 %v2669_v62  ;;  %3636 = vmatprep.mubr.f32.mxu1 %v2678_v11  ;;  %v158_v47 = vld [vmem:[%s19893_s1 + $0x338] sm:$0xff]  ;;  %v157_v52 = vld [vmem:[%s19893_s1 + $0x330] sm:$0xff]  ;;  %v124_v55 = vld [vmem:[%s19893_s1 + $0x228] sm:$0xff] }
  0x25   :  { %9188 = vmatprep.subr.mxu0 %v150_v12  ;;  %9223 = vmatprep.subr.mxu1 %v182_v13  ;;  %v156_v56 = vld [vmem:[%s19893_s1 + $0x328] sm:$0xff]  ;;  %v139_v58 = vld [vmem:[%s19893_s1 + $0x2a0] sm:$0xff]  ;;  %v138_v62 = vld [vmem:[%s19893_s1 + $0x298] sm:$0xff] }
  0x26   :  { %3637 = vmatmul.mubr.f32.vlgmr.msra.gmra.mxu1 %v2676_v3  ;;  %9189 = vmatpush3.msra.mxu0 %v134_v14  ;;  %v16_v57 = vld [vmem:[%s19892_s0 + $0x8] sm:$0xff]  ;;  %v171_v59 = vld [vmem:[%s19893_s1 + $0x3a0] sm:$0xff]  ;;  %v170_v63 = vld [vmem:[%s19893_s1 + $0x398] sm:$0xff] }
  0x27   :  { %9224 = vmatpush3.msra.mxu1 %v166_v15  ;;  %9190 = vmatprep.subr.mxu0 %v149_v16  ;;  %v123_v60 = vld [vmem:[%s19893_s1 + $0x220] sm:$0xff]  ;;  %v2679_v0 = vcombine.high %v16_v57, %v16_v57  ;;  %v122_v1 = vld [vmem:[%s19893_s1 + $0x218] sm:$0xff]  ;;  %v137_v3 = vld [vmem:[%s19893_s1 + $0x290] sm:$0xff]  ;;  %v2686_v5 = vrot.slane %v16_v57, %v12142_v51 }
  0x28   :  { %9225 = vmatprep.subr.mxu1 %v181_v17  ;;  %9191 = vmatpush3.msra.mxu0 %v133_v18  ;;  %v155_v61 = vld [vmem:[%s19893_s1 + $0x320] sm:$0xff]  ;;  %v154_v2 = vld [vmem:[%s19893_s1 + $0x318] sm:$0xff]  ;;  %v169_v4 = vld [vmem:[%s19893_s1 + $0x390] sm:$0xff] }
  0x29   :  { %9226 = vmatpush3.msra.mxu1 %v165_v19  ;;  %9192 = vmatprep.subr.mxu0 %v148_v20  ;;  %v121_v6 = vld [vmem:[%s19893_s1 + $0x210] sm:$0xff]  ;;  %v136_v8 = vld [vmem:[%s19893_s1 + $0x288] sm:$0xff]  ;;  %v2693_v10 = vrot.slane %v2679_v0, %v12142_v51  ;;  %v135_v13 = vld [vmem:[%s19893_s1 + $0x280] sm:$0xff]  ;;  %v2694_v15 = vcombine.high %v2686_v5, %v2686_v5 }
  0x2a   :  { %9227 = vmatprep.subr.mxu1 %v180_v21  ;;  %9193 = vmatpush3.msra.mxu0 %v132_v22  ;;  %v153_v7 = vld [vmem:[%s19893_s1 + $0x310] sm:$0xff]  ;;  %v168_v9 = vld [vmem:[%s19893_s1 + $0x388] sm:$0xff]  ;;  %v167_v14 = vld [vmem:[%s19893_s1 + $0x380] sm:$0xff] }
  0x2b   :  { %9228 = vmatpush3.msra.mxu1 %v164_v23  ;;  %9194 = vmatprep.subr.mxu0 %v147_v24  ;;  %v120_v11 = vld [vmem:[%s19893_s1 + $0x208] sm:$0xff]  ;;  %v119_v16 = vld [vmem:[%s19893_s1 + $0x200] sm:$0xff]  ;;  %v2695_v18 = vcombine.high %v2693_v10, %v2693_v10  ;;  %v214_v19 = vld [vmem:[%s19893_s1 + $0x4f8] sm:$0xff] }
  0x2c   :  { %9229 = vmatprep.subr.mxu1 %v179_v25  ;;  %9195 = vmatpush3.msra.mxu0 %v131_v26  ;;  %v152_v12 = vld [vmem:[%s19893_s1 + $0x308] sm:$0xff]  ;;  %v151_v17 = vld [vmem:[%s19893_s1 + $0x300] sm:$0xff]  ;;  %v246_v20 = vld [vmem:[%s19893_s1 + $0x5f8] sm:$0xff] }
  0x2d   :  { %9230 = vmatpush3.msra.mxu1 %v163_v27  ;;  %9196 = vmatprep.subr.mxu0 %v146_v28  ;;  %v198_v21 = vld [vmem:[%s19893_s1 + $0x478] sm:$0xff]  ;;  %v213_v23 = vld [vmem:[%s19893_s1 + $0x4f0] sm:$0xff]  ;;  %v212_v27 = vld [vmem:[%s19893_s1 + $0x4e8] sm:$0xff] }
  0x2e   :  { %9231 = vmatprep.subr.mxu1 %v178_v29  ;;  %9197 = vmatpush3.msra.mxu0 %v130_v30  ;;  %v230_v22 = vld [vmem:[%s19893_s1 + $0x578] sm:$0xff]  ;;  %v245_v24 = vld [vmem:[%s19893_s1 + $0x5f0] sm:$0xff]  ;;  %v244_v28 = vld [vmem:[%s19893_s1 + $0x5e8] sm:$0xff] }
  0x2f   :  { %9232 = vmatpush3.msra.mxu1 %v162_v31  ;;  %9198 = vmatprep.subr.mxu0 %v145_v32  ;;  %v197_v25 = vld [vmem:[%s19893_s1 + $0x470] sm:$0xff]  ;;  %v196_v29 = vld [vmem:[%s19893_s1 + $0x468] sm:$0xff]  ;;  %v211_v31 = vld [vmem:[%s19893_s1 + $0x4e0] sm:$0xff] }
  0x30   :  { %9233 = vmatprep.subr.mxu1 %v177_v33  ;;  %9199 = vmatpush3.msra.mxu0 %v129_v34  ;;  %v229_v26 = vld [vmem:[%s19893_s1 + $0x570] sm:$0xff]  ;;  %v228_v30 = vld [vmem:[%s19893_s1 + $0x568] sm:$0xff]  ;;  %v243_v32 = vld [vmem:[%s19893_s1 + $0x5e0] sm:$0xff] }
  0x31   :  { %9234 = vmatpush3.msra.mxu1 %v161_v35  ;;  %9200 = vmatprep.subr.mxu0 %v144_v36  ;;  %v195_v33 = vld [vmem:[%s19893_s1 + $0x460] sm:$0xff]  ;;  %v210_v35 = vld [vmem:[%s19893_s1 + $0x4d8] sm:$0xff]  ;;  %v237_v57 = vld [vmem:[%s19893_s1 + $0x5b0] sm:$0xff] }
  0x32   :  { %9235 = vmatprep.subr.mxu1 %v176_v37  ;;  %9201 = vmatpush3.msra.mxu0 %v128_v38  ;;  %v227_v34 = vld [vmem:[%s19893_s1 + $0x560] sm:$0xff]  ;;  %v242_v36 = vld [vmem:[%s19893_s1 + $0x5d8] sm:$0xff]  ;;  %v17_v0 = vld [vmem:[%s19892_s0 + $0x10] sm:$0xff] }
  0x33   :  { %9236 = vmatpush3.msra.mxu1 %v160_v39  ;;  %9202 = vmatprep.subr.mxu0 %v143_v40  ;;  %v194_v37 = vld [vmem:[%s19893_s1 + $0x458] sm:$0xff]  ;;  %v209_v39 = vld [vmem:[%s19893_s1 + $0x4d0] sm:$0xff] }
  0x34   :  { %9237 = vmatprep.subr.mxu1 %v175_v41  ;;  %9203 = vmatpush3.msra.mxu0 %v127_v42  ;;  %v226_v38 = vld [vmem:[%s19893_s1 + $0x558] sm:$0xff]  ;;  %v241_v40 = vld [vmem:[%s19893_s1 + $0x5d0] sm:$0xff] }
  0x35   :  { %9238 = vmatpush3.msra.mxu1 %v159_v43  ;;  %9204 = vmatprep.subr.mxu0 %v142_v44  ;;  %v193_v41 = vld [vmem:[%s19893_s1 + $0x450] sm:$0xff]  ;;  %v208_v43 = vld [vmem:[%s19893_s1 + $0x4c8] sm:$0xff] }
  0x36   :  { %9239 = vmatprep.subr.mxu1 %v174_v45  ;;  %9205 = vmatpush3.msra.mxu0 %v126_v46  ;;  %v225_v42 = vld [vmem:[%s19893_s1 + $0x550] sm:$0xff]  ;;  %v240_v44 = vld [vmem:[%s19893_s1 + $0x5c8] sm:$0xff] }
  0x37   :  { %9240 = vmatpush3.msra.mxu1 %v158_v47  ;;  %9206 = vmatprep.subr.mxu0 %v141_v48  ;;  %v192_v45 = vld [vmem:[%s19893_s1 + $0x448] sm:$0xff]  ;;  %v207_v47 = vld [vmem:[%s19893_s1 + $0x4c0] sm:$0xff] }
  0x38   :  { %9241 = vmatprep.subr.mxu1 %v173_v49  ;;  %9207 = vmatpush3.msra.mxu0 %v125_v50  ;;  %v224_v46 = vld [vmem:[%s19893_s1 + $0x548] sm:$0xff]  ;;  %v239_v48 = vld [vmem:[%s19893_s1 + $0x5c0] sm:$0xff] }
  0x39   :  { %9242 = vmatpush3.msra.mxu1 %v157_v52  ;;  %9208 = vmatprep.subr.mxu0 %v140_v53  ;;  %v191_v49 = vld [vmem:[%s19893_s1 + $0x440] sm:$0xff]  ;;  %v206_v52 = vld [vmem:[%s19893_s1 + $0x4b8] sm:$0xff] }
  0x3a   :  { %9243 = vmatprep.subr.mxu1 %v172_v54  ;;  %9209 = vmatpush3.msra.mxu0 %v124_v55  ;;  %v223_v50 = vld [vmem:[%s19893_s1 + $0x540] sm:$0xff]  ;;  %v238_v53 = vld [vmem:[%s19893_s1 + $0x5b8] sm:$0xff] }
  0x3b   :  { %9244 = vmatpush3.msra.mxu1 %v156_v56  ;;  %9210 = vmatprep.subr.mxu0 %v139_v58  ;;  %v190_v54 = vld [vmem:[%s19893_s1 + $0x438] sm:$0xff]  ;;  %v205_v56 = vld [vmem:[%s19893_s1 + $0x4b0] sm:$0xff] }
  0x3c   :  { %9245 = vmatprep.subr.mxu1 %v171_v59  ;;  %9211 = vmatpush3.msra.mxu0 %v123_v60  ;;  %v222_v55 = vld [vmem:[%s19893_s1 + $0x538] sm:$0xff]  ;;  %v189_v58 = vld [vmem:[%s19893_s1 + $0x430] sm:$0xff]  ;;  %v204_v60 = vld [vmem:[%s19893_s1 + $0x4a8] sm:$0xff] }
  0x3d   :  { %9246 = vmatpush3.msra.mxu1 %v155_v61  ;;  %9212 = vmatprep.subr.mxu0 %v138_v62  ;;  %v221_v59 = vld [vmem:[%s19893_s1 + $0x530] sm:$0xff]  ;;  %v236_v61 = vld [vmem:[%s19893_s1 + $0x5a8] sm:$0xff] }
  0x3e   :  { %9247 = vmatprep.subr.mxu1 %v170_v63  ;;  %9213 = vmatpush3.msra.mxu0 %v122_v1  ;;  %v188_v62 = vld [vmem:[%s19893_s1 + $0x428] sm:$0xff]  ;;  %v203_v1 = vld [vmem:[%s19893_s1 + $0x4a0] sm:$0xff] }
  0x3f   :  { %9248 = vmatpush3.msra.mxu1 %v154_v2  ;;  %9214 = vmatprep.subr.mxu0 %v137_v3  ;;  %v220_v63 = vld [vmem:[%s19893_s1 + $0x528] sm:$0xff]  ;;  %v235_v2 = vld [vmem:[%s19893_s1 + $0x5a0] sm:$0xff] }
  0x40   :  { %9249 = vmatprep.subr.mxu1 %v169_v4  ;;  %9215 = vmatpush3.msra.mxu0 %v121_v6  ;;  %v187_v3 = vld [vmem:[%s19893_s1 + $0x420] sm:$0xff]  ;;  %v234_v6 = vld [vmem:[%s19893_s1 + $0x598] sm:$0xff] }
  0x41   :  { %9250 = vmatpush3.msra.mxu1 %v153_v7  ;;  %9216 = vmatprep.subr.mxu0 %v136_v8  ;;  %v219_v4 = vld [vmem:[%s19893_s1 + $0x520] sm:$0xff]  ;;  %v2696_v7 = vcombine.high %v17_v0, %v17_v0  ;;  %v186_v8 = vld [vmem:[%s19893_s1 + $0x418] sm:$0xff] }
  0x42   :  { %9251 = vmatprep.subr.mxu1 %v168_v9  ;;  %9217 = vmatpush3.msra.mxu0 %v120_v11  ;;  %v218_v9 = vld [vmem:[%s19893_s1 + $0x518] sm:$0xff]  ;;  %v233_v11 = vld [vmem:[%s19893_s1 + $0x590] sm:$0xff] }
  0x43   :  { %9252 = vmatpush3.msra.mxu1 %v152_v12  ;;  %9218 = vmatprep.subr.mxu0 %v135_v13  ;;  %v2703_v12 = vrot.slane %v17_v0, %v12142_v51  ;;  %v185_v13 = vld [vmem:[%s19893_s1 + $0x410] sm:$0xff] }
  0x44   :  { %9253 = vmatprep.subr.mxu1 %v167_v14  ;;  %9219 = vmatpush3.msra.mxu0 %v119_v16  ;;  %v217_v14 = vld [vmem:[%s19893_s1 + $0x510] sm:$0xff]  ;;  %v232_v16 = vld [vmem:[%s19893_s1 + $0x588] sm:$0xff] }
  0x45   :  { %3706 = vmatprep.mubr.f32.mxu0 %v2694_v15  ;;  %9254 = vmatpush3.msra.mxu1 %v151_v17  ;;  %v200_v15 = vld [vmem:[%s19893_s1 + $0x488] sm:$0xff]  ;;  %v2710_v17 = vrot.slane %v2696_v7, %v12142_v51  ;;  %v301_v0 = vld [vmem:[%s19893_s1 + $0x7b0] sm:$0xff]  ;;  %v18_v7 = vld [vmem:[%s19892_s0 + $0x18] sm:$0xff] }
  0x46   :  { %3707 = vmatmul.mubr.f32.vlgmr.msra.gmra.mxu0 %v2686_v5  ;;  %3776 = vmatprep.mubr.f32.mxu1 %v2695_v18  ;;  %v202_v5 = vld [vmem:[%s19893_s1 + $0x498] sm:$0xff]  ;;  %v184_v18 = vld [vmem:[%s19893_s1 + $0x408] sm:$0xff] }
  0x47   :  { %9258 = vmatprep.subr.mxu0 %v214_v19  ;;  %9293 = vmatprep.subr.mxu1 %v246_v20  ;;  %v216_v19 = vld [vmem:[%s19893_s1 + $0x508] sm:$0xff]  ;;  %v199_v20 = vld [vmem:[%s19893_s1 + $0x480] sm:$0xff] }
  0x48   :  { %3777 = vmatmul.mubr.f32.vlgmr.msra.gmra.mxu1 %v2693_v10  ;;  %9259 = vmatpush3.msra.mxu0 %v198_v21  ;;  %v201_v10 = vld [vmem:[%s19893_s1 + $0x490] sm:$0xff]  ;;  %v231_v21 = vld [vmem:[%s19893_s1 + $0x580] sm:$0xff] }
  0x49   :  { %9294 = vmatpush3.msra.mxu1 %v230_v22  ;;  %9260 = vmatprep.subr.mxu0 %v213_v23  ;;  %v2711_v22 = vcombine.high %v2703_v12, %v2703_v12  ;;  %v183_v23 = vld [vmem:[%s19893_s1 + $0x400] sm:$0xff] }
  0x4a   :  { %9295 = vmatprep.subr.mxu1 %v245_v24  ;;  %9261 = vmatpush3.msra.mxu0 %v197_v25  ;;  %v215_v24 = vld [vmem:[%s19893_s1 + $0x500] sm:$0xff]  ;;  %v2712_v25 = vcombine.high %v2710_v17, %v2710_v17 }
  0x4b   :  { %9296 = vmatpush3.msra.mxu1 %v229_v26  ;;  %9262 = vmatprep.subr.mxu0 %v212_v27  ;;  %v278_v26 = vld [vmem:[%s19893_s1 + $0x6f8] sm:$0xff] }
  0x4c   :  { %9297 = vmatprep.subr.mxu1 %v244_v28  ;;  %9263 = vmatpush3.msra.mxu0 %v196_v29  ;;  %v310_v27 = vld [vmem:[%s19893_s1 + $0x7f8] sm:$0xff] }
  0x4d   :  { %9298 = vmatpush3.msra.mxu1 %v228_v30  ;;  %9264 = vmatprep.subr.mxu0 %v211_v31  ;;  %v262_v28 = vld [vmem:[%s19893_s1 + $0x678] sm:$0xff]  ;;  %v277_v30 = vld [vmem:[%s19893_s1 + $0x6f0] sm:$0xff] }
  0x4e   :  { %9299 = vmatprep.subr.mxu1 %v243_v32  ;;  %9265 = vmatpush3.msra.mxu0 %v195_v33  ;;  %v294_v29 = vld [vmem:[%s19893_s1 + $0x778] sm:$0xff]  ;;  %v309_v31 = vld [vmem:[%s19893_s1 + $0x7f0] sm:$0xff] }
  0x4f   :  { %9300 = vmatpush3.msra.mxu1 %v227_v34  ;;  %9266 = vmatprep.subr.mxu0 %v210_v35  ;;  %v261_v32 = vld [vmem:[%s19893_s1 + $0x670] sm:$0xff]  ;;  %v276_v34 = vld [vmem:[%s19893_s1 + $0x6e8] sm:$0xff] }
  0x50   :  { %9301 = vmatprep.subr.mxu1 %v242_v36  ;;  %9267 = vmatpush3.msra.mxu0 %v194_v37  ;;  %v293_v33 = vld [vmem:[%s19893_s1 + $0x770] sm:$0xff]  ;;  %v308_v35 = vld [vmem:[%s19893_s1 + $0x7e8] sm:$0xff] }
  0x51   :  { %9302 = vmatpush3.msra.mxu1 %v226_v38  ;;  %9268 = vmatprep.subr.mxu0 %v209_v39  ;;  %v260_v36 = vld [vmem:[%s19893_s1 + $0x668] sm:$0xff]  ;;  %v275_v38 = vld [vmem:[%s19893_s1 + $0x6e0] sm:$0xff] }
  0x52   :  { %9303 = vmatprep.subr.mxu1 %v241_v40  ;;  %9269 = vmatpush3.msra.mxu0 %v193_v41  ;;  %v292_v37 = vld [vmem:[%s19893_s1 + $0x768] sm:$0xff]  ;;  %v307_v39 = vld [vmem:[%s19893_s1 + $0x7e0] sm:$0xff] }
  0x53   :  { %9304 = vmatpush3.msra.mxu1 %v225_v42  ;;  %9270 = vmatprep.subr.mxu0 %v208_v43  ;;  %v259_v40 = vld [vmem:[%s19893_s1 + $0x660] sm:$0xff]  ;;  %v274_v42 = vld [vmem:[%s19893_s1 + $0x6d8] sm:$0xff] }
  0x54   :  { %9305 = vmatprep.subr.mxu1 %v240_v44  ;;  %9271 = vmatpush3.msra.mxu0 %v192_v45  ;;  %v291_v41 = vld [vmem:[%s19893_s1 + $0x760] sm:$0xff]  ;;  %v306_v43 = vld [vmem:[%s19893_s1 + $0x7d8] sm:$0xff] }
  0x55   :  { %9306 = vmatpush3.msra.mxu1 %v224_v46  ;;  %9272 = vmatprep.subr.mxu0 %v207_v47  ;;  %v258_v44 = vld [vmem:[%s19893_s1 + $0x658] sm:$0xff]  ;;  %v273_v46 = vld [vmem:[%s19893_s1 + $0x6d0] sm:$0xff] }
  0x56   :  { %9307 = vmatprep.subr.mxu1 %v239_v48  ;;  %9273 = vmatpush3.msra.mxu0 %v191_v49  ;;  %v290_v45 = vld [vmem:[%s19893_s1 + $0x758] sm:$0xff]  ;;  %v305_v47 = vld [vmem:[%s19893_s1 + $0x7d0] sm:$0xff] }
  0x57   :  { %9308 = vmatpush3.msra.mxu1 %v223_v50  ;;  %9274 = vmatprep.subr.mxu0 %v206_v52  ;;  %v257_v48 = vld [vmem:[%s19893_s1 + $0x650] sm:$0xff]  ;;  %v272_v50 = vld [vmem:[%s19893_s1 + $0x6c8] sm:$0xff] }
  0x58   :  { %9309 = vmatprep.subr.mxu1 %v238_v53  ;;  %9275 = vmatpush3.msra.mxu0 %v190_v54  ;;  %v289_v49 = vld [vmem:[%s19893_s1 + $0x750] sm:$0xff]  ;;  %v304_v52 = vld [vmem:[%s19893_s1 + $0x7c8] sm:$0xff] }
  0x59   :  { %9310 = vmatpush3.msra.mxu1 %v222_v55  ;;  %9276 = vmatprep.subr.mxu0 %v205_v56  ;;  %v256_v53 = vld [vmem:[%s19893_s1 + $0x648] sm:$0xff]  ;;  %v271_v55 = vld [vmem:[%s19893_s1 + $0x6c0] sm:$0xff] }
  0x5a   :  { %9311 = vmatprep.subr.mxu1 %v237_v57  ;;  %9277 = vmatpush3.msra.mxu0 %v189_v58  ;;  %v288_v54 = vld [vmem:[%s19893_s1 + $0x748] sm:$0xff]  ;;  %v303_v56 = vld [vmem:[%s19893_s1 + $0x7c0] sm:$0xff] }
  0x5b   :  { %9312 = vmatpush3.msra.mxu1 %v221_v59  ;;  %9278 = vmatprep.subr.mxu0 %v204_v60  ;;  %v255_v57 = vld [vmem:[%s19893_s1 + $0x640] sm:$0xff]  ;;  %v270_v59 = vld [vmem:[%s19893_s1 + $0x6b8] sm:$0xff] }
  0x5c   :  { %9313 = vmatprep.subr.mxu1 %v236_v61  ;;  %9279 = vmatpush3.msra.mxu0 %v188_v62  ;;  %v287_v58 = vld [vmem:[%s19893_s1 + $0x740] sm:$0xff]  ;;  %v302_v60 = vld [vmem:[%s19893_s1 + $0x7b8] sm:$0xff] }
  0x5d   :  { %9314 = vmatpush3.msra.mxu1 %v220_v63  ;;  %9280 = vmatprep.subr.mxu0 %v203_v1  ;;  %v254_v61 = vld [vmem:[%s19893_s1 + $0x638] sm:$0xff]  ;;  %v269_v63 = vld [vmem:[%s19893_s1 + $0x6b0] sm:$0xff] }
  0x5e   :  { %9315 = vmatprep.subr.mxu1 %v235_v2  ;;  %9281 = vmatpush3.msra.mxu0 %v187_v3  ;;  %v286_v62 = vld [vmem:[%s19893_s1 + $0x738] sm:$0xff]  ;;  %v253_v1 = vld [vmem:[%s19893_s1 + $0x630] sm:$0xff]  ;;  %v268_v3 = vld [vmem:[%s19893_s1 + $0x6a8] sm:$0xff] }
  0x5f   :  { %9316 = vmatpush3.msra.mxu1 %v219_v4  ;;  %9282 = vmatprep.subr.mxu0 %v202_v5  ;;  %v285_v2 = vld [vmem:[%s19893_s1 + $0x730] sm:$0xff]  ;;  %v300_v4 = vld [vmem:[%s19893_s1 + $0x7a8] sm:$0xff] }
  0x60   :  { %9317 = vmatprep.subr.mxu1 %v234_v6  ;;  %9283 = vmatpush3.msra.mxu0 %v186_v8  ;;  %v252_v5 = vld [vmem:[%s19893_s1 + $0x628] sm:$0xff]  ;;  %v267_v8 = vld [vmem:[%s19893_s1 + $0x6a0] sm:$0xff] }
  0x61   :  { %9318 = vmatpush3.msra.mxu1 %v218_v9  ;;  %9284 = vmatprep.subr.mxu0 %v201_v10  ;;  %v284_v6 = vld [vmem:[%s19893_s1 + $0x728] sm:$0xff]  ;;  %v299_v9 = vld [vmem:[%s19893_s1 + $0x7a0] sm:$0xff] }
  0x62   :  { %9319 = vmatprep.subr.mxu1 %v233_v11  ;;  %9285 = vmatpush3.msra.mxu0 %v185_v13  ;;  %v251_v10 = vld [vmem:[%s19893_s1 + $0x620] sm:$0xff]  ;;  %v298_v13 = vld [vmem:[%s19893_s1 + $0x798] sm:$0xff] }
  0x63   :  { %9320 = vmatpush3.msra.mxu1 %v217_v14  ;;  %9286 = vmatprep.subr.mxu0 %v200_v15  ;;  %v283_v11 = vld [vmem:[%s19893_s1 + $0x720] sm:$0xff]  ;;  %v2713_v14 = vcombine.high %v18_v7, %v18_v7  ;;  %v250_v15 = vld [vmem:[%s19893_s1 + $0x618] sm:$0xff] }
  0x64   :  { %9321 = vmatprep.subr.mxu1 %v232_v16  ;;  %9287 = vmatpush3.msra.mxu0 %v184_v18  ;;  %v282_v16 = vld [vmem:[%s19893_s1 + $0x718] sm:$0xff]  ;;  %v297_v18 = vld [vmem:[%s19893_s1 + $0x790] sm:$0xff] }
  0x65   :  { %9322 = vmatpush3.msra.mxu1 %v216_v19  ;;  %9288 = vmatprep.subr.mxu0 %v199_v20  ;;  %v2720_v19 = vrot.slane %v18_v7, %v12142_v51  ;;  %v249_v20 = vld [vmem:[%s19893_s1 + $0x610] sm:$0xff] }
  0x66   :  { %9323 = vmatprep.subr.mxu1 %v231_v21  ;;  %9289 = vmatpush3.msra.mxu0 %v183_v23  ;;  %v281_v21 = vld [vmem:[%s19893_s1 + $0x710] sm:$0xff]  ;;  %v296_v23 = vld [vmem:[%s19893_s1 + $0x788] sm:$0xff] }
  0x67   :  { %3846 = vmatprep.mubr.f32.mxu0 %v2711_v22  ;;  %9324 = vmatpush3.msra.mxu1 %v215_v24  ;;  %v264_v22 = vld [vmem:[%s19893_s1 + $0x688] sm:$0xff]  ;;  %v2727_v24 = vrot.slane %v2713_v14, %v12142_v51  ;;  %v365_v7 = vld [vmem:[%s19893_s1 + $0x9b0] sm:$0xff]  ;;  %v19_v14 = vld [vmem:[%s19892_s0 + $0x20] sm:$0xff] }
  0x68   :  { %3847 = vmatmul.mubr.f32.vlgmr.msra.gmra.mxu0 %v2703_v12  ;;  %3916 = vmatprep.mubr.f32.mxu1 %v2712_v25  ;;  %v266_v12 = vld [vmem:[%s19893_s1 + $0x698] sm:$0xff]  ;;  %v248_v25 = vld [vmem:[%s19893_s1 + $0x608] sm:$0xff] }
  0x69   :  { %9328 = vmatprep.subr.mxu0 %v278_v26  ;;  %9363 = vmatprep.subr.mxu1 %v310_v27  ;;  %v280_v26 = vld [vmem:[%s19893_s1 + $0x708] sm:$0xff]  ;;  %v263_v27 = vld [vmem:[%s19893_s1 + $0x680] sm:$0xff] }
  0x6a   :  { %3917 = vmatmul.mubr.f32.vlgmr.msra.gmra.mxu1 %v2710_v17  ;;  %9329 = vmatpush3.msra.mxu0 %v262_v28  ;;  %v265_v17 = vld [vmem:[%s19893_s1 + $0x690] sm:$0xff]  ;;  %v295_v28 = vld [vmem:[%s19893_s1 + $0x780] sm:$0xff] }
  0x6b   :  { %9364 = vmatpush3.msra.mxu1 %v294_v29  ;;  %9330 = vmatprep.subr.mxu0 %v277_v30  ;;  %v2728_v29 = vcombine.high %v2720_v19, %v2720_v19  ;;  %v247_v30 = vld [vmem:[%s19893_s1 + $0x600] sm:$0xff] }
  0x6c   :  { %9365 = vmatprep.subr.mxu1 %v309_v31  ;;  %9331 = vmatpush3.msra.mxu0 %v261_v32  ;;  %v279_v31 = vld [vmem:[%s19893_s1 + $0x700] sm:$0xff]  ;;  %v2729_v32 = vcombine.high %v2727_v24, %v2727_v24 }
  0x6d   :  { %9366 = vmatpush3.msra.mxu1 %v293_v33  ;;  %9332 = vmatprep.subr.mxu0 %v276_v34  ;;  %v342_v33 = vld [vmem:[%s19893_s1 + $0x8f8] sm:$0xff] }
  0x6e   :  { %9367 = vmatprep.subr.mxu1 %v308_v35  ;;  %9333 = vmatpush3.msra.mxu0 %v260_v36  ;;  %v374_v34 = vld [vmem:[%s19893_s1 + $0x9f8] sm:$0xff] }
  0x6f   :  { %9368 = vmatpush3.msra.mxu1 %v292_v37  ;;  %9334 = vmatprep.subr.mxu0 %v275_v38  ;;  %v326_v35 = vld [vmem:[%s19893_s1 + $0x878] sm:$0xff]  ;;  %v341_v37 = vld [vmem:[%s19893_s1 + $0x8f0] sm:$0xff] }
  0x70   :  { %9369 = vmatprep.subr.mxu1 %v307_v39  ;;  %9335 = vmatpush3.msra.mxu0 %v259_v40  ;;  %v358_v36 = vld [vmem:[%s19893_s1 + $0x978] sm:$0xff]  ;;  %v373_v38 = vld [vmem:[%s19893_s1 + $0x9f0] sm:$0xff] }
  0x71   :  { %9370 = vmatpush3.msra.mxu1 %v291_v41  ;;  %9336 = vmatprep.subr.mxu0 %v274_v42  ;;  %v325_v39 = vld [vmem:[%s19893_s1 + $0x870] sm:$0xff]  ;;  %v340_v41 = vld [vmem:[%s19893_s1 + $0x8e8] sm:$0xff] }
  0x72   :  { %9371 = vmatprep.subr.mxu1 %v306_v43  ;;  %9337 = vmatpush3.msra.mxu0 %v258_v44  ;;  %v357_v40 = vld [vmem:[%s19893_s1 + $0x970] sm:$0xff]  ;;  %v372_v42 = vld [vmem:[%s19893_s1 + $0x9e8] sm:$0xff] }
  0x73   :  { %9372 = vmatpush3.msra.mxu1 %v290_v45  ;;  %9338 = vmatprep.subr.mxu0 %v273_v46  ;;  %v324_v43 = vld [vmem:[%s19893_s1 + $0x868] sm:$0xff]  ;;  %v339_v45 = vld [vmem:[%s19893_s1 + $0x8e0] sm:$0xff] }
  0x74   :  { %9373 = vmatprep.subr.mxu1 %v305_v47  ;;  %9339 = vmatpush3.msra.mxu0 %v257_v48  ;;  %v356_v44 = vld [vmem:[%s19893_s1 + $0x968] sm:$0xff]  ;;  %v371_v46 = vld [vmem:[%s19893_s1 + $0x9e0] sm:$0xff] }
  0x75   :  { %9374 = vmatpush3.msra.mxu1 %v289_v49  ;;  %9340 = vmatprep.subr.mxu0 %v272_v50  ;;  %v323_v47 = vld [vmem:[%s19893_s1 + $0x860] sm:$0xff]  ;;  %v338_v49 = vld [vmem:[%s19893_s1 + $0x8d8] sm:$0xff] }
  0x76   :  { %9375 = vmatprep.subr.mxu1 %v304_v52  ;;  %9341 = vmatpush3.msra.mxu0 %v256_v53  ;;  %v355_v48 = vld [vmem:[%s19893_s1 + $0x960] sm:$0xff]  ;;  %v370_v50 = vld [vmem:[%s19893_s1 + $0x9d8] sm:$0xff] }
  0x77   :  { %9376 = vmatpush3.msra.mxu1 %v288_v54  ;;  %9342 = vmatprep.subr.mxu0 %v271_v55  ;;  %v322_v52 = vld [vmem:[%s19893_s1 + $0x858] sm:$0xff]  ;;  %v337_v54 = vld [vmem:[%s19893_s1 + $0x8d0] sm:$0xff] }
  0x78   :  { %9377 = vmatprep.subr.mxu1 %v303_v56  ;;  %9343 = vmatpush3.msra.mxu0 %v255_v57  ;;  %v354_v53 = vld [vmem:[%s19893_s1 + $0x958] sm:$0xff]  ;;  %v369_v55 = vld [vmem:[%s19893_s1 + $0x9d0] sm:$0xff] }
  0x79   :  { %9378 = vmatpush3.msra.mxu1 %v287_v58  ;;  %9344 = vmatprep.subr.mxu0 %v270_v59  ;;  %v321_v56 = vld [vmem:[%s19893_s1 + $0x850] sm:$0xff]  ;;  %v336_v58 = vld [vmem:[%s19893_s1 + $0x8c8] sm:$0xff] }
  0x7a   :  { %9379 = vmatprep.subr.mxu1 %v302_v60  ;;  %9345 = vmatpush3.msra.mxu0 %v254_v61  ;;  %v353_v57 = vld [vmem:[%s19893_s1 + $0x950] sm:$0xff]  ;;  %v368_v59 = vld [vmem:[%s19893_s1 + $0x9c8] sm:$0xff] }
  0x7b   :  { %9380 = vmatpush3.msra.mxu1 %v286_v62  ;;  %9346 = vmatprep.subr.mxu0 %v269_v63  ;;  %v320_v60 = vld [vmem:[%s19893_s1 + $0x848] sm:$0xff]  ;;  %v335_v62 = vld [vmem:[%s19893_s1 + $0x8c0] sm:$0xff] }
  0x7c   :  { %9381 = vmatprep.subr.mxu1 %v301_v0  ;;  %9347 = vmatpush3.msra.mxu0 %v253_v1  ;;  %v352_v61 = vld [vmem:[%s19893_s1 + $0x948] sm:$0xff]  ;;  %v367_v63 = vld [vmem:[%s19893_s1 + $0x9c0] sm:$0xff] }
  0x7d   :  { %9382 = vmatpush3.msra.mxu1 %v285_v2  ;;  %9348 = vmatprep.subr.mxu0 %v268_v3  ;;  %v319_v0 = vld [vmem:[%s19893_s1 + $0x840] sm:$0xff]  ;;  %v334_v2 = vld [vmem:[%s19893_s1 + $0x8b8] sm:$0xff] }
  0x7e   :  { %9383 = vmatprep.subr.mxu1 %v300_v4  ;;  %9349 = vmatpush3.msra.mxu0 %v252_v5  ;;  %v351_v1 = vld [vmem:[%s19893_s1 + $0x940] sm:$0xff]  ;;  %v366_v3 = vld [vmem:[%s19893_s1 + $0x9b8] sm:$0xff] }
  0x7f   :  { %9384 = vmatpush3.msra.mxu1 %v284_v6  ;;  %9350 = vmatprep.subr.mxu0 %v267_v8  ;;  %v318_v4 = vld [vmem:[%s19893_s1 + $0x838] sm:$0xff]  ;;  %v333_v6 = vld [vmem:[%s19893_s1 + $0x8b0] sm:$0xff] }
  0x80   :  { %9385 = vmatprep.subr.mxu1 %v299_v9  ;;  %9351 = vmatpush3.msra.mxu0 %v251_v10  ;;  %v350_v5 = vld [vmem:[%s19893_s1 + $0x938] sm:$0xff]  ;;  %v317_v8 = vld [vmem:[%s19893_s1 + $0x830] sm:$0xff]  ;;  %v332_v10 = vld [vmem:[%s19893_s1 + $0x8a8] sm:$0xff] }
  0x81   :  { %9386 = vmatpush3.msra.mxu1 %v283_v11  ;;  %9352 = vmatprep.subr.mxu0 %v266_v12  ;;  %v349_v9 = vld [vmem:[%s19893_s1 + $0x930] sm:$0xff]  ;;  %v364_v11 = vld [vmem:[%s19893_s1 + $0x9a8] sm:$0xff] }
  0x82   :  { %9387 = vmatprep.subr.mxu1 %v298_v13  ;;  %9353 = vmatpush3.msra.mxu0 %v250_v15  ;;  %v316_v12 = vld [vmem:[%s19893_s1 + $0x828] sm:$0xff]  ;;  %v331_v15 = vld [vmem:[%s19893_s1 + $0x8a0] sm:$0xff] }
  0x83   :  { %9388 = vmatpush3.msra.mxu1 %v282_v16  ;;  %9354 = vmatprep.subr.mxu0 %v265_v17  ;;  %v348_v13 = vld [vmem:[%s19893_s1 + $0x928] sm:$0xff]  ;;  %v363_v16 = vld [vmem:[%s19893_s1 + $0x9a0] sm:$0xff] }
  0x84   :  { %9389 = vmatprep.subr.mxu1 %v297_v18  ;;  %9355 = vmatpush3.msra.mxu0 %v249_v20  ;;  %v315_v17 = vld [vmem:[%s19893_s1 + $0x820] sm:$0xff]  ;;  %v362_v20 = vld [vmem:[%s19893_s1 + $0x998] sm:$0xff] }
  0x85   :  { %9390 = vmatpush3.msra.mxu1 %v281_v21  ;;  %9356 = vmatprep.subr.mxu0 %v264_v22  ;;  %v347_v18 = vld [vmem:[%s19893_s1 + $0x920] sm:$0xff]  ;;  %v2730_v21 = vcombine.high %v19_v14, %v19_v14  ;;  %v314_v22 = vld [vmem:[%s19893_s1 + $0x818] sm:$0xff] }
  0x86   :  { %9391 = vmatprep.subr.mxu1 %v296_v23  ;;  %9357 = vmatpush3.msra.mxu0 %v248_v25  ;;  %v346_v23 = vld [vmem:[%s19893_s1 + $0x918] sm:$0xff]  ;;  %v361_v25 = vld [vmem:[%s19893_s1 + $0x990] sm:$0xff] }
  0x87   :  { %9392 = vmatpush3.msra.mxu1 %v280_v26  ;;  %9358 = vmatprep.subr.mxu0 %v263_v27  ;;  %v2737_v26 = vrot.slane %v19_v14, %v12142_v51  ;;  %v313_v27 = vld [vmem:[%s19893_s1 + $0x810] sm:$0xff] }
  0x88   :  { %9393 = vmatprep.subr.mxu1 %v295_v28  ;;  %9359 = vmatpush3.msra.mxu0 %v247_v30  ;;  %v345_v28 = vld [vmem:[%s19893_s1 + $0x910] sm:$0xff]  ;;  %v360_v30 = vld [vmem:[%s19893_s1 + $0x988] sm:$0xff] }
  0x89   :  { %3986 = vmatprep.mubr.f32.mxu0 %v2728_v29  ;;  %9394 = vmatpush3.msra.mxu1 %v279_v31  ;;  %v328_v29 = vld [vmem:[%s19893_s1 + $0x888] sm:$0xff]  ;;  %v2744_v31 = vrot.slane %v2730_v21, %v12142_v51  ;;  %v429_v14 = vld [vmem:[%s19893_s1 + $0xbb0] sm:$0xff] }
  0x8a   :  { %3987 = vmatmul.mubr.f32.vlgmr.msra.gmra.mxu0 %v2720_v19  ;;  %4056 = vmatprep.mubr.f32.mxu1 %v2729_v32  ;;  %v330_v19 = vld [vmem:[%s19893_s1 + $0x898] sm:$0xff]  ;;  %v312_v32 = vld [vmem:[%s19893_s1 + $0x808] sm:$0xff] }
  0x8b   :  { %9398 = vmatprep.subr.mxu0 %v342_v33  ;;  %9433 = vmatprep.subr.mxu1 %v374_v34  ;;  %v344_v33 = vld [vmem:[%s19893_s1 + $0x908] sm:$0xff]  ;;  %v327_v34 = vld [vmem:[%s19893_s1 + $0x880] sm:$0xff] }
  0x8c   :  { %4057 = vmatmul.mubr.f32.vlgmr.msra.gmra.mxu1 %v2727_v24  ;;  %9399 = vmatpush3.msra.mxu0 %v326_v35  ;;  %v329_v24 = vld [vmem:[%s19893_s1 + $0x890] sm:$0xff]  ;;  %v359_v35 = vld [vmem:[%s19893_s1 + $0x980] sm:$0xff]  ;;  %v20_v21 = vld [vmem:[%s19892_s0 + $0x28] sm:$0xff] }
  0x8d   :  { %9434 = vmatpush3.msra.mxu1 %v358_v36  ;;  %9400 = vmatprep.subr.mxu0 %v341_v37  ;;  %v2745_v36 = vcombine.high %v2737_v26, %v2737_v26  ;;  %v311_v37 = vld [vmem:[%s19893_s1 + $0x800] sm:$0xff] }
  0x8e   :  { %9435 = vmatprep.subr.mxu1 %v373_v38  ;;  %9401 = vmatpush3.msra.mxu0 %v325_v39  ;;  %v343_v38 = vld [vmem:[%s19893_s1 + $0x900] sm:$0xff]  ;;  %v2746_v39 = vcombine.high %v2744_v31, %v2744_v31 }
  0x8f   :  { %9436 = vmatpush3.msra.mxu1 %v357_v40  ;;  %9402 = vmatprep.subr.mxu0 %v340_v41  ;;  %v406_v40 = vld [vmem:[%s19893_s1 + $0xaf8] sm:$0xff] }
  0x90   :  { %9437 = vmatprep.subr.mxu1 %v372_v42  ;;  %9403 = vmatpush3.msra.mxu0 %v324_v43  ;;  %v438_v41 = vld [vmem:[%s19893_s1 + $0xbf8] sm:$0xff] }
  0x91   :  { %9438 = vmatpush3.msra.mxu1 %v356_v44  ;;  %9404 = vmatprep.subr.mxu0 %v339_v45  ;;  %v390_v42 = vld [vmem:[%s19893_s1 + $0xa78] sm:$0xff]  ;;  %v405_v44 = vld [vmem:[%s19893_s1 + $0xaf0] sm:$0xff] }
  0x92   :  { %9439 = vmatprep.subr.mxu1 %v371_v46  ;;  %9405 = vmatpush3.msra.mxu0 %v323_v47  ;;  %v422_v43 = vld [vmem:[%s19893_s1 + $0xb78] sm:$0xff]  ;;  %v437_v45 = vld [vmem:[%s19893_s1 + $0xbf0] sm:$0xff] }
  0x93   :  { %9440 = vmatpush3.msra.mxu1 %v355_v48  ;;  %9406 = vmatprep.subr.mxu0 %v338_v49  ;;  %v389_v46 = vld [vmem:[%s19893_s1 + $0xa70] sm:$0xff]  ;;  %v404_v48 = vld [vmem:[%s19893_s1 + $0xae8] sm:$0xff] }
  0x94   :  { %9441 = vmatprep.subr.mxu1 %v370_v50  ;;  %9407 = vmatpush3.msra.mxu0 %v322_v52  ;;  %v421_v47 = vld [vmem:[%s19893_s1 + $0xb70] sm:$0xff]  ;;  %v436_v49 = vld [vmem:[%s19893_s1 + $0xbe8] sm:$0xff] }
  0x95   :  { %9442 = vmatpush3.msra.mxu1 %v354_v53  ;;  %9408 = vmatprep.subr.mxu0 %v337_v54  ;;  %v388_v50 = vld [vmem:[%s19893_s1 + $0xa68] sm:$0xff]  ;;  %v403_v53 = vld [vmem:[%s19893_s1 + $0xae0] sm:$0xff] }
  0x96   :  { %9443 = vmatprep.subr.mxu1 %v369_v55  ;;  %9409 = vmatpush3.msra.mxu0 %v321_v56  ;;  %v420_v52 = vld [vmem:[%s19893_s1 + $0xb68] sm:$0xff]  ;;  %v435_v54 = vld [vmem:[%s19893_s1 + $0xbe0] sm:$0xff] }
  0x97   :  { %9444 = vmatpush3.msra.mxu1 %v353_v57  ;;  %9410 = vmatprep.subr.mxu0 %v336_v58  ;;  %v387_v55 = vld [vmem:[%s19893_s1 + $0xa60] sm:$0xff]  ;;  %v402_v57 = vld [vmem:[%s19893_s1 + $0xad8] sm:$0xff] }
  0x98   :  { %9445 = vmatprep.subr.mxu1 %v368_v59  ;;  %9411 = vmatpush3.msra.mxu0 %v320_v60  ;;  %v419_v56 = vld [vmem:[%s19893_s1 + $0xb60] sm:$0xff]  ;;  %v434_v58 = vld [vmem:[%s19893_s1 + $0xbd8] sm:$0xff] }
  0x99   :  { %9446 = vmatpush3.msra.mxu1 %v352_v61  ;;  %9412 = vmatprep.subr.mxu0 %v335_v62  ;;  %v386_v59 = vld [vmem:[%s19893_s1 + $0xa58] sm:$0xff]  ;;  %v401_v61 = vld [vmem:[%s19893_s1 + $0xad0] sm:$0xff] }
  0x9a   :  { %9447 = vmatprep.subr.mxu1 %v367_v63  ;;  %9413 = vmatpush3.msra.mxu0 %v319_v0  ;;  %v418_v60 = vld [vmem:[%s19893_s1 + $0xb58] sm:$0xff]  ;;  %v433_v62 = vld [vmem:[%s19893_s1 + $0xbd0] sm:$0xff] }
  0x9b   :  { %9448 = vmatpush3.msra.mxu1 %v351_v1  ;;  %9414 = vmatprep.subr.mxu0 %v334_v2  ;;  %v385_v63 = vld [vmem:[%s19893_s1 + $0xa50] sm:$0xff]  ;;  %v400_v1 = vld [vmem:[%s19893_s1 + $0xac8] sm:$0xff] }
  0x9c   :  { %9449 = vmatprep.subr.mxu1 %v366_v3  ;;  %9415 = vmatpush3.msra.mxu0 %v318_v4  ;;  %v417_v0 = vld [vmem:[%s19893_s1 + $0xb50] sm:$0xff]  ;;  %v432_v2 = vld [vmem:[%s19893_s1 + $0xbc8] sm:$0xff] }
  0x9d   :  { %9450 = vmatpush3.msra.mxu1 %v350_v5  ;;  %9416 = vmatprep.subr.mxu0 %v333_v6  ;;  %v384_v3 = vld [vmem:[%s19893_s1 + $0xa48] sm:$0xff]  ;;  %v399_v5 = vld [vmem:[%s19893_s1 + $0xac0] sm:$0xff] }
  0x9e   :  { %9451 = vmatprep.subr.mxu1 %v365_v7  ;;  %9417 = vmatpush3.msra.mxu0 %v317_v8  ;;  %v416_v4 = vld [vmem:[%s19893_s1 + $0xb48] sm:$0xff]  ;;  %v431_v6 = vld [vmem:[%s19893_s1 + $0xbc0] sm:$0xff] }
  0x9f   :  { %9452 = vmatpush3.msra.mxu1 %v349_v9  ;;  %9418 = vmatprep.subr.mxu0 %v332_v10  ;;  %v383_v7 = vld [vmem:[%s19893_s1 + $0xa40] sm:$0xff]  ;;  %v398_v9 = vld [vmem:[%s19893_s1 + $0xab8] sm:$0xff] }
  0xa0   :  { %9453 = vmatprep.subr.mxu1 %v364_v11  ;;  %9419 = vmatpush3.msra.mxu0 %v316_v12  ;;  %v415_v8 = vld [vmem:[%s19893_s1 + $0xb40] sm:$0xff]  ;;  %v430_v10 = vld [vmem:[%s19893_s1 + $0xbb8] sm:$0xff] }
  0xa1   :  { %9454 = vmatpush3.msra.mxu1 %v348_v13  ;;  %9420 = vmatprep.subr.mxu0 %v331_v15  ;;  %v382_v11 = vld [vmem:[%s19893_s1 + $0xa38] sm:$0xff]  ;;  %v397_v13 = vld [vmem:[%s19893_s1 + $0xab0] sm:$0xff] }
  0xa2   :  { %9455 = vmatprep.subr.mxu1 %v363_v16  ;;  %9421 = vmatpush3.msra.mxu0 %v315_v17  ;;  %v414_v12 = vld [vmem:[%s19893_s1 + $0xb38] sm:$0xff]  ;;  %v381_v15 = vld [vmem:[%s19893_s1 + $0xa30] sm:$0xff]  ;;  %v396_v17 = vld [vmem:[%s19893_s1 + $0xaa8] sm:$0xff] }
  0xa3   :  { %9456 = vmatpush3.msra.mxu1 %v347_v18  ;;  %9422 = vmatprep.subr.mxu0 %v330_v19  ;;  %v413_v16 = vld [vmem:[%s19893_s1 + $0xb30] sm:$0xff]  ;;  %v428_v18 = vld [vmem:[%s19893_s1 + $0xba8] sm:$0xff] }
  0xa4   :  { %9457 = vmatprep.subr.mxu1 %v362_v20  ;;  %9423 = vmatpush3.msra.mxu0 %v314_v22  ;;  %v380_v19 = vld [vmem:[%s19893_s1 + $0xa28] sm:$0xff]  ;;  %v395_v22 = vld [vmem:[%s19893_s1 + $0xaa0] sm:$0xff] }
  0xa5   :  { %9458 = vmatpush3.msra.mxu1 %v346_v23  ;;  %9424 = vmatprep.subr.mxu0 %v329_v24  ;;  %v412_v20 = vld [vmem:[%s19893_s1 + $0xb28] sm:$0xff]  ;;  %v427_v23 = vld [vmem:[%s19893_s1 + $0xba0] sm:$0xff] }
  0xa6   :  { %9459 = vmatprep.subr.mxu1 %v361_v25  ;;  %9425 = vmatpush3.msra.mxu0 %v313_v27  ;;  %v379_v24 = vld [vmem:[%s19893_s1 + $0xa20] sm:$0xff]  ;;  %v426_v27 = vld [vmem:[%s19893_s1 + $0xb98] sm:$0xff] }
  0xa7   :  { %9460 = vmatpush3.msra.mxu1 %v345_v28  ;;  %9426 = vmatprep.subr.mxu0 %v328_v29  ;;  %v411_v25 = vld [vmem:[%s19893_s1 + $0xb20] sm:$0xff]  ;;  %v2747_v28 = vcombine.high %v20_v21, %v20_v21  ;;  %v378_v29 = vld [vmem:[%s19893_s1 + $0xa18] sm:$0xff] }
  0xa8   :  { %9461 = vmatprep.subr.mxu1 %v360_v30  ;;  %9427 = vmatpush3.msra.mxu0 %v312_v32  ;;  %v410_v30 = vld [vmem:[%s19893_s1 + $0xb18] sm:$0xff]  ;;  %v425_v32 = vld [vmem:[%s19893_s1 + $0xb90] sm:$0xff] }
  0xa9   :  { %9462 = vmatpush3.msra.mxu1 %v344_v33  ;;  %9428 = vmatprep.subr.mxu0 %v327_v34  ;;  %v2754_v33 = vrot.slane %v20_v21, %v12142_v51  ;;  %v377_v34 = vld [vmem:[%s19893_s1 + $0xa10] sm:$0xff] }
  0xaa   :  { %9463 = vmatprep.subr.mxu1 %v359_v35  ;;  %9429 = vmatpush3.msra.mxu0 %v311_v37  ;;  %v409_v35 = vld [vmem:[%s19893_s1 + $0xb10] sm:$0xff]  ;;  %v424_v37 = vld [vmem:[%s19893_s1 + $0xb88] sm:$0xff] }
  0xab   :  { %4126 = vmatprep.mubr.f32.mxu0 %v2745_v36  ;;  %9464 = vmatpush3.msra.mxu1 %v343_v38  ;;  %v392_v36 = vld [vmem:[%s19893_s1 + $0xa88] sm:$0xff]  ;;  %v2761_v38 = vrot.slane %v2747_v28, %v12142_v51  ;;  %v493_v21 = vld [vmem:[%s19893_s1 + $0xdb0] sm:$0xff] }
  0xac   :  { %4127 = vmatmul.mubr.f32.vlgmr.msra.gmra.mxu0 %v2737_v26  ;;  %4196 = vmatprep.mubr.f32.mxu1 %v2746_v39  ;;  %v394_v26 = vld [vmem:[%s19893_s1 + $0xa98] sm:$0xff]  ;;  %v376_v39 = vld [vmem:[%s19893_s1 + $0xa08] sm:$0xff]  ;;  %v21_v28 = vld [vmem:[%s19892_s0 + $0x30] sm:$0xff] }
  0xad   :  { %9468 = vmatprep.subr.mxu0 %v406_v40  ;;  %9503 = vmatprep.subr.mxu1 %v438_v41  ;;  %v408_v40 = vld [vmem:[%s19893_s1 + $0xb08] sm:$0xff]  ;;  %v391_v41 = vld [vmem:[%s19893_s1 + $0xa80] sm:$0xff] }
  0xae   :  { %4197 = vmatmul.mubr.f32.vlgmr.msra.gmra.mxu1 %v2744_v31  ;;  %9469 = vmatpush3.msra.mxu0 %v390_v42  ;;  %v393_v31 = vld [vmem:[%s19893_s1 + $0xa90] sm:$0xff]  ;;  %v423_v42 = vld [vmem:[%s19893_s1 + $0xb80] sm:$0xff] }
  0xaf   :  { %9504 = vmatpush3.msra.mxu1 %v422_v43  ;;  %9470 = vmatprep.subr.mxu0 %v405_v44  ;;  %v2762_v43 = vcombine.high %v2754_v33, %v2754_v33  ;;  %v375_v44 = vld [vmem:[%s19893_s1 + $0xa00] sm:$0xff] }
  0xb0   :  { %9505 = vmatprep.subr.mxu1 %v437_v45  ;;  %9471 = vmatpush3.msra.mxu0 %v389_v46  ;;  %v407_v45 = vld [vmem:[%s19893_s1 + $0xb00] sm:$0xff]  ;;  %v2763_v46 = vcombine.high %v2761_v38, %v2761_v38 }
  0xb1   :  { %9506 = vmatpush3.msra.mxu1 %v421_v47  ;;  %9472 = vmatprep.subr.mxu0 %v404_v48  ;;  %v470_v47 = vld [vmem:[%s19893_s1 + $0xcf8] sm:$0xff] }
  0xb2   :  { %9507 = vmatprep.subr.mxu1 %v436_v49  ;;  %9473 = vmatpush3.msra.mxu0 %v388_v50  ;;  %v502_v48 = vld [vmem:[%s19893_s1 + $0xdf8] sm:$0xff] }
  0xb3   :  { %9508 = vmatpush3.msra.mxu1 %v420_v52  ;;  %9474 = vmatprep.subr.mxu0 %v403_v53  ;;  %v454_v49 = vld [vmem:[%s19893_s1 + $0xc78] sm:$0xff]  ;;  %v469_v52 = vld [vmem:[%s19893_s1 + $0xcf0] sm:$0xff] }
  0xb4   :  { %9509 = vmatprep.subr.mxu1 %v435_v54  ;;  %9475 = vmatpush3.msra.mxu0 %v387_v55  ;;  %v486_v50 = vld [vmem:[%s19893_s1 + $0xd78] sm:$0xff]  ;;  %v501_v53 = vld [vmem:[%s19893_s1 + $0xdf0] sm:$0xff] }
  0xb5   :  { %9510 = vmatpush3.msra.mxu1 %v419_v56  ;;  %9476 = vmatprep.subr.mxu0 %v402_v57  ;;  %v453_v54 = vld [vmem:[%s19893_s1 + $0xc70] sm:$0xff]  ;;  %v468_v56 = vld [vmem:[%s19893_s1 + $0xce8] sm:$0xff] }
  0xb6   :  { %9511 = vmatprep.subr.mxu1 %v434_v58  ;;  %9477 = vmatpush3.msra.mxu0 %v386_v59  ;;  %v485_v55 = vld [vmem:[%s19893_s1 + $0xd70] sm:$0xff]  ;;  %v500_v57 = vld [vmem:[%s19893_s1 + $0xde8] sm:$0xff] }
  0xb7   :  { %9512 = vmatpush3.msra.mxu1 %v418_v60  ;;  %9478 = vmatprep.subr.mxu0 %v401_v61  ;;  %v452_v58 = vld [vmem:[%s19893_s1 + $0xc68] sm:$0xff]  ;;  %v467_v60 = vld [vmem:[%s19893_s1 + $0xce0] sm:$0xff] }
  0xb8   :  { %9513 = vmatprep.subr.mxu1 %v433_v62  ;;  %9479 = vmatpush3.msra.mxu0 %v385_v63  ;;  %v484_v59 = vld [vmem:[%s19893_s1 + $0xd68] sm:$0xff]  ;;  %v499_v61 = vld [vmem:[%s19893_s1 + $0xde0] sm:$0xff] }
  0xb9   :  { %9514 = vmatpush3.msra.mxu1 %v417_v0  ;;  %9480 = vmatprep.subr.mxu0 %v400_v1  ;;  %v451_v62 = vld [vmem:[%s19893_s1 + $0xc60] sm:$0xff]  ;;  %v466_v0 = vld [vmem:[%s19893_s1 + $0xcd8] sm:$0xff] }
  0xba   :  { %9515 = vmatprep.subr.mxu1 %v432_v2  ;;  %9481 = vmatpush3.msra.mxu0 %v384_v3  ;;  %v483_v63 = vld [vmem:[%s19893_s1 + $0xd60] sm:$0xff]  ;;  %v498_v1 = vld [vmem:[%s19893_s1 + $0xdd8] sm:$0xff] }
  0xbb   :  { %9516 = vmatpush3.msra.mxu1 %v416_v4  ;;  %9482 = vmatprep.subr.mxu0 %v399_v5  ;;  %v450_v2 = vld [vmem:[%s19893_s1 + $0xc58] sm:$0xff]  ;;  %v465_v4 = vld [vmem:[%s19893_s1 + $0xcd0] sm:$0xff] }
  0xbc   :  { %9517 = vmatprep.subr.mxu1 %v431_v6  ;;  %9483 = vmatpush3.msra.mxu0 %v383_v7  ;;  %v482_v3 = vld [vmem:[%s19893_s1 + $0xd58] sm:$0xff]  ;;  %v497_v5 = vld [vmem:[%s19893_s1 + $0xdd0] sm:$0xff] }
  0xbd   :  { %9518 = vmatpush3.msra.mxu1 %v415_v8  ;;  %9484 = vmatprep.subr.mxu0 %v398_v9  ;;  %v449_v6 = vld [vmem:[%s19893_s1 + $0xc50] sm:$0xff]  ;;  %v464_v8 = vld [vmem:[%s19893_s1 + $0xcc8] sm:$0xff] }
  0xbe   :  { %9519 = vmatprep.subr.mxu1 %v430_v10  ;;  %9485 = vmatpush3.msra.mxu0 %v382_v11  ;;  %v481_v7 = vld [vmem:[%s19893_s1 + $0xd50] sm:$0xff]  ;;  %v496_v9 = vld [vmem:[%s19893_s1 + $0xdc8] sm:$0xff] }
  0xbf   :  { %9520 = vmatpush3.msra.mxu1 %v414_v12  ;;  %9486 = vmatprep.subr.mxu0 %v397_v13  ;;  %v448_v10 = vld [vmem:[%s19893_s1 + $0xc48] sm:$0xff]  ;;  %v463_v12 = vld [vmem:[%s19893_s1 + $0xcc0] sm:$0xff] }
  0xc0   :  { %9521 = vmatprep.subr.mxu1 %v429_v14  ;;  %9487 = vmatpush3.msra.mxu0 %v381_v15  ;;  %v480_v11 = vld [vmem:[%s19893_s1 + $0xd48] sm:$0xff]  ;;  %v495_v13 = vld [vmem:[%s19893_s1 + $0xdc0] sm:$0xff] }
  0xc1   :  { %9522 = vmatpush3.msra.mxu1 %v413_v16  ;;  %9488 = vmatprep.subr.mxu0 %v396_v17  ;;  %v447_v14 = vld [vmem:[%s19893_s1 + $0xc40] sm:$0xff]  ;;  %v462_v16 = vld [vmem:[%s19893_s1 + $0xcb8] sm:$0xff] }
  0xc2   :  { %9523 = vmatprep.subr.mxu1 %v428_v18  ;;  %9489 = vmatpush3.msra.mxu0 %v380_v19  ;;  %v479_v15 = vld [vmem:[%s19893_s1 + $0xd40] sm:$0xff]  ;;  %v494_v17 = vld [vmem:[%s19893_s1 + $0xdb8] sm:$0xff] }
  0xc3   :  { %9524 = vmatpush3.msra.mxu1 %v412_v20  ;;  %9490 = vmatprep.subr.mxu0 %v395_v22  ;;  %v446_v18 = vld [vmem:[%s19893_s1 + $0xc38] sm:$0xff]  ;;  %v461_v20 = vld [vmem:[%s19893_s1 + $0xcb0] sm:$0xff] }
  0xc4   :  { %9525 = vmatprep.subr.mxu1 %v427_v23  ;;  %9491 = vmatpush3.msra.mxu0 %v379_v24  ;;  %v478_v19 = vld [vmem:[%s19893_s1 + $0xd38] sm:$0xff]  ;;  %v445_v22 = vld [vmem:[%s19893_s1 + $0xc30] sm:$0xff]  ;;  %v460_v24 = vld [vmem:[%s19893_s1 + $0xca8] sm:$0xff] }
  0xc5   :  { %9526 = vmatpush3.msra.mxu1 %v411_v25  ;;  %9492 = vmatprep.subr.mxu0 %v394_v26  ;;  %v477_v23 = vld [vmem:[%s19893_s1 + $0xd30] sm:$0xff]  ;;  %v492_v25 = vld [vmem:[%s19893_s1 + $0xda8] sm:$0xff] }
  0xc6   :  { %9527 = vmatprep.subr.mxu1 %v426_v27  ;;  %9493 = vmatpush3.msra.mxu0 %v378_v29  ;;  %v444_v26 = vld [vmem:[%s19893_s1 + $0xc28] sm:$0xff]  ;;  %v459_v29 = vld [vmem:[%s19893_s1 + $0xca0] sm:$0xff] }
  0xc7   :  { %9528 = vmatpush3.msra.mxu1 %v410_v30  ;;  %9494 = vmatprep.subr.mxu0 %v393_v31  ;;  %v476_v27 = vld [vmem:[%s19893_s1 + $0xd28] sm:$0xff]  ;;  %v491_v30 = vld [vmem:[%s19893_s1 + $0xda0] sm:$0xff] }
  0xc8   :  { %9529 = vmatprep.subr.mxu1 %v425_v32  ;;  %9495 = vmatpush3.msra.mxu0 %v377_v34  ;;  %v443_v31 = vld [vmem:[%s19893_s1 + $0xc20] sm:$0xff]  ;;  %v490_v34 = vld [vmem:[%s19893_s1 + $0xd98] sm:$0xff] }
  0xc9   :  { %9530 = vmatpush3.msra.mxu1 %v409_v35  ;;  %9496 = vmatprep.subr.mxu0 %v392_v36  ;;  %v475_v32 = vld [vmem:[%s19893_s1 + $0xd20] sm:$0xff]  ;;  %v2764_v35 = vcombine.high %v21_v28, %v21_v28  ;;  %v442_v36 = vld [vmem:[%s19893_s1 + $0xc18] sm:$0xff] }
  0xca   :  { %9531 = vmatprep.subr.mxu1 %v424_v37  ;;  %9497 = vmatpush3.msra.mxu0 %v376_v39  ;;  %v474_v37 = vld [vmem:[%s19893_s1 + $0xd18] sm:$0xff] }
  0xcb   :  { %9532 = vmatpush3.msra.mxu1 %v408_v40  ;;  %9498 = vmatprep.subr.mxu0 %v391_v41 }
  0xcc   :  { %9533 = vmatprep.subr.mxu1 %v423_v42  ;;  %9499 = vmatpush3.msra.mxu0 %v375_v44 }
  0xcd   :  { %4266 = vmatprep.mubr.f32.mxu0 %v2762_v43  ;;  %9534 = vmatpush3.msra.mxu1 %v407_v45 }
  0xce   :  { %4267 = vmatmul.mubr.f32.vlgmr.msra.gmra.mxu0 %v2754_v33  ;;  %4336 = vmatprep.mubr.f32.mxu1 %v2763_v46  ;;  %v458_v33 = vld [vmem:[%s19893_s1 + $0xc98] sm:$0xff] }
  0xcf   :  { %9538 = vmatprep.subr.mxu0 %v470_v47  ;;  %9573 = vmatprep.subr.mxu1 %v502_v48 }
  0xd0   :  { %4337 = vmatmul.mubr.f32.vlgmr.msra.gmra.mxu1 %v2761_v38  ;;  %9539 = vmatpush3.msra.mxu0 %v454_v49 }
  0xd1   :  { %9574 = vmatpush3.msra.mxu1 %v486_v50  ;;  %9540 = vmatprep.subr.mxu0 %v469_v52 }
  0xd2   :  { %9575 = vmatprep.subr.mxu1 %v501_v53  ;;  %9541 = vmatpush3.msra.mxu0 %v453_v54 }
  0xd3   :  { %9576 = vmatpush3.msra.mxu1 %v485_v55  ;;  %9542 = vmatprep.subr.mxu0 %v468_v56 }
  0xd4   :  { %9577 = vmatprep.subr.mxu1 %v500_v57  ;;  %9543 = vmatpush3.msra.mxu0 %v452_v58 }
  0xd5   :  { %9578 = vmatpush3.msra.mxu1 %v484_v59  ;;  %9544 = vmatprep.subr.mxu0 %v467_v60 }
  0xd6   :  { %9579 = vmatprep.subr.mxu1 %v499_v61  ;;  %9545 = vmatpush3.msra.mxu0 %v451_v62 }
  0xd7   :  { %9580 = vmatpush3.msra.mxu1 %v483_v63  ;;  %9546 = vmatprep.subr.mxu0 %v466_v0 }
  0xd8   :  { %9581 = vmatprep.subr.mxu1 %v498_v1  ;;  %9547 = vmatpush3.msra.mxu0 %v450_v2 }
  0xd9   :  { %9582 = vmatpush3.msra.mxu1 %v482_v3  ;;  %9548 = vmatprep.subr.mxu0 %v465_v4 }
  0xda   :  { %9583 = vmatprep.subr.mxu1 %v497_v5  ;;  %9549 = vmatpush3.msra.mxu0 %v449_v6 }
  0xdb   :  { %9584 = vmatpush3.msra.mxu1 %v481_v7  ;;  %9550 = vmatprep.subr.mxu0 %v464_v8 }
  0xdc   :  { %9585 = vmatprep.subr.mxu1 %v496_v9  ;;  %9551 = vmatpush3.msra.mxu0 %v448_v10 }
  0xdd   :  { %9586 = vmatpush3.msra.mxu1 %v480_v11  ;;  %9552 = vmatprep.subr.mxu0 %v463_v12 }
  0xde   :  { %9587 = vmatprep.subr.mxu1 %v495_v13  ;;  %9553 = vmatpush3.msra.mxu0 %v447_v14 }
  0xdf   :  { %9588 = vmatpush3.msra.mxu1 %v479_v15  ;;  %9554 = vmatprep.subr.mxu0 %v462_v16 }
  0xe0   :  { %9589 = vmatprep.subr.mxu1 %v494_v17  ;;  %9555 = vmatpush3.msra.mxu0 %v446_v18 }
  0xe1   :  { %9590 = vmatpush3.msra.mxu1 %v478_v19  ;;  %9556 = vmatprep.subr.mxu0 %v461_v20 }
  0xe2   :  { %9591 = vmatprep.subr.mxu1 %v493_v21  ;;  %9557 = vmatpush3.msra.mxu0 %v445_v22 }
  0xe3   :  { %9592 = vmatpush3.msra.mxu1 %v477_v23  ;;  %9558 = vmatprep.subr.mxu0 %v460_v24 }
  0xe4   :  { %9593 = vmatprep.subr.mxu1 %v492_v25  ;;  %9559 = vmatpush3.msra.mxu0 %v444_v26 }
  0xe5   :  { %9594 = vmatpush3.msra.mxu1 %v476_v27  ;;  %9560 = vmatprep.subr.mxu0 %v459_v29 }
  0xe6   :  { %9595 = vmatprep.subr.mxu1 %v491_v30 }
  0xe7   :  { %8 = vsyncpa [#allocation3], 0  ;;  %9561 = vmatpush3.msra.mxu0 %v443_v31  ;;  %9596 = vmatpush3.msra.mxu1 %v475_v32  ;;  %v457_v38 = vld [vmem:[%s19893_s1 + $0xc90] sm:$0xff]  ;;  %v2771_v40 = vrot.slane %v21_v28, %v12142_v51  ;;  %v456_v43 = vld [vmem:[%s19893_s1 + $0xc88] sm:$0xff]  ;;  %v2778_v45 = vrot.slane %v2764_v35, %v12142_v51 }
  0xe8   :  { %v489_v39 = vld [vmem:[%s19893_s1 + $0xd90] sm:$0xff]  ;;  %9562 = vmatprep.subr.mxu0 %v458_v33  ;;  %9597 = vmatprep.subr.mxu1 %v490_v34  ;;  %v488_v44 = vld [vmem:[%s19893_s1 + $0xd88] sm:$0xff]  ;;  %v455_v48 = vld [vmem:[%s19893_s1 + $0xc80] sm:$0xff] }
  0xe9   :  { %v441_v41 = vld [vmem:[%s19893_s1 + $0xc10] sm:$0xff]  ;;  %9563 = vmatpush3.msra.mxu0 %v442_v36  ;;  %9598 = vmatpush3.msra.mxu1 %v474_v37  ;;  %v440_v46 = vld [vmem:[%s19893_s1 + $0xc08] sm:$0xff]  ;;  %v487_v49 = vld [vmem:[%s19893_s1 + $0xd80] sm:$0xff]  ;;  %v2779_v50 = vcombine.high %v2771_v40, %v2771_v40  ;;  %v2780_v54 = vcombine.high %v2778_v45, %v2778_v45 }
  0xea   :  { %v473_v42 = vld [vmem:[%s19893_s1 + $0xd10] sm:$0xff]  ;;  %9564 = vmatprep.subr.mxu0 %v457_v38  ;;  %9599 = vmatprep.subr.mxu1 %v489_v39  ;;  %v472_v47 = vld [vmem:[%s19893_s1 + $0xd08] sm:$0xff]  ;;  %v439_v52 = vld [vmem:[%s19893_s1 + $0xc00] sm:$0xff] }
  0xeb   :  { %9565 = vmatpush3.msra.mxu0 %v441_v41  ;;  %9600 = vmatpush3.msra.mxu1 %v473_v42  ;;  %v471_v53 = vld [vmem:[%s19893_s1 + $0xd00] sm:$0xff]  ;;  %v534_v55 = vld [vmem:[%s19893_s1 + $0xef8] sm:$0xff]  ;;  %v533_v59 = vld [vmem:[%s19893_s1 + $0xef0] sm:$0xff] }
  0xec   :  { %9566 = vmatprep.subr.mxu0 %v456_v43  ;;  %9601 = vmatprep.subr.mxu1 %v488_v44  ;;  %v566_v56 = vld [vmem:[%s19893_s1 + $0xff8] sm:$0xff]  ;;  %v565_v60 = vld [vmem:[%s19893_s1 + $0xff0] sm:$0xff]  ;;  %v532_v63 = vld [vmem:[%s19893_s1 + $0xee8] sm:$0xff] }
  0xed   :  { %9567 = vmatpush3.msra.mxu0 %v440_v46  ;;  %9602 = vmatpush3.msra.mxu1 %v472_v47  ;;  %v518_v57 = vld [vmem:[%s19893_s1 + $0xe78] sm:$0xff]  ;;  %v517_v61 = vld [vmem:[%s19893_s1 + $0xe70] sm:$0xff]  ;;  %v564_v0 = vld [vmem:[%s19893_s1 + $0xfe8] sm:$0xff] }
  0xee   :  { %9568 = vmatprep.subr.mxu0 %v455_v48  ;;  %9603 = vmatprep.subr.mxu1 %v487_v49  ;;  %v550_v58 = vld [vmem:[%s19893_s1 + $0xf78] sm:$0xff]  ;;  %v549_v62 = vld [vmem:[%s19893_s1 + $0xf70] sm:$0xff]  ;;  %v516_v1 = vld [vmem:[%s19893_s1 + $0xe68] sm:$0xff] }
  0xef   :  { %9569 = vmatpush3.msra.mxu0 %v439_v52  ;;  %4406 = vmatprep.mubr.f32.mxu0 %v2779_v50  ;;  %v548_v2 = vld [vmem:[%s19893_s1 + $0xf68] sm:$0xff]  ;;  %v531_v3 = vld [vmem:[%s19893_s1 + $0xee0] sm:$0xff]  ;;  %v530_v7 = vld [vmem:[%s19893_s1 + $0xed8] sm:$0xff] }
  0xf0   :  { %9604 = vmatpush3.msra.mxu1 %v471_v53  ;;  %4407 = vmatmul.mubr.f32.vlgmr.msra.gmra.mxu0 %v2771_v40  ;;  %v563_v4 = vld [vmem:[%s19893_s1 + $0xfe0] sm:$0xff]  ;;  %v562_v8 = vld [vmem:[%s19893_s1 + $0xfd8] sm:$0xff]  ;;  %v529_v11 = vld [vmem:[%s19893_s1 + $0xed0] sm:$0xff] }
  0xf1   :  { %4476 = vmatprep.mubr.f32.mxu1 %v2780_v54  ;;  %9608 = vmatprep.subr.mxu0 %v534_v55  ;;  %v515_v5 = vld [vmem:[%s19893_s1 + $0xe60] sm:$0xff]  ;;  %v514_v9 = vld [vmem:[%s19893_s1 + $0xe58] sm:$0xff]  ;;  %v561_v12 = vld [vmem:[%s19893_s1 + $0xfd0] sm:$0xff] }
  0xf2   :  { %9643 = vmatprep.subr.mxu1 %v566_v56  ;;  %4477 = vmatmul.mubr.f32.vlgmr.msra.gmra.mxu1 %v2778_v45  ;;  %v547_v6 = vld [vmem:[%s19893_s1 + $0xf60] sm:$0xff]  ;;  %v546_v10 = vld [vmem:[%s19893_s1 + $0xf58] sm:$0xff]  ;;  %v513_v13 = vld [vmem:[%s19893_s1 + $0xe50] sm:$0xff] }
  0xf3   :  { %9609 = vmatpush3.msra.mxu0 %v518_v57  ;;  %9644 = vmatpush3.msra.mxu1 %v550_v58  ;;  %v545_v14 = vld [vmem:[%s19893_s1 + $0xf50] sm:$0xff]  ;;  %v528_v15 = vld [vmem:[%s19893_s1 + $0xec8] sm:$0xff]  ;;  %v527_v19 = vld [vmem:[%s19893_s1 + $0xec0] sm:$0xff] }
  0xf4   :  { %9610 = vmatprep.subr.mxu0 %v533_v59  ;;  %9645 = vmatprep.subr.mxu1 %v565_v60  ;;  %v560_v16 = vld [vmem:[%s19893_s1 + $0xfc8] sm:$0xff]  ;;  %v559_v20 = vld [vmem:[%s19893_s1 + $0xfc0] sm:$0xff]  ;;  %v526_v23 = vld [vmem:[%s19893_s1 + $0xeb8] sm:$0xff] }
  0xf5   :  { %9611 = vmatpush3.msra.mxu0 %v517_v61  ;;  %9646 = vmatpush3.msra.mxu1 %v549_v62  ;;  %v512_v17 = vld [vmem:[%s19893_s1 + $0xe48] sm:$0xff]  ;;  %v511_v21 = vld [vmem:[%s19893_s1 + $0xe40] sm:$0xff]  ;;  %v558_v24 = vld [vmem:[%s19893_s1 + $0xfb8] sm:$0xff] }
  0xf6   :  { %9612 = vmatprep.subr.mxu0 %v532_v63  ;;  %9647 = vmatprep.subr.mxu1 %v564_v0  ;;  %v544_v18 = vld [vmem:[%s19893_s1 + $0xf48] sm:$0xff]  ;;  %v543_v22 = vld [vmem:[%s19893_s1 + $0xf40] sm:$0xff]  ;;  %v510_v25 = vld [vmem:[%s19893_s1 + $0xe38] sm:$0xff] }
  0xf7   :  { %9613 = vmatpush3.msra.mxu0 %v516_v1  ;;  %9648 = vmatpush3.msra.mxu1 %v548_v2  ;;  %v542_v26 = vld [vmem:[%s19893_s1 + $0xf38] sm:$0xff]  ;;  %v525_v27 = vld [vmem:[%s19893_s1 + $0xeb0] sm:$0xff]  ;;  %v524_v31 = vld [vmem:[%s19893_s1 + $0xea8] sm:$0xff] }
  0xf8   :  { %9614 = vmatprep.subr.mxu0 %v531_v3  ;;  %9649 = vmatprep.subr.mxu1 %v563_v4  ;;  %v557_v28 = vld [vmem:[%s19893_s1 + $0xfb0] sm:$0xff]  ;;  %v556_v32 = vld [vmem:[%s19893_s1 + $0xfa8] sm:$0xff]  ;;  %v22_v35 = vld [vmem:[%s19892_s0 + $0x38] sm:$0xff] }
  0xf9   :  { %9615 = vmatpush3.msra.mxu0 %v515_v5  ;;  %9650 = vmatpush3.msra.mxu1 %v547_v6  ;;  %v509_v29 = vld [vmem:[%s19893_s1 + $0xe30] sm:$0xff]  ;;  %v508_v33 = vld [vmem:[%s19893_s1 + $0xe28] sm:$0xff]  ;;  %v523_v36 = vld [vmem:[%s19893_s1 + $0xea0] sm:$0xff]  ;;  %v2781_v42 = vcombine.high %v22_v35, %v22_v35  ;;  %v2788_v47 = vrot.slane %v22_v35, %v12142_v51 }
  0xfa   :  { %9616 = vmatprep.subr.mxu0 %v530_v7  ;;  %9651 = vmatprep.subr.mxu1 %v562_v8  ;;  %v541_v30 = vld [vmem:[%s19893_s1 + $0xf30] sm:$0xff]  ;;  %v540_v34 = vld [vmem:[%s19893_s1 + $0xf28] sm:$0xff]  ;;  %v555_v37 = vld [vmem:[%s19893_s1 + $0xfa0] sm:$0xff] }
  0xfb   :  { %9617 = vmatpush3.msra.mxu0 %v514_v9  ;;  %9652 = vmatpush3.msra.mxu1 %v546_v10  ;;  %v507_v38 = vld [vmem:[%s19893_s1 + $0xe20] sm:$0xff]  ;;  %v522_v40 = vld [vmem:[%s19893_s1 + $0xe98] sm:$0xff]  ;;  %v521_v45 = vld [vmem:[%s19893_s1 + $0xe90] sm:$0xff]  ;;  %v2795_v53 = vrot.slane %v2781_v42, %v12142_v51  ;;  %v2796_v58 = vcombine.high %v2788_v47, %v2788_v47 }
  0xfc   :  { %9618 = vmatprep.subr.mxu0 %v529_v11  ;;  %9653 = vmatprep.subr.mxu1 %v561_v12  ;;  %v539_v39 = vld [vmem:[%s19893_s1 + $0xf20] sm:$0xff]  ;;  %v554_v41 = vld [vmem:[%s19893_s1 + $0xf98] sm:$0xff]  ;;  %v553_v46 = vld [vmem:[%s19893_s1 + $0xf90] sm:$0xff] }
  0xfd   :  { %9619 = vmatpush3.msra.mxu0 %v513_v13  ;;  %9654 = vmatpush3.msra.mxu1 %v545_v14  ;;  %v506_v43 = vld [vmem:[%s19893_s1 + $0xe18] sm:$0xff]  ;;  %v505_v48 = vld [vmem:[%s19893_s1 + $0xe10] sm:$0xff]  ;;  %v520_v50 = vld [vmem:[%s19893_s1 + $0xe88] sm:$0xff]  ;;  %v2797_v61 = vcombine.high %v2795_v53, %v2795_v53 }
  0xfe   :  { %9620 = vmatprep.subr.mxu0 %v528_v15  ;;  %9655 = vmatprep.subr.mxu1 %v560_v16  ;;  %v538_v44 = vld [vmem:[%s19893_s1 + $0xf18] sm:$0xff]  ;;  %v537_v49 = vld [vmem:[%s19893_s1 + $0xf10] sm:$0xff]  ;;  %v552_v52 = vld [vmem:[%s19893_s1 + $0xf88] sm:$0xff] }
  0xff   :  { %9621 = vmatpush3.msra.mxu0 %v512_v17  ;;  %9656 = vmatpush3.msra.mxu1 %v544_v18  ;;  %v504_v54 = vld [vmem:[%s19893_s1 + $0xe08] sm:$0xff]  ;;  %v519_v56 = vld [vmem:[%s19893_s1 + $0xe80] sm:$0xff]  ;;  %v598_v62 = vld [vmem:[%s19893_s1 + $0x10f8] sm:$0xff] }
 0x100   :  { %9622 = vmatprep.subr.mxu0 %v527_v19  ;;  %9657 = vmatprep.subr.mxu1 %v559_v20  ;;  %v536_v55 = vld [vmem:[%s19893_s1 + $0xf08] sm:$0xff]  ;;  %v551_v57 = vld [vmem:[%s19893_s1 + $0xf80] sm:$0xff]  ;;  %v630_v63 = vld [vmem:[%s19893_s1 + $0x11f8] sm:$0xff] }
 0x101   :  { %9623 = vmatpush3.msra.mxu0 %v511_v21  ;;  %9658 = vmatpush3.msra.mxu1 %v543_v22  ;;  %v503_v59 = vld [vmem:[%s19893_s1 + $0xe00] sm:$0xff]  ;;  %v582_v0 = vld [vmem:[%s19893_s1 + $0x1078] sm:$0xff]  ;;  %v597_v2 = vld [vmem:[%s19893_s1 + $0x10f0] sm:$0xff] }
 0x102   :  { %9624 = vmatprep.subr.mxu0 %v526_v23  ;;  %9659 = vmatprep.subr.mxu1 %v558_v24  ;;  %v535_v60 = vld [vmem:[%s19893_s1 + $0xf00] sm:$0xff]  ;;  %v614_v1 = vld [vmem:[%s19893_s1 + $0x1178] sm:$0xff]  ;;  %v629_v3 = vld [vmem:[%s19893_s1 + $0x11f0] sm:$0xff] }
 0x103   :  { %9625 = vmatpush3.msra.mxu0 %v510_v25  ;;  %9660 = vmatpush3.msra.mxu1 %v542_v26  ;;  %v581_v4 = vld [vmem:[%s19893_s1 + $0x1070] sm:$0xff]  ;;  %v596_v6 = vld [vmem:[%s19893_s1 + $0x10e8] sm:$0xff]  ;;  %v595_v10 = vld [vmem:[%s19893_s1 + $0x10e0] sm:$0xff] }
 0x104   :  { %9626 = vmatprep.subr.mxu0 %v525_v27  ;;  %9661 = vmatprep.subr.mxu1 %v557_v28  ;;  %v613_v5 = vld [vmem:[%s19893_s1 + $0x1170] sm:$0xff]  ;;  %v628_v7 = vld [vmem:[%s19893_s1 + $0x11e8] sm:$0xff]  ;;  %v627_v11 = vld [vmem:[%s19893_s1 + $0x11e0] sm:$0xff] }
 0x105   :  { %9627 = vmatpush3.msra.mxu0 %v509_v29  ;;  %9662 = vmatpush3.msra.mxu1 %v541_v30  ;;  %v580_v8 = vld [vmem:[%s19893_s1 + $0x1068] sm:$0xff]  ;;  %v579_v12 = vld [vmem:[%s19893_s1 + $0x1060] sm:$0xff]  ;;  %v594_v14 = vld [vmem:[%s19893_s1 + $0x10d8] sm:$0xff] }
 0x106   :  { %9628 = vmatprep.subr.mxu0 %v524_v31  ;;  %9663 = vmatprep.subr.mxu1 %v556_v32  ;;  %v612_v9 = vld [vmem:[%s19893_s1 + $0x1168] sm:$0xff]  ;;  %v611_v13 = vld [vmem:[%s19893_s1 + $0x1160] sm:$0xff]  ;;  %v626_v15 = vld [vmem:[%s19893_s1 + $0x11d8] sm:$0xff] }
 0x107   :  { %9629 = vmatpush3.msra.mxu0 %v508_v33  ;;  %9664 = vmatpush3.msra.mxu1 %v540_v34  ;;  %v578_v16 = vld [vmem:[%s19893_s1 + $0x1058] sm:$0xff]  ;;  %v593_v18 = vld [vmem:[%s19893_s1 + $0x10d0] sm:$0xff]  ;;  %v592_v22 = vld [vmem:[%s19893_s1 + $0x10c8] sm:$0xff] }
 0x108   :  { %9630 = vmatprep.subr.mxu0 %v523_v36  ;;  %9665 = vmatprep.subr.mxu1 %v555_v37  ;;  %v610_v17 = vld [vmem:[%s19893_s1 + $0x1158] sm:$0xff]  ;;  %v625_v19 = vld [vmem:[%s19893_s1 + $0x11d0] sm:$0xff]  ;;  %v624_v23 = vld [vmem:[%s19893_s1 + $0x11c8] sm:$0xff] }
 0x109   :  { %9631 = vmatpush3.msra.mxu0 %v507_v38  ;;  %9666 = vmatpush3.msra.mxu1 %v539_v39  ;;  %v577_v20 = vld [vmem:[%s19893_s1 + $0x1050] sm:$0xff]  ;;  %v576_v24 = vld [vmem:[%s19893_s1 + $0x1048] sm:$0xff]  ;;  %v591_v26 = vld [vmem:[%s19893_s1 + $0x10c0] sm:$0xff] }
 0x10a   :  { %9632 = vmatprep.subr.mxu0 %v522_v40  ;;  %9667 = vmatprep.subr.mxu1 %v554_v41  ;;  %v609_v21 = vld [vmem:[%s19893_s1 + $0x1150] sm:$0xff]  ;;  %v608_v25 = vld [vmem:[%s19893_s1 + $0x1148] sm:$0xff]  ;;  %v623_v27 = vld [vmem:[%s19893_s1 + $0x11c0] sm:$0xff] }
 0x10b   :  { %9633 = vmatpush3.msra.mxu0 %v506_v43  ;;  %9668 = vmatpush3.msra.mxu1 %v538_v44  ;;  %v575_v28 = vld [vmem:[%s19893_s1 + $0x1040] sm:$0xff]  ;;  %v590_v30 = vld [vmem:[%s19893_s1 + $0x10b8] sm:$0xff]  ;;  %v589_v34 = vld [vmem:[%s19893_s1 + $0x10b0] sm:$0xff] }
 0x10c   :  { %9634 = vmatprep.subr.mxu0 %v521_v45  ;;  %9669 = vmatprep.subr.mxu1 %v553_v46  ;;  %v607_v29 = vld [vmem:[%s19893_s1 + $0x1140] sm:$0xff]  ;;  %v622_v31 = vld [vmem:[%s19893_s1 + $0x11b8] sm:$0xff]  ;;  %v621_v35 = vld [vmem:[%s19893_s1 + $0x11b0] sm:$0xff] }
 0x10d   :  { %9635 = vmatpush3.msra.mxu0 %v505_v48  ;;  %9670 = vmatpush3.msra.mxu1 %v537_v49  ;;  %v574_v32 = vld [vmem:[%s19893_s1 + $0x1038] sm:$0xff]  ;;  %v573_v36 = vld [vmem:[%s19893_s1 + $0x1030] sm:$0xff]  ;;  %v588_v38 = vld [vmem:[%s19893_s1 + $0x10a8] sm:$0xff] }
 0x10e   :  { %9636 = vmatprep.subr.mxu0 %v520_v50  ;;  %9671 = vmatprep.subr.mxu1 %v552_v52  ;;  %v606_v33 = vld [vmem:[%s19893_s1 + $0x1138] sm:$0xff]  ;;  %v605_v37 = vld [vmem:[%s19893_s1 + $0x1130] sm:$0xff]  ;;  %v620_v39 = vld [vmem:[%s19893_s1 + $0x11a8] sm:$0xff] }
 0x10f   :  { %9637 = vmatpush3.msra.mxu0 %v504_v54  ;;  %9672 = vmatpush3.msra.mxu1 %v536_v55  ;;  %v572_v40 = vld [vmem:[%s19893_s1 + $0x1028] sm:$0xff]  ;;  %v23_v42 = vld [vmem:[%s19892_s0 + $0x40] sm:$0xff]  ;;  %v618_v48 = vld [vmem:[%s19893_s1 + $0x1198] sm:$0xff] }
 0x110   :  { %9638 = vmatprep.subr.mxu0 %v519_v56  ;;  %9673 = vmatprep.subr.mxu1 %v551_v57  ;;  %v604_v41 = vld [vmem:[%s19893_s1 + $0x1128] sm:$0xff]  ;;  %v587_v43 = vld [vmem:[%s19893_s1 + $0x10a0] sm:$0xff]  ;;  %v2798_v49 = vcombine.high %v23_v42, %v23_v42  ;;  %v570_v50 = vld [vmem:[%s19893_s1 + $0x1018] sm:$0xff]  ;;  %v2805_v55 = vrot.slane %v23_v42, %v12142_v51 }
 0x111   :  { %9639 = vmatpush3.msra.mxu0 %v503_v59  ;;  %4546 = vmatprep.mubr.f32.mxu0 %v2796_v58  ;;  %v619_v44 = vld [vmem:[%s19893_s1 + $0x11a0] sm:$0xff]  ;;  %v602_v52 = vld [vmem:[%s19893_s1 + $0x1118] sm:$0xff]  ;;  %v617_v54 = vld [vmem:[%s19893_s1 + $0x1190] sm:$0xff] }
 0x112   :  { %9674 = vmatpush3.msra.mxu1 %v535_v60  ;;  %4547 = vmatmul.mubr.f32.vlgmr.msra.gmra.mxu0 %v2788_v47  ;;  %v571_v45 = vld [vmem:[%s19893_s1 + $0x1020] sm:$0xff]  ;;  %v586_v47 = vld [vmem:[%s19893_s1 + $0x1098] sm:$0xff]  ;;  %v569_v56 = vld [vmem:[%s19893_s1 + $0x1010] sm:$0xff]  ;;  %v2812_v60 = vrot.slane %v2798_v49, %v12142_v51 }
 0x113   :  { %4616 = vmatprep.mubr.f32.mxu1 %v2797_v61  ;;  %9678 = vmatprep.subr.mxu0 %v598_v62  ;;  %v603_v46 = vld [vmem:[%s19893_s1 + $0x1120] sm:$0xff]  ;;  %v601_v57 = vld [vmem:[%s19893_s1 + $0x1110] sm:$0xff]  ;;  %v584_v58 = vld [vmem:[%s19893_s1 + $0x1088] sm:$0xff] }
 0x114   :  { %9713 = vmatprep.subr.mxu1 %v630_v63  ;;  %4617 = vmatmul.mubr.f32.vlgmr.msra.gmra.mxu1 %v2795_v53  ;;  %v585_v53 = vld [vmem:[%s19893_s1 + $0x1090] sm:$0xff]  ;;  %v616_v59 = vld [vmem:[%s19893_s1 + $0x1188] sm:$0xff]  ;;  %v583_v63 = vld [vmem:[%s19893_s1 + $0x1080] sm:$0xff] }
 0x115   :  { %9679 = vmatpush3.msra.mxu0 %v582_v0  ;;  %9714 = vmatpush3.msra.mxu1 %v614_v1  ;;  %v568_v61 = vld [vmem:[%s19893_s1 + $0x1008] sm:$0xff]  ;;  %v615_v0 = vld [vmem:[%s19893_s1 + $0x1180] sm:$0xff]  ;;  %v2813_v1 = vcombine.high %v2805_v55, %v2805_v55  ;;  %v685_v42 = vld [vmem:[%s19893_s1 + $0x13b0] sm:$0xff] }
 0x116   :  { %9680 = vmatprep.subr.mxu0 %v597_v2  ;;  %9715 = vmatprep.subr.mxu1 %v629_v3  ;;  %v600_v62 = vld [vmem:[%s19893_s1 + $0x1108] sm:$0xff]  ;;  %v567_v2 = vld [vmem:[%s19893_s1 + $0x1000] sm:$0xff] }
 0x117   :  { %9681 = vmatpush3.msra.mxu0 %v581_v4  ;;  %9716 = vmatpush3.msra.mxu1 %v613_v5  ;;  %v599_v3 = vld [vmem:[%s19893_s1 + $0x1100] sm:$0xff]  ;;  %v2814_v4 = vcombine.high %v2812_v60, %v2812_v60  ;;  %v662_v5 = vld [vmem:[%s19893_s1 + $0x12f8] sm:$0xff]  ;;  %v24_v49 = vld [vmem:[%s19892_s0 + $0x48] sm:$0xff] }
 0x118   :  { %9682 = vmatprep.subr.mxu0 %v596_v6  ;;  %9717 = vmatprep.subr.mxu1 %v628_v7  ;;  %v694_v6 = vld [vmem:[%s19893_s1 + $0x13f8] sm:$0xff] }
 0x119   :  { %9683 = vmatpush3.msra.mxu0 %v580_v8  ;;  %9718 = vmatpush3.msra.mxu1 %v612_v9  ;;  %v646_v7 = vld [vmem:[%s19893_s1 + $0x1278] sm:$0xff]  ;;  %v661_v9 = vld [vmem:[%s19893_s1 + $0x12f0] sm:$0xff] }
 0x11a   :  { %9684 = vmatprep.subr.mxu0 %v595_v10  ;;  %9719 = vmatprep.subr.mxu1 %v627_v11  ;;  %v678_v8 = vld [vmem:[%s19893_s1 + $0x1378] sm:$0xff]  ;;  %v693_v10 = vld [vmem:[%s19893_s1 + $0x13f0] sm:$0xff] }
 0x11b   :  { %9685 = vmatpush3.msra.mxu0 %v579_v12  ;;  %9720 = vmatpush3.msra.mxu1 %v611_v13  ;;  %v645_v11 = vld [vmem:[%s19893_s1 + $0x1270] sm:$0xff]  ;;  %v660_v13 = vld [vmem:[%s19893_s1 + $0x12e8] sm:$0xff] }
 0x11c   :  { %9686 = vmatprep.subr.mxu0 %v594_v14  ;;  %9721 = vmatprep.subr.mxu1 %v626_v15  ;;  %v677_v12 = vld [vmem:[%s19893_s1 + $0x1370] sm:$0xff]  ;;  %v692_v14 = vld [vmem:[%s19893_s1 + $0x13e8] sm:$0xff] }
 0x11d   :  { %9687 = vmatpush3.msra.mxu0 %v578_v16  ;;  %9722 = vmatpush3.msra.mxu1 %v610_v17  ;;  %v644_v15 = vld [vmem:[%s19893_s1 + $0x1268] sm:$0xff]  ;;  %v659_v17 = vld [vmem:[%s19893_s1 + $0x12e0] sm:$0xff] }
 0x11e   :  { %9688 = vmatprep.subr.mxu0 %v593_v18  ;;  %9723 = vmatprep.subr.mxu1 %v625_v19  ;;  %v676_v16 = vld [vmem:[%s19893_s1 + $0x1368] sm:$0xff]  ;;  %v691_v18 = vld [vmem:[%s19893_s1 + $0x13e0] sm:$0xff] }
 0x11f   :  { %9689 = vmatpush3.msra.mxu0 %v577_v20  ;;  %9724 = vmatpush3.msra.mxu1 %v609_v21  ;;  %v643_v19 = vld [vmem:[%s19893_s1 + $0x1260] sm:$0xff]  ;;  %v658_v21 = vld [vmem:[%s19893_s1 + $0x12d8] sm:$0xff] }
 0x120   :  { %9690 = vmatprep.subr.mxu0 %v592_v22  ;;  %9725 = vmatprep.subr.mxu1 %v624_v23  ;;  %v675_v20 = vld [vmem:[%s19893_s1 + $0x1360] sm:$0xff]  ;;  %v690_v22 = vld [vmem:[%s19893_s1 + $0x13d8] sm:$0xff] }
 0x121   :  { %9691 = vmatpush3.msra.mxu0 %v576_v24  ;;  %9726 = vmatpush3.msra.mxu1 %v608_v25  ;;  %v642_v23 = vld [vmem:[%s19893_s1 + $0x1258] sm:$0xff]  ;;  %v657_v25 = vld [vmem:[%s19893_s1 + $0x12d0] sm:$0xff] }
 0x122   :  { %9692 = vmatprep.subr.mxu0 %v591_v26  ;;  %9727 = vmatprep.subr.mxu1 %v623_v27  ;;  %v674_v24 = vld [vmem:[%s19893_s1 + $0x1358] sm:$0xff]  ;;  %v689_v26 = vld [vmem:[%s19893_s1 + $0x13d0] sm:$0xff] }
 0x123   :  { %9693 = vmatpush3.msra.mxu0 %v575_v28  ;;  %9728 = vmatpush3.msra.mxu1 %v607_v29  ;;  %v641_v27 = vld [vmem:[%s19893_s1 + $0x1250] sm:$0xff]  ;;  %v656_v29 = vld [vmem:[%s19893_s1 + $0x12c8] sm:$0xff] }
 0x124   :  { %9694 = vmatprep.subr.mxu0 %v590_v30  ;;  %9729 = vmatprep.subr.mxu1 %v622_v31  ;;  %v673_v28 = vld [vmem:[%s19893_s1 + $0x1350] sm:$0xff]  ;;  %v688_v30 = vld [vmem:[%s19893_s1 + $0x13c8] sm:$0xff] }
 0x125   :  { %9695 = vmatpush3.msra.mxu0 %v574_v32  ;;  %9730 = vmatpush3.msra.mxu1 %v606_v33  ;;  %v640_v31 = vld [vmem:[%s19893_s1 + $0x1248] sm:$0xff]  ;;  %v655_v33 = vld [vmem:[%s19893_s1 + $0x12c0] sm:$0xff] }
 0x126   :  { %9696 = vmatprep.subr.mxu0 %v589_v34  ;;  %9731 = vmatprep.subr.mxu1 %v621_v35  ;;  %v672_v32 = vld [vmem:[%s19893_s1 + $0x1348] sm:$0xff]  ;;  %v687_v34 = vld [vmem:[%s19893_s1 + $0x13c0] sm:$0xff] }
 0x127   :  { %9697 = vmatpush3.msra.mxu0 %v573_v36  ;;  %9732 = vmatpush3.msra.mxu1 %v605_v37  ;;  %v639_v35 = vld [vmem:[%s19893_s1 + $0x1240] sm:$0xff]  ;;  %v654_v37 = vld [vmem:[%s19893_s1 + $0x12b8] sm:$0xff] }
 0x128   :  { %9698 = vmatprep.subr.mxu0 %v588_v38  ;;  %9733 = vmatprep.subr.mxu1 %v620_v39  ;;  %v671_v36 = vld [vmem:[%s19893_s1 + $0x1340] sm:$0xff]  ;;  %v686_v38 = vld [vmem:[%s19893_s1 + $0x13b8] sm:$0xff] }
 0x129   :  { %9699 = vmatpush3.msra.mxu0 %v572_v40  ;;  %9734 = vmatpush3.msra.mxu1 %v604_v41  ;;  %v638_v39 = vld [vmem:[%s19893_s1 + $0x1238] sm:$0xff]  ;;  %v653_v41 = vld [vmem:[%s19893_s1 + $0x12b0] sm:$0xff] }
 0x12a   :  { %9700 = vmatprep.subr.mxu0 %v587_v43  ;;  %9735 = vmatprep.subr.mxu1 %v619_v44  ;;  %v670_v40 = vld [vmem:[%s19893_s1 + $0x1338] sm:$0xff]  ;;  %v637_v43 = vld [vmem:[%s19893_s1 + $0x1230] sm:$0xff] }
 0x12b   :  { %9701 = vmatpush3.msra.mxu0 %v571_v45  ;;  %9736 = vmatpush3.msra.mxu1 %v603_v46  ;;  %v669_v44 = vld [vmem:[%s19893_s1 + $0x1330] sm:$0xff]  ;;  %v652_v45 = vld [vmem:[%s19893_s1 + $0x12a8] sm:$0xff] }
 0x12c   :  { %9702 = vmatprep.subr.mxu0 %v586_v47  ;;  %9737 = vmatprep.subr.mxu1 %v618_v48  ;;  %v684_v46 = vld [vmem:[%s19893_s1 + $0x13a8] sm:$0xff] }
 0x12d   :  { %9703 = vmatpush3.msra.mxu0 %v570_v50  ;;  %9738 = vmatpush3.msra.mxu1 %v602_v52  ;;  %v636_v47 = vld [vmem:[%s19893_s1 + $0x1228] sm:$0xff]  ;;  %v651_v50 = vld [vmem:[%s19893_s1 + $0x12a0] sm:$0xff] }
 0x12e   :  { %9704 = vmatprep.subr.mxu0 %v585_v53  ;;  %9739 = vmatprep.subr.mxu1 %v617_v54  ;;  %v668_v48 = vld [vmem:[%s19893_s1 + $0x1328] sm:$0xff]  ;;  %v683_v52 = vld [vmem:[%s19893_s1 + $0x13a0] sm:$0xff] }
 0x12f   :  { %9705 = vmatpush3.msra.mxu0 %v569_v56  ;;  %9740 = vmatpush3.msra.mxu1 %v601_v57  ;;  %v635_v53 = vld [vmem:[%s19893_s1 + $0x1220] sm:$0xff]  ;;  %v682_v56 = vld [vmem:[%s19893_s1 + $0x1398] sm:$0xff]  ;;  %v2815_v57 = vcombine.high %v24_v49, %v24_v49 }
 0x130   :  { %9706 = vmatprep.subr.mxu0 %v584_v58  ;;  %9741 = vmatprep.subr.mxu1 %v616_v59  ;;  %v667_v54 = vld [vmem:[%s19893_s1 + $0x1320] sm:$0xff]  ;;  %v634_v58 = vld [vmem:[%s19893_s1 + $0x1218] sm:$0xff] }
 0x131   :  { %9707 = vmatpush3.msra.mxu0 %v568_v61  ;;  %9742 = vmatpush3.msra.mxu1 %v600_v62  ;;  %v666_v59 = vld [vmem:[%s19893_s1 + $0x1318] sm:$0xff]  ;;  %v681_v61 = vld [vmem:[%s19893_s1 + $0x1390] sm:$0xff]  ;;  %v2822_v62 = vrot.slane %v24_v49, %v12142_v51 }
 0x132   :  { %9708 = vmatprep.subr.mxu0 %v583_v63  ;;  %9743 = vmatprep.subr.mxu1 %v615_v0  ;;  %v633_v63 = vld [vmem:[%s19893_s1 + $0x1210] sm:$0xff] }
 0x133   :  { %9709 = vmatpush3.msra.mxu0 %v567_v2  ;;  %4686 = vmatprep.mubr.f32.mxu0 %v2813_v1  ;;  %v665_v0 = vld [vmem:[%s19893_s1 + $0x1310] sm:$0xff]  ;;  %v648_v1 = vld [vmem:[%s19893_s1 + $0x1288] sm:$0xff] }
 0x134   :  { %9744 = vmatpush3.msra.mxu1 %v599_v3  ;;  %4687 = vmatmul.mubr.f32.vlgmr.msra.gmra.mxu0 %v2805_v55  ;;  %v650_v55 = vld [vmem:[%s19893_s1 + $0x1298] sm:$0xff]  ;;  %v680_v2 = vld [vmem:[%s19893_s1 + $0x1388] sm:$0xff]  ;;  %v2829_v3 = vrot.slane %v2815_v57, %v12142_v51  ;;  %v749_v49 = vld [vmem:[%s19893_s1 + $0x15b0] sm:$0xff] }
 0x135   :  { %4756 = vmatprep.mubr.f32.mxu1 %v2814_v4  ;;  %9748 = vmatprep.subr.mxu0 %v662_v5  ;;  %v632_v4 = vld [vmem:[%s19893_s1 + $0x1208] sm:$0xff]  ;;  %v25_v57 = vld [vmem:[%s19892_s0 + $0x50] sm:$0xff] }
 0x136   :  { %9783 = vmatprep.subr.mxu1 %v694_v6  ;;  %4757 = vmatmul.mubr.f32.vlgmr.msra.gmra.mxu1 %v2812_v60  ;;  %v649_v60 = vld [vmem:[%s19893_s1 + $0x1290] sm:$0xff]  ;;  %v664_v5 = vld [vmem:[%s19893_s1 + $0x1308] sm:$0xff]  ;;  %v647_v6 = vld [vmem:[%s19893_s1 + $0x1280] sm:$0xff] }
 0x137   :  { %9749 = vmatpush3.msra.mxu0 %v646_v7  ;;  %9784 = vmatpush3.msra.mxu1 %v678_v8  ;;  %v679_v7 = vld [vmem:[%s19893_s1 + $0x1380] sm:$0xff]  ;;  %v2830_v8 = vcombine.high %v2822_v62, %v2822_v62 }
 0x138   :  { %9750 = vmatprep.subr.mxu0 %v661_v9  ;;  %9785 = vmatprep.subr.mxu1 %v693_v10  ;;  %v631_v9 = vld [vmem:[%s19893_s1 + $0x1200] sm:$0xff] }
 0x139   :  { %9751 = vmatpush3.msra.mxu0 %v645_v11  ;;  %9786 = vmatpush3.msra.mxu1 %v677_v12  ;;  %v663_v10 = vld [vmem:[%s19893_s1 + $0x1300] sm:$0xff]  ;;  %v2831_v11 = vcombine.high %v2829_v3, %v2829_v3  ;;  %v726_v12 = vld [vmem:[%s19893_s1 + $0x14f8] sm:$0xff] }
 0x13a   :  { %9752 = vmatprep.subr.mxu0 %v660_v13  ;;  %9787 = vmatprep.subr.mxu1 %v692_v14  ;;  %v758_v13 = vld [vmem:[%s19893_s1 + $0x15f8] sm:$0xff] }
 0x13b   :  { %9753 = vmatpush3.msra.mxu0 %v644_v15  ;;  %9788 = vmatpush3.msra.mxu1 %v676_v16  ;;  %v710_v14 = vld [vmem:[%s19893_s1 + $0x1478] sm:$0xff]  ;;  %v725_v16 = vld [vmem:[%s19893_s1 + $0x14f0] sm:$0xff] }
 0x13c   :  { %9754 = vmatprep.subr.mxu0 %v659_v17  ;;  %9789 = vmatprep.subr.mxu1 %v691_v18  ;;  %v742_v15 = vld [vmem:[%s19893_s1 + $0x1578] sm:$0xff]  ;;  %v757_v17 = vld [vmem:[%s19893_s1 + $0x15f0] sm:$0xff] }
 0x13d   :  { %9755 = vmatpush3.msra.mxu0 %v643_v19  ;;  %9790 = vmatpush3.msra.mxu1 %v675_v20  ;;  %v709_v18 = vld [vmem:[%s19893_s1 + $0x1470] sm:$0xff]  ;;  %v724_v20 = vld [vmem:[%s19893_s1 + $0x14e8] sm:$0xff] }
 0x13e   :  { %9756 = vmatprep.subr.mxu0 %v658_v21  ;;  %9791 = vmatprep.subr.mxu1 %v690_v22  ;;  %v741_v19 = vld [vmem:[%s19893_s1 + $0x1570] sm:$0xff]  ;;  %v756_v21 = vld [vmem:[%s19893_s1 + $0x15e8] sm:$0xff] }
 0x13f   :  { %9757 = vmatpush3.msra.mxu0 %v642_v23  ;;  %9792 = vmatpush3.msra.mxu1 %v674_v24  ;;  %v708_v22 = vld [vmem:[%s19893_s1 + $0x1468] sm:$0xff]  ;;  %v723_v24 = vld [vmem:[%s19893_s1 + $0x14e0] sm:$0xff] }
 0x140   :  { %9758 = vmatprep.subr.mxu0 %v657_v25  ;;  %9793 = vmatprep.subr.mxu1 %v689_v26  ;;  %v740_v23 = vld [vmem:[%s19893_s1 + $0x1568] sm:$0xff]  ;;  %v755_v25 = vld [vmem:[%s19893_s1 + $0x15e0] sm:$0xff] }
 0x141   :  { %9759 = vmatpush3.msra.mxu0 %v641_v27  ;;  %9794 = vmatpush3.msra.mxu1 %v673_v28  ;;  %v707_v26 = vld [vmem:[%s19893_s1 + $0x1460] sm:$0xff]  ;;  %v722_v28 = vld [vmem:[%s19893_s1 + $0x14d8] sm:$0xff] }
 0x142   :  { %9760 = vmatprep.subr.mxu0 %v656_v29  ;;  %9795 = vmatprep.subr.mxu1 %v688_v30  ;;  %v739_v27 = vld [vmem:[%s19893_s1 + $0x1560] sm:$0xff]  ;;  %v754_v29 = vld [vmem:[%s19893_s1 + $0x15d8] sm:$0xff] }
 0x143   :  { %9761 = vmatpush3.msra.mxu0 %v640_v31  ;;  %9796 = vmatpush3.msra.mxu1 %v672_v32  ;;  %v706_v30 = vld [vmem:[%s19893_s1 + $0x1458] sm:$0xff]  ;;  %v721_v32 = vld [vmem:[%s19893_s1 + $0x14d0] sm:$0xff] }
 0x144   :  { %9762 = vmatprep.subr.mxu0 %v655_v33  ;;  %9797 = vmatprep.subr.mxu1 %v687_v34  ;;  %v738_v31 = vld [vmem:[%s19893_s1 + $0x1558] sm:$0xff]  ;;  %v753_v33 = vld [vmem:[%s19893_s1 + $0x15d0] sm:$0xff] }
 0x145   :  { %9763 = vmatpush3.msra.mxu0 %v639_v35  ;;  %9798 = vmatpush3.msra.mxu1 %v671_v36  ;;  %v705_v34 = vld [vmem:[%s19893_s1 + $0x1450] sm:$0xff]  ;;  %v720_v36 = vld [vmem:[%s19893_s1 + $0x14c8] sm:$0xff] }
 0x146   :  { %9764 = vmatprep.subr.mxu0 %v654_v37  ;;  %9799 = vmatprep.subr.mxu1 %v686_v38  ;;  %v737_v35 = vld [vmem:[%s19893_s1 + $0x1550] sm:$0xff]  ;;  %v752_v37 = vld [vmem:[%s19893_s1 + $0x15c8] sm:$0xff] }
 0x147   :  { %9765 = vmatpush3.msra.mxu0 %v638_v39  ;;  %9800 = vmatpush3.msra.mxu1 %v670_v40  ;;  %v704_v38 = vld [vmem:[%s19893_s1 + $0x1448] sm:$0xff]  ;;  %v719_v40 = vld [vmem:[%s19893_s1 + $0x14c0] sm:$0xff] }
 0x148   :  { %9766 = vmatprep.subr.mxu0 %v653_v41  ;;  %9801 = vmatprep.subr.mxu1 %v685_v42  ;;  %v736_v39 = vld [vmem:[%s19893_s1 + $0x1548] sm:$0xff]  ;;  %v751_v41 = vld [vmem:[%s19893_s1 + $0x15c0] sm:$0xff] }
 0x149   :  { %9767 = vmatpush3.msra.mxu0 %v637_v43  ;;  %9802 = vmatpush3.msra.mxu1 %v669_v44  ;;  %v703_v42 = vld [vmem:[%s19893_s1 + $0x1440] sm:$0xff]  ;;  %v718_v44 = vld [vmem:[%s19893_s1 + $0x14b8] sm:$0xff] }
 0x14a   :  { %9768 = vmatprep.subr.mxu0 %v652_v45  ;;  %9803 = vmatprep.subr.mxu1 %v684_v46  ;;  %v735_v43 = vld [vmem:[%s19893_s1 + $0x1540] sm:$0xff]  ;;  %v750_v45 = vld [vmem:[%s19893_s1 + $0x15b8] sm:$0xff] }
 0x14b   :  { %9769 = vmatpush3.msra.mxu0 %v636_v47  ;;  %9804 = vmatpush3.msra.mxu1 %v668_v48  ;;  %v702_v46 = vld [vmem:[%s19893_s1 + $0x1438] sm:$0xff]  ;;  %v717_v48 = vld [vmem:[%s19893_s1 + $0x14b0] sm:$0xff] }
 0x14c   :  { %9770 = vmatprep.subr.mxu0 %v651_v50  ;;  %9805 = vmatprep.subr.mxu1 %v683_v52  ;;  %v734_v47 = vld [vmem:[%s19893_s1 + $0x1538] sm:$0xff]  ;;  %v701_v50 = vld [vmem:[%s19893_s1 + $0x1430] sm:$0xff] }
 0x14d   :  { %9771 = vmatpush3.msra.mxu0 %v635_v53  ;;  %9806 = vmatpush3.msra.mxu1 %v667_v54  ;;  %v733_v52 = vld [vmem:[%s19893_s1 + $0x1530] sm:$0xff]  ;;  %v716_v53 = vld [vmem:[%s19893_s1 + $0x14a8] sm:$0xff] }
 0x14e   :  { %9772 = vmatprep.subr.mxu0 %v650_v55  ;;  %9807 = vmatprep.subr.mxu1 %v682_v56  ;;  %v748_v54 = vld [vmem:[%s19893_s1 + $0x15a8] sm:$0xff] }
 0x14f   :  { %9773 = vmatpush3.msra.mxu0 %v634_v58  ;;  %9808 = vmatpush3.msra.mxu1 %v666_v59  ;;  %v700_v55 = vld [vmem:[%s19893_s1 + $0x1428] sm:$0xff]  ;;  %v715_v58 = vld [vmem:[%s19893_s1 + $0x14a0] sm:$0xff] }
 0x150   :  { %9774 = vmatprep.subr.mxu0 %v649_v60  ;;  %9809 = vmatprep.subr.mxu1 %v681_v61  ;;  %v732_v56 = vld [vmem:[%s19893_s1 + $0x1528] sm:$0xff]  ;;  %v747_v59 = vld [vmem:[%s19893_s1 + $0x15a0] sm:$0xff] }
 0x151   :  { %9775 = vmatpush3.msra.mxu0 %v633_v63  ;;  %9810 = vmatpush3.msra.mxu1 %v665_v0  ;;  %v699_v60 = vld [vmem:[%s19893_s1 + $0x1420] sm:$0xff]  ;;  %v746_v63 = vld [vmem:[%s19893_s1 + $0x1598] sm:$0xff]  ;;  %v2832_v0 = vcombine.high %v25_v57, %v25_v57 }
 0x152   :  { %9776 = vmatprep.subr.mxu0 %v648_v1  ;;  %9811 = vmatprep.subr.mxu1 %v680_v2  ;;  %v731_v61 = vld [vmem:[%s19893_s1 + $0x1520] sm:$0xff]  ;;  %v698_v1 = vld [vmem:[%s19893_s1 + $0x1418] sm:$0xff] }
 0x153   :  { %9777 = vmatpush3.msra.mxu0 %v632_v4  ;;  %9812 = vmatpush3.msra.mxu1 %v664_v5  ;;  %v730_v2 = vld [vmem:[%s19893_s1 + $0x1518] sm:$0xff]  ;;  %v745_v4 = vld [vmem:[%s19893_s1 + $0x1590] sm:$0xff]  ;;  %v2839_v5 = vrot.slane %v25_v57, %v12142_v51 }
 0x154   :  { %9778 = vmatprep.subr.mxu0 %v647_v6  ;;  %9813 = vmatprep.subr.mxu1 %v679_v7  ;;  %v697_v6 = vld [vmem:[%s19893_s1 + $0x1410] sm:$0xff] }
 0x155   :  { %9779 = vmatpush3.msra.mxu0 %v631_v9  ;;  %4826 = vmatprep.mubr.f32.mxu0 %v2830_v8  ;;  %v729_v7 = vld [vmem:[%s19893_s1 + $0x1510] sm:$0xff]  ;;  %v712_v8 = vld [vmem:[%s19893_s1 + $0x1488] sm:$0xff] }
 0x156   :  { %9814 = vmatpush3.msra.mxu1 %v663_v10  ;;  %4827 = vmatmul.mubr.f32.vlgmr.msra.gmra.mxu0 %v2822_v62  ;;  %v714_v62 = vld [vmem:[%s19893_s1 + $0x1498] sm:$0xff]  ;;  %v744_v9 = vld [vmem:[%s19893_s1 + $0x1588] sm:$0xff]  ;;  %v2846_v10 = vrot.slane %v2832_v0, %v12142_v51  ;;  %v813_v57 = vld [vmem:[%s19893_s1 + $0x17b0] sm:$0xff] }
 0x157   :  { %4896 = vmatprep.mubr.f32.mxu1 %v2831_v11  ;;  %9818 = vmatprep.subr.mxu0 %v726_v12  ;;  %v696_v11 = vld [vmem:[%s19893_s1 + $0x1408] sm:$0xff]  ;;  %v26_v0 = vld [vmem:[%s19892_s0 + $0x58] sm:$0xff] }
 0x158   :  { %9853 = vmatprep.subr.mxu1 %v758_v13  ;;  %4897 = vmatmul.mubr.f32.vlgmr.msra.gmra.mxu1 %v2829_v3  ;;  %v713_v3 = vld [vmem:[%s19893_s1 + $0x1490] sm:$0xff]  ;;  %v728_v12 = vld [vmem:[%s19893_s1 + $0x1508] sm:$0xff]  ;;  %v711_v13 = vld [vmem:[%s19893_s1 + $0x1480] sm:$0xff] }
 0x159   :  { %9819 = vmatpush3.msra.mxu0 %v710_v14  ;;  %9854 = vmatpush3.msra.mxu1 %v742_v15  ;;  %v743_v14 = vld [vmem:[%s19893_s1 + $0x1580] sm:$0xff]  ;;  %v2847_v15 = vcombine.high %v2839_v5, %v2839_v5 }
 0x15a   :  { %9820 = vmatprep.subr.mxu0 %v725_v16  ;;  %9855 = vmatprep.subr.mxu1 %v757_v17  ;;  %v695_v16 = vld [vmem:[%s19893_s1 + $0x1400] sm:$0xff] }
 0x15b   :  { %9821 = vmatpush3.msra.mxu0 %v709_v18  ;;  %9856 = vmatpush3.msra.mxu1 %v741_v19  ;;  %v727_v17 = vld [vmem:[%s19893_s1 + $0x1500] sm:$0xff]  ;;  %v2848_v18 = vcombine.high %v2846_v10, %v2846_v10  ;;  %v790_v19 = vld [vmem:[%s19893_s1 + $0x16f8] sm:$0xff] }
 0x15c   :  { %9822 = vmatprep.subr.mxu0 %v724_v20  ;;  %9857 = vmatprep.subr.mxu1 %v756_v21  ;;  %v822_v20 = vld [vmem:[%s19893_s1 + $0x17f8] sm:$0xff] }
 0x15d   :  { %9823 = vmatpush3.msra.mxu0 %v708_v22  ;;  %9858 = vmatpush3.msra.mxu1 %v740_v23  ;;  %v774_v21 = vld [vmem:[%s19893_s1 + $0x1678] sm:$0xff]  ;;  %v789_v23 = vld [vmem:[%s19893_s1 + $0x16f0] sm:$0xff] }
 0x15e   :  { %9824 = vmatprep.subr.mxu0 %v723_v24  ;;  %9859 = vmatprep.subr.mxu1 %v755_v25  ;;  %v806_v22 = vld [vmem:[%s19893_s1 + $0x1778] sm:$0xff]  ;;  %v821_v24 = vld [vmem:[%s19893_s1 + $0x17f0] sm:$0xff] }
 0x15f   :  { %9825 = vmatpush3.msra.mxu0 %v707_v26  ;;  %9860 = vmatpush3.msra.mxu1 %v739_v27  ;;  %v773_v25 = vld [vmem:[%s19893_s1 + $0x1670] sm:$0xff]  ;;  %v788_v27 = vld [vmem:[%s19893_s1 + $0x16e8] sm:$0xff] }
 0x160   :  { %9826 = vmatprep.subr.mxu0 %v722_v28  ;;  %9861 = vmatprep.subr.mxu1 %v754_v29  ;;  %v805_v26 = vld [vmem:[%s19893_s1 + $0x1770] sm:$0xff]  ;;  %v820_v28 = vld [vmem:[%s19893_s1 + $0x17e8] sm:$0xff] }
 0x161   :  { %9827 = vmatpush3.msra.mxu0 %v706_v30  ;;  %9862 = vmatpush3.msra.mxu1 %v738_v31  ;;  %v772_v29 = vld [vmem:[%s19893_s1 + $0x1668] sm:$0xff]  ;;  %v787_v31 = vld [vmem:[%s19893_s1 + $0x16e0] sm:$0xff] }
 0x162   :  { %9828 = vmatprep.subr.mxu0 %v721_v32  ;;  %9863 = vmatprep.subr.mxu1 %v753_v33  ;;  %v804_v30 = vld [vmem:[%s19893_s1 + $0x1768] sm:$0xff]  ;;  %v819_v32 = vld [vmem:[%s19893_s1 + $0x17e0] sm:$0xff] }
 0x163   :  { %9829 = vmatpush3.msra.mxu0 %v705_v34  ;;  %9864 = vmatpush3.msra.mxu1 %v737_v35  ;;  %v771_v33 = vld [vmem:[%s19893_s1 + $0x1660] sm:$0xff]  ;;  %v786_v35 = vld [vmem:[%s19893_s1 + $0x16d8] sm:$0xff] }
 0x164   :  { %9830 = vmatprep.subr.mxu0 %v720_v36  ;;  %9865 = vmatprep.subr.mxu1 %v752_v37  ;;  %v803_v34 = vld [vmem:[%s19893_s1 + $0x1760] sm:$0xff]  ;;  %v818_v36 = vld [vmem:[%s19893_s1 + $0x17d8] sm:$0xff] }
 0x165   :  { %9831 = vmatpush3.msra.mxu0 %v704_v38  ;;  %9866 = vmatpush3.msra.mxu1 %v736_v39  ;;  %v770_v37 = vld [vmem:[%s19893_s1 + $0x1658] sm:$0xff]  ;;  %v785_v39 = vld [vmem:[%s19893_s1 + $0x16d0] sm:$0xff] }
 0x166   :  { %9832 = vmatprep.subr.mxu0 %v719_v40  ;;  %9867 = vmatprep.subr.mxu1 %v751_v41  ;;  %v802_v38 = vld [vmem:[%s19893_s1 + $0x1758] sm:$0xff]  ;;  %v817_v40 = vld [vmem:[%s19893_s1 + $0x17d0] sm:$0xff] }
 0x167   :  { %9833 = vmatpush3.msra.mxu0 %v703_v42  ;;  %9868 = vmatpush3.msra.mxu1 %v735_v43  ;;  %v769_v41 = vld [vmem:[%s19893_s1 + $0x1650] sm:$0xff]  ;;  %v784_v43 = vld [vmem:[%s19893_s1 + $0x16c8] sm:$0xff] }
 0x168   :  { %9834 = vmatprep.subr.mxu0 %v718_v44  ;;  %9869 = vmatprep.subr.mxu1 %v750_v45  ;;  %v801_v42 = vld [vmem:[%s19893_s1 + $0x1750] sm:$0xff]  ;;  %v816_v44 = vld [vmem:[%s19893_s1 + $0x17c8] sm:$0xff] }
 0x169   :  { %9835 = vmatpush3.msra.mxu0 %v702_v46  ;;  %9870 = vmatpush3.msra.mxu1 %v734_v47  ;;  %v768_v45 = vld [vmem:[%s19893_s1 + $0x1648] sm:$0xff]  ;;  %v783_v47 = vld [vmem:[%s19893_s1 + $0x16c0] sm:$0xff] }
 0x16a   :  { %9836 = vmatprep.subr.mxu0 %v717_v48  ;;  %9871 = vmatprep.subr.mxu1 %v749_v49  ;;  %v800_v46 = vld [vmem:[%s19893_s1 + $0x1748] sm:$0xff]  ;;  %v815_v48 = vld [vmem:[%s19893_s1 + $0x17c0] sm:$0xff] }
 0x16b   :  { %9837 = vmatpush3.msra.mxu0 %v701_v50  ;;  %9872 = vmatpush3.msra.mxu1 %v733_v52  ;;  %v767_v49 = vld [vmem:[%s19893_s1 + $0x1640] sm:$0xff]  ;;  %v782_v52 = vld [vmem:[%s19893_s1 + $0x16b8] sm:$0xff] }
 0x16c   :  { %9838 = vmatprep.subr.mxu0 %v716_v53  ;;  %9873 = vmatprep.subr.mxu1 %v748_v54  ;;  %v799_v50 = vld [vmem:[%s19893_s1 + $0x1740] sm:$0xff]  ;;  %v814_v53 = vld [vmem:[%s19893_s1 + $0x17b8] sm:$0xff] }
 0x16d   :  { %9839 = vmatpush3.msra.mxu0 %v700_v55  ;;  %9874 = vmatpush3.msra.mxu1 %v732_v56  ;;  %v766_v54 = vld [vmem:[%s19893_s1 + $0x1638] sm:$0xff]  ;;  %v781_v56 = vld [vmem:[%s19893_s1 + $0x16b0] sm:$0xff] }
 0x16e   :  { %9840 = vmatprep.subr.mxu0 %v715_v58  ;;  %9875 = vmatprep.subr.mxu1 %v747_v59  ;;  %v798_v55 = vld [vmem:[%s19893_s1 + $0x1738] sm:$0xff]  ;;  %v765_v58 = vld [vmem:[%s19893_s1 + $0x1630] sm:$0xff] }
 0x16f   :  { %9841 = vmatpush3.msra.mxu0 %v699_v60  ;;  %9876 = vmatpush3.msra.mxu1 %v731_v61  ;;  %v797_v59 = vld [vmem:[%s19893_s1 + $0x1730] sm:$0xff]  ;;  %v780_v60 = vld [vmem:[%s19893_s1 + $0x16a8] sm:$0xff] }
 0x170   :  { %9842 = vmatprep.subr.mxu0 %v714_v62  ;;  %9877 = vmatprep.subr.mxu1 %v746_v63  ;;  %v812_v61 = vld [vmem:[%s19893_s1 + $0x17a8] sm:$0xff] }
 0x171   :  { %9843 = vmatpush3.msra.mxu0 %v698_v1  ;;  %9878 = vmatpush3.msra.mxu1 %v730_v2  ;;  %v764_v62 = vld [vmem:[%s19893_s1 + $0x1628] sm:$0xff]  ;;  %v779_v1 = vld [vmem:[%s19893_s1 + $0x16a0] sm:$0xff] }
 0x172   :  { %9844 = vmatprep.subr.mxu0 %v713_v3  ;;  %9879 = vmatprep.subr.mxu1 %v745_v4  ;;  %v796_v63 = vld [vmem:[%s19893_s1 + $0x1728] sm:$0xff]  ;;  %v811_v2 = vld [vmem:[%s19893_s1 + $0x17a0] sm:$0xff] }
 0x173   :  { %9845 = vmatpush3.msra.mxu0 %v697_v6  ;;  %9880 = vmatpush3.msra.mxu1 %v729_v7  ;;  %v763_v3 = vld [vmem:[%s19893_s1 + $0x1620] sm:$0xff]  ;;  %v810_v6 = vld [vmem:[%s19893_s1 + $0x1798] sm:$0xff]  ;;  %v2849_v7 = vcombine.high %v26_v0, %v26_v0 }
 0x174   :  { %9846 = vmatprep.subr.mxu0 %v712_v8  ;;  %9881 = vmatprep.subr.mxu1 %v744_v9  ;;  %v795_v4 = vld [vmem:[%s19893_s1 + $0x1720] sm:$0xff]  ;;  %v762_v8 = vld [vmem:[%s19893_s1 + $0x1618] sm:$0xff] }
 0x175   :  { %9847 = vmatpush3.msra.mxu0 %v696_v11  ;;  %9882 = vmatpush3.msra.mxu1 %v728_v12  ;;  %v794_v9 = vld [vmem:[%s19893_s1 + $0x1718] sm:$0xff]  ;;  %v809_v11 = vld [vmem:[%s19893_s1 + $0x1790] sm:$0xff]  ;;  %v2856_v12 = vrot.slane %v26_v0, %v12142_v51 }
 0x176   :  { %9848 = vmatprep.subr.mxu0 %v711_v13  ;;  %9883 = vmatprep.subr.mxu1 %v743_v14  ;;  %v761_v13 = vld [vmem:[%s19893_s1 + $0x1610] sm:$0xff] }
 0x177   :  { %9849 = vmatpush3.msra.mxu0 %v695_v16  ;;  %4966 = vmatprep.mubr.f32.mxu0 %v2847_v15  ;;  %v793_v14 = vld [vmem:[%s19893_s1 + $0x1710] sm:$0xff]  ;;  %v776_v15 = vld [vmem:[%s19893_s1 + $0x1688] sm:$0xff] }
 0x178   :  { %9884 = vmatpush3.msra.mxu1 %v727_v17  ;;  %4967 = vmatmul.mubr.f32.vlgmr.msra.gmra.mxu0 %v2839_v5  ;;  %v778_v5 = vld [vmem:[%s19893_s1 + $0x1698] sm:$0xff]  ;;  %v808_v16 = vld [vmem:[%s19893_s1 + $0x1788] sm:$0xff]  ;;  %v2863_v17 = vrot.slane %v2849_v7, %v12142_v51  ;;  %v877_v0 = vld [vmem:[%s19893_s1 + $0x19b0] sm:$0xff] }
 0x179   :  { %5036 = vmatprep.mubr.f32.mxu1 %v2848_v18  ;;  %9888 = vmatprep.subr.mxu0 %v790_v19  ;;  %v760_v18 = vld [vmem:[%s19893_s1 + $0x1608] sm:$0xff]  ;;  %v27_v7 = vld [vmem:[%s19892_s0 + $0x60] sm:$0xff] }
 0x17a   :  { %9923 = vmatprep.subr.mxu1 %v822_v20  ;;  %5037 = vmatmul.mubr.f32.vlgmr.msra.gmra.mxu1 %v2846_v10  ;;  %v777_v10 = vld [vmem:[%s19893_s1 + $0x1690] sm:$0xff]  ;;  %v792_v19 = vld [vmem:[%s19893_s1 + $0x1708] sm:$0xff]  ;;  %v775_v20 = vld [vmem:[%s19893_s1 + $0x1680] sm:$0xff] }
 0x17b   :  { %9889 = vmatpush3.msra.mxu0 %v774_v21  ;;  %9924 = vmatpush3.msra.mxu1 %v806_v22  ;;  %v807_v21 = vld [vmem:[%s19893_s1 + $0x1780] sm:$0xff]  ;;  %v2864_v22 = vcombine.high %v2856_v12, %v2856_v12 }
 0x17c   :  { %9890 = vmatprep.subr.mxu0 %v789_v23  ;;  %9925 = vmatprep.subr.mxu1 %v821_v24  ;;  %v759_v23 = vld [vmem:[%s19893_s1 + $0x1600] sm:$0xff] }
 0x17d   :  { %9891 = vmatpush3.msra.mxu0 %v773_v25  ;;  %9926 = vmatpush3.msra.mxu1 %v805_v26  ;;  %v791_v24 = vld [vmem:[%s19893_s1 + $0x1700] sm:$0xff]  ;;  %v2865_v25 = vcombine.high %v2863_v17, %v2863_v17  ;;  %v854_v26 = vld [vmem:[%s19893_s1 + $0x18f8] sm:$0xff] }
 0x17e   :  { %9892 = vmatprep.subr.mxu0 %v788_v27  ;;  %9927 = vmatprep.subr.mxu1 %v820_v28  ;;  %v886_v27 = vld [vmem:[%s19893_s1 + $0x19f8] sm:$0xff] }
 0x17f   :  { %9893 = vmatpush3.msra.mxu0 %v772_v29  ;;  %9928 = vmatpush3.msra.mxu1 %v804_v30  ;;  %v838_v28 = vld [vmem:[%s19893_s1 + $0x1878] sm:$0xff]  ;;  %v853_v30 = vld [vmem:[%s19893_s1 + $0x18f0] sm:$0xff] }
 0x180   :  { %9894 = vmatprep.subr.mxu0 %v787_v31  ;;  %9929 = vmatprep.subr.mxu1 %v819_v32  ;;  %v870_v29 = vld [vmem:[%s19893_s1 + $0x1978] sm:$0xff]  ;;  %v885_v31 = vld [vmem:[%s19893_s1 + $0x19f0] sm:$0xff] }
 0x181   :  { %9895 = vmatpush3.msra.mxu0 %v771_v33  ;;  %9930 = vmatpush3.msra.mxu1 %v803_v34  ;;  %v837_v32 = vld [vmem:[%s19893_s1 + $0x1870] sm:$0xff]  ;;  %v852_v34 = vld [vmem:[%s19893_s1 + $0x18e8] sm:$0xff] }
 0x182   :  { %9896 = vmatprep.subr.mxu0 %v786_v35  ;;  %9931 = vmatprep.subr.mxu1 %v818_v36  ;;  %v869_v33 = vld [vmem:[%s19893_s1 + $0x1970] sm:$0xff]  ;;  %v884_v35 = vld [vmem:[%s19893_s1 + $0x19e8] sm:$0xff] }
 0x183   :  { %9897 = vmatpush3.msra.mxu0 %v770_v37  ;;  %9932 = vmatpush3.msra.mxu1 %v802_v38  ;;  %v836_v36 = vld [vmem:[%s19893_s1 + $0x1868] sm:$0xff]  ;;  %v851_v38 = vld [vmem:[%s19893_s1 + $0x18e0] sm:$0xff] }
 0x184   :  { %9898 = vmatprep.subr.mxu0 %v785_v39  ;;  %9933 = vmatprep.subr.mxu1 %v817_v40  ;;  %v868_v37 = vld [vmem:[%s19893_s1 + $0x1968] sm:$0xff]  ;;  %v883_v39 = vld [vmem:[%s19893_s1 + $0x19e0] sm:$0xff] }
 0x185   :  { %9899 = vmatpush3.msra.mxu0 %v769_v41  ;;  %9934 = vmatpush3.msra.mxu1 %v801_v42  ;;  %v835_v40 = vld [vmem:[%s19893_s1 + $0x1860] sm:$0xff]  ;;  %v850_v42 = vld [vmem:[%s19893_s1 + $0x18d8] sm:$0xff] }
 0x186   :  { %9900 = vmatprep.subr.mxu0 %v784_v43  ;;  %9935 = vmatprep.subr.mxu1 %v816_v44  ;;  %v867_v41 = vld [vmem:[%s19893_s1 + $0x1960] sm:$0xff]  ;;  %v882_v43 = vld [vmem:[%s19893_s1 + $0x19d8] sm:$0xff] }
 0x187   :  { %9901 = vmatpush3.msra.mxu0 %v768_v45  ;;  %9936 = vmatpush3.msra.mxu1 %v800_v46  ;;  %v834_v44 = vld [vmem:[%s19893_s1 + $0x1858] sm:$0xff]  ;;  %v849_v46 = vld [vmem:[%s19893_s1 + $0x18d0] sm:$0xff] }
 0x188   :  { %9902 = vmatprep.subr.mxu0 %v783_v47  ;;  %9937 = vmatprep.subr.mxu1 %v815_v48  ;;  %v866_v45 = vld [vmem:[%s19893_s1 + $0x1958] sm:$0xff]  ;;  %v881_v47 = vld [vmem:[%s19893_s1 + $0x19d0] sm:$0xff] }
 0x189   :  { %9903 = vmatpush3.msra.mxu0 %v767_v49  ;;  %9938 = vmatpush3.msra.mxu1 %v799_v50  ;;  %v833_v48 = vld [vmem:[%s19893_s1 + $0x1850] sm:$0xff]  ;;  %v848_v50 = vld [vmem:[%s19893_s1 + $0x18c8] sm:$0xff] }
 0x18a   :  { %9904 = vmatprep.subr.mxu0 %v782_v52  ;;  %9939 = vmatprep.subr.mxu1 %v814_v53  ;;  %v865_v49 = vld [vmem:[%s19893_s1 + $0x1950] sm:$0xff]  ;;  %v880_v52 = vld [vmem:[%s19893_s1 + $0x19c8] sm:$0xff] }
 0x18b   :  { %9905 = vmatpush3.msra.mxu0 %v766_v54  ;;  %9940 = vmatpush3.msra.mxu1 %v798_v55  ;;  %v832_v53 = vld [vmem:[%s19893_s1 + $0x1848] sm:$0xff]  ;;  %v847_v55 = vld [vmem:[%s19893_s1 + $0x18c0] sm:$0xff] }
 0x18c   :  { %9906 = vmatprep.subr.mxu0 %v781_v56  ;;  %9941 = vmatprep.subr.mxu1 %v813_v57  ;;  %v864_v54 = vld [vmem:[%s19893_s1 + $0x1948] sm:$0xff]  ;;  %v879_v56 = vld [vmem:[%s19893_s1 + $0x19c0] sm:$0xff] }
 0x18d   :  { %9907 = vmatpush3.msra.mxu0 %v765_v58  ;;  %9942 = vmatpush3.msra.mxu1 %v797_v59  ;;  %v831_v57 = vld [vmem:[%s19893_s1 + $0x1840] sm:$0xff]  ;;  %v846_v59 = vld [vmem:[%s19893_s1 + $0x18b8] sm:$0xff] }
 0x18e   :  { %9908 = vmatprep.subr.mxu0 %v780_v60  ;;  %9943 = vmatprep.subr.mxu1 %v812_v61  ;;  %v863_v58 = vld [vmem:[%s19893_s1 + $0x1940] sm:$0xff]  ;;  %v878_v60 = vld [vmem:[%s19893_s1 + $0x19b8] sm:$0xff] }
 0x18f   :  { %9909 = vmatpush3.msra.mxu0 %v764_v62  ;;  %9944 = vmatpush3.msra.mxu1 %v796_v63  ;;  %v830_v61 = vld [vmem:[%s19893_s1 + $0x1838] sm:$0xff]  ;;  %v845_v63 = vld [vmem:[%s19893_s1 + $0x18b0] sm:$0xff] }
 0x190   :  { %9910 = vmatprep.subr.mxu0 %v779_v1  ;;  %9945 = vmatprep.subr.mxu1 %v811_v2  ;;  %v862_v62 = vld [vmem:[%s19893_s1 + $0x1938] sm:$0xff]  ;;  %v829_v1 = vld [vmem:[%s19893_s1 + $0x1830] sm:$0xff] }
 0x191   :  { %9911 = vmatpush3.msra.mxu0 %v763_v3  ;;  %9946 = vmatpush3.msra.mxu1 %v795_v4  ;;  %v861_v2 = vld [vmem:[%s19893_s1 + $0x1930] sm:$0xff]  ;;  %v844_v3 = vld [vmem:[%s19893_s1 + $0x18a8] sm:$0xff] }
 0x192   :  { %9912 = vmatprep.subr.mxu0 %v778_v5  ;;  %9947 = vmatprep.subr.mxu1 %v810_v6  ;;  %v876_v4 = vld [vmem:[%s19893_s1 + $0x19a8] sm:$0xff] }
 0x193   :  { %9913 = vmatpush3.msra.mxu0 %v762_v8  ;;  %9948 = vmatpush3.msra.mxu1 %v794_v9  ;;  %v828_v5 = vld [vmem:[%s19893_s1 + $0x1828] sm:$0xff]  ;;  %v843_v8 = vld [vmem:[%s19893_s1 + $0x18a0] sm:$0xff] }
 0x194   :  { %9914 = vmatprep.subr.mxu0 %v777_v10  ;;  %9949 = vmatprep.subr.mxu1 %v809_v11  ;;  %v860_v6 = vld [vmem:[%s19893_s1 + $0x1928] sm:$0xff]  ;;  %v875_v9 = vld [vmem:[%s19893_s1 + $0x19a0] sm:$0xff] }
 0x195   :  { %9915 = vmatpush3.msra.mxu0 %v761_v13  ;;  %9950 = vmatpush3.msra.mxu1 %v793_v14  ;;  %v827_v10 = vld [vmem:[%s19893_s1 + $0x1820] sm:$0xff]  ;;  %v874_v13 = vld [vmem:[%s19893_s1 + $0x1998] sm:$0xff]  ;;  %v2866_v14 = vcombine.high %v27_v7, %v27_v7 }
 0x196   :  { %9916 = vmatprep.subr.mxu0 %v776_v15  ;;  %9951 = vmatprep.subr.mxu1 %v808_v16  ;;  %v859_v11 = vld [vmem:[%s19893_s1 + $0x1920] sm:$0xff]  ;;  %v826_v15 = vld [vmem:[%s19893_s1 + $0x1818] sm:$0xff] }
 0x197   :  { %9917 = vmatpush3.msra.mxu0 %v760_v18  ;;  %9952 = vmatpush3.msra.mxu1 %v792_v19  ;;  %v858_v16 = vld [vmem:[%s19893_s1 + $0x1918] sm:$0xff]  ;;  %v873_v18 = vld [vmem:[%s19893_s1 + $0x1990] sm:$0xff]  ;;  %v2873_v19 = vrot.slane %v27_v7, %v12142_v51 }
 0x198   :  { %9918 = vmatprep.subr.mxu0 %v775_v20  ;;  %9953 = vmatprep.subr.mxu1 %v807_v21  ;;  %v825_v20 = vld [vmem:[%s19893_s1 + $0x1810] sm:$0xff] }
 0x199   :  { %9919 = vmatpush3.msra.mxu0 %v759_v23  ;;  %5106 = vmatprep.mubr.f32.mxu0 %v2864_v22  ;;  %v857_v21 = vld [vmem:[%s19893_s1 + $0x1910] sm:$0xff]  ;;  %v840_v22 = vld [vmem:[%s19893_s1 + $0x1888] sm:$0xff] }
 0x19a   :  { %9954 = vmatpush3.msra.mxu1 %v791_v24  ;;  %5107 = vmatmul.mubr.f32.vlgmr.msra.gmra.mxu0 %v2856_v12  ;;  %v842_v12 = vld [vmem:[%s19893_s1 + $0x1898] sm:$0xff]  ;;  %v872_v23 = vld [vmem:[%s19893_s1 + $0x1988] sm:$0xff]  ;;  %v2880_v24 = vrot.slane %v2866_v14, %v12142_v51  ;;  %v941_v7 = vld [vmem:[%s19893_s1 + $0x1bb0] sm:$0xff] }
 0x19b   :  { %5176 = vmatprep.mubr.f32.mxu1 %v2865_v25  ;;  %9958 = vmatprep.subr.mxu0 %v854_v26  ;;  %v824_v25 = vld [vmem:[%s19893_s1 + $0x1808] sm:$0xff] }
 0x19c   :  { %9993 = vmatprep.subr.mxu1 %v886_v27  ;;  %5177 = vmatmul.mubr.f32.vlgmr.msra.gmra.mxu1 %v2863_v17  ;;  %v841_v17 = vld [vmem:[%s19893_s1 + $0x1890] sm:$0xff]  ;;  %v856_v26 = vld [vmem:[%s19893_s1 + $0x1908] sm:$0xff]  ;;  %v839_v27 = vld [vmem:[%s19893_s1 + $0x1880] sm:$0xff] }
 0x19d   :  { %9959 = vmatpush3.msra.mxu0 %v838_v28  ;;  %9994 = vmatpush3.msra.mxu1 %v870_v29  ;;  %v871_v28 = vld [vmem:[%s19893_s1 + $0x1980] sm:$0xff]  ;;  %v2881_v29 = vcombine.high %v2873_v19, %v2873_v19  ;;  %v28_v14 = vld [vmem:[%s19892_s0 + $0x68] sm:$0xff] }
 0x19e   :  { %9960 = vmatprep.subr.mxu0 %v853_v30  ;;  %9995 = vmatprep.subr.mxu1 %v885_v31  ;;  %v823_v30 = vld [vmem:[%s19893_s1 + $0x1800] sm:$0xff] }
 0x19f   :  { %9961 = vmatpush3.msra.mxu0 %v837_v32  ;;  %9996 = vmatpush3.msra.mxu1 %v869_v33  ;;  %v855_v31 = vld [vmem:[%s19893_s1 + $0x1900] sm:$0xff]  ;;  %v2882_v32 = vcombine.high %v2880_v24, %v2880_v24  ;;  %v918_v33 = vld [vmem:[%s19893_s1 + $0x1af8] sm:$0xff] }
 0x1a0   :  { %9962 = vmatprep.subr.mxu0 %v852_v34  ;;  %9997 = vmatprep.subr.mxu1 %v884_v35  ;;  %v950_v34 = vld [vmem:[%s19893_s1 + $0x1bf8] sm:$0xff] }
 0x1a1   :  { %9963 = vmatpush3.msra.mxu0 %v836_v36  ;;  %9998 = vmatpush3.msra.mxu1 %v868_v37  ;;  %v902_v35 = vld [vmem:[%s19893_s1 + $0x1a78] sm:$0xff]  ;;  %v917_v37 = vld [vmem:[%s19893_s1 + $0x1af0] sm:$0xff] }
 0x1a2   :  { %9964 = vmatprep.subr.mxu0 %v851_v38  ;;  %9999 = vmatprep.subr.mxu1 %v883_v39  ;;  %v934_v36 = vld [vmem:[%s19893_s1 + $0x1b78] sm:$0xff]  ;;  %v949_v38 = vld [vmem:[%s19893_s1 + $0x1bf0] sm:$0xff] }
 0x1a3   :  { %9965 = vmatpush3.msra.mxu0 %v835_v40  ;;  %10000 = vmatpush3.msra.mxu1 %v867_v41  ;;  %v901_v39 = vld [vmem:[%s19893_s1 + $0x1a70] sm:$0xff]  ;;  %v916_v41 = vld [vmem:[%s19893_s1 + $0x1ae8] sm:$0xff] }
 0x1a4   :  { %9966 = vmatprep.subr.mxu0 %v850_v42  ;;  %10001 = vmatprep.subr.mxu1 %v882_v43  ;;  %v933_v40 = vld [vmem:[%s19893_s1 + $0x1b70] sm:$0xff]  ;;  %v948_v42 = vld [vmem:[%s19893_s1 + $0x1be8] sm:$0xff] }
 0x1a5   :  { %9967 = vmatpush3.msra.mxu0 %v834_v44  ;;  %10002 = vmatpush3.msra.mxu1 %v866_v45  ;;  %v900_v43 = vld [vmem:[%s19893_s1 + $0x1a68] sm:$0xff]  ;;  %v915_v45 = vld [vmem:[%s19893_s1 + $0x1ae0] sm:$0xff] }
 0x1a6   :  { %9968 = vmatprep.subr.mxu0 %v849_v46  ;;  %10003 = vmatprep.subr.mxu1 %v881_v47  ;;  %v932_v44 = vld [vmem:[%s19893_s1 + $0x1b68] sm:$0xff]  ;;  %v947_v46 = vld [vmem:[%s19893_s1 + $0x1be0] sm:$0xff] }
 0x1a7   :  { %9969 = vmatpush3.msra.mxu0 %v833_v48  ;;  %10004 = vmatpush3.msra.mxu1 %v865_v49  ;;  %v899_v47 = vld [vmem:[%s19893_s1 + $0x1a60] sm:$0xff]  ;;  %v914_v49 = vld [vmem:[%s19893_s1 + $0x1ad8] sm:$0xff] }
 0x1a8   :  { %9970 = vmatprep.subr.mxu0 %v848_v50  ;;  %10005 = vmatprep.subr.mxu1 %v880_v52  ;;  %v931_v48 = vld [vmem:[%s19893_s1 + $0x1b60] sm:$0xff]  ;;  %v946_v50 = vld [vmem:[%s19893_s1 + $0x1bd8] sm:$0xff] }
 0x1a9   :  { %9971 = vmatpush3.msra.mxu0 %v832_v53  ;;  %10006 = vmatpush3.msra.mxu1 %v864_v54  ;;  %v898_v52 = vld [vmem:[%s19893_s1 + $0x1a58] sm:$0xff]  ;;  %v913_v54 = vld [vmem:[%s19893_s1 + $0x1ad0] sm:$0xff] }
 0x1aa   :  { %9972 = vmatprep.subr.mxu0 %v847_v55  ;;  %10007 = vmatprep.subr.mxu1 %v879_v56  ;;  %v930_v53 = vld [vmem:[%s19893_s1 + $0x1b58] sm:$0xff]  ;;  %v945_v55 = vld [vmem:[%s19893_s1 + $0x1bd0] sm:$0xff] }
 0x1ab   :  { %9973 = vmatpush3.msra.mxu0 %v831_v57  ;;  %10008 = vmatpush3.msra.mxu1 %v863_v58  ;;  %v897_v56 = vld [vmem:[%s19893_s1 + $0x1a50] sm:$0xff]  ;;  %v912_v58 = vld [vmem:[%s19893_s1 + $0x1ac8] sm:$0xff] }
 0x1ac   :  { %9974 = vmatprep.subr.mxu0 %v846_v59  ;;  %10009 = vmatprep.subr.mxu1 %v878_v60  ;;  %v929_v57 = vld [vmem:[%s19893_s1 + $0x1b50] sm:$0xff]  ;;  %v944_v59 = vld [vmem:[%s19893_s1 + $0x1bc8] sm:$0xff] }
 0x1ad   :  { %9975 = vmatpush3.msra.mxu0 %v830_v61  ;;  %10010 = vmatpush3.msra.mxu1 %v862_v62  ;;  %v896_v60 = vld [vmem:[%s19893_s1 + $0x1a48] sm:$0xff]  ;;  %v911_v62 = vld [vmem:[%s19893_s1 + $0x1ac0] sm:$0xff] }
 0x1ae   :  { %9976 = vmatprep.subr.mxu0 %v845_v63  ;;  %10011 = vmatprep.subr.mxu1 %v877_v0  ;;  %v928_v61 = vld [vmem:[%s19893_s1 + $0x1b48] sm:$0xff]  ;;  %v943_v63 = vld [vmem:[%s19893_s1 + $0x1bc0] sm:$0xff] }
 0x1af   :  { %9977 = vmatpush3.msra.mxu0 %v829_v1  ;;  %10012 = vmatpush3.msra.mxu1 %v861_v2  ;;  %v895_v0 = vld [vmem:[%s19893_s1 + $0x1a40] sm:$0xff]  ;;  %v910_v2 = vld [vmem:[%s19893_s1 + $0x1ab8] sm:$0xff] }
 0x1b0   :  { %9978 = vmatprep.subr.mxu0 %v844_v3  ;;  %10013 = vmatprep.subr.mxu1 %v876_v4  ;;  %v927_v1 = vld [vmem:[%s19893_s1 + $0x1b40] sm:$0xff]  ;;  %v942_v3 = vld [vmem:[%s19893_s1 + $0x1bb8] sm:$0xff] }
 0x1b1   :  { %9979 = vmatpush3.msra.mxu0 %v828_v5  ;;  %10014 = vmatpush3.msra.mxu1 %v860_v6  ;;  %v894_v4 = vld [vmem:[%s19893_s1 + $0x1a38] sm:$0xff]  ;;  %v909_v6 = vld [vmem:[%s19893_s1 + $0x1ab0] sm:$0xff] }
 0x1b2   :  { %9980 = vmatprep.subr.mxu0 %v843_v8  ;;  %10015 = vmatprep.subr.mxu1 %v875_v9  ;;  %v926_v5 = vld [vmem:[%s19893_s1 + $0x1b38] sm:$0xff]  ;;  %v893_v8 = vld [vmem:[%s19893_s1 + $0x1a30] sm:$0xff] }
 0x1b3   :  { %9981 = vmatpush3.msra.mxu0 %v827_v10  ;;  %10016 = vmatpush3.msra.mxu1 %v859_v11  ;;  %v925_v9 = vld [vmem:[%s19893_s1 + $0x1b30] sm:$0xff]  ;;  %v908_v10 = vld [vmem:[%s19893_s1 + $0x1aa8] sm:$0xff] }
 0x1b4   :  { %9982 = vmatprep.subr.mxu0 %v842_v12  ;;  %10017 = vmatprep.subr.mxu1 %v874_v13  ;;  %v940_v11 = vld [vmem:[%s19893_s1 + $0x1ba8] sm:$0xff] }
 0x1b5   :  { %9983 = vmatpush3.msra.mxu0 %v826_v15  ;;  %10018 = vmatpush3.msra.mxu1 %v858_v16  ;;  %v892_v12 = vld [vmem:[%s19893_s1 + $0x1a28] sm:$0xff]  ;;  %v907_v15 = vld [vmem:[%s19893_s1 + $0x1aa0] sm:$0xff] }
 0x1b6   :  { %9984 = vmatprep.subr.mxu0 %v841_v17  ;;  %10019 = vmatprep.subr.mxu1 %v873_v18  ;;  %v924_v13 = vld [vmem:[%s19893_s1 + $0x1b28] sm:$0xff]  ;;  %v939_v16 = vld [vmem:[%s19893_s1 + $0x1ba0] sm:$0xff] }
 0x1b7   :  { %9985 = vmatpush3.msra.mxu0 %v825_v20  ;;  %10020 = vmatpush3.msra.mxu1 %v857_v21  ;;  %v891_v17 = vld [vmem:[%s19893_s1 + $0x1a20] sm:$0xff]  ;;  %v938_v20 = vld [vmem:[%s19893_s1 + $0x1b98] sm:$0xff]  ;;  %v2883_v21 = vcombine.high %v28_v14, %v28_v14 }
 0x1b8   :  { %9986 = vmatprep.subr.mxu0 %v840_v22  ;;  %10021 = vmatprep.subr.mxu1 %v872_v23  ;;  %v923_v18 = vld [vmem:[%s19893_s1 + $0x1b20] sm:$0xff]  ;;  %v890_v22 = vld [vmem:[%s19893_s1 + $0x1a18] sm:$0xff] }
 0x1b9   :  { %9987 = vmatpush3.msra.mxu0 %v824_v25  ;;  %10022 = vmatpush3.msra.mxu1 %v856_v26  ;;  %v922_v23 = vld [vmem:[%s19893_s1 + $0x1b18] sm:$0xff]  ;;  %v937_v25 = vld [vmem:[%s19893_s1 + $0x1b90] sm:$0xff]  ;;  %v2890_v26 = vrot.slane %v28_v14, %v12142_v51 }
 0x1ba   :  { %9988 = vmatprep.subr.mxu0 %v839_v27  ;;  %10023 = vmatprep.subr.mxu1 %v871_v28  ;;  %v889_v27 = vld [vmem:[%s19893_s1 + $0x1a10] sm:$0xff] }
 0x1bb   :  { %9989 = vmatpush3.msra.mxu0 %v823_v30  ;;  %5246 = vmatprep.mubr.f32.mxu0 %v2881_v29  ;;  %v921_v28 = vld [vmem:[%s19893_s1 + $0x1b10] sm:$0xff]  ;;  %v904_v29 = vld [vmem:[%s19893_s1 + $0x1a88] sm:$0xff] }
 0x1bc   :  { %10024 = vmatpush3.msra.mxu1 %v855_v31  ;;  %5247 = vmatmul.mubr.f32.vlgmr.msra.gmra.mxu0 %v2873_v19  ;;  %v906_v19 = vld [vmem:[%s19893_s1 + $0x1a98] sm:$0xff]  ;;  %v936_v30 = vld [vmem:[%s19893_s1 + $0x1b88] sm:$0xff]  ;;  %v2897_v31 = vrot.slane %v2883_v21, %v12142_v51  ;;  %v1005_v14 = vld [vmem:[%s19893_s1 + $0x1db0] sm:$0xff] }
 0x1bd   :  { %5316 = vmatprep.mubr.f32.mxu1 %v2882_v32  ;;  %10028 = vmatprep.subr.mxu0 %v918_v33  ;;  %v888_v32 = vld [vmem:[%s19893_s1 + $0x1a08] sm:$0xff]  ;;  %v29_v21 = vld [vmem:[%s19892_s0 + $0x70] sm:$0xff] }
 0x1be   :  { %10063 = vmatprep.subr.mxu1 %v950_v34  ;;  %5317 = vmatmul.mubr.f32.vlgmr.msra.gmra.mxu1 %v2880_v24  ;;  %v905_v24 = vld [vmem:[%s19893_s1 + $0x1a90] sm:$0xff]  ;;  %v920_v33 = vld [vmem:[%s19893_s1 + $0x1b08] sm:$0xff]  ;;  %v903_v34 = vld [vmem:[%s19893_s1 + $0x1a80] sm:$0xff] }
 0x1bf   :  { %10029 = vmatpush3.msra.mxu0 %v902_v35  ;;  %10064 = vmatpush3.msra.mxu1 %v934_v36  ;;  %v935_v35 = vld [vmem:[%s19893_s1 + $0x1b80] sm:$0xff]  ;;  %v2898_v36 = vcombine.high %v2890_v26, %v2890_v26 }
 0x1c0   :  { %10030 = vmatprep.subr.mxu0 %v917_v37  ;;  %10065 = vmatprep.subr.mxu1 %v949_v38  ;;  %v887_v37 = vld [vmem:[%s19893_s1 + $0x1a00] sm:$0xff] }
 0x1c1   :  { %10031 = vmatpush3.msra.mxu0 %v901_v39  ;;  %10066 = vmatpush3.msra.mxu1 %v933_v40  ;;  %v919_v38 = vld [vmem:[%s19893_s1 + $0x1b00] sm:$0xff]  ;;  %v2899_v39 = vcombine.high %v2897_v31, %v2897_v31  ;;  %v982_v40 = vld [vmem:[%s19893_s1 + $0x1cf8] sm:$0xff] }
 0x1c2   :  { %10032 = vmatprep.subr.mxu0 %v916_v41  ;;  %10067 = vmatprep.subr.mxu1 %v948_v42  ;;  %v1014_v41 = vld [vmem:[%s19893_s1 + $0x1df8] sm:$0xff] }
 0x1c3   :  { %10033 = vmatpush3.msra.mxu0 %v900_v43  ;;  %10068 = vmatpush3.msra.mxu1 %v932_v44  ;;  %v966_v42 = vld [vmem:[%s19893_s1 + $0x1c78] sm:$0xff]  ;;  %v981_v44 = vld [vmem:[%s19893_s1 + $0x1cf0] sm:$0xff] }
 0x1c4   :  { %10034 = vmatprep.subr.mxu0 %v915_v45  ;;  %10069 = vmatprep.subr.mxu1 %v947_v46  ;;  %v998_v43 = vld [vmem:[%s19893_s1 + $0x1d78] sm:$0xff]  ;;  %v1013_v45 = vld [vmem:[%s19893_s1 + $0x1df0] sm:$0xff] }
 0x1c5   :  { %10035 = vmatpush3.msra.mxu0 %v899_v47  ;;  %10070 = vmatpush3.msra.mxu1 %v931_v48  ;;  %v965_v46 = vld [vmem:[%s19893_s1 + $0x1c70] sm:$0xff]  ;;  %v980_v48 = vld [vmem:[%s19893_s1 + $0x1ce8] sm:$0xff] }
 0x1c6   :  { %10036 = vmatprep.subr.mxu0 %v914_v49  ;;  %10071 = vmatprep.subr.mxu1 %v946_v50  ;;  %v997_v47 = vld [vmem:[%s19893_s1 + $0x1d70] sm:$0xff]  ;;  %v1012_v49 = vld [vmem:[%s19893_s1 + $0x1de8] sm:$0xff] }
 0x1c7   :  { %10037 = vmatpush3.msra.mxu0 %v898_v52  ;;  %10072 = vmatpush3.msra.mxu1 %v930_v53  ;;  %v964_v50 = vld [vmem:[%s19893_s1 + $0x1c68] sm:$0xff]  ;;  %v979_v53 = vld [vmem:[%s19893_s1 + $0x1ce0] sm:$0xff] }
 0x1c8   :  { %10038 = vmatprep.subr.mxu0 %v913_v54  ;;  %10073 = vmatprep.subr.mxu1 %v945_v55  ;;  %v996_v52 = vld [vmem:[%s19893_s1 + $0x1d68] sm:$0xff]  ;;  %v1011_v54 = vld [vmem:[%s19893_s1 + $0x1de0] sm:$0xff] }
 0x1c9   :  { %10039 = vmatpush3.msra.mxu0 %v897_v56  ;;  %10074 = vmatpush3.msra.mxu1 %v929_v57  ;;  %v963_v55 = vld [vmem:[%s19893_s1 + $0x1c60] sm:$0xff]  ;;  %v978_v57 = vld [vmem:[%s19893_s1 + $0x1cd8] sm:$0xff] }
 0x1ca   :  { %10040 = vmatprep.subr.mxu0 %v912_v58  ;;  %10075 = vmatprep.subr.mxu1 %v944_v59  ;;  %v995_v56 = vld [vmem:[%s19893_s1 + $0x1d60] sm:$0xff]  ;;  %v1010_v58 = vld [vmem:[%s19893_s1 + $0x1dd8] sm:$0xff] }
 0x1cb   :  { %10041 = vmatpush3.msra.mxu0 %v896_v60  ;;  %10076 = vmatpush3.msra.mxu1 %v928_v61  ;;  %v962_v59 = vld [vmem:[%s19893_s1 + $0x1c58] sm:$0xff]  ;;  %v977_v61 = vld [vmem:[%s19893_s1 + $0x1cd0] sm:$0xff] }
 0x1cc   :  { %10042 = vmatprep.subr.mxu0 %v911_v62  ;;  %10077 = vmatprep.subr.mxu1 %v943_v63  ;;  %v994_v60 = vld [vmem:[%s19893_s1 + $0x1d58] sm:$0xff]  ;;  %v1009_v62 = vld [vmem:[%s19893_s1 + $0x1dd0] sm:$0xff] }
 0x1cd   :  { %10043 = vmatpush3.msra.mxu0 %v895_v0  ;;  %10078 = vmatpush3.msra.mxu1 %v927_v1  ;;  %v961_v63 = vld [vmem:[%s19893_s1 + $0x1c50] sm:$0xff]  ;;  %v976_v1 = vld [vmem:[%s19893_s1 + $0x1cc8] sm:$0xff] }
 0x1ce   :  { %10044 = vmatprep.subr.mxu0 %v910_v2  ;;  %10079 = vmatprep.subr.mxu1 %v942_v3  ;;  %v993_v0 = vld [vmem:[%s19893_s1 + $0x1d50] sm:$0xff]  ;;  %v1008_v2 = vld [vmem:[%s19893_s1 + $0x1dc8] sm:$0xff] }
 0x1cf   :  { %10045 = vmatpush3.msra.mxu0 %v894_v4  ;;  %10080 = vmatpush3.msra.mxu1 %v926_v5  ;;  %v960_v3 = vld [vmem:[%s19893_s1 + $0x1c48] sm:$0xff]  ;;  %v975_v5 = vld [vmem:[%s19893_s1 + $0x1cc0] sm:$0xff] }
 0x1d0   :  { %10046 = vmatprep.subr.mxu0 %v909_v6  ;;  %10081 = vmatprep.subr.mxu1 %v941_v7  ;;  %v992_v4 = vld [vmem:[%s19893_s1 + $0x1d48] sm:$0xff]  ;;  %v1007_v6 = vld [vmem:[%s19893_s1 + $0x1dc0] sm:$0xff] }
 0x1d1   :  { %10047 = vmatpush3.msra.mxu0 %v893_v8  ;;  %10082 = vmatpush3.msra.mxu1 %v925_v9  ;;  %v959_v7 = vld [vmem:[%s19893_s1 + $0x1c40] sm:$0xff]  ;;  %v974_v9 = vld [vmem:[%s19893_s1 + $0x1cb8] sm:$0xff] }
 0x1d2   :  { %10048 = vmatprep.subr.mxu0 %v908_v10  ;;  %10083 = vmatprep.subr.mxu1 %v940_v11  ;;  %v991_v8 = vld [vmem:[%s19893_s1 + $0x1d40] sm:$0xff]  ;;  %v1006_v10 = vld [vmem:[%s19893_s1 + $0x1db8] sm:$0xff] }
 0x1d3   :  { %10049 = vmatpush3.msra.mxu0 %v892_v12  ;;  %10084 = vmatpush3.msra.mxu1 %v924_v13  ;;  %v958_v11 = vld [vmem:[%s19893_s1 + $0x1c38] sm:$0xff]  ;;  %v973_v13 = vld [vmem:[%s19893_s1 + $0x1cb0] sm:$0xff] }
 0x1d4   :  { %10050 = vmatprep.subr.mxu0 %v907_v15  ;;  %10085 = vmatprep.subr.mxu1 %v939_v16  ;;  %v990_v12 = vld [vmem:[%s19893_s1 + $0x1d38] sm:$0xff]  ;;  %v957_v15 = vld [vmem:[%s19893_s1 + $0x1c30] sm:$0xff] }
 0x1d5   :  { %10051 = vmatpush3.msra.mxu0 %v891_v17  ;;  %10086 = vmatpush3.msra.mxu1 %v923_v18  ;;  %v989_v16 = vld [vmem:[%s19893_s1 + $0x1d30] sm:$0xff]  ;;  %v972_v17 = vld [vmem:[%s19893_s1 + $0x1ca8] sm:$0xff] }
 0x1d6   :  { %10052 = vmatprep.subr.mxu0 %v906_v19  ;;  %10087 = vmatprep.subr.mxu1 %v938_v20  ;;  %v1004_v18 = vld [vmem:[%s19893_s1 + $0x1da8] sm:$0xff] }
 0x1d7   :  { %10053 = vmatpush3.msra.mxu0 %v890_v22  ;;  %10088 = vmatpush3.msra.mxu1 %v922_v23  ;;  %v956_v19 = vld [vmem:[%s19893_s1 + $0x1c28] sm:$0xff]  ;;  %v971_v22 = vld [vmem:[%s19893_s1 + $0x1ca0] sm:$0xff] }
 0x1d8   :  { %10054 = vmatprep.subr.mxu0 %v905_v24  ;;  %10089 = vmatprep.subr.mxu1 %v937_v25  ;;  %v988_v20 = vld [vmem:[%s19893_s1 + $0x1d28] sm:$0xff]  ;;  %v1003_v23 = vld [vmem:[%s19893_s1 + $0x1da0] sm:$0xff] }
 0x1d9   :  { %10055 = vmatpush3.msra.mxu0 %v889_v27  ;;  %10090 = vmatpush3.msra.mxu1 %v921_v28  ;;  %v955_v24 = vld [vmem:[%s19893_s1 + $0x1c20] sm:$0xff]  ;;  %v1002_v27 = vld [vmem:[%s19893_s1 + $0x1d98] sm:$0xff]  ;;  %v2900_v28 = vcombine.high %v29_v21, %v29_v21 }
 0x1da   :  { %10056 = vmatprep.subr.mxu0 %v904_v29  ;;  %10091 = vmatprep.subr.mxu1 %v936_v30  ;;  %v987_v25 = vld [vmem:[%s19893_s1 + $0x1d20] sm:$0xff]  ;;  %v954_v29 = vld [vmem:[%s19893_s1 + $0x1c18] sm:$0xff] }
 0x1db   :  { %10057 = vmatpush3.msra.mxu0 %v888_v32  ;;  %10092 = vmatpush3.msra.mxu1 %v920_v33  ;;  %v986_v30 = vld [vmem:[%s19893_s1 + $0x1d18] sm:$0xff]  ;;  %v1001_v32 = vld [vmem:[%s19893_s1 + $0x1d90] sm:$0xff]  ;;  %v2907_v33 = vrot.slane %v29_v21, %v12142_v51 }
 0x1dc   :  { %10058 = vmatprep.subr.mxu0 %v903_v34  ;;  %10093 = vmatprep.subr.mxu1 %v935_v35  ;;  %v953_v34 = vld [vmem:[%s19893_s1 + $0x1c10] sm:$0xff] }
 0x1dd   :  { %10059 = vmatpush3.msra.mxu0 %v887_v37  ;;  %5386 = vmatprep.mubr.f32.mxu0 %v2898_v36  ;;  %v985_v35 = vld [vmem:[%s19893_s1 + $0x1d10] sm:$0xff]  ;;  %v968_v36 = vld [vmem:[%s19893_s1 + $0x1c88] sm:$0xff] }
 0x1de   :  { %10094 = vmatpush3.msra.mxu1 %v919_v38  ;;  %5387 = vmatmul.mubr.f32.vlgmr.msra.gmra.mxu0 %v2890_v26  ;;  %v970_v26 = vld [vmem:[%s19893_s1 + $0x1c98] sm:$0xff]  ;;  %v1000_v37 = vld [vmem:[%s19893_s1 + $0x1d88] sm:$0xff]  ;;  %v2914_v38 = vrot.slane %v2900_v28, %v12142_v51  ;;  %v1069_v21 = vld [vmem:[%s19893_s1 + $0x1fb0] sm:$0xff] }
 0x1df   :  { %5456 = vmatprep.mubr.f32.mxu1 %v2899_v39  ;;  %10098 = vmatprep.subr.mxu0 %v982_v40  ;;  %v952_v39 = vld [vmem:[%s19893_s1 + $0x1c08] sm:$0xff]  ;;  %v30_v28 = vld [vmem:[%s19892_s0 + $0x78] sm:$0xff] }
 0x1e0   :  { %10133 = vmatprep.subr.mxu1 %v1014_v41  ;;  %5457 = vmatmul.mubr.f32.vlgmr.msra.gmra.mxu1 %v2897_v31  ;;  %v969_v31 = vld [vmem:[%s19893_s1 + $0x1c90] sm:$0xff]  ;;  %v984_v40 = vld [vmem:[%s19893_s1 + $0x1d08] sm:$0xff]  ;;  %v967_v41 = vld [vmem:[%s19893_s1 + $0x1c80] sm:$0xff] }
 0x1e1   :  { %10099 = vmatpush3.msra.mxu0 %v966_v42  ;;  %10134 = vmatpush3.msra.mxu1 %v998_v43  ;;  %v999_v42 = vld [vmem:[%s19893_s1 + $0x1d80] sm:$0xff]  ;;  %v2915_v43 = vcombine.high %v2907_v33, %v2907_v33 }
 0x1e2   :  { %10100 = vmatprep.subr.mxu0 %v981_v44  ;;  %10135 = vmatprep.subr.mxu1 %v1013_v45  ;;  %v951_v44 = vld [vmem:[%s19893_s1 + $0x1c00] sm:$0xff] }
 0x1e3   :  { %10101 = vmatpush3.msra.mxu0 %v965_v46  ;;  %10136 = vmatpush3.msra.mxu1 %v997_v47  ;;  %v983_v45 = vld [vmem:[%s19893_s1 + $0x1d00] sm:$0xff]  ;;  %v2916_v46 = vcombine.high %v2914_v38, %v2914_v38  ;;  %v1046_v47 = vld [vmem:[%s19893_s1 + $0x1ef8] sm:$0xff] }
 0x1e4   :  { %10102 = vmatprep.subr.mxu0 %v980_v48  ;;  %10137 = vmatprep.subr.mxu1 %v1012_v49  ;;  %v1078_v48 = vld [vmem:[%s19893_s1 + $0x1ff8] sm:$0xff] }
 0x1e5   :  { %10103 = vmatpush3.msra.mxu0 %v964_v50  ;;  %10138 = vmatpush3.msra.mxu1 %v996_v52  ;;  %v1030_v49 = vld [vmem:[%s19893_s1 + $0x1e78] sm:$0xff]  ;;  %v1045_v52 = vld [vmem:[%s19893_s1 + $0x1ef0] sm:$0xff] }
 0x1e6   :  { %10104 = vmatprep.subr.mxu0 %v979_v53  ;;  %10139 = vmatprep.subr.mxu1 %v1011_v54  ;;  %v1062_v50 = vld [vmem:[%s19893_s1 + $0x1f78] sm:$0xff]  ;;  %v1077_v53 = vld [vmem:[%s19893_s1 + $0x1ff0] sm:$0xff] }
 0x1e7   :  { %10105 = vmatpush3.msra.mxu0 %v963_v55  ;;  %10140 = vmatpush3.msra.mxu1 %v995_v56  ;;  %v1029_v54 = vld [vmem:[%s19893_s1 + $0x1e70] sm:$0xff]  ;;  %v1044_v56 = vld [vmem:[%s19893_s1 + $0x1ee8] sm:$0xff] }
 0x1e8   :  { %10106 = vmatprep.subr.mxu0 %v978_v57  ;;  %10141 = vmatprep.subr.mxu1 %v1010_v58  ;;  %v1061_v55 = vld [vmem:[%s19893_s1 + $0x1f70] sm:$0xff]  ;;  %v1076_v57 = vld [vmem:[%s19893_s1 + $0x1fe8] sm:$0xff] }
 0x1e9   :  { %10107 = vmatpush3.msra.mxu0 %v962_v59  ;;  %10142 = vmatpush3.msra.mxu1 %v994_v60  ;;  %v1028_v58 = vld [vmem:[%s19893_s1 + $0x1e68] sm:$0xff]  ;;  %v1043_v60 = vld [vmem:[%s19893_s1 + $0x1ee0] sm:$0xff] }
 0x1ea   :  { %10108 = vmatprep.subr.mxu0 %v977_v61  ;;  %10143 = vmatprep.subr.mxu1 %v1009_v62  ;;  %v1060_v59 = vld [vmem:[%s19893_s1 + $0x1f68] sm:$0xff]  ;;  %v1075_v61 = vld [vmem:[%s19893_s1 + $0x1fe0] sm:$0xff] }
 0x1eb   :  { %10109 = vmatpush3.msra.mxu0 %v961_v63  ;;  %10144 = vmatpush3.msra.mxu1 %v993_v0  ;;  %v1027_v62 = vld [vmem:[%s19893_s1 + $0x1e60] sm:$0xff]  ;;  %v1042_v0 = vld [vmem:[%s19893_s1 + $0x1ed8] sm:$0xff] }
 0x1ec   :  { %10110 = vmatprep.subr.mxu0 %v976_v1  ;;  %10145 = vmatprep.subr.mxu1 %v1008_v2  ;;  %v1059_v63 = vld [vmem:[%s19893_s1 + $0x1f60] sm:$0xff]  ;;  %v1074_v1 = vld [vmem:[%s19893_s1 + $0x1fd8] sm:$0xff] }
 0x1ed   :  { %10111 = vmatpush3.msra.mxu0 %v960_v3  ;;  %10146 = vmatpush3.msra.mxu1 %v992_v4  ;;  %v1026_v2 = vld [vmem:[%s19893_s1 + $0x1e58] sm:$0xff]  ;;  %v1041_v4 = vld [vmem:[%s19893_s1 + $0x1ed0] sm:$0xff] }
 0x1ee   :  { %10112 = vmatprep.subr.mxu0 %v975_v5  ;;  %10147 = vmatprep.subr.mxu1 %v1007_v6  ;;  %v1058_v3 = vld [vmem:[%s19893_s1 + $0x1f58] sm:$0xff]  ;;  %v1073_v5 = vld [vmem:[%s19893_s1 + $0x1fd0] sm:$0xff] }
 0x1ef   :  { %10113 = vmatpush3.msra.mxu0 %v959_v7  ;;  %10148 = vmatpush3.msra.mxu1 %v991_v8  ;;  %v1025_v6 = vld [vmem:[%s19893_s1 + $0x1e50] sm:$0xff]  ;;  %v1040_v8 = vld [vmem:[%s19893_s1 + $0x1ec8] sm:$0xff] }
 0x1f0   :  { %10114 = vmatprep.subr.mxu0 %v974_v9  ;;  %10149 = vmatprep.subr.mxu1 %v1006_v10  ;;  %v1057_v7 = vld [vmem:[%s19893_s1 + $0x1f50] sm:$0xff]  ;;  %v1072_v9 = vld [vmem:[%s19893_s1 + $0x1fc8] sm:$0xff] }
 0x1f1   :  { %10115 = vmatpush3.msra.mxu0 %v958_v11  ;;  %10150 = vmatpush3.msra.mxu1 %v990_v12  ;;  %v1024_v10 = vld [vmem:[%s19893_s1 + $0x1e48] sm:$0xff]  ;;  %v1039_v12 = vld [vmem:[%s19893_s1 + $0x1ec0] sm:$0xff] }
 0x1f2   :  { %10116 = vmatprep.subr.mxu0 %v973_v13  ;;  %10151 = vmatprep.subr.mxu1 %v1005_v14  ;;  %v1056_v11 = vld [vmem:[%s19893_s1 + $0x1f48] sm:$0xff]  ;;  %v1071_v13 = vld [vmem:[%s19893_s1 + $0x1fc0] sm:$0xff] }
 0x1f3   :  { %10117 = vmatpush3.msra.mxu0 %v957_v15  ;;  %10152 = vmatpush3.msra.mxu1 %v989_v16  ;;  %v1023_v14 = vld [vmem:[%s19893_s1 + $0x1e40] sm:$0xff]  ;;  %v1038_v16 = vld [vmem:[%s19893_s1 + $0x1eb8] sm:$0xff] }
 0x1f4   :  { %10118 = vmatprep.subr.mxu0 %v972_v17  ;;  %10153 = vmatprep.subr.mxu1 %v1004_v18  ;;  %v1055_v15 = vld [vmem:[%s19893_s1 + $0x1f40] sm:$0xff]  ;;  %v1070_v17 = vld [vmem:[%s19893_s1 + $0x1fb8] sm:$0xff] }
 0x1f5   :  { %10119 = vmatpush3.msra.mxu0 %v956_v19  ;;  %10154 = vmatpush3.msra.mxu1 %v988_v20  ;;  %v1022_v18 = vld [vmem:[%s19893_s1 + $0x1e38] sm:$0xff]  ;;  %v1037_v20 = vld [vmem:[%s19893_s1 + $0x1eb0] sm:$0xff] }
 0x1f6   :  { %10120 = vmatprep.subr.mxu0 %v971_v22  ;;  %10155 = vmatprep.subr.mxu1 %v1003_v23  ;;  %v1054_v19 = vld [vmem:[%s19893_s1 + $0x1f38] sm:$0xff]  ;;  %v1021_v22 = vld [vmem:[%s19893_s1 + $0x1e30] sm:$0xff] }
 0x1f7   :  { %10121 = vmatpush3.msra.mxu0 %v955_v24  ;;  %10156 = vmatpush3.msra.mxu1 %v987_v25  ;;  %v1053_v23 = vld [vmem:[%s19893_s1 + $0x1f30] sm:$0xff]  ;;  %v1036_v24 = vld [vmem:[%s19893_s1 + $0x1ea8] sm:$0xff] }
 0x1f8   :  { %10122 = vmatprep.subr.mxu0 %v970_v26  ;;  %10157 = vmatprep.subr.mxu1 %v1002_v27  ;;  %v1068_v25 = vld [vmem:[%s19893_s1 + $0x1fa8] sm:$0xff] }
 0x1f9   :  { %10123 = vmatpush3.msra.mxu0 %v954_v29  ;;  %10158 = vmatpush3.msra.mxu1 %v986_v30  ;;  %v1020_v26 = vld [vmem:[%s19893_s1 + $0x1e28] sm:$0xff]  ;;  %v1035_v29 = vld [vmem:[%s19893_s1 + $0x1ea0] sm:$0xff] }
 0x1fa   :  { %10124 = vmatprep.subr.mxu0 %v969_v31  ;;  %10159 = vmatprep.subr.mxu1 %v1001_v32  ;;  %v1052_v27 = vld [vmem:[%s19893_s1 + $0x1f28] sm:$0xff]  ;;  %v1067_v30 = vld [vmem:[%s19893_s1 + $0x1fa0] sm:$0xff] }
 0x1fb   :  { %10125 = vmatpush3.msra.mxu0 %v953_v34  ;;  %10160 = vmatpush3.msra.mxu1 %v985_v35  ;;  %v1019_v31 = vld [vmem:[%s19893_s1 + $0x1e20] sm:$0xff]  ;;  %v1066_v34 = vld [vmem:[%s19893_s1 + $0x1f98] sm:$0xff]  ;;  %v2917_v35 = vcombine.high %v30_v28, %v30_v28 }
 0x1fc   :  { %10126 = vmatprep.subr.mxu0 %v968_v36  ;;  %10161 = vmatprep.subr.mxu1 %v1000_v37  ;;  %v1051_v32 = vld [vmem:[%s19893_s1 + $0x1f20] sm:$0xff]  ;;  %v1018_v36 = vld [vmem:[%s19893_s1 + $0x1e18] sm:$0xff] }
 0x1fd   :  { %10127 = vmatpush3.msra.mxu0 %v952_v39  ;;  %10162 = vmatpush3.msra.mxu1 %v984_v40  ;;  %v1050_v37 = vld [vmem:[%s19893_s1 + $0x1f18] sm:$0xff]  ;;  %v1065_v39 = vld [vmem:[%s19893_s1 + $0x1f90] sm:$0xff]  ;;  %v2924_v40 = vrot.slane %v30_v28, %v12142_v51 }
 0x1fe   :  { %10128 = vmatprep.subr.mxu0 %v967_v41  ;;  %10163 = vmatprep.subr.mxu1 %v999_v42  ;;  %v1017_v41 = vld [vmem:[%s19893_s1 + $0x1e10] sm:$0xff] }
 0x1ff   :  { %10129 = vmatpush3.msra.mxu0 %v951_v44  ;;  %5526 = vmatprep.mubr.f32.mxu0 %v2915_v43  ;;  %v1049_v42 = vld [vmem:[%s19893_s1 + $0x1f10] sm:$0xff]  ;;  %v1032_v43 = vld [vmem:[%s19893_s1 + $0x1e88] sm:$0xff] }
 0x200   :  { %10164 = vmatpush3.msra.mxu1 %v983_v45  ;;  %5527 = vmatmul.mubr.f32.vlgmr.msra.gmra.mxu0 %v2907_v33  ;;  %v1034_v33 = vld [vmem:[%s19893_s1 + $0x1e98] sm:$0xff]  ;;  %v1064_v44 = vld [vmem:[%s19893_s1 + $0x1f88] sm:$0xff]  ;;  %v2931_v45 = vrot.slane %v2917_v35, %v12142_v51  ;;  %v1133_v28 = vld [vmem:[%s19893_s1 + $0x21b0] sm:$0xff] }
 0x201   :  { %5596 = vmatprep.mubr.f32.mxu1 %v2916_v46  ;;  %10168 = vmatprep.subr.mxu0 %v1046_v47  ;;  %v1016_v46 = vld [vmem:[%s19893_s1 + $0x1e08] sm:$0xff]  ;;  %v31_v35 = vld [vmem:[%s19892_s0 + $0x80] sm:$0xff] }
 0x202   :  { %10203 = vmatprep.subr.mxu1 %v1078_v48  ;;  %5597 = vmatmul.mubr.f32.vlgmr.msra.gmra.mxu1 %v2914_v38  ;;  %v1033_v38 = vld [vmem:[%s19893_s1 + $0x1e90] sm:$0xff]  ;;  %v1048_v47 = vld [vmem:[%s19893_s1 + $0x1f08] sm:$0xff]  ;;  %v1031_v48 = vld [vmem:[%s19893_s1 + $0x1e80] sm:$0xff] }
 0x203   :  { %10169 = vmatpush3.msra.mxu0 %v1030_v49  ;;  %10204 = vmatpush3.msra.mxu1 %v1062_v50  ;;  %v1063_v49 = vld [vmem:[%s19893_s1 + $0x1f80] sm:$0xff]  ;;  %v2932_v50 = vcombine.high %v2924_v40, %v2924_v40 }
 0x204   :  { %10170 = vmatprep.subr.mxu0 %v1045_v52  ;;  %10205 = vmatprep.subr.mxu1 %v1077_v53  ;;  %v1015_v52 = vld [vmem:[%s19893_s1 + $0x1e00] sm:$0xff] }
 0x205   :  { %10171 = vmatpush3.msra.mxu0 %v1029_v54  ;;  %10206 = vmatpush3.msra.mxu1 %v1061_v55  ;;  %v1047_v53 = vld [vmem:[%s19893_s1 + $0x1f00] sm:$0xff]  ;;  %v2933_v54 = vcombine.high %v2931_v45, %v2931_v45  ;;  %v1110_v55 = vld [vmem:[%s19893_s1 + $0x20f8] sm:$0xff] }
 0x206   :  { %10172 = vmatprep.subr.mxu0 %v1044_v56  ;;  %10207 = vmatprep.subr.mxu1 %v1076_v57  ;;  %v1142_v56 = vld [vmem:[%s19893_s1 + $0x21f8] sm:$0xff] }
 0x207   :  { %10173 = vmatpush3.msra.mxu0 %v1028_v58  ;;  %10208 = vmatpush3.msra.mxu1 %v1060_v59  ;;  %v1094_v57 = vld [vmem:[%s19893_s1 + $0x2078] sm:$0xff]  ;;  %v1109_v59 = vld [vmem:[%s19893_s1 + $0x20f0] sm:$0xff] }
 0x208   :  { %10174 = vmatprep.subr.mxu0 %v1043_v60  ;;  %10209 = vmatprep.subr.mxu1 %v1075_v61  ;;  %v1126_v58 = vld [vmem:[%s19893_s1 + $0x2178] sm:$0xff]  ;;  %v1141_v60 = vld [vmem:[%s19893_s1 + $0x21f0] sm:$0xff] }
 0x209   :  { %10175 = vmatpush3.msra.mxu0 %v1027_v62  ;;  %10210 = vmatpush3.msra.mxu1 %v1059_v63  ;;  %v1093_v61 = vld [vmem:[%s19893_s1 + $0x2070] sm:$0xff]  ;;  %v1108_v63 = vld [vmem:[%s19893_s1 + $0x20e8] sm:$0xff] }
 0x20a   :  { %10176 = vmatprep.subr.mxu0 %v1042_v0  ;;  %10211 = vmatprep.subr.mxu1 %v1074_v1  ;;  %v1125_v62 = vld [vmem:[%s19893_s1 + $0x2170] sm:$0xff]  ;;  %v1140_v0 = vld [vmem:[%s19893_s1 + $0x21e8] sm:$0xff] }
 0x20b   :  { %10177 = vmatpush3.msra.mxu0 %v1026_v2  ;;  %10212 = vmatpush3.msra.mxu1 %v1058_v3  ;;  %v1092_v1 = vld [vmem:[%s19893_s1 + $0x2068] sm:$0xff]  ;;  %v1107_v3 = vld [vmem:[%s19893_s1 + $0x20e0] sm:$0xff] }
 0x20c   :  { %10178 = vmatprep.subr.mxu0 %v1041_v4  ;;  %10213 = vmatprep.subr.mxu1 %v1073_v5  ;;  %v1124_v2 = vld [vmem:[%s19893_s1 + $0x2168] sm:$0xff]  ;;  %v1139_v4 = vld [vmem:[%s19893_s1 + $0x21e0] sm:$0xff] }
 0x20d   :  { %10179 = vmatpush3.msra.mxu0 %v1025_v6  ;;  %10214 = vmatpush3.msra.mxu1 %v1057_v7  ;;  %v1091_v5 = vld [vmem:[%s19893_s1 + $0x2060] sm:$0xff]  ;;  %v1106_v7 = vld [vmem:[%s19893_s1 + $0x20d8] sm:$0xff] }
 0x20e   :  { %10180 = vmatprep.subr.mxu0 %v1040_v8  ;;  %10215 = vmatprep.subr.mxu1 %v1072_v9  ;;  %v1123_v6 = vld [vmem:[%s19893_s1 + $0x2160] sm:$0xff]  ;;  %v1138_v8 = vld [vmem:[%s19893_s1 + $0x21d8] sm:$0xff] }
 0x20f   :  { %10181 = vmatpush3.msra.mxu0 %v1024_v10  ;;  %10216 = vmatpush3.msra.mxu1 %v1056_v11  ;;  %v1090_v9 = vld [vmem:[%s19893_s1 + $0x2058] sm:$0xff]  ;;  %v1105_v11 = vld [vmem:[%s19893_s1 + $0x20d0] sm:$0xff] }
 0x210   :  { %10182 = vmatprep.subr.mxu0 %v1039_v12  ;;  %10217 = vmatprep.subr.mxu1 %v1071_v13  ;;  %v1122_v10 = vld [vmem:[%s19893_s1 + $0x2158] sm:$0xff]  ;;  %v1137_v12 = vld [vmem:[%s19893_s1 + $0x21d0] sm:$0xff] }
 0x211   :  { %10183 = vmatpush3.msra.mxu0 %v1023_v14  ;;  %10218 = vmatpush3.msra.mxu1 %v1055_v15  ;;  %v1089_v13 = vld [vmem:[%s19893_s1 + $0x2050] sm:$0xff]  ;;  %v1104_v15 = vld [vmem:[%s19893_s1 + $0x20c8] sm:$0xff] }
 0x212   :  { %10184 = vmatprep.subr.mxu0 %v1038_v16  ;;  %10219 = vmatprep.subr.mxu1 %v1070_v17  ;;  %v1121_v14 = vld [vmem:[%s19893_s1 + $0x2150] sm:$0xff]  ;;  %v1136_v16 = vld [vmem:[%s19893_s1 + $0x21c8] sm:$0xff] }
 0x213   :  { %10185 = vmatpush3.msra.mxu0 %v1022_v18  ;;  %10220 = vmatpush3.msra.mxu1 %v1054_v19  ;;  %v1088_v17 = vld [vmem:[%s19893_s1 + $0x2048] sm:$0xff]  ;;  %v1103_v19 = vld [vmem:[%s19893_s1 + $0x20c0] sm:$0xff] }
 0x214   :  { %10186 = vmatprep.subr.mxu0 %v1037_v20  ;;  %10221 = vmatprep.subr.mxu1 %v1069_v21  ;;  %v1120_v18 = vld [vmem:[%s19893_s1 + $0x2148] sm:$0xff]  ;;  %v1135_v20 = vld [vmem:[%s19893_s1 + $0x21c0] sm:$0xff] }
 0x215   :  { %10187 = vmatpush3.msra.mxu0 %v1021_v22  ;;  %10222 = vmatpush3.msra.mxu1 %v1053_v23  ;;  %v1087_v21 = vld [vmem:[%s19893_s1 + $0x2040] sm:$0xff]  ;;  %v1102_v23 = vld [vmem:[%s19893_s1 + $0x20b8] sm:$0xff] }
 0x216   :  { %10188 = vmatprep.subr.mxu0 %v1036_v24  ;;  %10223 = vmatprep.subr.mxu1 %v1068_v25  ;;  %v1119_v22 = vld [vmem:[%s19893_s1 + $0x2140] sm:$0xff]  ;;  %v1134_v24 = vld [vmem:[%s19893_s1 + $0x21b8] sm:$0xff] }
 0x217   :  { %10189 = vmatpush3.msra.mxu0 %v1020_v26  ;;  %10224 = vmatpush3.msra.mxu1 %v1052_v27  ;;  %v1086_v25 = vld [vmem:[%s19893_s1 + $0x2038] sm:$0xff]  ;;  %v1101_v27 = vld [vmem:[%s19893_s1 + $0x20b0] sm:$0xff] }
 0x218   :  { %10190 = vmatprep.subr.mxu0 %v1035_v29  ;;  %10225 = vmatprep.subr.mxu1 %v1067_v30  ;;  %v1118_v26 = vld [vmem:[%s19893_s1 + $0x2138] sm:$0xff]  ;;  %v1085_v29 = vld [vmem:[%s19893_s1 + $0x2030] sm:$0xff] }
 0x219   :  { %10191 = vmatpush3.msra.mxu0 %v1019_v31  ;;  %10226 = vmatpush3.msra.mxu1 %v1051_v32  ;;  %v1117_v30 = vld [vmem:[%s19893_s1 + $0x2130] sm:$0xff]  ;;  %v1100_v31 = vld [vmem:[%s19893_s1 + $0x20a8] sm:$0xff] }
 0x21a   :  { %10192 = vmatprep.subr.mxu0 %v1034_v33  ;;  %10227 = vmatprep.subr.mxu1 %v1066_v34  ;;  %v1132_v32 = vld [vmem:[%s19893_s1 + $0x21a8] sm:$0xff] }
 0x21b   :  { %10193 = vmatpush3.msra.mxu0 %v1018_v36  ;;  %10228 = vmatpush3.msra.mxu1 %v1050_v37  ;;  %v1084_v33 = vld [vmem:[%s19893_s1 + $0x2028] sm:$0xff]  ;;  %v1099_v36 = vld [vmem:[%s19893_s1 + $0x20a0] sm:$0xff] }
 0x21c   :  { %10194 = vmatprep.subr.mxu0 %v1033_v38  ;;  %10229 = vmatprep.subr.mxu1 %v1065_v39  ;;  %v1116_v34 = vld [vmem:[%s19893_s1 + $0x2128] sm:$0xff]  ;;  %v1131_v37 = vld [vmem:[%s19893_s1 + $0x21a0] sm:$0xff] }
 0x21d   :  { %10195 = vmatpush3.msra.mxu0 %v1017_v41  ;;  %10230 = vmatpush3.msra.mxu1 %v1049_v42  ;;  %v1083_v38 = vld [vmem:[%s19893_s1 + $0x2020] sm:$0xff]  ;;  %v1130_v41 = vld [vmem:[%s19893_s1 + $0x2198] sm:$0xff]  ;;  %v2934_v42 = vcombine.high %v31_v35, %v31_v35 }
 0x21e   :  { %10196 = vmatprep.subr.mxu0 %v1032_v43  ;;  %10231 = vmatprep.subr.mxu1 %v1064_v44  ;;  %v1115_v39 = vld [vmem:[%s19893_s1 + $0x2120] sm:$0xff]  ;;  %v1082_v43 = vld [vmem:[%s19893_s1 + $0x2018] sm:$0xff] }
 0x21f   :  { %10197 = vmatpush3.msra.mxu0 %v1016_v46  ;;  %10232 = vmatpush3.msra.mxu1 %v1048_v47  ;;  %v1114_v44 = vld [vmem:[%s19893_s1 + $0x2118] sm:$0xff]  ;;  %v1129_v46 = vld [vmem:[%s19893_s1 + $0x2190] sm:$0xff]  ;;  %v2941_v47 = vrot.slane %v31_v35, %v12142_v51 }
 0x220   :  { %10198 = vmatprep.subr.mxu0 %v1031_v48  ;;  %10233 = vmatprep.subr.mxu1 %v1063_v49  ;;  %v1081_v48 = vld [vmem:[%s19893_s1 + $0x2010] sm:$0xff] }
 0x221   :  { %10199 = vmatpush3.msra.mxu0 %v1015_v52  ;;  %5666 = vmatprep.mubr.f32.mxu0 %v2932_v50  ;;  %v1113_v49 = vld [vmem:[%s19893_s1 + $0x2110] sm:$0xff]  ;;  %v1096_v50 = vld [vmem:[%s19893_s1 + $0x2088] sm:$0xff] }
 0x222   :  { %10234 = vmatpush3.msra.mxu1 %v1047_v53  ;;  %5667 = vmatmul.mubr.f32.vlgmr.msra.gmra.mxu0 %v2924_v40  ;;  %v1098_v40 = vld [vmem:[%s19893_s1 + $0x2098] sm:$0xff]  ;;  %v1128_v52 = vld [vmem:[%s19893_s1 + $0x2188] sm:$0xff]  ;;  %v2948_v53 = vrot.slane %v2934_v42, %v12142_v51  ;;  %v1197_v35 = vld [vmem:[%s19893_s1 + $0x23b0] sm:$0xff] }
 0x223   :  { %5736 = vmatprep.mubr.f32.mxu1 %v2933_v54  ;;  %10238 = vmatprep.subr.mxu0 %v1110_v55  ;;  %v1080_v54 = vld [vmem:[%s19893_s1 + $0x2008] sm:$0xff] }
 0x224   :  { %10273 = vmatprep.subr.mxu1 %v1142_v56  ;;  %5737 = vmatmul.mubr.f32.vlgmr.msra.gmra.mxu1 %v2931_v45  ;;  %v1097_v45 = vld [vmem:[%s19893_s1 + $0x2090] sm:$0xff]  ;;  %v1112_v55 = vld [vmem:[%s19893_s1 + $0x2108] sm:$0xff]  ;;  %v1095_v56 = vld [vmem:[%s19893_s1 + $0x2080] sm:$0xff] }
 0x225   :  { %10239 = vmatpush3.msra.mxu0 %v1094_v57  ;;  %10274 = vmatpush3.msra.mxu1 %v1126_v58  ;;  %v1127_v57 = vld [vmem:[%s19893_s1 + $0x2180] sm:$0xff]  ;;  %v2949_v58 = vcombine.high %v2941_v47, %v2941_v47  ;;  %v32_v42 = vld [vmem:[%s19892_s0 + $0x88] sm:$0xff] }
 0x226   :  { %10240 = vmatprep.subr.mxu0 %v1109_v59  ;;  %10275 = vmatprep.subr.mxu1 %v1141_v60  ;;  %v1079_v59 = vld [vmem:[%s19893_s1 + $0x2000] sm:$0xff] }
 0x227   :  { %10241 = vmatpush3.msra.mxu0 %v1093_v61  ;;  %10276 = vmatpush3.msra.mxu1 %v1125_v62  ;;  %v1111_v60 = vld [vmem:[%s19893_s1 + $0x2100] sm:$0xff]  ;;  %v2950_v61 = vcombine.high %v2948_v53, %v2948_v53  ;;  %v1174_v62 = vld [vmem:[%s19893_s1 + $0x22f8] sm:$0xff] }
 0x228   :  { %10242 = vmatprep.subr.mxu0 %v1108_v63  ;;  %10277 = vmatprep.subr.mxu1 %v1140_v0  ;;  %v1206_v63 = vld [vmem:[%s19893_s1 + $0x23f8] sm:$0xff] }
 0x229   :  { %10243 = vmatpush3.msra.mxu0 %v1092_v1  ;;  %10278 = vmatpush3.msra.mxu1 %v1124_v2  ;;  %v1158_v0 = vld [vmem:[%s19893_s1 + $0x2278] sm:$0xff]  ;;  %v1173_v2 = vld [vmem:[%s19893_s1 + $0x22f0] sm:$0xff] }
 0x22a   :  { %10244 = vmatprep.subr.mxu0 %v1107_v3  ;;  %10279 = vmatprep.subr.mxu1 %v1139_v4  ;;  %v1190_v1 = vld [vmem:[%s19893_s1 + $0x2378] sm:$0xff]  ;;  %v1205_v3 = vld [vmem:[%s19893_s1 + $0x23f0] sm:$0xff] }
 0x22b   :  { %10245 = vmatpush3.msra.mxu0 %v1091_v5  ;;  %10280 = vmatpush3.msra.mxu1 %v1123_v6  ;;  %v1157_v4 = vld [vmem:[%s19893_s1 + $0x2270] sm:$0xff]  ;;  %v1172_v6 = vld [vmem:[%s19893_s1 + $0x22e8] sm:$0xff] }
 0x22c   :  { %10246 = vmatprep.subr.mxu0 %v1106_v7  ;;  %10281 = vmatprep.subr.mxu1 %v1138_v8  ;;  %v1189_v5 = vld [vmem:[%s19893_s1 + $0x2370] sm:$0xff]  ;;  %v1204_v7 = vld [vmem:[%s19893_s1 + $0x23e8] sm:$0xff] }
 0x22d   :  { %10247 = vmatpush3.msra.mxu0 %v1090_v9  ;;  %10282 = vmatpush3.msra.mxu1 %v1122_v10  ;;  %v1156_v8 = vld [vmem:[%s19893_s1 + $0x2268] sm:$0xff]  ;;  %v1171_v10 = vld [vmem:[%s19893_s1 + $0x22e0] sm:$0xff] }
 0x22e   :  { %10248 = vmatprep.subr.mxu0 %v1105_v11  ;;  %10283 = vmatprep.subr.mxu1 %v1137_v12  ;;  %v1188_v9 = vld [vmem:[%s19893_s1 + $0x2368] sm:$0xff]  ;;  %v1203_v11 = vld [vmem:[%s19893_s1 + $0x23e0] sm:$0xff] }
 0x22f   :  { %10249 = vmatpush3.msra.mxu0 %v1089_v13  ;;  %10284 = vmatpush3.msra.mxu1 %v1121_v14  ;;  %v1155_v12 = vld [vmem:[%s19893_s1 + $0x2260] sm:$0xff]  ;;  %v1170_v14 = vld [vmem:[%s19893_s1 + $0x22d8] sm:$0xff] }
 0x230   :  { %10250 = vmatprep.subr.mxu0 %v1104_v15  ;;  %10285 = vmatprep.subr.mxu1 %v1136_v16  ;;  %v1187_v13 = vld [vmem:[%s19893_s1 + $0x2360] sm:$0xff]  ;;  %v1202_v15 = vld [vmem:[%s19893_s1 + $0x23d8] sm:$0xff] }
 0x231   :  { %10251 = vmatpush3.msra.mxu0 %v1088_v17  ;;  %10286 = vmatpush3.msra.mxu1 %v1120_v18  ;;  %v1154_v16 = vld [vmem:[%s19893_s1 + $0x2258] sm:$0xff]  ;;  %v1169_v18 = vld [vmem:[%s19893_s1 + $0x22d0] sm:$0xff] }
 0x232   :  { %10252 = vmatprep.subr.mxu0 %v1103_v19  ;;  %10287 = vmatprep.subr.mxu1 %v1135_v20  ;;  %v1186_v17 = vld [vmem:[%s19893_s1 + $0x2358] sm:$0xff]  ;;  %v1201_v19 = vld [vmem:[%s19893_s1 + $0x23d0] sm:$0xff] }
 0x233   :  { %10253 = vmatpush3.msra.mxu0 %v1087_v21  ;;  %10288 = vmatpush3.msra.mxu1 %v1119_v22  ;;  %v1153_v20 = vld [vmem:[%s19893_s1 + $0x2250] sm:$0xff]  ;;  %v1168_v22 = vld [vmem:[%s19893_s1 + $0x22c8] sm:$0xff] }
 0x234   :  { %10254 = vmatprep.subr.mxu0 %v1102_v23  ;;  %10289 = vmatprep.subr.mxu1 %v1134_v24  ;;  %v1185_v21 = vld [vmem:[%s19893_s1 + $0x2350] sm:$0xff]  ;;  %v1200_v23 = vld [vmem:[%s19893_s1 + $0x23c8] sm:$0xff] }
 0x235   :  { %10255 = vmatpush3.msra.mxu0 %v1086_v25  ;;  %10290 = vmatpush3.msra.mxu1 %v1118_v26  ;;  %v1152_v24 = vld [vmem:[%s19893_s1 + $0x2248] sm:$0xff]  ;;  %v1167_v26 = vld [vmem:[%s19893_s1 + $0x22c0] sm:$0xff] }
 0x236   :  { %10256 = vmatprep.subr.mxu0 %v1101_v27  ;;  %10291 = vmatprep.subr.mxu1 %v1133_v28  ;;  %v1184_v25 = vld [vmem:[%s19893_s1 + $0x2348] sm:$0xff]  ;;  %v1199_v27 = vld [vmem:[%s19893_s1 + $0x23c0] sm:$0xff] }
 0x237   :  { %10257 = vmatpush3.msra.mxu0 %v1085_v29  ;;  %10292 = vmatpush3.msra.mxu1 %v1117_v30  ;;  %v1151_v28 = vld [vmem:[%s19893_s1 + $0x2240] sm:$0xff]  ;;  %v1166_v30 = vld [vmem:[%s19893_s1 + $0x22b8] sm:$0xff] }
 0x238   :  { %10258 = vmatprep.subr.mxu0 %v1100_v31  ;;  %10293 = vmatprep.subr.mxu1 %v1132_v32  ;;  %v1183_v29 = vld [vmem:[%s19893_s1 + $0x2340] sm:$0xff]  ;;  %v1198_v31 = vld [vmem:[%s19893_s1 + $0x23b8] sm:$0xff] }
 0x239   :  { %10259 = vmatpush3.msra.mxu0 %v1084_v33  ;;  %10294 = vmatpush3.msra.mxu1 %v1116_v34  ;;  %v1150_v32 = vld [vmem:[%s19893_s1 + $0x2238] sm:$0xff]  ;;  %v1165_v34 = vld [vmem:[%s19893_s1 + $0x22b0] sm:$0xff] }
 0x23a   :  { %10260 = vmatprep.subr.mxu0 %v1099_v36  ;;  %10295 = vmatprep.subr.mxu1 %v1131_v37  ;;  %v1182_v33 = vld [vmem:[%s19893_s1 + $0x2338] sm:$0xff]  ;;  %v1149_v36 = vld [vmem:[%s19893_s1 + $0x2230] sm:$0xff] }
 0x23b   :  { %10261 = vmatpush3.msra.mxu0 %v1083_v38  ;;  %10296 = vmatpush3.msra.mxu1 %v1115_v39  ;;  %v1181_v37 = vld [vmem:[%s19893_s1 + $0x2330] sm:$0xff]  ;;  %v1164_v38 = vld [vmem:[%s19893_s1 + $0x22a8] sm:$0xff] }
 0x23c   :  { %10262 = vmatprep.subr.mxu0 %v1098_v40  ;;  %10297 = vmatprep.subr.mxu1 %v1130_v41  ;;  %v1196_v39 = vld [vmem:[%s19893_s1 + $0x23a8] sm:$0xff] }
 0x23d   :  { %10263 = vmatpush3.msra.mxu0 %v1082_v43  ;;  %10298 = vmatpush3.msra.mxu1 %v1114_v44  ;;  %v1148_v40 = vld [vmem:[%s19893_s1 + $0x2228] sm:$0xff]  ;;  %v1163_v43 = vld [vmem:[%s19893_s1 + $0x22a0] sm:$0xff] }
 0x23e   :  { %10264 = vmatprep.subr.mxu0 %v1097_v45  ;;  %10299 = vmatprep.subr.mxu1 %v1129_v46  ;;  %v1180_v41 = vld [vmem:[%s19893_s1 + $0x2328] sm:$0xff]  ;;  %v1195_v44 = vld [vmem:[%s19893_s1 + $0x23a0] sm:$0xff] }
 0x23f   :  { %10265 = vmatpush3.msra.mxu0 %v1081_v48  ;;  %10300 = vmatpush3.msra.mxu1 %v1113_v49  ;;  %v1147_v45 = vld [vmem:[%s19893_s1 + $0x2220] sm:$0xff]  ;;  %v1194_v48 = vld [vmem:[%s19893_s1 + $0x2398] sm:$0xff]  ;;  %v2951_v49 = vcombine.high %v32_v42, %v32_v42 }
 0x240   :  { %10266 = vmatprep.subr.mxu0 %v1096_v50  ;;  %10301 = vmatprep.subr.mxu1 %v1128_v52  ;;  %v1179_v46 = vld [vmem:[%s19893_s1 + $0x2320] sm:$0xff]  ;;  %v1146_v50 = vld [vmem:[%s19893_s1 + $0x2218] sm:$0xff] }
 0x241   :  { %10267 = vmatpush3.msra.mxu0 %v1080_v54  ;;  %10302 = vmatpush3.msra.mxu1 %v1112_v55  ;;  %v1178_v52 = vld [vmem:[%s19893_s1 + $0x2318] sm:$0xff]  ;;  %v1193_v54 = vld [vmem:[%s19893_s1 + $0x2390] sm:$0xff]  ;;  %v2958_v55 = vrot.slane %v32_v42, %v12142_v51 }
 0x242   :  { %10268 = vmatprep.subr.mxu0 %v1095_v56  ;;  %10303 = vmatprep.subr.mxu1 %v1127_v57  ;;  %v1145_v56 = vld [vmem:[%s19893_s1 + $0x2210] sm:$0xff] }
 0x243   :  { %10269 = vmatpush3.msra.mxu0 %v1079_v59  ;;  %5806 = vmatprep.mubr.f32.mxu0 %v2949_v58  ;;  %v1177_v57 = vld [vmem:[%s19893_s1 + $0x2310] sm:$0xff]  ;;  %v1160_v58 = vld [vmem:[%s19893_s1 + $0x2288] sm:$0xff] }
 0x244   :  { %10304 = vmatpush3.msra.mxu1 %v1111_v60  ;;  %5807 = vmatmul.mubr.f32.vlgmr.msra.gmra.mxu0 %v2941_v47  ;;  %v1162_v47 = vld [vmem:[%s19893_s1 + $0x2298] sm:$0xff]  ;;  %v1192_v59 = vld [vmem:[%s19893_s1 + $0x2388] sm:$0xff]  ;;  %v2965_v60 = vrot.slane %v2951_v49, %v12142_v51  ;;  %v1261_v42 = vld [vmem:[%s19893_s1 + $0x25b0] sm:$0xff] }
 0x245   :  { %5876 = vmatprep.mubr.f32.mxu1 %v2950_v61  ;;  %10308 = vmatprep.subr.mxu0 %v1174_v62  ;;  %v1144_v61 = vld [vmem:[%s19893_s1 + $0x2208] sm:$0xff]  ;;  %v33_v49 = vld [vmem:[%s19892_s0 + $0x90] sm:$0xff] }
 0x246   :  { %10343 = vmatprep.subr.mxu1 %v1206_v63  ;;  %5877 = vmatmul.mubr.f32.vlgmr.msra.gmra.mxu1 %v2948_v53  ;;  %v1161_v53 = vld [vmem:[%s19893_s1 + $0x2290] sm:$0xff]  ;;  %v1176_v62 = vld [vmem:[%s19893_s1 + $0x2308] sm:$0xff]  ;;  %v1159_v63 = vld [vmem:[%s19893_s1 + $0x2280] sm:$0xff] }
 0x247   :  { %10309 = vmatpush3.msra.mxu0 %v1158_v0  ;;  %10344 = vmatpush3.msra.mxu1 %v1190_v1  ;;  %v1191_v0 = vld [vmem:[%s19893_s1 + $0x2380] sm:$0xff]  ;;  %v2966_v1 = vcombine.high %v2958_v55, %v2958_v55 }
 0x248   :  { %10310 = vmatprep.subr.mxu0 %v1173_v2  ;;  %10345 = vmatprep.subr.mxu1 %v1205_v3  ;;  %v1143_v2 = vld [vmem:[%s19893_s1 + $0x2200] sm:$0xff] }
 0x249   :  { %10311 = vmatpush3.msra.mxu0 %v1157_v4  ;;  %10346 = vmatpush3.msra.mxu1 %v1189_v5  ;;  %v1175_v3 = vld [vmem:[%s19893_s1 + $0x2300] sm:$0xff]  ;;  %v2967_v4 = vcombine.high %v2965_v60, %v2965_v60  ;;  %v1238_v5 = vld [vmem:[%s19893_s1 + $0x24f8] sm:$0xff] }
 0x24a   :  { %10312 = vmatprep.subr.mxu0 %v1172_v6  ;;  %10347 = vmatprep.subr.mxu1 %v1204_v7  ;;  %v1270_v6 = vld [vmem:[%s19893_s1 + $0x25f8] sm:$0xff] }
 0x24b   :  { %10313 = vmatpush3.msra.mxu0 %v1156_v8  ;;  %10348 = vmatpush3.msra.mxu1 %v1188_v9  ;;  %v1222_v7 = vld [vmem:[%s19893_s1 + $0x2478] sm:$0xff]  ;;  %v1237_v9 = vld [vmem:[%s19893_s1 + $0x24f0] sm:$0xff] }
 0x24c   :  { %10314 = vmatprep.subr.mxu0 %v1171_v10  ;;  %10349 = vmatprep.subr.mxu1 %v1203_v11  ;;  %v1254_v8 = vld [vmem:[%s19893_s1 + $0x2578] sm:$0xff]  ;;  %v1269_v10 = vld [vmem:[%s19893_s1 + $0x25f0] sm:$0xff] }
 0x24d   :  { %10315 = vmatpush3.msra.mxu0 %v1155_v12  ;;  %10350 = vmatpush3.msra.mxu1 %v1187_v13  ;;  %v1221_v11 = vld [vmem:[%s19893_s1 + $0x2470] sm:$0xff]  ;;  %v1236_v13 = vld [vmem:[%s19893_s1 + $0x24e8] sm:$0xff] }
 0x24e   :  { %10316 = vmatprep.subr.mxu0 %v1170_v14  ;;  %10351 = vmatprep.subr.mxu1 %v1202_v15  ;;  %v1253_v12 = vld [vmem:[%s19893_s1 + $0x2570] sm:$0xff]  ;;  %v1268_v14 = vld [vmem:[%s19893_s1 + $0x25e8] sm:$0xff] }
 0x24f   :  { %10317 = vmatpush3.msra.mxu0 %v1154_v16  ;;  %10352 = vmatpush3.msra.mxu1 %v1186_v17  ;;  %v1220_v15 = vld [vmem:[%s19893_s1 + $0x2468] sm:$0xff]  ;;  %v1235_v17 = vld [vmem:[%s19893_s1 + $0x24e0] sm:$0xff] }
 0x250   :  { %10318 = vmatprep.subr.mxu0 %v1169_v18  ;;  %10353 = vmatprep.subr.mxu1 %v1201_v19  ;;  %v1252_v16 = vld [vmem:[%s19893_s1 + $0x2568] sm:$0xff]  ;;  %v1267_v18 = vld [vmem:[%s19893_s1 + $0x25e0] sm:$0xff] }
 0x251   :  { %10319 = vmatpush3.msra.mxu0 %v1153_v20  ;;  %10354 = vmatpush3.msra.mxu1 %v1185_v21  ;;  %v1219_v19 = vld [vmem:[%s19893_s1 + $0x2460] sm:$0xff]  ;;  %v1234_v21 = vld [vmem:[%s19893_s1 + $0x24d8] sm:$0xff] }
 0x252   :  { %10320 = vmatprep.subr.mxu0 %v1168_v22  ;;  %10355 = vmatprep.subr.mxu1 %v1200_v23  ;;  %v1251_v20 = vld [vmem:[%s19893_s1 + $0x2560] sm:$0xff]  ;;  %v1266_v22 = vld [vmem:[%s19893_s1 + $0x25d8] sm:$0xff] }
 0x253   :  { %10321 = vmatpush3.msra.mxu0 %v1152_v24  ;;  %10356 = vmatpush3.msra.mxu1 %v1184_v25  ;;  %v1218_v23 = vld [vmem:[%s19893_s1 + $0x2458] sm:$0xff]  ;;  %v1233_v25 = vld [vmem:[%s19893_s1 + $0x24d0] sm:$0xff] }
 0x254   :  { %10322 = vmatprep.subr.mxu0 %v1167_v26  ;;  %10357 = vmatprep.subr.mxu1 %v1199_v27  ;;  %v1250_v24 = vld [vmem:[%s19893_s1 + $0x2558] sm:$0xff]  ;;  %v1265_v26 = vld [vmem:[%s19893_s1 + $0x25d0] sm:$0xff] }
 0x255   :  { %10323 = vmatpush3.msra.mxu0 %v1151_v28  ;;  %10358 = vmatpush3.msra.mxu1 %v1183_v29  ;;  %v1217_v27 = vld [vmem:[%s19893_s1 + $0x2450] sm:$0xff]  ;;  %v1232_v29 = vld [vmem:[%s19893_s1 + $0x24c8] sm:$0xff] }
 0x256   :  { %10324 = vmatprep.subr.mxu0 %v1166_v30  ;;  %10359 = vmatprep.subr.mxu1 %v1198_v31  ;;  %v1249_v28 = vld [vmem:[%s19893_s1 + $0x2550] sm:$0xff]  ;;  %v1264_v30 = vld [vmem:[%s19893_s1 + $0x25c8] sm:$0xff] }
 0x257   :  { %10325 = vmatpush3.msra.mxu0 %v1150_v32  ;;  %10360 = vmatpush3.msra.mxu1 %v1182_v33  ;;  %v1216_v31 = vld [vmem:[%s19893_s1 + $0x2448] sm:$0xff]  ;;  %v1231_v33 = vld [vmem:[%s19893_s1 + $0x24c0] sm:$0xff] }
 0x258   :  { %10326 = vmatprep.subr.mxu0 %v1165_v34  ;;  %10361 = vmatprep.subr.mxu1 %v1197_v35  ;;  %v1248_v32 = vld [vmem:[%s19893_s1 + $0x2548] sm:$0xff]  ;;  %v1263_v34 = vld [vmem:[%s19893_s1 + $0x25c0] sm:$0xff] }
 0x259   :  { %10327 = vmatpush3.msra.mxu0 %v1149_v36  ;;  %10362 = vmatpush3.msra.mxu1 %v1181_v37  ;;  %v1215_v35 = vld [vmem:[%s19893_s1 + $0x2440] sm:$0xff]  ;;  %v1230_v37 = vld [vmem:[%s19893_s1 + $0x24b8] sm:$0xff] }
 0x25a   :  { %10328 = vmatprep.subr.mxu0 %v1164_v38  ;;  %10363 = vmatprep.subr.mxu1 %v1196_v39  ;;  %v1247_v36 = vld [vmem:[%s19893_s1 + $0x2540] sm:$0xff]  ;;  %v1262_v38 = vld [vmem:[%s19893_s1 + $0x25b8] sm:$0xff] }
 0x25b   :  { %10329 = vmatpush3.msra.mxu0 %v1148_v40  ;;  %10364 = vmatpush3.msra.mxu1 %v1180_v41  ;;  %v1214_v39 = vld [vmem:[%s19893_s1 + $0x2438] sm:$0xff]  ;;  %v1229_v41 = vld [vmem:[%s19893_s1 + $0x24b0] sm:$0xff] }
 0x25c   :  { %10330 = vmatprep.subr.mxu0 %v1163_v43  ;;  %10365 = vmatprep.subr.mxu1 %v1195_v44  ;;  %v1246_v40 = vld [vmem:[%s19893_s1 + $0x2538] sm:$0xff]  ;;  %v1213_v43 = vld [vmem:[%s19893_s1 + $0x2430] sm:$0xff] }
 0x25d   :  { %10331 = vmatpush3.msra.mxu0 %v1147_v45  ;;  %10366 = vmatpush3.msra.mxu1 %v1179_v46  ;;  %v1245_v44 = vld [vmem:[%s19893_s1 + $0x2530] sm:$0xff]  ;;  %v1228_v45 = vld [vmem:[%s19893_s1 + $0x24a8] sm:$0xff] }
 0x25e   :  { %10332 = vmatprep.subr.mxu0 %v1162_v47  ;;  %10367 = vmatprep.subr.mxu1 %v1194_v48  ;;  %v1260_v46 = vld [vmem:[%s19893_s1 + $0x25a8] sm:$0xff] }
 0x25f   :  { %10333 = vmatpush3.msra.mxu0 %v1146_v50  ;;  %10368 = vmatpush3.msra.mxu1 %v1178_v52  ;;  %v1212_v47 = vld [vmem:[%s19893_s1 + $0x2428] sm:$0xff]  ;;  %v1227_v50 = vld [vmem:[%s19893_s1 + $0x24a0] sm:$0xff] }
 0x260   :  { %10334 = vmatprep.subr.mxu0 %v1161_v53  ;;  %10369 = vmatprep.subr.mxu1 %v1193_v54  ;;  %v1244_v48 = vld [vmem:[%s19893_s1 + $0x2528] sm:$0xff]  ;;  %v1259_v52 = vld [vmem:[%s19893_s1 + $0x25a0] sm:$0xff] }
 0x261   :  { %10335 = vmatpush3.msra.mxu0 %v1145_v56  ;;  %10370 = vmatpush3.msra.mxu1 %v1177_v57  ;;  %v1211_v53 = vld [vmem:[%s19893_s1 + $0x2420] sm:$0xff]  ;;  %v1258_v56 = vld [vmem:[%s19893_s1 + $0x2598] sm:$0xff]  ;;  %v2968_v57 = vcombine.high %v33_v49, %v33_v49 }
 0x262   :  { %10336 = vmatprep.subr.mxu0 %v1160_v58  ;;  %10371 = vmatprep.subr.mxu1 %v1192_v59  ;;  %v1243_v54 = vld [vmem:[%s19893_s1 + $0x2520] sm:$0xff]  ;;  %v1210_v58 = vld [vmem:[%s19893_s1 + $0x2418] sm:$0xff] }
 0x263   :  { %10337 = vmatpush3.msra.mxu0 %v1144_v61  ;;  %10372 = vmatpush3.msra.mxu1 %v1176_v62  ;;  %v1242_v59 = vld [vmem:[%s19893_s1 + $0x2518] sm:$0xff]  ;;  %v1257_v61 = vld [vmem:[%s19893_s1 + $0x2590] sm:$0xff]  ;;  %v2975_v62 = vrot.slane %v33_v49, %v12142_v51 }
 0x264   :  { %10338 = vmatprep.subr.mxu0 %v1159_v63  ;;  %10373 = vmatprep.subr.mxu1 %v1191_v0  ;;  %v1209_v63 = vld [vmem:[%s19893_s1 + $0x2410] sm:$0xff] }
 0x265   :  { %10339 = vmatpush3.msra.mxu0 %v1143_v2  ;;  %5946 = vmatprep.mubr.f32.mxu0 %v2966_v1  ;;  %v1241_v0 = vld [vmem:[%s19893_s1 + $0x2510] sm:$0xff]  ;;  %v1224_v1 = vld [vmem:[%s19893_s1 + $0x2488] sm:$0xff] }
 0x266   :  { %10374 = vmatpush3.msra.mxu1 %v1175_v3  ;;  %5947 = vmatmul.mubr.f32.vlgmr.msra.gmra.mxu0 %v2958_v55  ;;  %v1226_v55 = vld [vmem:[%s19893_s1 + $0x2498] sm:$0xff]  ;;  %v1256_v2 = vld [vmem:[%s19893_s1 + $0x2588] sm:$0xff]  ;;  %v2982_v3 = vrot.slane %v2968_v57, %v12142_v51  ;;  %v1325_v49 = vld [vmem:[%s19893_s1 + $0x27b0] sm:$0xff] }
 0x267   :  { %6016 = vmatprep.mubr.f32.mxu1 %v2967_v4  ;;  %10378 = vmatprep.subr.mxu0 %v1238_v5  ;;  %v1208_v4 = vld [vmem:[%s19893_s1 + $0x2408] sm:$0xff]  ;;  %v34_v57 = vld [vmem:[%s19892_s0 + $0x98] sm:$0xff] }
 0x268   :  { %10413 = vmatprep.subr.mxu1 %v1270_v6  ;;  %6017 = vmatmul.mubr.f32.vlgmr.msra.gmra.mxu1 %v2965_v60  ;;  %v1225_v60 = vld [vmem:[%s19893_s1 + $0x2490] sm:$0xff]  ;;  %v1240_v5 = vld [vmem:[%s19893_s1 + $0x2508] sm:$0xff]  ;;  %v1223_v6 = vld [vmem:[%s19893_s1 + $0x2480] sm:$0xff] }
 0x269   :  { %10379 = vmatpush3.msra.mxu0 %v1222_v7  ;;  %10414 = vmatpush3.msra.mxu1 %v1254_v8  ;;  %v1255_v7 = vld [vmem:[%s19893_s1 + $0x2580] sm:$0xff]  ;;  %v2983_v8 = vcombine.high %v2975_v62, %v2975_v62 }
 0x26a   :  { %10380 = vmatprep.subr.mxu0 %v1237_v9  ;;  %10415 = vmatprep.subr.mxu1 %v1269_v10  ;;  %v1207_v9 = vld [vmem:[%s19893_s1 + $0x2400] sm:$0xff] }
 0x26b   :  { %10381 = vmatpush3.msra.mxu0 %v1221_v11  ;;  %10416 = vmatpush3.msra.mxu1 %v1253_v12  ;;  %v1239_v10 = vld [vmem:[%s19893_s1 + $0x2500] sm:$0xff]  ;;  %v2984_v11 = vcombine.high %v2982_v3, %v2982_v3  ;;  %v1302_v12 = vld [vmem:[%s19893_s1 + $0x26f8] sm:$0xff] }
 0x26c   :  { %10382 = vmatprep.subr.mxu0 %v1236_v13  ;;  %10417 = vmatprep.subr.mxu1 %v1268_v14  ;;  %v1334_v13 = vld [vmem:[%s19893_s1 + $0x27f8] sm:$0xff] }
 0x26d   :  { %10383 = vmatpush3.msra.mxu0 %v1220_v15  ;;  %10418 = vmatpush3.msra.mxu1 %v1252_v16  ;;  %v1286_v14 = vld [vmem:[%s19893_s1 + $0x2678] sm:$0xff]  ;;  %v1301_v16 = vld [vmem:[%s19893_s1 + $0x26f0] sm:$0xff] }
 0x26e   :  { %10384 = vmatprep.subr.mxu0 %v1235_v17  ;;  %10419 = vmatprep.subr.mxu1 %v1267_v18  ;;  %v1318_v15 = vld [vmem:[%s19893_s1 + $0x2778] sm:$0xff]  ;;  %v1333_v17 = vld [vmem:[%s19893_s1 + $0x27f0] sm:$0xff] }
 0x26f   :  { %10385 = vmatpush3.msra.mxu0 %v1219_v19  ;;  %10420 = vmatpush3.msra.mxu1 %v1251_v20  ;;  %v1285_v18 = vld [vmem:[%s19893_s1 + $0x2670] sm:$0xff]  ;;  %v1300_v20 = vld [vmem:[%s19893_s1 + $0x26e8] sm:$0xff] }
 0x270   :  { %10386 = vmatprep.subr.mxu0 %v1234_v21  ;;  %10421 = vmatprep.subr.mxu1 %v1266_v22  ;;  %v1317_v19 = vld [vmem:[%s19893_s1 + $0x2770] sm:$0xff]  ;;  %v1332_v21 = vld [vmem:[%s19893_s1 + $0x27e8] sm:$0xff] }
 0x271   :  { %10387 = vmatpush3.msra.mxu0 %v1218_v23  ;;  %10422 = vmatpush3.msra.mxu1 %v1250_v24  ;;  %v1284_v22 = vld [vmem:[%s19893_s1 + $0x2668] sm:$0xff]  ;;  %v1299_v24 = vld [vmem:[%s19893_s1 + $0x26e0] sm:$0xff] }
 0x272   :  { %10388 = vmatprep.subr.mxu0 %v1233_v25  ;;  %10423 = vmatprep.subr.mxu1 %v1265_v26  ;;  %v1316_v23 = vld [vmem:[%s19893_s1 + $0x2768] sm:$0xff]  ;;  %v1331_v25 = vld [vmem:[%s19893_s1 + $0x27e0] sm:$0xff] }
 0x273   :  { %10389 = vmatpush3.msra.mxu0 %v1217_v27  ;;  %10424 = vmatpush3.msra.mxu1 %v1249_v28  ;;  %v1283_v26 = vld [vmem:[%s19893_s1 + $0x2660] sm:$0xff]  ;;  %v1298_v28 = vld [vmem:[%s19893_s1 + $0x26d8] sm:$0xff] }
 0x274   :  { %10390 = vmatprep.subr.mxu0 %v1232_v29  ;;  %10425 = vmatprep.subr.mxu1 %v1264_v30  ;;  %v1315_v27 = vld [vmem:[%s19893_s1 + $0x2760] sm:$0xff]  ;;  %v1330_v29 = vld [vmem:[%s19893_s1 + $0x27d8] sm:$0xff] }
 0x275   :  { %10391 = vmatpush3.msra.mxu0 %v1216_v31  ;;  %10426 = vmatpush3.msra.mxu1 %v1248_v32  ;;  %v1282_v30 = vld [vmem:[%s19893_s1 + $0x2658] sm:$0xff]  ;;  %v1297_v32 = vld [vmem:[%s19893_s1 + $0x26d0] sm:$0xff] }
 0x276   :  { %10392 = vmatprep.subr.mxu0 %v1231_v33  ;;  %10427 = vmatprep.subr.mxu1 %v1263_v34  ;;  %v1314_v31 = vld [vmem:[%s19893_s1 + $0x2758] sm:$0xff]  ;;  %v1329_v33 = vld [vmem:[%s19893_s1 + $0x27d0] sm:$0xff] }
 0x277   :  { %10393 = vmatpush3.msra.mxu0 %v1215_v35  ;;  %10428 = vmatpush3.msra.mxu1 %v1247_v36  ;;  %v1281_v34 = vld [vmem:[%s19893_s1 + $0x2650] sm:$0xff]  ;;  %v1296_v36 = vld [vmem:[%s19893_s1 + $0x26c8] sm:$0xff] }
 0x278   :  { %10394 = vmatprep.subr.mxu0 %v1230_v37  ;;  %10429 = vmatprep.subr.mxu1 %v1262_v38  ;;  %v1313_v35 = vld [vmem:[%s19893_s1 + $0x2750] sm:$0xff]  ;;  %v1328_v37 = vld [vmem:[%s19893_s1 + $0x27c8] sm:$0xff] }
 0x279   :  { %10395 = vmatpush3.msra.mxu0 %v1214_v39  ;;  %10430 = vmatpush3.msra.mxu1 %v1246_v40  ;;  %v1280_v38 = vld [vmem:[%s19893_s1 + $0x2648] sm:$0xff]  ;;  %v1295_v40 = vld [vmem:[%s19893_s1 + $0x26c0] sm:$0xff] }
 0x27a   :  { %10396 = vmatprep.subr.mxu0 %v1229_v41  ;;  %10431 = vmatprep.subr.mxu1 %v1261_v42  ;;  %v1312_v39 = vld [vmem:[%s19893_s1 + $0x2748] sm:$0xff]  ;;  %v1327_v41 = vld [vmem:[%s19893_s1 + $0x27c0] sm:$0xff] }
 0x27b   :  { %10397 = vmatpush3.msra.mxu0 %v1213_v43  ;;  %10432 = vmatpush3.msra.mxu1 %v1245_v44  ;;  %v1279_v42 = vld [vmem:[%s19893_s1 + $0x2640] sm:$0xff]  ;;  %v1294_v44 = vld [vmem:[%s19893_s1 + $0x26b8] sm:$0xff] }
 0x27c   :  { %10398 = vmatprep.subr.mxu0 %v1228_v45  ;;  %10433 = vmatprep.subr.mxu1 %v1260_v46  ;;  %v1311_v43 = vld [vmem:[%s19893_s1 + $0x2740] sm:$0xff]  ;;  %v1326_v45 = vld [vmem:[%s19893_s1 + $0x27b8] sm:$0xff] }
 0x27d   :  { %10399 = vmatpush3.msra.mxu0 %v1212_v47  ;;  %10434 = vmatpush3.msra.mxu1 %v1244_v48  ;;  %v1278_v46 = vld [vmem:[%s19893_s1 + $0x2638] sm:$0xff]  ;;  %v1293_v48 = vld [vmem:[%s19893_s1 + $0x26b0] sm:$0xff] }
 0x27e   :  { %10400 = vmatprep.subr.mxu0 %v1227_v50  ;;  %10435 = vmatprep.subr.mxu1 %v1259_v52  ;;  %v1310_v47 = vld [vmem:[%s19893_s1 + $0x2738] sm:$0xff]  ;;  %v1277_v50 = vld [vmem:[%s19893_s1 + $0x2630] sm:$0xff] }
 0x27f   :  { %10401 = vmatpush3.msra.mxu0 %v1211_v53  ;;  %10436 = vmatpush3.msra.mxu1 %v1243_v54  ;;  %v1309_v52 = vld [vmem:[%s19893_s1 + $0x2730] sm:$0xff]  ;;  %v1292_v53 = vld [vmem:[%s19893_s1 + $0x26a8] sm:$0xff] }
 0x280   :  { %10402 = vmatprep.subr.mxu0 %v1226_v55  ;;  %10437 = vmatprep.subr.mxu1 %v1258_v56  ;;  %v1324_v54 = vld [vmem:[%s19893_s1 + $0x27a8] sm:$0xff] }
 0x281   :  { %10403 = vmatpush3.msra.mxu0 %v1210_v58  ;;  %10438 = vmatpush3.msra.mxu1 %v1242_v59  ;;  %v1276_v55 = vld [vmem:[%s19893_s1 + $0x2628] sm:$0xff]  ;;  %v1291_v58 = vld [vmem:[%s19893_s1 + $0x26a0] sm:$0xff] }
 0x282   :  { %10404 = vmatprep.subr.mxu0 %v1225_v60  ;;  %10439 = vmatprep.subr.mxu1 %v1257_v61  ;;  %v1308_v56 = vld [vmem:[%s19893_s1 + $0x2728] sm:$0xff]  ;;  %v1323_v59 = vld [vmem:[%s19893_s1 + $0x27a0] sm:$0xff] }
 0x283   :  { %10405 = vmatpush3.msra.mxu0 %v1209_v63  ;;  %10440 = vmatpush3.msra.mxu1 %v1241_v0  ;;  %v1275_v60 = vld [vmem:[%s19893_s1 + $0x2620] sm:$0xff]  ;;  %v1322_v63 = vld [vmem:[%s19893_s1 + $0x2798] sm:$0xff]  ;;  %v2985_v0 = vcombine.high %v34_v57, %v34_v57 }
 0x284   :  { %10406 = vmatprep.subr.mxu0 %v1224_v1  ;;  %10441 = vmatprep.subr.mxu1 %v1256_v2  ;;  %v1307_v61 = vld [vmem:[%s19893_s1 + $0x2720] sm:$0xff]  ;;  %v1274_v1 = vld [vmem:[%s19893_s1 + $0x2618] sm:$0xff] }
 0x285   :  { %10407 = vmatpush3.msra.mxu0 %v1208_v4  ;;  %10442 = vmatpush3.msra.mxu1 %v1240_v5  ;;  %v1306_v2 = vld [vmem:[%s19893_s1 + $0x2718] sm:$0xff]  ;;  %v1321_v4 = vld [vmem:[%s19893_s1 + $0x2790] sm:$0xff]  ;;  %v2992_v5 = vrot.slane %v34_v57, %v12142_v51 }
 0x286   :  { %10408 = vmatprep.subr.mxu0 %v1223_v6  ;;  %10443 = vmatprep.subr.mxu1 %v1255_v7  ;;  %v1273_v6 = vld [vmem:[%s19893_s1 + $0x2610] sm:$0xff] }
 0x287   :  { %10409 = vmatpush3.msra.mxu0 %v1207_v9  ;;  %6086 = vmatprep.mubr.f32.mxu0 %v2983_v8  ;;  %v1305_v7 = vld [vmem:[%s19893_s1 + $0x2710] sm:$0xff]  ;;  %v1288_v8 = vld [vmem:[%s19893_s1 + $0x2688] sm:$0xff] }
 0x288   :  { %10444 = vmatpush3.msra.mxu1 %v1239_v10  ;;  %6087 = vmatmul.mubr.f32.vlgmr.msra.gmra.mxu0 %v2975_v62  ;;  %v1290_v62 = vld [vmem:[%s19893_s1 + $0x2698] sm:$0xff]  ;;  %v1320_v9 = vld [vmem:[%s19893_s1 + $0x2788] sm:$0xff]  ;;  %v2999_v10 = vrot.slane %v2985_v0, %v12142_v51  ;;  %v1389_v57 = vld [vmem:[%s19893_s1 + $0x29b0] sm:$0xff] }
 0x289   :  { %6156 = vmatprep.mubr.f32.mxu1 %v2984_v11  ;;  %10448 = vmatprep.subr.mxu0 %v1302_v12  ;;  %v1272_v11 = vld [vmem:[%s19893_s1 + $0x2608] sm:$0xff]  ;;  %v35_v0 = vld [vmem:[%s19892_s0 + $0xa0] sm:$0xff] }
 0x28a   :  { %10483 = vmatprep.subr.mxu1 %v1334_v13  ;;  %6157 = vmatmul.mubr.f32.vlgmr.msra.gmra.mxu1 %v2982_v3  ;;  %v1289_v3 = vld [vmem:[%s19893_s1 + $0x2690] sm:$0xff]  ;;  %v1304_v12 = vld [vmem:[%s19893_s1 + $0x2708] sm:$0xff]  ;;  %v1287_v13 = vld [vmem:[%s19893_s1 + $0x2680] sm:$0xff] }
 0x28b   :  { %10449 = vmatpush3.msra.mxu0 %v1286_v14  ;;  %10484 = vmatpush3.msra.mxu1 %v1318_v15  ;;  %v1319_v14 = vld [vmem:[%s19893_s1 + $0x2780] sm:$0xff]  ;;  %v3000_v15 = vcombine.high %v2992_v5, %v2992_v5 }
 0x28c   :  { %10450 = vmatprep.subr.mxu0 %v1301_v16  ;;  %10485 = vmatprep.subr.mxu1 %v1333_v17  ;;  %v1271_v16 = vld [vmem:[%s19893_s1 + $0x2600] sm:$0xff] }
 0x28d   :  { %10451 = vmatpush3.msra.mxu0 %v1285_v18  ;;  %10486 = vmatpush3.msra.mxu1 %v1317_v19  ;;  %v1303_v17 = vld [vmem:[%s19893_s1 + $0x2700] sm:$0xff]  ;;  %v3001_v18 = vcombine.high %v2999_v10, %v2999_v10  ;;  %v1366_v19 = vld [vmem:[%s19893_s1 + $0x28f8] sm:$0xff] }
 0x28e   :  { %10452 = vmatprep.subr.mxu0 %v1300_v20  ;;  %10487 = vmatprep.subr.mxu1 %v1332_v21  ;;  %v1398_v20 = vld [vmem:[%s19893_s1 + $0x29f8] sm:$0xff] }
 0x28f   :  { %10453 = vmatpush3.msra.mxu0 %v1284_v22  ;;  %10488 = vmatpush3.msra.mxu1 %v1316_v23  ;;  %v1350_v21 = vld [vmem:[%s19893_s1 + $0x2878] sm:$0xff]  ;;  %v1365_v23 = vld [vmem:[%s19893_s1 + $0x28f0] sm:$0xff] }
 0x290   :  { %10454 = vmatprep.subr.mxu0 %v1299_v24  ;;  %10489 = vmatprep.subr.mxu1 %v1331_v25  ;;  %v1382_v22 = vld [vmem:[%s19893_s1 + $0x2978] sm:$0xff]  ;;  %v1397_v24 = vld [vmem:[%s19893_s1 + $0x29f0] sm:$0xff] }
 0x291   :  { %10455 = vmatpush3.msra.mxu0 %v1283_v26  ;;  %10490 = vmatpush3.msra.mxu1 %v1315_v27  ;;  %v1349_v25 = vld [vmem:[%s19893_s1 + $0x2870] sm:$0xff]  ;;  %v1364_v27 = vld [vmem:[%s19893_s1 + $0x28e8] sm:$0xff] }
 0x292   :  { %10456 = vmatprep.subr.mxu0 %v1298_v28  ;;  %10491 = vmatprep.subr.mxu1 %v1330_v29  ;;  %v1381_v26 = vld [vmem:[%s19893_s1 + $0x2970] sm:$0xff]  ;;  %v1396_v28 = vld [vmem:[%s19893_s1 + $0x29e8] sm:$0xff] }
 0x293   :  { %10457 = vmatpush3.msra.mxu0 %v1282_v30  ;;  %10492 = vmatpush3.msra.mxu1 %v1314_v31  ;;  %v1348_v29 = vld [vmem:[%s19893_s1 + $0x2868] sm:$0xff]  ;;  %v1363_v31 = vld [vmem:[%s19893_s1 + $0x28e0] sm:$0xff] }
 0x294   :  { %10458 = vmatprep.subr.mxu0 %v1297_v32  ;;  %10493 = vmatprep.subr.mxu1 %v1329_v33  ;;  %v1380_v30 = vld [vmem:[%s19893_s1 + $0x2968] sm:$0xff]  ;;  %v1395_v32 = vld [vmem:[%s19893_s1 + $0x29e0] sm:$0xff] }
 0x295   :  { %10459 = vmatpush3.msra.mxu0 %v1281_v34  ;;  %10494 = vmatpush3.msra.mxu1 %v1313_v35  ;;  %v1347_v33 = vld [vmem:[%s19893_s1 + $0x2860] sm:$0xff]  ;;  %v1362_v35 = vld [vmem:[%s19893_s1 + $0x28d8] sm:$0xff] }
 0x296   :  { %10460 = vmatprep.subr.mxu0 %v1296_v36  ;;  %10495 = vmatprep.subr.mxu1 %v1328_v37  ;;  %v1379_v34 = vld [vmem:[%s19893_s1 + $0x2960] sm:$0xff]  ;;  %v1394_v36 = vld [vmem:[%s19893_s1 + $0x29d8] sm:$0xff] }
 0x297   :  { %10461 = vmatpush3.msra.mxu0 %v1280_v38  ;;  %10496 = vmatpush3.msra.mxu1 %v1312_v39  ;;  %v1346_v37 = vld [vmem:[%s19893_s1 + $0x2858] sm:$0xff]  ;;  %v1361_v39 = vld [vmem:[%s19893_s1 + $0x28d0] sm:$0xff] }
 0x298   :  { %10462 = vmatprep.subr.mxu0 %v1295_v40  ;;  %10497 = vmatprep.subr.mxu1 %v1327_v41  ;;  %v1378_v38 = vld [vmem:[%s19893_s1 + $0x2958] sm:$0xff]  ;;  %v1393_v40 = vld [vmem:[%s19893_s1 + $0x29d0] sm:$0xff] }
 0x299   :  { %10463 = vmatpush3.msra.mxu0 %v1279_v42  ;;  %10498 = vmatpush3.msra.mxu1 %v1311_v43  ;;  %v1345_v41 = vld [vmem:[%s19893_s1 + $0x2850] sm:$0xff]  ;;  %v1360_v43 = vld [vmem:[%s19893_s1 + $0x28c8] sm:$0xff] }
 0x29a   :  { %10464 = vmatprep.subr.mxu0 %v1294_v44  ;;  %10499 = vmatprep.subr.mxu1 %v1326_v45  ;;  %v1377_v42 = vld [vmem:[%s19893_s1 + $0x2950] sm:$0xff]  ;;  %v1392_v44 = vld [vmem:[%s19893_s1 + $0x29c8] sm:$0xff] }
 0x29b   :  { %10465 = vmatpush3.msra.mxu0 %v1278_v46  ;;  %10500 = vmatpush3.msra.mxu1 %v1310_v47  ;;  %v1344_v45 = vld [vmem:[%s19893_s1 + $0x2848] sm:$0xff]  ;;  %v1359_v47 = vld [vmem:[%s19893_s1 + $0x28c0] sm:$0xff] }
 0x29c   :  { %10466 = vmatprep.subr.mxu0 %v1293_v48  ;;  %10501 = vmatprep.subr.mxu1 %v1325_v49  ;;  %v1376_v46 = vld [vmem:[%s19893_s1 + $0x2948] sm:$0xff]  ;;  %v1391_v48 = vld [vmem:[%s19893_s1 + $0x29c0] sm:$0xff] }
 0x29d   :  { %10467 = vmatpush3.msra.mxu0 %v1277_v50  ;;  %10502 = vmatpush3.msra.mxu1 %v1309_v52  ;;  %v1343_v49 = vld [vmem:[%s19893_s1 + $0x2840] sm:$0xff]  ;;  %v1358_v52 = vld [vmem:[%s19893_s1 + $0x28b8] sm:$0xff] }
 0x29e   :  { %10468 = vmatprep.subr.mxu0 %v1292_v53  ;;  %10503 = vmatprep.subr.mxu1 %v1324_v54  ;;  %v1375_v50 = vld [vmem:[%s19893_s1 + $0x2940] sm:$0xff]  ;;  %v1390_v53 = vld [vmem:[%s19893_s1 + $0x29b8] sm:$0xff] }
 0x29f   :  { %10469 = vmatpush3.msra.mxu0 %v1276_v55  ;;  %10504 = vmatpush3.msra.mxu1 %v1308_v56  ;;  %v1342_v54 = vld [vmem:[%s19893_s1 + $0x2838] sm:$0xff]  ;;  %v1357_v56 = vld [vmem:[%s19893_s1 + $0x28b0] sm:$0xff] }
 0x2a0   :  { %10470 = vmatprep.subr.mxu0 %v1291_v58  ;;  %10505 = vmatprep.subr.mxu1 %v1323_v59  ;;  %v1374_v55 = vld [vmem:[%s19893_s1 + $0x2938] sm:$0xff]  ;;  %v1341_v58 = vld [vmem:[%s19893_s1 + $0x2830] sm:$0xff] }
 0x2a1   :  { %10471 = vmatpush3.msra.mxu0 %v1275_v60  ;;  %10506 = vmatpush3.msra.mxu1 %v1307_v61  ;;  %v1373_v59 = vld [vmem:[%s19893_s1 + $0x2930] sm:$0xff]  ;;  %v1356_v60 = vld [vmem:[%s19893_s1 + $0x28a8] sm:$0xff] }
 0x2a2   :  { %10472 = vmatprep.subr.mxu0 %v1290_v62  ;;  %10507 = vmatprep.subr.mxu1 %v1322_v63  ;;  %v1388_v61 = vld [vmem:[%s19893_s1 + $0x29a8] sm:$0xff] }
 0x2a3   :  { %10473 = vmatpush3.msra.mxu0 %v1274_v1  ;;  %10508 = vmatpush3.msra.mxu1 %v1306_v2  ;;  %v1340_v62 = vld [vmem:[%s19893_s1 + $0x2828] sm:$0xff]  ;;  %v1355_v1 = vld [vmem:[%s19893_s1 + $0x28a0] sm:$0xff] }
 0x2a4   :  { %10474 = vmatprep.subr.mxu0 %v1289_v3  ;;  %10509 = vmatprep.subr.mxu1 %v1321_v4  ;;  %v1372_v63 = vld [vmem:[%s19893_s1 + $0x2928] sm:$0xff]  ;;  %v1387_v2 = vld [vmem:[%s19893_s1 + $0x29a0] sm:$0xff] }
 0x2a5   :  { %10475 = vmatpush3.msra.mxu0 %v1273_v6  ;;  %10510 = vmatpush3.msra.mxu1 %v1305_v7  ;;  %v1339_v3 = vld [vmem:[%s19893_s1 + $0x2820] sm:$0xff]  ;;  %v1386_v6 = vld [vmem:[%s19893_s1 + $0x2998] sm:$0xff]  ;;  %v3002_v7 = vcombine.high %v35_v0, %v35_v0 }
 0x2a6   :  { %10476 = vmatprep.subr.mxu0 %v1288_v8  ;;  %10511 = vmatprep.subr.mxu1 %v1320_v9  ;;  %v1371_v4 = vld [vmem:[%s19893_s1 + $0x2920] sm:$0xff]  ;;  %v1338_v8 = vld [vmem:[%s19893_s1 + $0x2818] sm:$0xff] }
 0x2a7   :  { %10477 = vmatpush3.msra.mxu0 %v1272_v11  ;;  %10512 = vmatpush3.msra.mxu1 %v1304_v12  ;;  %v1370_v9 = vld [vmem:[%s19893_s1 + $0x2918] sm:$0xff]  ;;  %v1385_v11 = vld [vmem:[%s19893_s1 + $0x2990] sm:$0xff]  ;;  %v3009_v12 = vrot.slane %v35_v0, %v12142_v51 }
 0x2a8   :  { %10478 = vmatprep.subr.mxu0 %v1287_v13  ;;  %10513 = vmatprep.subr.mxu1 %v1319_v14  ;;  %v1337_v13 = vld [vmem:[%s19893_s1 + $0x2810] sm:$0xff] }
 0x2a9   :  { %10479 = vmatpush3.msra.mxu0 %v1271_v16  ;;  %6226 = vmatprep.mubr.f32.mxu0 %v3000_v15  ;;  %v1369_v14 = vld [vmem:[%s19893_s1 + $0x2910] sm:$0xff]  ;;  %v1352_v15 = vld [vmem:[%s19893_s1 + $0x2888] sm:$0xff] }
 0x2aa   :  { %10514 = vmatpush3.msra.mxu1 %v1303_v17  ;;  %6227 = vmatmul.mubr.f32.vlgmr.msra.gmra.mxu0 %v2992_v5  ;;  %v1354_v5 = vld [vmem:[%s19893_s1 + $0x2898] sm:$0xff]  ;;  %v1384_v16 = vld [vmem:[%s19893_s1 + $0x2988] sm:$0xff]  ;;  %v3016_v17 = vrot.slane %v3002_v7, %v12142_v51  ;;  %v1453_v0 = vld [vmem:[%s19893_s1 + $0x2bb0] sm:$0xff] }
 0x2ab   :  { %6296 = vmatprep.mubr.f32.mxu1 %v3001_v18  ;;  %10518 = vmatprep.subr.mxu0 %v1366_v19  ;;  %v1336_v18 = vld [vmem:[%s19893_s1 + $0x2808] sm:$0xff] }
 0x2ac   :  { %10553 = vmatprep.subr.mxu1 %v1398_v20  ;;  %6297 = vmatmul.mubr.f32.vlgmr.msra.gmra.mxu1 %v2999_v10  ;;  %v1353_v10 = vld [vmem:[%s19893_s1 + $0x2890] sm:$0xff]  ;;  %v1368_v19 = vld [vmem:[%s19893_s1 + $0x2908] sm:$0xff]  ;;  %v1351_v20 = vld [vmem:[%s19893_s1 + $0x2880] sm:$0xff] }
 0x2ad   :  { %10519 = vmatpush3.msra.mxu0 %v1350_v21  ;;  %10554 = vmatpush3.msra.mxu1 %v1382_v22  ;;  %v1383_v21 = vld [vmem:[%s19893_s1 + $0x2980] sm:$0xff]  ;;  %v3017_v22 = vcombine.high %v3009_v12, %v3009_v12  ;;  %v36_v7 = vld [vmem:[%s19892_s0 + $0xa8] sm:$0xff] }
 0x2ae   :  { %10520 = vmatprep.subr.mxu0 %v1365_v23  ;;  %10555 = vmatprep.subr.mxu1 %v1397_v24  ;;  %v1335_v23 = vld [vmem:[%s19893_s1 + $0x2800] sm:$0xff] }
 0x2af   :  { %10521 = vmatpush3.msra.mxu0 %v1349_v25  ;;  %10556 = vmatpush3.msra.mxu1 %v1381_v26  ;;  %v1367_v24 = vld [vmem:[%s19893_s1 + $0x2900] sm:$0xff]  ;;  %v3018_v25 = vcombine.high %v3016_v17, %v3016_v17  ;;  %v1430_v26 = vld [vmem:[%s19893_s1 + $0x2af8] sm:$0xff] }
 0x2b0   :  { %10522 = vmatprep.subr.mxu0 %v1364_v27  ;;  %10557 = vmatprep.subr.mxu1 %v1396_v28  ;;  %v1462_v27 = vld [vmem:[%s19893_s1 + $0x2bf8] sm:$0xff] }
 0x2b1   :  { %10523 = vmatpush3.msra.mxu0 %v1348_v29  ;;  %10558 = vmatpush3.msra.mxu1 %v1380_v30  ;;  %v1414_v28 = vld [vmem:[%s19893_s1 + $0x2a78] sm:$0xff]  ;;  %v1429_v30 = vld [vmem:[%s19893_s1 + $0x2af0] sm:$0xff] }
 0x2b2   :  { %10524 = vmatprep.subr.mxu0 %v1363_v31  ;;  %10559 = vmatprep.subr.mxu1 %v1395_v32  ;;  %v1446_v29 = vld [vmem:[%s19893_s1 + $0x2b78] sm:$0xff]  ;;  %v1461_v31 = vld [vmem:[%s19893_s1 + $0x2bf0] sm:$0xff] }
 0x2b3   :  { %10525 = vmatpush3.msra.mxu0 %v1347_v33  ;;  %10560 = vmatpush3.msra.mxu1 %v1379_v34  ;;  %v1413_v32 = vld [vmem:[%s19893_s1 + $0x2a70] sm:$0xff]  ;;  %v1428_v34 = vld [vmem:[%s19893_s1 + $0x2ae8] sm:$0xff] }
 0x2b4   :  { %10526 = vmatprep.subr.mxu0 %v1362_v35  ;;  %10561 = vmatprep.subr.mxu1 %v1394_v36  ;;  %v1445_v33 = vld [vmem:[%s19893_s1 + $0x2b70] sm:$0xff]  ;;  %v1460_v35 = vld [vmem:[%s19893_s1 + $0x2be8] sm:$0xff] }
 0x2b5   :  { %10527 = vmatpush3.msra.mxu0 %v1346_v37  ;;  %10562 = vmatpush3.msra.mxu1 %v1378_v38  ;;  %v1412_v36 = vld [vmem:[%s19893_s1 + $0x2a68] sm:$0xff]  ;;  %v1427_v38 = vld [vmem:[%s19893_s1 + $0x2ae0] sm:$0xff] }
 0x2b6   :  { %10528 = vmatprep.subr.mxu0 %v1361_v39  ;;  %10563 = vmatprep.subr.mxu1 %v1393_v40  ;;  %v1444_v37 = vld [vmem:[%s19893_s1 + $0x2b68] sm:$0xff]  ;;  %v1459_v39 = vld [vmem:[%s19893_s1 + $0x2be0] sm:$0xff] }
 0x2b7   :  { %10529 = vmatpush3.msra.mxu0 %v1345_v41  ;;  %10564 = vmatpush3.msra.mxu1 %v1377_v42  ;;  %v1411_v40 = vld [vmem:[%s19893_s1 + $0x2a60] sm:$0xff]  ;;  %v1426_v42 = vld [vmem:[%s19893_s1 + $0x2ad8] sm:$0xff] }
 0x2b8   :  { %10530 = vmatprep.subr.mxu0 %v1360_v43  ;;  %10565 = vmatprep.subr.mxu1 %v1392_v44  ;;  %v1443_v41 = vld [vmem:[%s19893_s1 + $0x2b60] sm:$0xff]  ;;  %v1458_v43 = vld [vmem:[%s19893_s1 + $0x2bd8] sm:$0xff] }
 0x2b9   :  { %10531 = vmatpush3.msra.mxu0 %v1344_v45  ;;  %10566 = vmatpush3.msra.mxu1 %v1376_v46  ;;  %v1410_v44 = vld [vmem:[%s19893_s1 + $0x2a58] sm:$0xff]  ;;  %v1425_v46 = vld [vmem:[%s19893_s1 + $0x2ad0] sm:$0xff] }
 0x2ba   :  { %10532 = vmatprep.subr.mxu0 %v1359_v47  ;;  %10567 = vmatprep.subr.mxu1 %v1391_v48  ;;  %v1442_v45 = vld [vmem:[%s19893_s1 + $0x2b58] sm:$0xff]  ;;  %v1457_v47 = vld [vmem:[%s19893_s1 + $0x2bd0] sm:$0xff] }
 0x2bb   :  { %10533 = vmatpush3.msra.mxu0 %v1343_v49  ;;  %10568 = vmatpush3.msra.mxu1 %v1375_v50  ;;  %v1409_v48 = vld [vmem:[%s19893_s1 + $0x2a50] sm:$0xff]  ;;  %v1424_v50 = vld [vmem:[%s19893_s1 + $0x2ac8] sm:$0xff] }
 0x2bc   :  { %10534 = vmatprep.subr.mxu0 %v1358_v52  ;;  %10569 = vmatprep.subr.mxu1 %v1390_v53  ;;  %v1441_v49 = vld [vmem:[%s19893_s1 + $0x2b50] sm:$0xff]  ;;  %v1456_v52 = vld [vmem:[%s19893_s1 + $0x2bc8] sm:$0xff] }
 0x2bd   :  { %10535 = vmatpush3.msra.mxu0 %v1342_v54  ;;  %10570 = vmatpush3.msra.mxu1 %v1374_v55  ;;  %v1408_v53 = vld [vmem:[%s19893_s1 + $0x2a48] sm:$0xff]  ;;  %v1423_v55 = vld [vmem:[%s19893_s1 + $0x2ac0] sm:$0xff] }
 0x2be   :  { %10536 = vmatprep.subr.mxu0 %v1357_v56  ;;  %10571 = vmatprep.subr.mxu1 %v1389_v57  ;;  %v1440_v54 = vld [vmem:[%s19893_s1 + $0x2b48] sm:$0xff]  ;;  %v1455_v56 = vld [vmem:[%s19893_s1 + $0x2bc0] sm:$0xff] }
 0x2bf   :  { %10537 = vmatpush3.msra.mxu0 %v1341_v58  ;;  %10572 = vmatpush3.msra.mxu1 %v1373_v59  ;;  %v1407_v57 = vld [vmem:[%s19893_s1 + $0x2a40] sm:$0xff]  ;;  %v1422_v59 = vld [vmem:[%s19893_s1 + $0x2ab8] sm:$0xff] }
 0x2c0   :  { %10538 = vmatprep.subr.mxu0 %v1356_v60  ;;  %10573 = vmatprep.subr.mxu1 %v1388_v61  ;;  %v1439_v58 = vld [vmem:[%s19893_s1 + $0x2b40] sm:$0xff]  ;;  %v1454_v60 = vld [vmem:[%s19893_s1 + $0x2bb8] sm:$0xff] }
 0x2c1   :  { %10539 = vmatpush3.msra.mxu0 %v1340_v62  ;;  %10574 = vmatpush3.msra.mxu1 %v1372_v63  ;;  %v1406_v61 = vld [vmem:[%s19893_s1 + $0x2a38] sm:$0xff]  ;;  %v1421_v63 = vld [vmem:[%s19893_s1 + $0x2ab0] sm:$0xff] }
 0x2c2   :  { %10540 = vmatprep.subr.mxu0 %v1355_v1  ;;  %10575 = vmatprep.subr.mxu1 %v1387_v2  ;;  %v1438_v62 = vld [vmem:[%s19893_s1 + $0x2b38] sm:$0xff]  ;;  %v1405_v1 = vld [vmem:[%s19893_s1 + $0x2a30] sm:$0xff] }
 0x2c3   :  { %10541 = vmatpush3.msra.mxu0 %v1339_v3  ;;  %10576 = vmatpush3.msra.mxu1 %v1371_v4  ;;  %v1437_v2 = vld [vmem:[%s19893_s1 + $0x2b30] sm:$0xff]  ;;  %v1420_v3 = vld [vmem:[%s19893_s1 + $0x2aa8] sm:$0xff] }
 0x2c4   :  { %10542 = vmatprep.subr.mxu0 %v1354_v5  ;;  %10577 = vmatprep.subr.mxu1 %v1386_v6  ;;  %v1452_v4 = vld [vmem:[%s19893_s1 + $0x2ba8] sm:$0xff] }
 0x2c5   :  { %10543 = vmatpush3.msra.mxu0 %v1338_v8  ;;  %10578 = vmatpush3.msra.mxu1 %v1370_v9  ;;  %v1404_v5 = vld [vmem:[%s19893_s1 + $0x2a28] sm:$0xff]  ;;  %v1419_v8 = vld [vmem:[%s19893_s1 + $0x2aa0] sm:$0xff] }
 0x2c6   :  { %10544 = vmatprep.subr.mxu0 %v1353_v10  ;;  %10579 = vmatprep.subr.mxu1 %v1385_v11  ;;  %v1436_v6 = vld [vmem:[%s19893_s1 + $0x2b28] sm:$0xff]  ;;  %v1451_v9 = vld [vmem:[%s19893_s1 + $0x2ba0] sm:$0xff] }
 0x2c7   :  { %10545 = vmatpush3.msra.mxu0 %v1337_v13  ;;  %10580 = vmatpush3.msra.mxu1 %v1369_v14  ;;  %v1403_v10 = vld [vmem:[%s19893_s1 + $0x2a20] sm:$0xff]  ;;  %v1450_v13 = vld [vmem:[%s19893_s1 + $0x2b98] sm:$0xff]  ;;  %v3019_v14 = vcombine.high %v36_v7, %v36_v7 }
 0x2c8   :  { %10546 = vmatprep.subr.mxu0 %v1352_v15  ;;  %10581 = vmatprep.subr.mxu1 %v1384_v16  ;;  %v1435_v11 = vld [vmem:[%s19893_s1 + $0x2b20] sm:$0xff]  ;;  %v1402_v15 = vld [vmem:[%s19893_s1 + $0x2a18] sm:$0xff] }
 0x2c9   :  { %10547 = vmatpush3.msra.mxu0 %v1336_v18  ;;  %10582 = vmatpush3.msra.mxu1 %v1368_v19  ;;  %v1434_v16 = vld [vmem:[%s19893_s1 + $0x2b18] sm:$0xff]  ;;  %v1449_v18 = vld [vmem:[%s19893_s1 + $0x2b90] sm:$0xff]  ;;  %v3026_v19 = vrot.slane %v36_v7, %v12142_v51 }
 0x2ca   :  { %10548 = vmatprep.subr.mxu0 %v1351_v20  ;;  %10583 = vmatprep.subr.mxu1 %v1383_v21  ;;  %v1401_v20 = vld [vmem:[%s19893_s1 + $0x2a10] sm:$0xff] }
 0x2cb   :  { %10549 = vmatpush3.msra.mxu0 %v1335_v23  ;;  %6366 = vmatprep.mubr.f32.mxu0 %v3017_v22  ;;  %v1433_v21 = vld [vmem:[%s19893_s1 + $0x2b10] sm:$0xff]  ;;  %v1416_v22 = vld [vmem:[%s19893_s1 + $0x2a88] sm:$0xff] }
 0x2cc   :  { %10584 = vmatpush3.msra.mxu1 %v1367_v24  ;;  %6367 = vmatmul.mubr.f32.vlgmr.msra.gmra.mxu0 %v3009_v12  ;;  %v1418_v12 = vld [vmem:[%s19893_s1 + $0x2a98] sm:$0xff]  ;;  %v1448_v23 = vld [vmem:[%s19893_s1 + $0x2b88] sm:$0xff]  ;;  %v3033_v24 = vrot.slane %v3019_v14, %v12142_v51  ;;  %v1517_v7 = vld [vmem:[%s19893_s1 + $0x2db0] sm:$0xff] }
 0x2cd   :  { %6436 = vmatprep.mubr.f32.mxu1 %v3018_v25  ;;  %10588 = vmatprep.subr.mxu0 %v1430_v26  ;;  %v1400_v25 = vld [vmem:[%s19893_s1 + $0x2a08] sm:$0xff]  ;;  %v37_v14 = vld [vmem:[%s19892_s0 + $0xb0] sm:$0xff] }
 0x2ce   :  { %10623 = vmatprep.subr.mxu1 %v1462_v27  ;;  %6437 = vmatmul.mubr.f32.vlgmr.msra.gmra.mxu1 %v3016_v17  ;;  %v1417_v17 = vld [vmem:[%s19893_s1 + $0x2a90] sm:$0xff]  ;;  %v1432_v26 = vld [vmem:[%s19893_s1 + $0x2b08] sm:$0xff]  ;;  %v1415_v27 = vld [vmem:[%s19893_s1 + $0x2a80] sm:$0xff] }
 0x2cf   :  { %10589 = vmatpush3.msra.mxu0 %v1414_v28  ;;  %10624 = vmatpush3.msra.mxu1 %v1446_v29  ;;  %v1447_v28 = vld [vmem:[%s19893_s1 + $0x2b80] sm:$0xff]  ;;  %v3034_v29 = vcombine.high %v3026_v19, %v3026_v19 }
 0x2d0   :  { %10590 = vmatprep.subr.mxu0 %v1429_v30  ;;  %10625 = vmatprep.subr.mxu1 %v1461_v31  ;;  %v1399_v30 = vld [vmem:[%s19893_s1 + $0x2a00] sm:$0xff] }
 0x2d1   :  { %10591 = vmatpush3.msra.mxu0 %v1413_v32  ;;  %10626 = vmatpush3.msra.mxu1 %v1445_v33  ;;  %v1431_v31 = vld [vmem:[%s19893_s1 + $0x2b00] sm:$0xff]  ;;  %v3035_v32 = vcombine.high %v3033_v24, %v3033_v24  ;;  %v1494_v33 = vld [vmem:[%s19893_s1 + $0x2cf8] sm:$0xff] }
 0x2d2   :  { %10592 = vmatprep.subr.mxu0 %v1428_v34  ;;  %10627 = vmatprep.subr.mxu1 %v1460_v35  ;;  %v1526_v34 = vld [vmem:[%s19893_s1 + $0x2df8] sm:$0xff] }
 0x2d3   :  { %10593 = vmatpush3.msra.mxu0 %v1412_v36  ;;  %10628 = vmatpush3.msra.mxu1 %v1444_v37  ;;  %v1478_v35 = vld [vmem:[%s19893_s1 + $0x2c78] sm:$0xff]  ;;  %v1493_v37 = vld [vmem:[%s19893_s1 + $0x2cf0] sm:$0xff] }
 0x2d4   :  { %10594 = vmatprep.subr.mxu0 %v1427_v38  ;;  %10629 = vmatprep.subr.mxu1 %v1459_v39  ;;  %v1510_v36 = vld [vmem:[%s19893_s1 + $0x2d78] sm:$0xff]  ;;  %v1525_v38 = vld [vmem:[%s19893_s1 + $0x2df0] sm:$0xff] }
 0x2d5   :  { %10595 = vmatpush3.msra.mxu0 %v1411_v40  ;;  %10630 = vmatpush3.msra.mxu1 %v1443_v41  ;;  %v1477_v39 = vld [vmem:[%s19893_s1 + $0x2c70] sm:$0xff]  ;;  %v1492_v41 = vld [vmem:[%s19893_s1 + $0x2ce8] sm:$0xff] }
 0x2d6   :  { %10596 = vmatprep.subr.mxu0 %v1426_v42  ;;  %10631 = vmatprep.subr.mxu1 %v1458_v43  ;;  %v1509_v40 = vld [vmem:[%s19893_s1 + $0x2d70] sm:$0xff]  ;;  %v1524_v42 = vld [vmem:[%s19893_s1 + $0x2de8] sm:$0xff] }
 0x2d7   :  { %10597 = vmatpush3.msra.mxu0 %v1410_v44  ;;  %10632 = vmatpush3.msra.mxu1 %v1442_v45  ;;  %v1476_v43 = vld [vmem:[%s19893_s1 + $0x2c68] sm:$0xff]  ;;  %v1491_v45 = vld [vmem:[%s19893_s1 + $0x2ce0] sm:$0xff] }
 0x2d8   :  { %10598 = vmatprep.subr.mxu0 %v1425_v46  ;;  %10633 = vmatprep.subr.mxu1 %v1457_v47  ;;  %v1508_v44 = vld [vmem:[%s19893_s1 + $0x2d68] sm:$0xff]  ;;  %v1523_v46 = vld [vmem:[%s19893_s1 + $0x2de0] sm:$0xff] }
 0x2d9   :  { %10599 = vmatpush3.msra.mxu0 %v1409_v48  ;;  %10634 = vmatpush3.msra.mxu1 %v1441_v49  ;;  %v1475_v47 = vld [vmem:[%s19893_s1 + $0x2c60] sm:$0xff]  ;;  %v1490_v49 = vld [vmem:[%s19893_s1 + $0x2cd8] sm:$0xff] }
 0x2da   :  { %10600 = vmatprep.subr.mxu0 %v1424_v50  ;;  %10635 = vmatprep.subr.mxu1 %v1456_v52  ;;  %v1507_v48 = vld [vmem:[%s19893_s1 + $0x2d60] sm:$0xff]  ;;  %v1522_v50 = vld [vmem:[%s19893_s1 + $0x2dd8] sm:$0xff] }
 0x2db   :  { %10601 = vmatpush3.msra.mxu0 %v1408_v53  ;;  %10636 = vmatpush3.msra.mxu1 %v1440_v54  ;;  %v1474_v52 = vld [vmem:[%s19893_s1 + $0x2c58] sm:$0xff]  ;;  %v1489_v54 = vld [vmem:[%s19893_s1 + $0x2cd0] sm:$0xff] }
 0x2dc   :  { %10602 = vmatprep.subr.mxu0 %v1423_v55  ;;  %10637 = vmatprep.subr.mxu1 %v1455_v56  ;;  %v1506_v53 = vld [vmem:[%s19893_s1 + $0x2d58] sm:$0xff]  ;;  %v1521_v55 = vld [vmem:[%s19893_s1 + $0x2dd0] sm:$0xff] }
 0x2dd   :  { %10603 = vmatpush3.msra.mxu0 %v1407_v57  ;;  %10638 = vmatpush3.msra.mxu1 %v1439_v58  ;;  %v1473_v56 = vld [vmem:[%s19893_s1 + $0x2c50] sm:$0xff]  ;;  %v1488_v58 = vld [vmem:[%s19893_s1 + $0x2cc8] sm:$0xff] }
 0x2de   :  { %10604 = vmatprep.subr.mxu0 %v1422_v59  ;;  %10639 = vmatprep.subr.mxu1 %v1454_v60  ;;  %v1505_v57 = vld [vmem:[%s19893_s1 + $0x2d50] sm:$0xff]  ;;  %v1520_v59 = vld [vmem:[%s19893_s1 + $0x2dc8] sm:$0xff] }
 0x2df   :  { %10605 = vmatpush3.msra.mxu0 %v1406_v61  ;;  %10640 = vmatpush3.msra.mxu1 %v1438_v62  ;;  %v1472_v60 = vld [vmem:[%s19893_s1 + $0x2c48] sm:$0xff]  ;;  %v1487_v62 = vld [vmem:[%s19893_s1 + $0x2cc0] sm:$0xff] }
 0x2e0   :  { %10606 = vmatprep.subr.mxu0 %v1421_v63  ;;  %10641 = vmatprep.subr.mxu1 %v1453_v0  ;;  %v1504_v61 = vld [vmem:[%s19893_s1 + $0x2d48] sm:$0xff]  ;;  %v1519_v63 = vld [vmem:[%s19893_s1 + $0x2dc0] sm:$0xff] }
 0x2e1   :  { %10607 = vmatpush3.msra.mxu0 %v1405_v1  ;;  %10642 = vmatpush3.msra.mxu1 %v1437_v2  ;;  %v1471_v0 = vld [vmem:[%s19893_s1 + $0x2c40] sm:$0xff]  ;;  %v1486_v2 = vld [vmem:[%s19893_s1 + $0x2cb8] sm:$0xff] }
 0x2e2   :  { %10608 = vmatprep.subr.mxu0 %v1420_v3  ;;  %10643 = vmatprep.subr.mxu1 %v1452_v4  ;;  %v1503_v1 = vld [vmem:[%s19893_s1 + $0x2d40] sm:$0xff]  ;;  %v1518_v3 = vld [vmem:[%s19893_s1 + $0x2db8] sm:$0xff] }
 0x2e3   :  { %10609 = vmatpush3.msra.mxu0 %v1404_v5  ;;  %10644 = vmatpush3.msra.mxu1 %v1436_v6  ;;  %v1470_v4 = vld [vmem:[%s19893_s1 + $0x2c38] sm:$0xff]  ;;  %v1485_v6 = vld [vmem:[%s19893_s1 + $0x2cb0] sm:$0xff] }
 0x2e4   :  { %10610 = vmatprep.subr.mxu0 %v1419_v8  ;;  %10645 = vmatprep.subr.mxu1 %v1451_v9  ;;  %v1502_v5 = vld [vmem:[%s19893_s1 + $0x2d38] sm:$0xff]  ;;  %v1469_v8 = vld [vmem:[%s19893_s1 + $0x2c30] sm:$0xff] }
 0x2e5   :  { %10611 = vmatpush3.msra.mxu0 %v1403_v10  ;;  %10646 = vmatpush3.msra.mxu1 %v1435_v11  ;;  %v1501_v9 = vld [vmem:[%s19893_s1 + $0x2d30] sm:$0xff]  ;;  %v1484_v10 = vld [vmem:[%s19893_s1 + $0x2ca8] sm:$0xff] }
 0x2e6   :  { %10612 = vmatprep.subr.mxu0 %v1418_v12  ;;  %10647 = vmatprep.subr.mxu1 %v1450_v13  ;;  %v1516_v11 = vld [vmem:[%s19893_s1 + $0x2da8] sm:$0xff] }
 0x2e7   :  { %10613 = vmatpush3.msra.mxu0 %v1402_v15  ;;  %10648 = vmatpush3.msra.mxu1 %v1434_v16  ;;  %v1468_v12 = vld [vmem:[%s19893_s1 + $0x2c28] sm:$0xff]  ;;  %v1483_v15 = vld [vmem:[%s19893_s1 + $0x2ca0] sm:$0xff] }
 0x2e8   :  { %10614 = vmatprep.subr.mxu0 %v1417_v17  ;;  %10649 = vmatprep.subr.mxu1 %v1449_v18  ;;  %v1500_v13 = vld [vmem:[%s19893_s1 + $0x2d28] sm:$0xff]  ;;  %v1515_v16 = vld [vmem:[%s19893_s1 + $0x2da0] sm:$0xff] }
 0x2e9   :  { %10615 = vmatpush3.msra.mxu0 %v1401_v20  ;;  %10650 = vmatpush3.msra.mxu1 %v1433_v21  ;;  %v1467_v17 = vld [vmem:[%s19893_s1 + $0x2c20] sm:$0xff]  ;;  %v1514_v20 = vld [vmem:[%s19893_s1 + $0x2d98] sm:$0xff]  ;;  %v3036_v21 = vcombine.high %v37_v14, %v37_v14 }
 0x2ea   :  { %10616 = vmatprep.subr.mxu0 %v1416_v22  ;;  %10651 = vmatprep.subr.mxu1 %v1448_v23  ;;  %v1499_v18 = vld [vmem:[%s19893_s1 + $0x2d20] sm:$0xff]  ;;  %v1466_v22 = vld [vmem:[%s19893_s1 + $0x2c18] sm:$0xff] }
 0x2eb   :  { %10617 = vmatpush3.msra.mxu0 %v1400_v25  ;;  %10652 = vmatpush3.msra.mxu1 %v1432_v26  ;;  %v1498_v23 = vld [vmem:[%s19893_s1 + $0x2d18] sm:$0xff]  ;;  %v1513_v25 = vld [vmem:[%s19893_s1 + $0x2d90] sm:$0xff]  ;;  %v3043_v26 = vrot.slane %v37_v14, %v12142_v51 }
 0x2ec   :  { %10618 = vmatprep.subr.mxu0 %v1415_v27  ;;  %10653 = vmatprep.subr.mxu1 %v1447_v28  ;;  %v1465_v27 = vld [vmem:[%s19893_s1 + $0x2c10] sm:$0xff] }
 0x2ed   :  { %10619 = vmatpush3.msra.mxu0 %v1399_v30  ;;  %6506 = vmatprep.mubr.f32.mxu0 %v3034_v29  ;;  %v1497_v28 = vld [vmem:[%s19893_s1 + $0x2d10] sm:$0xff]  ;;  %v1480_v29 = vld [vmem:[%s19893_s1 + $0x2c88] sm:$0xff] }
 0x2ee   :  { %10654 = vmatpush3.msra.mxu1 %v1431_v31  ;;  %6507 = vmatmul.mubr.f32.vlgmr.msra.gmra.mxu0 %v3026_v19  ;;  %v1482_v19 = vld [vmem:[%s19893_s1 + $0x2c98] sm:$0xff]  ;;  %v1512_v30 = vld [vmem:[%s19893_s1 + $0x2d88] sm:$0xff]  ;;  %v3050_v31 = vrot.slane %v3036_v21, %v12142_v51  ;;  %v1581_v14 = vld [vmem:[%s19893_s1 + $0x2fb0] sm:$0xff] }
 0x2ef   :  { %6576 = vmatprep.mubr.f32.mxu1 %v3035_v32  ;;  %10658 = vmatprep.subr.mxu0 %v1494_v33  ;;  %v1464_v32 = vld [vmem:[%s19893_s1 + $0x2c08] sm:$0xff]  ;;  %v38_v21 = vld [vmem:[%s19892_s0 + $0xb8] sm:$0xff] }
 0x2f0   :  { %10693 = vmatprep.subr.mxu1 %v1526_v34  ;;  %6577 = vmatmul.mubr.f32.vlgmr.msra.gmra.mxu1 %v3033_v24  ;;  %v1481_v24 = vld [vmem:[%s19893_s1 + $0x2c90] sm:$0xff]  ;;  %v1496_v33 = vld [vmem:[%s19893_s1 + $0x2d08] sm:$0xff]  ;;  %v1479_v34 = vld [vmem:[%s19893_s1 + $0x2c80] sm:$0xff] }
 0x2f1   :  { %10659 = vmatpush3.msra.mxu0 %v1478_v35  ;;  %10694 = vmatpush3.msra.mxu1 %v1510_v36  ;;  %v1511_v35 = vld [vmem:[%s19893_s1 + $0x2d80] sm:$0xff]  ;;  %v3051_v36 = vcombine.high %v3043_v26, %v3043_v26 }
 0x2f2   :  { %10660 = vmatprep.subr.mxu0 %v1493_v37  ;;  %10695 = vmatprep.subr.mxu1 %v1525_v38  ;;  %v1463_v37 = vld [vmem:[%s19893_s1 + $0x2c00] sm:$0xff] }
 0x2f3   :  { %10661 = vmatpush3.msra.mxu0 %v1477_v39  ;;  %10696 = vmatpush3.msra.mxu1 %v1509_v40  ;;  %v1495_v38 = vld [vmem:[%s19893_s1 + $0x2d00] sm:$0xff]  ;;  %v3052_v39 = vcombine.high %v3050_v31, %v3050_v31  ;;  %v1558_v40 = vld [vmem:[%s19893_s1 + $0x2ef8] sm:$0xff] }
 0x2f4   :  { %10662 = vmatprep.subr.mxu0 %v1492_v41  ;;  %10697 = vmatprep.subr.mxu1 %v1524_v42  ;;  %v1590_v41 = vld [vmem:[%s19893_s1 + $0x2ff8] sm:$0xff] }
 0x2f5   :  { %10663 = vmatpush3.msra.mxu0 %v1476_v43  ;;  %10698 = vmatpush3.msra.mxu1 %v1508_v44  ;;  %v1542_v42 = vld [vmem:[%s19893_s1 + $0x2e78] sm:$0xff]  ;;  %v1557_v44 = vld [vmem:[%s19893_s1 + $0x2ef0] sm:$0xff] }
 0x2f6   :  { %10664 = vmatprep.subr.mxu0 %v1491_v45  ;;  %10699 = vmatprep.subr.mxu1 %v1523_v46  ;;  %v1574_v43 = vld [vmem:[%s19893_s1 + $0x2f78] sm:$0xff]  ;;  %v1589_v45 = vld [vmem:[%s19893_s1 + $0x2ff0] sm:$0xff] }
 0x2f7   :  { %10665 = vmatpush3.msra.mxu0 %v1475_v47  ;;  %10700 = vmatpush3.msra.mxu1 %v1507_v48  ;;  %v1541_v46 = vld [vmem:[%s19893_s1 + $0x2e70] sm:$0xff]  ;;  %v1556_v48 = vld [vmem:[%s19893_s1 + $0x2ee8] sm:$0xff] }
 0x2f8   :  { %10666 = vmatprep.subr.mxu0 %v1490_v49  ;;  %10701 = vmatprep.subr.mxu1 %v1522_v50  ;;  %v1573_v47 = vld [vmem:[%s19893_s1 + $0x2f70] sm:$0xff]  ;;  %v1588_v49 = vld [vmem:[%s19893_s1 + $0x2fe8] sm:$0xff] }
 0x2f9   :  { %10667 = vmatpush3.msra.mxu0 %v1474_v52  ;;  %10702 = vmatpush3.msra.mxu1 %v1506_v53  ;;  %v1540_v50 = vld [vmem:[%s19893_s1 + $0x2e68] sm:$0xff]  ;;  %v1555_v53 = vld [vmem:[%s19893_s1 + $0x2ee0] sm:$0xff] }
 0x2fa   :  { %10668 = vmatprep.subr.mxu0 %v1489_v54  ;;  %10703 = vmatprep.subr.mxu1 %v1521_v55  ;;  %v1572_v52 = vld [vmem:[%s19893_s1 + $0x2f68] sm:$0xff]  ;;  %v1587_v54 = vld [vmem:[%s19893_s1 + $0x2fe0] sm:$0xff] }
 0x2fb   :  { %10669 = vmatpush3.msra.mxu0 %v1473_v56  ;;  %10704 = vmatpush3.msra.mxu1 %v1505_v57  ;;  %v1539_v55 = vld [vmem:[%s19893_s1 + $0x2e60] sm:$0xff]  ;;  %v1554_v57 = vld [vmem:[%s19893_s1 + $0x2ed8] sm:$0xff] }
 0x2fc   :  { %10670 = vmatprep.subr.mxu0 %v1488_v58  ;;  %10705 = vmatprep.subr.mxu1 %v1520_v59  ;;  %v1571_v56 = vld [vmem:[%s19893_s1 + $0x2f60] sm:$0xff]  ;;  %v1586_v58 = vld [vmem:[%s19893_s1 + $0x2fd8] sm:$0xff] }
 0x2fd   :  { %10671 = vmatpush3.msra.mxu0 %v1472_v60  ;;  %10706 = vmatpush3.msra.mxu1 %v1504_v61  ;;  %v1538_v59 = vld [vmem:[%s19893_s1 + $0x2e58] sm:$0xff]  ;;  %v1553_v61 = vld [vmem:[%s19893_s1 + $0x2ed0] sm:$0xff] }
 0x2fe   :  { %10672 = vmatprep.subr.mxu0 %v1487_v62  ;;  %10707 = vmatprep.subr.mxu1 %v1519_v63  ;;  %v1570_v60 = vld [vmem:[%s19893_s1 + $0x2f58] sm:$0xff]  ;;  %v1585_v62 = vld [vmem:[%s19893_s1 + $0x2fd0] sm:$0xff] }
 0x2ff   :  { %10673 = vmatpush3.msra.mxu0 %v1471_v0  ;;  %10708 = vmatpush3.msra.mxu1 %v1503_v1  ;;  %v1537_v63 = vld [vmem:[%s19893_s1 + $0x2e50] sm:$0xff]  ;;  %v1552_v1 = vld [vmem:[%s19893_s1 + $0x2ec8] sm:$0xff] }
 0x300   :  { %10674 = vmatprep.subr.mxu0 %v1486_v2  ;;  %10709 = vmatprep.subr.mxu1 %v1518_v3  ;;  %v1569_v0 = vld [vmem:[%s19893_s1 + $0x2f50] sm:$0xff]  ;;  %v1584_v2 = vld [vmem:[%s19893_s1 + $0x2fc8] sm:$0xff] }
 0x301   :  { %10675 = vmatpush3.msra.mxu0 %v1470_v4  ;;  %10710 = vmatpush3.msra.mxu1 %v1502_v5  ;;  %v1536_v3 = vld [vmem:[%s19893_s1 + $0x2e48] sm:$0xff]  ;;  %v1551_v5 = vld [vmem:[%s19893_s1 + $0x2ec0] sm:$0xff] }
 0x302   :  { %10676 = vmatprep.subr.mxu0 %v1485_v6  ;;  %10711 = vmatprep.subr.mxu1 %v1517_v7  ;;  %v1568_v4 = vld [vmem:[%s19893_s1 + $0x2f48] sm:$0xff]  ;;  %v1583_v6 = vld [vmem:[%s19893_s1 + $0x2fc0] sm:$0xff] }
 0x303   :  { %10677 = vmatpush3.msra.mxu0 %v1469_v8  ;;  %10712 = vmatpush3.msra.mxu1 %v1501_v9  ;;  %v1535_v7 = vld [vmem:[%s19893_s1 + $0x2e40] sm:$0xff]  ;;  %v1550_v9 = vld [vmem:[%s19893_s1 + $0x2eb8] sm:$0xff] }
 0x304   :  { %10678 = vmatprep.subr.mxu0 %v1484_v10  ;;  %10713 = vmatprep.subr.mxu1 %v1516_v11  ;;  %v1567_v8 = vld [vmem:[%s19893_s1 + $0x2f40] sm:$0xff]  ;;  %v1582_v10 = vld [vmem:[%s19893_s1 + $0x2fb8] sm:$0xff] }
 0x305   :  { %10679 = vmatpush3.msra.mxu0 %v1468_v12  ;;  %10714 = vmatpush3.msra.mxu1 %v1500_v13  ;;  %v1534_v11 = vld [vmem:[%s19893_s1 + $0x2e38] sm:$0xff]  ;;  %v1549_v13 = vld [vmem:[%s19893_s1 + $0x2eb0] sm:$0xff] }
 0x306   :  { %10680 = vmatprep.subr.mxu0 %v1483_v15  ;;  %10715 = vmatprep.subr.mxu1 %v1515_v16  ;;  %v1566_v12 = vld [vmem:[%s19893_s1 + $0x2f38] sm:$0xff]  ;;  %v1533_v15 = vld [vmem:[%s19893_s1 + $0x2e30] sm:$0xff] }
 0x307   :  { %10681 = vmatpush3.msra.mxu0 %v1467_v17  ;;  %10716 = vmatpush3.msra.mxu1 %v1499_v18  ;;  %v1565_v16 = vld [vmem:[%s19893_s1 + $0x2f30] sm:$0xff]  ;;  %v1548_v17 = vld [vmem:[%s19893_s1 + $0x2ea8] sm:$0xff] }
 0x308   :  { %10682 = vmatprep.subr.mxu0 %v1482_v19  ;;  %10717 = vmatprep.subr.mxu1 %v1514_v20  ;;  %v1580_v18 = vld [vmem:[%s19893_s1 + $0x2fa8] sm:$0xff] }
 0x309   :  { %10683 = vmatpush3.msra.mxu0 %v1466_v22  ;;  %10718 = vmatpush3.msra.mxu1 %v1498_v23  ;;  %v1532_v19 = vld [vmem:[%s19893_s1 + $0x2e28] sm:$0xff]  ;;  %v1547_v22 = vld [vmem:[%s19893_s1 + $0x2ea0] sm:$0xff] }
 0x30a   :  { %10684 = vmatprep.subr.mxu0 %v1481_v24  ;;  %10719 = vmatprep.subr.mxu1 %v1513_v25  ;;  %v1564_v20 = vld [vmem:[%s19893_s1 + $0x2f28] sm:$0xff]  ;;  %v1579_v23 = vld [vmem:[%s19893_s1 + $0x2fa0] sm:$0xff] }
 0x30b   :  { %10685 = vmatpush3.msra.mxu0 %v1465_v27  ;;  %10720 = vmatpush3.msra.mxu1 %v1497_v28  ;;  %v1531_v24 = vld [vmem:[%s19893_s1 + $0x2e20] sm:$0xff]  ;;  %v1578_v27 = vld [vmem:[%s19893_s1 + $0x2f98] sm:$0xff]  ;;  %v3053_v28 = vcombine.high %v38_v21, %v38_v21 }
 0x30c   :  { %10686 = vmatprep.subr.mxu0 %v1480_v29  ;;  %10721 = vmatprep.subr.mxu1 %v1512_v30  ;;  %v1563_v25 = vld [vmem:[%s19893_s1 + $0x2f20] sm:$0xff]  ;;  %v1530_v29 = vld [vmem:[%s19893_s1 + $0x2e18] sm:$0xff] }
 0x30d   :  { %10687 = vmatpush3.msra.mxu0 %v1464_v32  ;;  %10722 = vmatpush3.msra.mxu1 %v1496_v33  ;;  %v1562_v30 = vld [vmem:[%s19893_s1 + $0x2f18] sm:$0xff]  ;;  %v1577_v32 = vld [vmem:[%s19893_s1 + $0x2f90] sm:$0xff]  ;;  %v3060_v33 = vrot.slane %v38_v21, %v12142_v51 }
 0x30e   :  { %10688 = vmatprep.subr.mxu0 %v1479_v34  ;;  %10723 = vmatprep.subr.mxu1 %v1511_v35  ;;  %v1529_v34 = vld [vmem:[%s19893_s1 + $0x2e10] sm:$0xff] }
 0x30f   :  { %10689 = vmatpush3.msra.mxu0 %v1463_v37  ;;  %6646 = vmatprep.mubr.f32.mxu0 %v3051_v36  ;;  %v1561_v35 = vld [vmem:[%s19893_s1 + $0x2f10] sm:$0xff]  ;;  %v1544_v36 = vld [vmem:[%s19893_s1 + $0x2e88] sm:$0xff] }
 0x310   :  { %10724 = vmatpush3.msra.mxu1 %v1495_v38  ;;  %6647 = vmatmul.mubr.f32.vlgmr.msra.gmra.mxu0 %v3043_v26  ;;  %v1546_v26 = vld [vmem:[%s19893_s1 + $0x2e98] sm:$0xff]  ;;  %v1576_v37 = vld [vmem:[%s19893_s1 + $0x2f88] sm:$0xff]  ;;  %v3067_v38 = vrot.slane %v3053_v28, %v12142_v51  ;;  %v1645_v21 = vld [vmem:[%s19893_s1 + $0x31b0] sm:$0xff] }
 0x311   :  { %6716 = vmatprep.mubr.f32.mxu1 %v3052_v39  ;;  %10728 = vmatprep.subr.mxu0 %v1558_v40  ;;  %v1528_v39 = vld [vmem:[%s19893_s1 + $0x2e08] sm:$0xff]  ;;  %v39_v28 = vld [vmem:[%s19892_s0 + $0xc0] sm:$0xff] }
 0x312   :  { %10763 = vmatprep.subr.mxu1 %v1590_v41  ;;  %6717 = vmatmul.mubr.f32.vlgmr.msra.gmra.mxu1 %v3050_v31  ;;  %v1545_v31 = vld [vmem:[%s19893_s1 + $0x2e90] sm:$0xff]  ;;  %v1560_v40 = vld [vmem:[%s19893_s1 + $0x2f08] sm:$0xff]  ;;  %v1543_v41 = vld [vmem:[%s19893_s1 + $0x2e80] sm:$0xff] }
 0x313   :  { %10729 = vmatpush3.msra.mxu0 %v1542_v42  ;;  %10764 = vmatpush3.msra.mxu1 %v1574_v43  ;;  %v1575_v42 = vld [vmem:[%s19893_s1 + $0x2f80] sm:$0xff]  ;;  %v3068_v43 = vcombine.high %v3060_v33, %v3060_v33 }
 0x314   :  { %10730 = vmatprep.subr.mxu0 %v1557_v44  ;;  %10765 = vmatprep.subr.mxu1 %v1589_v45  ;;  %v1527_v44 = vld [vmem:[%s19893_s1 + $0x2e00] sm:$0xff] }
 0x315   :  { %10731 = vmatpush3.msra.mxu0 %v1541_v46  ;;  %10766 = vmatpush3.msra.mxu1 %v1573_v47  ;;  %v1559_v45 = vld [vmem:[%s19893_s1 + $0x2f00] sm:$0xff]  ;;  %v3069_v46 = vcombine.high %v3067_v38, %v3067_v38  ;;  %v1622_v47 = vld [vmem:[%s19893_s1 + $0x30f8] sm:$0xff] }
 0x316   :  { %10732 = vmatprep.subr.mxu0 %v1556_v48  ;;  %10767 = vmatprep.subr.mxu1 %v1588_v49  ;;  %v1654_v48 = vld [vmem:[%s19893_s1 + $0x31f8] sm:$0xff] }
 0x317   :  { %10733 = vmatpush3.msra.mxu0 %v1540_v50  ;;  %10768 = vmatpush3.msra.mxu1 %v1572_v52  ;;  %v1606_v49 = vld [vmem:[%s19893_s1 + $0x3078] sm:$0xff]  ;;  %v1621_v52 = vld [vmem:[%s19893_s1 + $0x30f0] sm:$0xff] }
 0x318   :  { %10734 = vmatprep.subr.mxu0 %v1555_v53  ;;  %10769 = vmatprep.subr.mxu1 %v1587_v54  ;;  %v1638_v50 = vld [vmem:[%s19893_s1 + $0x3178] sm:$0xff]  ;;  %v1653_v53 = vld [vmem:[%s19893_s1 + $0x31f0] sm:$0xff] }
 0x319   :  { %10735 = vmatpush3.msra.mxu0 %v1539_v55  ;;  %10770 = vmatpush3.msra.mxu1 %v1571_v56  ;;  %v1605_v54 = vld [vmem:[%s19893_s1 + $0x3070] sm:$0xff]  ;;  %v1620_v56 = vld [vmem:[%s19893_s1 + $0x30e8] sm:$0xff] }
 0x31a   :  { %10736 = vmatprep.subr.mxu0 %v1554_v57  ;;  %10771 = vmatprep.subr.mxu1 %v1586_v58  ;;  %v1637_v55 = vld [vmem:[%s19893_s1 + $0x3170] sm:$0xff]  ;;  %v1652_v57 = vld [vmem:[%s19893_s1 + $0x31e8] sm:$0xff] }
 0x31b   :  { %10737 = vmatpush3.msra.mxu0 %v1538_v59  ;;  %10772 = vmatpush3.msra.mxu1 %v1570_v60  ;;  %v1604_v58 = vld [vmem:[%s19893_s1 + $0x3068] sm:$0xff]  ;;  %v1619_v60 = vld [vmem:[%s19893_s1 + $0x30e0] sm:$0xff] }
 0x31c   :  { %10738 = vmatprep.subr.mxu0 %v1553_v61  ;;  %10773 = vmatprep.subr.mxu1 %v1585_v62  ;;  %v1636_v59 = vld [vmem:[%s19893_s1 + $0x3168] sm:$0xff]  ;;  %v1651_v61 = vld [vmem:[%s19893_s1 + $0x31e0] sm:$0xff] }
 0x31d   :  { %10739 = vmatpush3.msra.mxu0 %v1537_v63  ;;  %10774 = vmatpush3.msra.mxu1 %v1569_v0  ;;  %v1603_v62 = vld [vmem:[%s19893_s1 + $0x3060] sm:$0xff]  ;;  %v1618_v0 = vld [vmem:[%s19893_s1 + $0x30d8] sm:$0xff] }
 0x31e   :  { %10740 = vmatprep.subr.mxu0 %v1552_v1  ;;  %10775 = vmatprep.subr.mxu1 %v1584_v2  ;;  %v1635_v63 = vld [vmem:[%s19893_s1 + $0x3160] sm:$0xff]  ;;  %v1650_v1 = vld [vmem:[%s19893_s1 + $0x31d8] sm:$0xff] }
 0x31f   :  { %10741 = vmatpush3.msra.mxu0 %v1536_v3  ;;  %10776 = vmatpush3.msra.mxu1 %v1568_v4  ;;  %v1602_v2 = vld [vmem:[%s19893_s1 + $0x3058] sm:$0xff]  ;;  %v1617_v4 = vld [vmem:[%s19893_s1 + $0x30d0] sm:$0xff] }
 0x320   :  { %10742 = vmatprep.subr.mxu0 %v1551_v5  ;;  %10777 = vmatprep.subr.mxu1 %v1583_v6  ;;  %v1634_v3 = vld [vmem:[%s19893_s1 + $0x3158] sm:$0xff]  ;;  %v1649_v5 = vld [vmem:[%s19893_s1 + $0x31d0] sm:$0xff] }
 0x321   :  { %10743 = vmatpush3.msra.mxu0 %v1535_v7  ;;  %10778 = vmatpush3.msra.mxu1 %v1567_v8  ;;  %v1601_v6 = vld [vmem:[%s19893_s1 + $0x3050] sm:$0xff]  ;;  %v1616_v8 = vld [vmem:[%s19893_s1 + $0x30c8] sm:$0xff] }
 0x322   :  { %10744 = vmatprep.subr.mxu0 %v1550_v9  ;;  %10779 = vmatprep.subr.mxu1 %v1582_v10  ;;  %v1633_v7 = vld [vmem:[%s19893_s1 + $0x3150] sm:$0xff]  ;;  %v1648_v9 = vld [vmem:[%s19893_s1 + $0x31c8] sm:$0xff] }
 0x323   :  { %10745 = vmatpush3.msra.mxu0 %v1534_v11  ;;  %10780 = vmatpush3.msra.mxu1 %v1566_v12  ;;  %v1600_v10 = vld [vmem:[%s19893_s1 + $0x3048] sm:$0xff]  ;;  %v1615_v12 = vld [vmem:[%s19893_s1 + $0x30c0] sm:$0xff] }
 0x324   :  { %10746 = vmatprep.subr.mxu0 %v1549_v13  ;;  %10781 = vmatprep.subr.mxu1 %v1581_v14  ;;  %v1632_v11 = vld [vmem:[%s19893_s1 + $0x3148] sm:$0xff]  ;;  %v1647_v13 = vld [vmem:[%s19893_s1 + $0x31c0] sm:$0xff] }
 0x325   :  { %10747 = vmatpush3.msra.mxu0 %v1533_v15  ;;  %10782 = vmatpush3.msra.mxu1 %v1565_v16  ;;  %v1599_v14 = vld [vmem:[%s19893_s1 + $0x3040] sm:$0xff]  ;;  %v1614_v16 = vld [vmem:[%s19893_s1 + $0x30b8] sm:$0xff] }
 0x326   :  { %10748 = vmatprep.subr.mxu0 %v1548_v17  ;;  %10783 = vmatprep.subr.mxu1 %v1580_v18  ;;  %v1631_v15 = vld [vmem:[%s19893_s1 + $0x3140] sm:$0xff]  ;;  %v1646_v17 = vld [vmem:[%s19893_s1 + $0x31b8] sm:$0xff] }
 0x327   :  { %10749 = vmatpush3.msra.mxu0 %v1532_v19  ;;  %10784 = vmatpush3.msra.mxu1 %v1564_v20  ;;  %v1598_v18 = vld [vmem:[%s19893_s1 + $0x3038] sm:$0xff]  ;;  %v1613_v20 = vld [vmem:[%s19893_s1 + $0x30b0] sm:$0xff] }
 0x328   :  { %10750 = vmatprep.subr.mxu0 %v1547_v22  ;;  %10785 = vmatprep.subr.mxu1 %v1579_v23  ;;  %v1630_v19 = vld [vmem:[%s19893_s1 + $0x3138] sm:$0xff]  ;;  %v1597_v22 = vld [vmem:[%s19893_s1 + $0x3030] sm:$0xff] }
 0x329   :  { %10751 = vmatpush3.msra.mxu0 %v1531_v24  ;;  %10786 = vmatpush3.msra.mxu1 %v1563_v25  ;;  %v1629_v23 = vld [vmem:[%s19893_s1 + $0x3130] sm:$0xff]  ;;  %v1612_v24 = vld [vmem:[%s19893_s1 + $0x30a8] sm:$0xff] }
 0x32a   :  { %10752 = vmatprep.subr.mxu0 %v1546_v26  ;;  %10787 = vmatprep.subr.mxu1 %v1578_v27  ;;  %v1644_v25 = vld [vmem:[%s19893_s1 + $0x31a8] sm:$0xff] }
 0x32b   :  { %10753 = vmatpush3.msra.mxu0 %v1530_v29  ;;  %10788 = vmatpush3.msra.mxu1 %v1562_v30  ;;  %v1596_v26 = vld [vmem:[%s19893_s1 + $0x3028] sm:$0xff]  ;;  %v1611_v29 = vld [vmem:[%s19893_s1 + $0x30a0] sm:$0xff] }
 0x32c   :  { %10754 = vmatprep.subr.mxu0 %v1545_v31  ;;  %10789 = vmatprep.subr.mxu1 %v1577_v32  ;;  %v1628_v27 = vld [vmem:[%s19893_s1 + $0x3128] sm:$0xff]  ;;  %v1643_v30 = vld [vmem:[%s19893_s1 + $0x31a0] sm:$0xff] }
 0x32d   :  { %10755 = vmatpush3.msra.mxu0 %v1529_v34  ;;  %10790 = vmatpush3.msra.mxu1 %v1561_v35  ;;  %v1595_v31 = vld [vmem:[%s19893_s1 + $0x3020] sm:$0xff]  ;;  %v1642_v34 = vld [vmem:[%s19893_s1 + $0x3198] sm:$0xff]  ;;  %v3070_v35 = vcombine.high %v39_v28, %v39_v28 }
 0x32e   :  { %10756 = vmatprep.subr.mxu0 %v1544_v36  ;;  %10791 = vmatprep.subr.mxu1 %v1576_v37  ;;  %v1627_v32 = vld [vmem:[%s19893_s1 + $0x3120] sm:$0xff]  ;;  %v1594_v36 = vld [vmem:[%s19893_s1 + $0x3018] sm:$0xff] }
 0x32f   :  { %10757 = vmatpush3.msra.mxu0 %v1528_v39  ;;  %10792 = vmatpush3.msra.mxu1 %v1560_v40  ;;  %v1626_v37 = vld [vmem:[%s19893_s1 + $0x3118] sm:$0xff]  ;;  %v1641_v39 = vld [vmem:[%s19893_s1 + $0x3190] sm:$0xff]  ;;  %v3077_v40 = vrot.slane %v39_v28, %v12142_v51 }
 0x330   :  { %10758 = vmatprep.subr.mxu0 %v1543_v41  ;;  %10793 = vmatprep.subr.mxu1 %v1575_v42  ;;  %v1593_v41 = vld [vmem:[%s19893_s1 + $0x3010] sm:$0xff] }
 0x331   :  { %10759 = vmatpush3.msra.mxu0 %v1527_v44  ;;  %6786 = vmatprep.mubr.f32.mxu0 %v3068_v43  ;;  %v1625_v42 = vld [vmem:[%s19893_s1 + $0x3110] sm:$0xff]  ;;  %v1608_v43 = vld [vmem:[%s19893_s1 + $0x3088] sm:$0xff] }
 0x332   :  { %10794 = vmatpush3.msra.mxu1 %v1559_v45  ;;  %6787 = vmatmul.mubr.f32.vlgmr.msra.gmra.mxu0 %v3060_v33  ;;  %v1610_v33 = vld [vmem:[%s19893_s1 + $0x3098] sm:$0xff]  ;;  %v1640_v44 = vld [vmem:[%s19893_s1 + $0x3188] sm:$0xff]  ;;  %v3084_v45 = vrot.slane %v3070_v35, %v12142_v51  ;;  %v1709_v28 = vld [vmem:[%s19893_s1 + $0x33b0] sm:$0xff] }
 0x333   :  { %6856 = vmatprep.mubr.f32.mxu1 %v3069_v46  ;;  %10798 = vmatprep.subr.mxu0 %v1622_v47  ;;  %v1592_v46 = vld [vmem:[%s19893_s1 + $0x3008] sm:$0xff] }
 0x334   :  { %10833 = vmatprep.subr.mxu1 %v1654_v48  ;;  %6857 = vmatmul.mubr.f32.vlgmr.msra.gmra.mxu1 %v3067_v38  ;;  %v1609_v38 = vld [vmem:[%s19893_s1 + $0x3090] sm:$0xff]  ;;  %v1624_v47 = vld [vmem:[%s19893_s1 + $0x3108] sm:$0xff]  ;;  %v1607_v48 = vld [vmem:[%s19893_s1 + $0x3080] sm:$0xff] }
 0x335   :  { %10799 = vmatpush3.msra.mxu0 %v1606_v49  ;;  %10834 = vmatpush3.msra.mxu1 %v1638_v50  ;;  %v1639_v49 = vld [vmem:[%s19893_s1 + $0x3180] sm:$0xff]  ;;  %v3085_v50 = vcombine.high %v3077_v40, %v3077_v40  ;;  %v40_v35 = vld [vmem:[%s19892_s0 + $0xc8] sm:$0xff] }
 0x336   :  { %10800 = vmatprep.subr.mxu0 %v1621_v52  ;;  %10835 = vmatprep.subr.mxu1 %v1653_v53  ;;  %v1591_v52 = vld [vmem:[%s19893_s1 + $0x3000] sm:$0xff] }
 0x337   :  { %10801 = vmatpush3.msra.mxu0 %v1605_v54  ;;  %10836 = vmatpush3.msra.mxu1 %v1637_v55  ;;  %v1623_v53 = vld [vmem:[%s19893_s1 + $0x3100] sm:$0xff]  ;;  %v3086_v54 = vcombine.high %v3084_v45, %v3084_v45  ;;  %v1686_v55 = vld [vmem:[%s19893_s1 + $0x32f8] sm:$0xff] }
 0x338   :  { %10802 = vmatprep.subr.mxu0 %v1620_v56  ;;  %10837 = vmatprep.subr.mxu1 %v1652_v57  ;;  %v1718_v56 = vld [vmem:[%s19893_s1 + $0x33f8] sm:$0xff] }
 0x339   :  { %10803 = vmatpush3.msra.mxu0 %v1604_v58  ;;  %10838 = vmatpush3.msra.mxu1 %v1636_v59  ;;  %v1670_v57 = vld [vmem:[%s19893_s1 + $0x3278] sm:$0xff]  ;;  %v1685_v59 = vld [vmem:[%s19893_s1 + $0x32f0] sm:$0xff] }
 0x33a   :  { %10804 = vmatprep.subr.mxu0 %v1619_v60  ;;  %10839 = vmatprep.subr.mxu1 %v1651_v61  ;;  %v1702_v58 = vld [vmem:[%s19893_s1 + $0x3378] sm:$0xff]  ;;  %v1717_v60 = vld [vmem:[%s19893_s1 + $0x33f0] sm:$0xff] }
 0x33b   :  { %10805 = vmatpush3.msra.mxu0 %v1603_v62  ;;  %10840 = vmatpush3.msra.mxu1 %v1635_v63  ;;  %v1669_v61 = vld [vmem:[%s19893_s1 + $0x3270] sm:$0xff]  ;;  %v1684_v63 = vld [vmem:[%s19893_s1 + $0x32e8] sm:$0xff] }
 0x33c   :  { %10806 = vmatprep.subr.mxu0 %v1618_v0  ;;  %10841 = vmatprep.subr.mxu1 %v1650_v1  ;;  %v1701_v62 = vld [vmem:[%s19893_s1 + $0x3370] sm:$0xff]  ;;  %v1716_v0 = vld [vmem:[%s19893_s1 + $0x33e8] sm:$0xff] }
 0x33d   :  { %10807 = vmatpush3.msra.mxu0 %v1602_v2  ;;  %10842 = vmatpush3.msra.mxu1 %v1634_v3  ;;  %v1668_v1 = vld [vmem:[%s19893_s1 + $0x3268] sm:$0xff]  ;;  %v1683_v3 = vld [vmem:[%s19893_s1 + $0x32e0] sm:$0xff] }
 0x33e   :  { %10808 = vmatprep.subr.mxu0 %v1617_v4  ;;  %10843 = vmatprep.subr.mxu1 %v1649_v5  ;;  %v1700_v2 = vld [vmem:[%s19893_s1 + $0x3368] sm:$0xff]  ;;  %v1715_v4 = vld [vmem:[%s19893_s1 + $0x33e0] sm:$0xff] }
 0x33f   :  { %10809 = vmatpush3.msra.mxu0 %v1601_v6  ;;  %10844 = vmatpush3.msra.mxu1 %v1633_v7  ;;  %v1667_v5 = vld [vmem:[%s19893_s1 + $0x3260] sm:$0xff]  ;;  %v1682_v7 = vld [vmem:[%s19893_s1 + $0x32d8] sm:$0xff] }
 0x340   :  { %10810 = vmatprep.subr.mxu0 %v1616_v8  ;;  %10845 = vmatprep.subr.mxu1 %v1648_v9  ;;  %v1699_v6 = vld [vmem:[%s19893_s1 + $0x3360] sm:$0xff]  ;;  %v1714_v8 = vld [vmem:[%s19893_s1 + $0x33d8] sm:$0xff] }
 0x341   :  { %10811 = vmatpush3.msra.mxu0 %v1600_v10  ;;  %10846 = vmatpush3.msra.mxu1 %v1632_v11  ;;  %v1666_v9 = vld [vmem:[%s19893_s1 + $0x3258] sm:$0xff]  ;;  %v1681_v11 = vld [vmem:[%s19893_s1 + $0x32d0] sm:$0xff] }
 0x342   :  { %10812 = vmatprep.subr.mxu0 %v1615_v12  ;;  %10847 = vmatprep.subr.mxu1 %v1647_v13  ;;  %v1698_v10 = vld [vmem:[%s19893_s1 + $0x3358] sm:$0xff]  ;;  %v1713_v12 = vld [vmem:[%s19893_s1 + $0x33d0] sm:$0xff] }
 0x343   :  { %10813 = vmatpush3.msra.mxu0 %v1599_v14  ;;  %10848 = vmatpush3.msra.mxu1 %v1631_v15  ;;  %v1665_v13 = vld [vmem:[%s19893_s1 + $0x3250] sm:$0xff]  ;;  %v1680_v15 = vld [vmem:[%s19893_s1 + $0x32c8] sm:$0xff] }
 0x344   :  { %10814 = vmatprep.subr.mxu0 %v1614_v16  ;;  %10849 = vmatprep.subr.mxu1 %v1646_v17  ;;  %v1697_v14 = vld [vmem:[%s19893_s1 + $0x3350] sm:$0xff]  ;;  %v1712_v16 = vld [vmem:[%s19893_s1 + $0x33c8] sm:$0xff] }
 0x345   :  { %10815 = vmatpush3.msra.mxu0 %v1598_v18  ;;  %10850 = vmatpush3.msra.mxu1 %v1630_v19  ;;  %v1664_v17 = vld [vmem:[%s19893_s1 + $0x3248] sm:$0xff]  ;;  %v1679_v19 = vld [vmem:[%s19893_s1 + $0x32c0] sm:$0xff] }
 0x346   :  { %10816 = vmatprep.subr.mxu0 %v1613_v20  ;;  %10851 = vmatprep.subr.mxu1 %v1645_v21  ;;  %v1696_v18 = vld [vmem:[%s19893_s1 + $0x3348] sm:$0xff]  ;;  %v1711_v20 = vld [vmem:[%s19893_s1 + $0x33c0] sm:$0xff] }
 0x347   :  { %10817 = vmatpush3.msra.mxu0 %v1597_v22  ;;  %10852 = vmatpush3.msra.mxu1 %v1629_v23  ;;  %v1663_v21 = vld [vmem:[%s19893_s1 + $0x3240] sm:$0xff]  ;;  %v1678_v23 = vld [vmem:[%s19893_s1 + $0x32b8] sm:$0xff] }
 0x348   :  { %10818 = vmatprep.subr.mxu0 %v1612_v24  ;;  %10853 = vmatprep.subr.mxu1 %v1644_v25  ;;  %v1695_v22 = vld [vmem:[%s19893_s1 + $0x3340] sm:$0xff]  ;;  %v1710_v24 = vld [vmem:[%s19893_s1 + $0x33b8] sm:$0xff] }
 0x349   :  { %10819 = vmatpush3.msra.mxu0 %v1596_v26  ;;  %10854 = vmatpush3.msra.mxu1 %v1628_v27  ;;  %v1662_v25 = vld [vmem:[%s19893_s1 + $0x3238] sm:$0xff]  ;;  %v1677_v27 = vld [vmem:[%s19893_s1 + $0x32b0] sm:$0xff] }
 0x34a   :  { %10820 = vmatprep.subr.mxu0 %v1611_v29  ;;  %10855 = vmatprep.subr.mxu1 %v1643_v30  ;;  %v1694_v26 = vld [vmem:[%s19893_s1 + $0x3338] sm:$0xff]  ;;  %v1661_v29 = vld [vmem:[%s19893_s1 + $0x3230] sm:$0xff] }
 0x34b   :  { %10821 = vmatpush3.msra.mxu0 %v1595_v31  ;;  %10856 = vmatpush3.msra.mxu1 %v1627_v32  ;;  %v1693_v30 = vld [vmem:[%s19893_s1 + $0x3330] sm:$0xff]  ;;  %v1676_v31 = vld [vmem:[%s19893_s1 + $0x32a8] sm:$0xff] }
 0x34c   :  { %10822 = vmatprep.subr.mxu0 %v1610_v33  ;;  %10857 = vmatprep.subr.mxu1 %v1642_v34  ;;  %v1708_v32 = vld [vmem:[%s19893_s1 + $0x33a8] sm:$0xff] }
 0x34d   :  { %10823 = vmatpush3.msra.mxu0 %v1594_v36  ;;  %10858 = vmatpush3.msra.mxu1 %v1626_v37  ;;  %v1660_v33 = vld [vmem:[%s19893_s1 + $0x3228] sm:$0xff]  ;;  %v1675_v36 = vld [vmem:[%s19893_s1 + $0x32a0] sm:$0xff] }
 0x34e   :  { %10824 = vmatprep.subr.mxu0 %v1609_v38  ;;  %10859 = vmatprep.subr.mxu1 %v1641_v39  ;;  %v1692_v34 = vld [vmem:[%s19893_s1 + $0x3328] sm:$0xff]  ;;  %v1707_v37 = vld [vmem:[%s19893_s1 + $0x33a0] sm:$0xff] }
 0x34f   :  { %10825 = vmatpush3.msra.mxu0 %v1593_v41  ;;  %10860 = vmatpush3.msra.mxu1 %v1625_v42  ;;  %v1659_v38 = vld [vmem:[%s19893_s1 + $0x3220] sm:$0xff]  ;;  %v1706_v41 = vld [vmem:[%s19893_s1 + $0x3398] sm:$0xff]  ;;  %v3087_v42 = vcombine.high %v40_v35, %v40_v35 }
 0x350   :  { %10826 = vmatprep.subr.mxu0 %v1608_v43  ;;  %10861 = vmatprep.subr.mxu1 %v1640_v44  ;;  %v1691_v39 = vld [vmem:[%s19893_s1 + $0x3320] sm:$0xff]  ;;  %v1658_v43 = vld [vmem:[%s19893_s1 + $0x3218] sm:$0xff] }
 0x351   :  { %10827 = vmatpush3.msra.mxu0 %v1592_v46  ;;  %10862 = vmatpush3.msra.mxu1 %v1624_v47  ;;  %v1690_v44 = vld [vmem:[%s19893_s1 + $0x3318] sm:$0xff]  ;;  %v1705_v46 = vld [vmem:[%s19893_s1 + $0x3390] sm:$0xff]  ;;  %v3094_v47 = vrot.slane %v40_v35, %v12142_v51 }
 0x352   :  { %10828 = vmatprep.subr.mxu0 %v1607_v48  ;;  %10863 = vmatprep.subr.mxu1 %v1639_v49  ;;  %v1657_v48 = vld [vmem:[%s19893_s1 + $0x3210] sm:$0xff] }
 0x353   :  { %10829 = vmatpush3.msra.mxu0 %v1591_v52  ;;  %6926 = vmatprep.mubr.f32.mxu0 %v3085_v50  ;;  %v1689_v49 = vld [vmem:[%s19893_s1 + $0x3310] sm:$0xff]  ;;  %v1672_v50 = vld [vmem:[%s19893_s1 + $0x3288] sm:$0xff] }
 0x354   :  { %10864 = vmatpush3.msra.mxu1 %v1623_v53  ;;  %6927 = vmatmul.mubr.f32.vlgmr.msra.gmra.mxu0 %v3077_v40  ;;  %v1674_v40 = vld [vmem:[%s19893_s1 + $0x3298] sm:$0xff]  ;;  %v1704_v52 = vld [vmem:[%s19893_s1 + $0x3388] sm:$0xff]  ;;  %v3101_v53 = vrot.slane %v3087_v42, %v12142_v51  ;;  %v1773_v35 = vld [vmem:[%s19893_s1 + $0x35b0] sm:$0xff] }
 0x355   :  { %6996 = vmatprep.mubr.f32.mxu1 %v3086_v54  ;;  %10868 = vmatprep.subr.mxu0 %v1686_v55  ;;  %v1656_v54 = vld [vmem:[%s19893_s1 + $0x3208] sm:$0xff]  ;;  %v41_v42 = vld [vmem:[%s19892_s0 + $0xd0] sm:$0xff] }
 0x356   :  { %10903 = vmatprep.subr.mxu1 %v1718_v56  ;;  %6997 = vmatmul.mubr.f32.vlgmr.msra.gmra.mxu1 %v3084_v45  ;;  %v1673_v45 = vld [vmem:[%s19893_s1 + $0x3290] sm:$0xff]  ;;  %v1688_v55 = vld [vmem:[%s19893_s1 + $0x3308] sm:$0xff]  ;;  %v1671_v56 = vld [vmem:[%s19893_s1 + $0x3280] sm:$0xff] }
 0x357   :  { %10869 = vmatpush3.msra.mxu0 %v1670_v57  ;;  %10904 = vmatpush3.msra.mxu1 %v1702_v58  ;;  %v1703_v57 = vld [vmem:[%s19893_s1 + $0x3380] sm:$0xff]  ;;  %v3102_v58 = vcombine.high %v3094_v47, %v3094_v47 }
 0x358   :  { %10870 = vmatprep.subr.mxu0 %v1685_v59  ;;  %10905 = vmatprep.subr.mxu1 %v1717_v60  ;;  %v1655_v59 = vld [vmem:[%s19893_s1 + $0x3200] sm:$0xff] }
 0x359   :  { %10871 = vmatpush3.msra.mxu0 %v1669_v61  ;;  %10906 = vmatpush3.msra.mxu1 %v1701_v62  ;;  %v1687_v60 = vld [vmem:[%s19893_s1 + $0x3300] sm:$0xff]  ;;  %v3103_v61 = vcombine.high %v3101_v53, %v3101_v53  ;;  %v1750_v62 = vld [vmem:[%s19893_s1 + $0x34f8] sm:$0xff] }
 0x35a   :  { %10872 = vmatprep.subr.mxu0 %v1684_v63  ;;  %10907 = vmatprep.subr.mxu1 %v1716_v0  ;;  %v1782_v63 = vld [vmem:[%s19893_s1 + $0x35f8] sm:$0xff] }
 0x35b   :  { %10873 = vmatpush3.msra.mxu0 %v1668_v1  ;;  %10908 = vmatpush3.msra.mxu1 %v1700_v2  ;;  %v1734_v0 = vld [vmem:[%s19893_s1 + $0x3478] sm:$0xff]  ;;  %v1749_v2 = vld [vmem:[%s19893_s1 + $0x34f0] sm:$0xff] }
 0x35c   :  { %10874 = vmatprep.subr.mxu0 %v1683_v3  ;;  %10909 = vmatprep.subr.mxu1 %v1715_v4  ;;  %v1766_v1 = vld [vmem:[%s19893_s1 + $0x3578] sm:$0xff]  ;;  %v1781_v3 = vld [vmem:[%s19893_s1 + $0x35f0] sm:$0xff] }
 0x35d   :  { %10875 = vmatpush3.msra.mxu0 %v1667_v5  ;;  %10910 = vmatpush3.msra.mxu1 %v1699_v6  ;;  %v1733_v4 = vld [vmem:[%s19893_s1 + $0x3470] sm:$0xff]  ;;  %v1748_v6 = vld [vmem:[%s19893_s1 + $0x34e8] sm:$0xff] }
 0x35e   :  { %10876 = vmatprep.subr.mxu0 %v1682_v7  ;;  %10911 = vmatprep.subr.mxu1 %v1714_v8  ;;  %v1765_v5 = vld [vmem:[%s19893_s1 + $0x3570] sm:$0xff]  ;;  %v1780_v7 = vld [vmem:[%s19893_s1 + $0x35e8] sm:$0xff] }
 0x35f   :  { %10877 = vmatpush3.msra.mxu0 %v1666_v9  ;;  %10912 = vmatpush3.msra.mxu1 %v1698_v10  ;;  %v1732_v8 = vld [vmem:[%s19893_s1 + $0x3468] sm:$0xff]  ;;  %v1747_v10 = vld [vmem:[%s19893_s1 + $0x34e0] sm:$0xff] }
 0x360   :  { %10878 = vmatprep.subr.mxu0 %v1681_v11  ;;  %10913 = vmatprep.subr.mxu1 %v1713_v12  ;;  %v1764_v9 = vld [vmem:[%s19893_s1 + $0x3568] sm:$0xff]  ;;  %v1779_v11 = vld [vmem:[%s19893_s1 + $0x35e0] sm:$0xff] }
 0x361   :  { %10879 = vmatpush3.msra.mxu0 %v1665_v13  ;;  %10914 = vmatpush3.msra.mxu1 %v1697_v14  ;;  %v1731_v12 = vld [vmem:[%s19893_s1 + $0x3460] sm:$0xff]  ;;  %v1746_v14 = vld [vmem:[%s19893_s1 + $0x34d8] sm:$0xff] }
 0x362   :  { %10880 = vmatprep.subr.mxu0 %v1680_v15  ;;  %10915 = vmatprep.subr.mxu1 %v1712_v16  ;;  %v1763_v13 = vld [vmem:[%s19893_s1 + $0x3560] sm:$0xff]  ;;  %v1778_v15 = vld [vmem:[%s19893_s1 + $0x35d8] sm:$0xff] }
 0x363   :  { %10881 = vmatpush3.msra.mxu0 %v1664_v17  ;;  %10916 = vmatpush3.msra.mxu1 %v1696_v18  ;;  %v1730_v16 = vld [vmem:[%s19893_s1 + $0x3458] sm:$0xff]  ;;  %v1745_v18 = vld [vmem:[%s19893_s1 + $0x34d0] sm:$0xff] }
 0x364   :  { %10882 = vmatprep.subr.mxu0 %v1679_v19  ;;  %10917 = vmatprep.subr.mxu1 %v1711_v20  ;;  %v1762_v17 = vld [vmem:[%s19893_s1 + $0x3558] sm:$0xff]  ;;  %v1777_v19 = vld [vmem:[%s19893_s1 + $0x35d0] sm:$0xff] }
 0x365   :  { %10883 = vmatpush3.msra.mxu0 %v1663_v21  ;;  %10918 = vmatpush3.msra.mxu1 %v1695_v22  ;;  %v1729_v20 = vld [vmem:[%s19893_s1 + $0x3450] sm:$0xff]  ;;  %v1744_v22 = vld [vmem:[%s19893_s1 + $0x34c8] sm:$0xff] }
 0x366   :  { %10884 = vmatprep.subr.mxu0 %v1678_v23  ;;  %10919 = vmatprep.subr.mxu1 %v1710_v24  ;;  %v1761_v21 = vld [vmem:[%s19893_s1 + $0x3550] sm:$0xff]  ;;  %v1776_v23 = vld [vmem:[%s19893_s1 + $0x35c8] sm:$0xff] }
 0x367   :  { %10885 = vmatpush3.msra.mxu0 %v1662_v25  ;;  %10920 = vmatpush3.msra.mxu1 %v1694_v26  ;;  %v1728_v24 = vld [vmem:[%s19893_s1 + $0x3448] sm:$0xff]  ;;  %v1743_v26 = vld [vmem:[%s19893_s1 + $0x34c0] sm:$0xff] }
 0x368   :  { %10886 = vmatprep.subr.mxu0 %v1677_v27  ;;  %10921 = vmatprep.subr.mxu1 %v1709_v28  ;;  %v1760_v25 = vld [vmem:[%s19893_s1 + $0x3548] sm:$0xff]  ;;  %v1775_v27 = vld [vmem:[%s19893_s1 + $0x35c0] sm:$0xff] }
 0x369   :  { %10887 = vmatpush3.msra.mxu0 %v1661_v29  ;;  %10922 = vmatpush3.msra.mxu1 %v1693_v30  ;;  %v1727_v28 = vld [vmem:[%s19893_s1 + $0x3440] sm:$0xff]  ;;  %v1742_v30 = vld [vmem:[%s19893_s1 + $0x34b8] sm:$0xff] }
 0x36a   :  { %10888 = vmatprep.subr.mxu0 %v1676_v31  ;;  %10923 = vmatprep.subr.mxu1 %v1708_v32  ;;  %v1759_v29 = vld [vmem:[%s19893_s1 + $0x3540] sm:$0xff]  ;;  %v1774_v31 = vld [vmem:[%s19893_s1 + $0x35b8] sm:$0xff] }
 0x36b   :  { %10889 = vmatpush3.msra.mxu0 %v1660_v33  ;;  %10924 = vmatpush3.msra.mxu1 %v1692_v34  ;;  %v1726_v32 = vld [vmem:[%s19893_s1 + $0x3438] sm:$0xff]  ;;  %v1741_v34 = vld [vmem:[%s19893_s1 + $0x34b0] sm:$0xff] }
 0x36c   :  { %10890 = vmatprep.subr.mxu0 %v1675_v36  ;;  %10925 = vmatprep.subr.mxu1 %v1707_v37  ;;  %v1758_v33 = vld [vmem:[%s19893_s1 + $0x3538] sm:$0xff]  ;;  %v1725_v36 = vld [vmem:[%s19893_s1 + $0x3430] sm:$0xff] }
 0x36d   :  { %10891 = vmatpush3.msra.mxu0 %v1659_v38  ;;  %10926 = vmatpush3.msra.mxu1 %v1691_v39  ;;  %v1757_v37 = vld [vmem:[%s19893_s1 + $0x3530] sm:$0xff]  ;;  %v1740_v38 = vld [vmem:[%s19893_s1 + $0x34a8] sm:$0xff] }
 0x36e   :  { %10892 = vmatprep.subr.mxu0 %v1674_v40  ;;  %10927 = vmatprep.subr.mxu1 %v1706_v41  ;;  %v1772_v39 = vld [vmem:[%s19893_s1 + $0x35a8] sm:$0xff] }
 0x36f   :  { %10893 = vmatpush3.msra.mxu0 %v1658_v43  ;;  %10928 = vmatpush3.msra.mxu1 %v1690_v44  ;;  %v1724_v40 = vld [vmem:[%s19893_s1 + $0x3428] sm:$0xff]  ;;  %v1739_v43 = vld [vmem:[%s19893_s1 + $0x34a0] sm:$0xff] }
 0x370   :  { %10894 = vmatprep.subr.mxu0 %v1673_v45  ;;  %10929 = vmatprep.subr.mxu1 %v1705_v46  ;;  %v1756_v41 = vld [vmem:[%s19893_s1 + $0x3528] sm:$0xff]  ;;  %v1771_v44 = vld [vmem:[%s19893_s1 + $0x35a0] sm:$0xff] }
 0x371   :  { %10895 = vmatpush3.msra.mxu0 %v1657_v48  ;;  %10930 = vmatpush3.msra.mxu1 %v1689_v49  ;;  %v1723_v45 = vld [vmem:[%s19893_s1 + $0x3420] sm:$0xff]  ;;  %v1770_v48 = vld [vmem:[%s19893_s1 + $0x3598] sm:$0xff]  ;;  %v3104_v49 = vcombine.high %v41_v42, %v41_v42 }
 0x372   :  { %10896 = vmatprep.subr.mxu0 %v1672_v50  ;;  %10931 = vmatprep.subr.mxu1 %v1704_v52  ;;  %v1755_v46 = vld [vmem:[%s19893_s1 + $0x3520] sm:$0xff]  ;;  %v1722_v50 = vld [vmem:[%s19893_s1 + $0x3418] sm:$0xff] }
 0x373   :  { %10897 = vmatpush3.msra.mxu0 %v1656_v54  ;;  %10932 = vmatpush3.msra.mxu1 %v1688_v55  ;;  %v1754_v52 = vld [vmem:[%s19893_s1 + $0x3518] sm:$0xff]  ;;  %v1769_v54 = vld [vmem:[%s19893_s1 + $0x3590] sm:$0xff]  ;;  %v3111_v55 = vrot.slane %v41_v42, %v12142_v51 }
 0x374   :  { %10898 = vmatprep.subr.mxu0 %v1671_v56  ;;  %10933 = vmatprep.subr.mxu1 %v1703_v57  ;;  %v1721_v56 = vld [vmem:[%s19893_s1 + $0x3410] sm:$0xff] }
 0x375   :  { %10899 = vmatpush3.msra.mxu0 %v1655_v59  ;;  %7066 = vmatprep.mubr.f32.mxu0 %v3102_v58  ;;  %v1753_v57 = vld [vmem:[%s19893_s1 + $0x3510] sm:$0xff]  ;;  %v1736_v58 = vld [vmem:[%s19893_s1 + $0x3488] sm:$0xff] }
 0x376   :  { %10934 = vmatpush3.msra.mxu1 %v1687_v60  ;;  %7067 = vmatmul.mubr.f32.vlgmr.msra.gmra.mxu0 %v3094_v47  ;;  %v1738_v47 = vld [vmem:[%s19893_s1 + $0x3498] sm:$0xff]  ;;  %v1768_v59 = vld [vmem:[%s19893_s1 + $0x3588] sm:$0xff]  ;;  %v3118_v60 = vrot.slane %v3104_v49, %v12142_v51  ;;  %v1837_v42 = vld [vmem:[%s19893_s1 + $0x37b0] sm:$0xff] }
 0x377   :  { %7136 = vmatprep.mubr.f32.mxu1 %v3103_v61  ;;  %10938 = vmatprep.subr.mxu0 %v1750_v62  ;;  %v1720_v61 = vld [vmem:[%s19893_s1 + $0x3408] sm:$0xff]  ;;  %v42_v49 = vld [vmem:[%s19892_s0 + $0xd8] sm:$0xff] }
 0x378   :  { %10973 = vmatprep.subr.mxu1 %v1782_v63  ;;  %7137 = vmatmul.mubr.f32.vlgmr.msra.gmra.mxu1 %v3101_v53  ;;  %v1737_v53 = vld [vmem:[%s19893_s1 + $0x3490] sm:$0xff]  ;;  %v1752_v62 = vld [vmem:[%s19893_s1 + $0x3508] sm:$0xff]  ;;  %v1735_v63 = vld [vmem:[%s19893_s1 + $0x3480] sm:$0xff] }
 0x379   :  { %10939 = vmatpush3.msra.mxu0 %v1734_v0  ;;  %10974 = vmatpush3.msra.mxu1 %v1766_v1  ;;  %v1767_v0 = vld [vmem:[%s19893_s1 + $0x3580] sm:$0xff]  ;;  %v3119_v1 = vcombine.high %v3111_v55, %v3111_v55 }
 0x37a   :  { %10940 = vmatprep.subr.mxu0 %v1749_v2  ;;  %10975 = vmatprep.subr.mxu1 %v1781_v3  ;;  %v1719_v2 = vld [vmem:[%s19893_s1 + $0x3400] sm:$0xff] }
 0x37b   :  { %10941 = vmatpush3.msra.mxu0 %v1733_v4  ;;  %10976 = vmatpush3.msra.mxu1 %v1765_v5  ;;  %v1751_v3 = vld [vmem:[%s19893_s1 + $0x3500] sm:$0xff]  ;;  %v3120_v4 = vcombine.high %v3118_v60, %v3118_v60  ;;  %v1814_v5 = vld [vmem:[%s19893_s1 + $0x36f8] sm:$0xff] }
 0x37c   :  { %10942 = vmatprep.subr.mxu0 %v1748_v6  ;;  %10977 = vmatprep.subr.mxu1 %v1780_v7  ;;  %v1846_v6 = vld [vmem:[%s19893_s1 + $0x37f8] sm:$0xff] }
 0x37d   :  { %10943 = vmatpush3.msra.mxu0 %v1732_v8  ;;  %10978 = vmatpush3.msra.mxu1 %v1764_v9  ;;  %v1798_v7 = vld [vmem:[%s19893_s1 + $0x3678] sm:$0xff]  ;;  %v1813_v9 = vld [vmem:[%s19893_s1 + $0x36f0] sm:$0xff] }
 0x37e   :  { %10944 = vmatprep.subr.mxu0 %v1747_v10  ;;  %10979 = vmatprep.subr.mxu1 %v1779_v11  ;;  %v1830_v8 = vld [vmem:[%s19893_s1 + $0x3778] sm:$0xff]  ;;  %v1845_v10 = vld [vmem:[%s19893_s1 + $0x37f0] sm:$0xff] }
 0x37f   :  { %10945 = vmatpush3.msra.mxu0 %v1731_v12  ;;  %10980 = vmatpush3.msra.mxu1 %v1763_v13  ;;  %v1797_v11 = vld [vmem:[%s19893_s1 + $0x3670] sm:$0xff]  ;;  %v1812_v13 = vld [vmem:[%s19893_s1 + $0x36e8] sm:$0xff] }
 0x380   :  { %10946 = vmatprep.subr.mxu0 %v1746_v14  ;;  %10981 = vmatprep.subr.mxu1 %v1778_v15  ;;  %v1829_v12 = vld [vmem:[%s19893_s1 + $0x3770] sm:$0xff]  ;;  %v1844_v14 = vld [vmem:[%s19893_s1 + $0x37e8] sm:$0xff] }
 0x381   :  { %10947 = vmatpush3.msra.mxu0 %v1730_v16  ;;  %10982 = vmatpush3.msra.mxu1 %v1762_v17  ;;  %v1796_v15 = vld [vmem:[%s19893_s1 + $0x3668] sm:$0xff]  ;;  %v1811_v17 = vld [vmem:[%s19893_s1 + $0x36e0] sm:$0xff] }
 0x382   :  { %10948 = vmatprep.subr.mxu0 %v1745_v18  ;;  %10983 = vmatprep.subr.mxu1 %v1777_v19  ;;  %v1828_v16 = vld [vmem:[%s19893_s1 + $0x3768] sm:$0xff]  ;;  %v1843_v18 = vld [vmem:[%s19893_s1 + $0x37e0] sm:$0xff] }
 0x383   :  { %10949 = vmatpush3.msra.mxu0 %v1729_v20  ;;  %10984 = vmatpush3.msra.mxu1 %v1761_v21  ;;  %v1795_v19 = vld [vmem:[%s19893_s1 + $0x3660] sm:$0xff]  ;;  %v1810_v21 = vld [vmem:[%s19893_s1 + $0x36d8] sm:$0xff] }
 0x384   :  { %10950 = vmatprep.subr.mxu0 %v1744_v22  ;;  %10985 = vmatprep.subr.mxu1 %v1776_v23  ;;  %v1827_v20 = vld [vmem:[%s19893_s1 + $0x3760] sm:$0xff]  ;;  %v1842_v22 = vld [vmem:[%s19893_s1 + $0x37d8] sm:$0xff] }
 0x385   :  { %10951 = vmatpush3.msra.mxu0 %v1728_v24  ;;  %10986 = vmatpush3.msra.mxu1 %v1760_v25  ;;  %v1794_v23 = vld [vmem:[%s19893_s1 + $0x3658] sm:$0xff]  ;;  %v1809_v25 = vld [vmem:[%s19893_s1 + $0x36d0] sm:$0xff] }
 0x386   :  { %10952 = vmatprep.subr.mxu0 %v1743_v26  ;;  %10987 = vmatprep.subr.mxu1 %v1775_v27  ;;  %v1826_v24 = vld [vmem:[%s19893_s1 + $0x3758] sm:$0xff]  ;;  %v1841_v26 = vld [vmem:[%s19893_s1 + $0x37d0] sm:$0xff] }
 0x387   :  { %10953 = vmatpush3.msra.mxu0 %v1727_v28  ;;  %10988 = vmatpush3.msra.mxu1 %v1759_v29  ;;  %v1793_v27 = vld [vmem:[%s19893_s1 + $0x3650] sm:$0xff]  ;;  %v1808_v29 = vld [vmem:[%s19893_s1 + $0x36c8] sm:$0xff] }
 0x388   :  { %10954 = vmatprep.subr.mxu0 %v1742_v30  ;;  %10989 = vmatprep.subr.mxu1 %v1774_v31  ;;  %v1825_v28 = vld [vmem:[%s19893_s1 + $0x3750] sm:$0xff]  ;;  %v1840_v30 = vld [vmem:[%s19893_s1 + $0x37c8] sm:$0xff] }
 0x389   :  { %10955 = vmatpush3.msra.mxu0 %v1726_v32  ;;  %10990 = vmatpush3.msra.mxu1 %v1758_v33  ;;  %v1792_v31 = vld [vmem:[%s19893_s1 + $0x3648] sm:$0xff]  ;;  %v1807_v33 = vld [vmem:[%s19893_s1 + $0x36c0] sm:$0xff] }
 0x38a   :  { %10956 = vmatprep.subr.mxu0 %v1741_v34  ;;  %10991 = vmatprep.subr.mxu1 %v1773_v35  ;;  %v1824_v32 = vld [vmem:[%s19893_s1 + $0x3748] sm:$0xff]  ;;  %v1839_v34 = vld [vmem:[%s19893_s1 + $0x37c0] sm:$0xff] }
 0x38b   :  { %10957 = vmatpush3.msra.mxu0 %v1725_v36  ;;  %10992 = vmatpush3.msra.mxu1 %v1757_v37  ;;  %v1791_v35 = vld [vmem:[%s19893_s1 + $0x3640] sm:$0xff]  ;;  %v1806_v37 = vld [vmem:[%s19893_s1 + $0x36b8] sm:$0xff] }
 0x38c   :  { %10958 = vmatprep.subr.mxu0 %v1740_v38  ;;  %10993 = vmatprep.subr.mxu1 %v1772_v39  ;;  %v1823_v36 = vld [vmem:[%s19893_s1 + $0x3740] sm:$0xff]  ;;  %v1838_v38 = vld [vmem:[%s19893_s1 + $0x37b8] sm:$0xff] }
 0x38d   :  { %10959 = vmatpush3.msra.mxu0 %v1724_v40  ;;  %10994 = vmatpush3.msra.mxu1 %v1756_v41  ;;  %v1790_v39 = vld [vmem:[%s19893_s1 + $0x3638] sm:$0xff]  ;;  %v1805_v41 = vld [vmem:[%s19893_s1 + $0x36b0] sm:$0xff] }
 0x38e   :  { %10960 = vmatprep.subr.mxu0 %v1739_v43  ;;  %10995 = vmatprep.subr.mxu1 %v1771_v44  ;;  %v1822_v40 = vld [vmem:[%s19893_s1 + $0x3738] sm:$0xff]  ;;  %v1789_v43 = vld [vmem:[%s19893_s1 + $0x3630] sm:$0xff] }
 0x38f   :  { %10961 = vmatpush3.msra.mxu0 %v1723_v45  ;;  %10996 = vmatpush3.msra.mxu1 %v1755_v46  ;;  %v1821_v44 = vld [vmem:[%s19893_s1 + $0x3730] sm:$0xff]  ;;  %v1804_v45 = vld [vmem:[%s19893_s1 + $0x36a8] sm:$0xff] }
 0x390   :  { %10962 = vmatprep.subr.mxu0 %v1738_v47  ;;  %10997 = vmatprep.subr.mxu1 %v1770_v48  ;;  %v1836_v46 = vld [vmem:[%s19893_s1 + $0x37a8] sm:$0xff] }
 0x391   :  { %10963 = vmatpush3.msra.mxu0 %v1722_v50  ;;  %10998 = vmatpush3.msra.mxu1 %v1754_v52  ;;  %v1788_v47 = vld [vmem:[%s19893_s1 + $0x3628] sm:$0xff]  ;;  %v1803_v50 = vld [vmem:[%s19893_s1 + $0x36a0] sm:$0xff] }
 0x392   :  { %10964 = vmatprep.subr.mxu0 %v1737_v53  ;;  %10999 = vmatprep.subr.mxu1 %v1769_v54  ;;  %v1820_v48 = vld [vmem:[%s19893_s1 + $0x3728] sm:$0xff]  ;;  %v1835_v52 = vld [vmem:[%s19893_s1 + $0x37a0] sm:$0xff] }
 0x393   :  { %10965 = vmatpush3.msra.mxu0 %v1721_v56  ;;  %11000 = vmatpush3.msra.mxu1 %v1753_v57  ;;  %v1787_v53 = vld [vmem:[%s19893_s1 + $0x3620] sm:$0xff]  ;;  %v1834_v56 = vld [vmem:[%s19893_s1 + $0x3798] sm:$0xff]  ;;  %v3121_v57 = vcombine.high %v42_v49, %v42_v49 }
 0x394   :  { %10966 = vmatprep.subr.mxu0 %v1736_v58  ;;  %11001 = vmatprep.subr.mxu1 %v1768_v59  ;;  %v1819_v54 = vld [vmem:[%s19893_s1 + $0x3720] sm:$0xff]  ;;  %v1786_v58 = vld [vmem:[%s19893_s1 + $0x3618] sm:$0xff] }
 0x395   :  { %10967 = vmatpush3.msra.mxu0 %v1720_v61  ;;  %11002 = vmatpush3.msra.mxu1 %v1752_v62  ;;  %v1818_v59 = vld [vmem:[%s19893_s1 + $0x3718] sm:$0xff]  ;;  %v1833_v61 = vld [vmem:[%s19893_s1 + $0x3790] sm:$0xff]  ;;  %v3128_v62 = vrot.slane %v42_v49, %v12142_v51 }
 0x396   :  { %10968 = vmatprep.subr.mxu0 %v1735_v63  ;;  %11003 = vmatprep.subr.mxu1 %v1767_v0  ;;  %v1785_v63 = vld [vmem:[%s19893_s1 + $0x3610] sm:$0xff] }
 0x397   :  { %10969 = vmatpush3.msra.mxu0 %v1719_v2  ;;  %7206 = vmatprep.mubr.f32.mxu0 %v3119_v1  ;;  %v1817_v0 = vld [vmem:[%s19893_s1 + $0x3710] sm:$0xff]  ;;  %v1800_v1 = vld [vmem:[%s19893_s1 + $0x3688] sm:$0xff] }
 0x398   :  { %11004 = vmatpush3.msra.mxu1 %v1751_v3  ;;  %7207 = vmatmul.mubr.f32.vlgmr.msra.gmra.mxu0 %v3111_v55  ;;  %v1802_v55 = vld [vmem:[%s19893_s1 + $0x3698] sm:$0xff]  ;;  %v1832_v2 = vld [vmem:[%s19893_s1 + $0x3788] sm:$0xff]  ;;  %v3135_v3 = vrot.slane %v3121_v57, %v12142_v51  ;;  %v1901_v49 = vld [vmem:[%s19893_s1 + $0x39b0] sm:$0xff] }
 0x399   :  { %7276 = vmatprep.mubr.f32.mxu1 %v3120_v4  ;;  %11008 = vmatprep.subr.mxu0 %v1814_v5  ;;  %v1784_v4 = vld [vmem:[%s19893_s1 + $0x3608] sm:$0xff]  ;;  %v43_v57 = vld [vmem:[%s19892_s0 + $0xe0] sm:$0xff] }
 0x39a   :  { %11043 = vmatprep.subr.mxu1 %v1846_v6  ;;  %7277 = vmatmul.mubr.f32.vlgmr.msra.gmra.mxu1 %v3118_v60  ;;  %v1801_v60 = vld [vmem:[%s19893_s1 + $0x3690] sm:$0xff]  ;;  %v1816_v5 = vld [vmem:[%s19893_s1 + $0x3708] sm:$0xff]  ;;  %v1799_v6 = vld [vmem:[%s19893_s1 + $0x3680] sm:$0xff] }
 0x39b   :  { %11009 = vmatpush3.msra.mxu0 %v1798_v7  ;;  %11044 = vmatpush3.msra.mxu1 %v1830_v8  ;;  %v1831_v7 = vld [vmem:[%s19893_s1 + $0x3780] sm:$0xff]  ;;  %v3136_v8 = vcombine.high %v3128_v62, %v3128_v62 }
 0x39c   :  { %11010 = vmatprep.subr.mxu0 %v1813_v9  ;;  %11045 = vmatprep.subr.mxu1 %v1845_v10  ;;  %v1783_v9 = vld [vmem:[%s19893_s1 + $0x3600] sm:$0xff] }
 0x39d   :  { %11011 = vmatpush3.msra.mxu0 %v1797_v11  ;;  %11046 = vmatpush3.msra.mxu1 %v1829_v12  ;;  %v1815_v10 = vld [vmem:[%s19893_s1 + $0x3700] sm:$0xff]  ;;  %v3137_v11 = vcombine.high %v3135_v3, %v3135_v3  ;;  %v1878_v12 = vld [vmem:[%s19893_s1 + $0x38f8] sm:$0xff] }
 0x39e   :  { %11012 = vmatprep.subr.mxu0 %v1812_v13  ;;  %11047 = vmatprep.subr.mxu1 %v1844_v14  ;;  %v1910_v13 = vld [vmem:[%s19893_s1 + $0x39f8] sm:$0xff] }
 0x39f   :  { %11013 = vmatpush3.msra.mxu0 %v1796_v15  ;;  %11048 = vmatpush3.msra.mxu1 %v1828_v16  ;;  %v1862_v14 = vld [vmem:[%s19893_s1 + $0x3878] sm:$0xff]  ;;  %v1877_v16 = vld [vmem:[%s19893_s1 + $0x38f0] sm:$0xff] }
 0x3a0   :  { %11014 = vmatprep.subr.mxu0 %v1811_v17  ;;  %11049 = vmatprep.subr.mxu1 %v1843_v18  ;;  %v1894_v15 = vld [vmem:[%s19893_s1 + $0x3978] sm:$0xff]  ;;  %v1909_v17 = vld [vmem:[%s19893_s1 + $0x39f0] sm:$0xff] }
 0x3a1   :  { %11015 = vmatpush3.msra.mxu0 %v1795_v19  ;;  %11050 = vmatpush3.msra.mxu1 %v1827_v20  ;;  %v1861_v18 = vld [vmem:[%s19893_s1 + $0x3870] sm:$0xff]  ;;  %v1876_v20 = vld [vmem:[%s19893_s1 + $0x38e8] sm:$0xff] }
 0x3a2   :  { %11016 = vmatprep.subr.mxu0 %v1810_v21  ;;  %11051 = vmatprep.subr.mxu1 %v1842_v22  ;;  %v1893_v19 = vld [vmem:[%s19893_s1 + $0x3970] sm:$0xff]  ;;  %v1908_v21 = vld [vmem:[%s19893_s1 + $0x39e8] sm:$0xff] }
 0x3a3   :  { %11017 = vmatpush3.msra.mxu0 %v1794_v23  ;;  %11052 = vmatpush3.msra.mxu1 %v1826_v24  ;;  %v1860_v22 = vld [vmem:[%s19893_s1 + $0x3868] sm:$0xff]  ;;  %v1875_v24 = vld [vmem:[%s19893_s1 + $0x38e0] sm:$0xff] }
 0x3a4   :  { %11018 = vmatprep.subr.mxu0 %v1809_v25  ;;  %11053 = vmatprep.subr.mxu1 %v1841_v26  ;;  %v1892_v23 = vld [vmem:[%s19893_s1 + $0x3968] sm:$0xff]  ;;  %v1907_v25 = vld [vmem:[%s19893_s1 + $0x39e0] sm:$0xff] }
 0x3a5   :  { %11019 = vmatpush3.msra.mxu0 %v1793_v27  ;;  %11054 = vmatpush3.msra.mxu1 %v1825_v28  ;;  %v1859_v26 = vld [vmem:[%s19893_s1 + $0x3860] sm:$0xff]  ;;  %v1874_v28 = vld [vmem:[%s19893_s1 + $0x38d8] sm:$0xff] }
 0x3a6   :  { %11020 = vmatprep.subr.mxu0 %v1808_v29  ;;  %11055 = vmatprep.subr.mxu1 %v1840_v30  ;;  %v1891_v27 = vld [vmem:[%s19893_s1 + $0x3960] sm:$0xff]  ;;  %v1906_v29 = vld [vmem:[%s19893_s1 + $0x39d8] sm:$0xff] }
 0x3a7   :  { %11021 = vmatpush3.msra.mxu0 %v1792_v31  ;;  %11056 = vmatpush3.msra.mxu1 %v1824_v32  ;;  %v1858_v30 = vld [vmem:[%s19893_s1 + $0x3858] sm:$0xff]  ;;  %v1873_v32 = vld [vmem:[%s19893_s1 + $0x38d0] sm:$0xff] }
 0x3a8   :  { %11022 = vmatprep.subr.mxu0 %v1807_v33  ;;  %11057 = vmatprep.subr.mxu1 %v1839_v34  ;;  %v1890_v31 = vld [vmem:[%s19893_s1 + $0x3958] sm:$0xff]  ;;  %v1905_v33 = vld [vmem:[%s19893_s1 + $0x39d0] sm:$0xff] }
 0x3a9   :  { %11023 = vmatpush3.msra.mxu0 %v1791_v35  ;;  %11058 = vmatpush3.msra.mxu1 %v1823_v36  ;;  %v1857_v34 = vld [vmem:[%s19893_s1 + $0x3850] sm:$0xff]  ;;  %v1872_v36 = vld [vmem:[%s19893_s1 + $0x38c8] sm:$0xff] }
 0x3aa   :  { %11024 = vmatprep.subr.mxu0 %v1806_v37  ;;  %11059 = vmatprep.subr.mxu1 %v1838_v38  ;;  %v1889_v35 = vld [vmem:[%s19893_s1 + $0x3950] sm:$0xff]  ;;  %v1904_v37 = vld [vmem:[%s19893_s1 + $0x39c8] sm:$0xff] }
 0x3ab   :  { %11025 = vmatpush3.msra.mxu0 %v1790_v39  ;;  %11060 = vmatpush3.msra.mxu1 %v1822_v40  ;;  %v1856_v38 = vld [vmem:[%s19893_s1 + $0x3848] sm:$0xff]  ;;  %v1871_v40 = vld [vmem:[%s19893_s1 + $0x38c0] sm:$0xff] }
 0x3ac   :  { %11026 = vmatprep.subr.mxu0 %v1805_v41  ;;  %11061 = vmatprep.subr.mxu1 %v1837_v42  ;;  %v1888_v39 = vld [vmem:[%s19893_s1 + $0x3948] sm:$0xff]  ;;  %v1903_v41 = vld [vmem:[%s19893_s1 + $0x39c0] sm:$0xff] }
 0x3ad   :  { %11027 = vmatpush3.msra.mxu0 %v1789_v43  ;;  %11062 = vmatpush3.msra.mxu1 %v1821_v44  ;;  %v1855_v42 = vld [vmem:[%s19893_s1 + $0x3840] sm:$0xff]  ;;  %v1870_v44 = vld [vmem:[%s19893_s1 + $0x38b8] sm:$0xff] }
 0x3ae   :  { %11028 = vmatprep.subr.mxu0 %v1804_v45  ;;  %11063 = vmatprep.subr.mxu1 %v1836_v46  ;;  %v1887_v43 = vld [vmem:[%s19893_s1 + $0x3940] sm:$0xff]  ;;  %v1902_v45 = vld [vmem:[%s19893_s1 + $0x39b8] sm:$0xff] }
 0x3af   :  { %11029 = vmatpush3.msra.mxu0 %v1788_v47  ;;  %11064 = vmatpush3.msra.mxu1 %v1820_v48  ;;  %v1854_v46 = vld [vmem:[%s19893_s1 + $0x3838] sm:$0xff]  ;;  %v1869_v48 = vld [vmem:[%s19893_s1 + $0x38b0] sm:$0xff] }
 0x3b0   :  { %11030 = vmatprep.subr.mxu0 %v1803_v50  ;;  %11065 = vmatprep.subr.mxu1 %v1835_v52  ;;  %v1886_v47 = vld [vmem:[%s19893_s1 + $0x3938] sm:$0xff]  ;;  %v1853_v50 = vld [vmem:[%s19893_s1 + $0x3830] sm:$0xff] }
 0x3b1   :  { %11031 = vmatpush3.msra.mxu0 %v1787_v53  ;;  %11066 = vmatpush3.msra.mxu1 %v1819_v54  ;;  %v1885_v52 = vld [vmem:[%s19893_s1 + $0x3930] sm:$0xff]  ;;  %v1868_v53 = vld [vmem:[%s19893_s1 + $0x38a8] sm:$0xff] }
 0x3b2   :  { %11032 = vmatprep.subr.mxu0 %v1802_v55  ;;  %11067 = vmatprep.subr.mxu1 %v1834_v56  ;;  %v1900_v54 = vld [vmem:[%s19893_s1 + $0x39a8] sm:$0xff] }
 0x3b3   :  { %11033 = vmatpush3.msra.mxu0 %v1786_v58  ;;  %11068 = vmatpush3.msra.mxu1 %v1818_v59  ;;  %v1852_v55 = vld [vmem:[%s19893_s1 + $0x3828] sm:$0xff]  ;;  %v1867_v58 = vld [vmem:[%s19893_s1 + $0x38a0] sm:$0xff] }
 0x3b4   :  { %11034 = vmatprep.subr.mxu0 %v1801_v60  ;;  %11069 = vmatprep.subr.mxu1 %v1833_v61  ;;  %v1884_v56 = vld [vmem:[%s19893_s1 + $0x3928] sm:$0xff]  ;;  %v1899_v59 = vld [vmem:[%s19893_s1 + $0x39a0] sm:$0xff] }
 0x3b5   :  { %11035 = vmatpush3.msra.mxu0 %v1785_v63  ;;  %11070 = vmatpush3.msra.mxu1 %v1817_v0  ;;  %v1851_v60 = vld [vmem:[%s19893_s1 + $0x3820] sm:$0xff]  ;;  %v1898_v63 = vld [vmem:[%s19893_s1 + $0x3998] sm:$0xff]  ;;  %v3138_v0 = vcombine.high %v43_v57, %v43_v57 }
 0x3b6   :  { %11036 = vmatprep.subr.mxu0 %v1800_v1  ;;  %11071 = vmatprep.subr.mxu1 %v1832_v2  ;;  %v1883_v61 = vld [vmem:[%s19893_s1 + $0x3920] sm:$0xff]  ;;  %v1850_v1 = vld [vmem:[%s19893_s1 + $0x3818] sm:$0xff] }
 0x3b7   :  { %11037 = vmatpush3.msra.mxu0 %v1784_v4  ;;  %11072 = vmatpush3.msra.mxu1 %v1816_v5  ;;  %v1882_v2 = vld [vmem:[%s19893_s1 + $0x3918] sm:$0xff]  ;;  %v1897_v4 = vld [vmem:[%s19893_s1 + $0x3990] sm:$0xff]  ;;  %v3145_v5 = vrot.slane %v43_v57, %v12142_v51 }
 0x3b8   :  { %11038 = vmatprep.subr.mxu0 %v1799_v6  ;;  %11073 = vmatprep.subr.mxu1 %v1831_v7  ;;  %v1849_v6 = vld [vmem:[%s19893_s1 + $0x3810] sm:$0xff] }
 0x3b9   :  { %11039 = vmatpush3.msra.mxu0 %v1783_v9  ;;  %7346 = vmatprep.mubr.f32.mxu0 %v3136_v8  ;;  %v1881_v7 = vld [vmem:[%s19893_s1 + $0x3910] sm:$0xff]  ;;  %v1864_v8 = vld [vmem:[%s19893_s1 + $0x3888] sm:$0xff] }
 0x3ba   :  { %11074 = vmatpush3.msra.mxu1 %v1815_v10  ;;  %7347 = vmatmul.mubr.f32.vlgmr.msra.gmra.mxu0 %v3128_v62  ;;  %v1866_v62 = vld [vmem:[%s19893_s1 + $0x3898] sm:$0xff]  ;;  %v1896_v9 = vld [vmem:[%s19893_s1 + $0x3988] sm:$0xff]  ;;  %v3152_v10 = vrot.slane %v3138_v0, %v12142_v51  ;;  %v1965_v57 = vld [vmem:[%s19893_s1 + $0x3bb0] sm:$0xff] }
 0x3bb   :  { %7416 = vmatprep.mubr.f32.mxu1 %v3137_v11  ;;  %11078 = vmatprep.subr.mxu0 %v1878_v12  ;;  %v1848_v11 = vld [vmem:[%s19893_s1 + $0x3808] sm:$0xff] }
 0x3bc   :  { %11113 = vmatprep.subr.mxu1 %v1910_v13  ;;  %7417 = vmatmul.mubr.f32.vlgmr.msra.gmra.mxu1 %v3135_v3  ;;  %v1865_v3 = vld [vmem:[%s19893_s1 + $0x3890] sm:$0xff]  ;;  %v1880_v12 = vld [vmem:[%s19893_s1 + $0x3908] sm:$0xff]  ;;  %v1863_v13 = vld [vmem:[%s19893_s1 + $0x3880] sm:$0xff] }
 0x3bd   :  { %11079 = vmatpush3.msra.mxu0 %v1862_v14  ;;  %11114 = vmatpush3.msra.mxu1 %v1894_v15  ;;  %v1895_v14 = vld [vmem:[%s19893_s1 + $0x3980] sm:$0xff]  ;;  %v3153_v15 = vcombine.high %v3145_v5, %v3145_v5  ;;  %v44_v0 = vld [vmem:[%s19892_s0 + $0xe8] sm:$0xff] }
 0x3be   :  { %11080 = vmatprep.subr.mxu0 %v1877_v16  ;;  %11115 = vmatprep.subr.mxu1 %v1909_v17  ;;  %v1847_v16 = vld [vmem:[%s19893_s1 + $0x3800] sm:$0xff] }
 0x3bf   :  { %11081 = vmatpush3.msra.mxu0 %v1861_v18  ;;  %11116 = vmatpush3.msra.mxu1 %v1893_v19  ;;  %v1879_v17 = vld [vmem:[%s19893_s1 + $0x3900] sm:$0xff]  ;;  %v3154_v18 = vcombine.high %v3152_v10, %v3152_v10  ;;  %v1942_v19 = vld [vmem:[%s19893_s1 + $0x3af8] sm:$0xff] }
 0x3c0   :  { %11082 = vmatprep.subr.mxu0 %v1876_v20  ;;  %11117 = vmatprep.subr.mxu1 %v1908_v21  ;;  %v1974_v20 = vld [vmem:[%s19893_s1 + $0x3bf8] sm:$0xff] }
 0x3c1   :  { %11083 = vmatpush3.msra.mxu0 %v1860_v22  ;;  %11118 = vmatpush3.msra.mxu1 %v1892_v23  ;;  %v1926_v21 = vld [vmem:[%s19893_s1 + $0x3a78] sm:$0xff]  ;;  %v1941_v23 = vld [vmem:[%s19893_s1 + $0x3af0] sm:$0xff] }
 0x3c2   :  { %11084 = vmatprep.subr.mxu0 %v1875_v24  ;;  %11119 = vmatprep.subr.mxu1 %v1907_v25  ;;  %v1958_v22 = vld [vmem:[%s19893_s1 + $0x3b78] sm:$0xff]  ;;  %v1973_v24 = vld [vmem:[%s19893_s1 + $0x3bf0] sm:$0xff] }
 0x3c3   :  { %11085 = vmatpush3.msra.mxu0 %v1859_v26  ;;  %11120 = vmatpush3.msra.mxu1 %v1891_v27  ;;  %v1925_v25 = vld [vmem:[%s19893_s1 + $0x3a70] sm:$0xff]  ;;  %v1940_v27 = vld [vmem:[%s19893_s1 + $0x3ae8] sm:$0xff] }
 0x3c4   :  { %11086 = vmatprep.subr.mxu0 %v1874_v28  ;;  %11121 = vmatprep.subr.mxu1 %v1906_v29  ;;  %v1957_v26 = vld [vmem:[%s19893_s1 + $0x3b70] sm:$0xff]  ;;  %v1972_v28 = vld [vmem:[%s19893_s1 + $0x3be8] sm:$0xff] }
 0x3c5   :  { %11087 = vmatpush3.msra.mxu0 %v1858_v30  ;;  %11122 = vmatpush3.msra.mxu1 %v1890_v31  ;;  %v1924_v29 = vld [vmem:[%s19893_s1 + $0x3a68] sm:$0xff]  ;;  %v1939_v31 = vld [vmem:[%s19893_s1 + $0x3ae0] sm:$0xff] }
 0x3c6   :  { %11088 = vmatprep.subr.mxu0 %v1873_v32  ;;  %11123 = vmatprep.subr.mxu1 %v1905_v33  ;;  %v1956_v30 = vld [vmem:[%s19893_s1 + $0x3b68] sm:$0xff]  ;;  %v1971_v32 = vld [vmem:[%s19893_s1 + $0x3be0] sm:$0xff] }
 0x3c7   :  { %11089 = vmatpush3.msra.mxu0 %v1857_v34  ;;  %11124 = vmatpush3.msra.mxu1 %v1889_v35  ;;  %v1923_v33 = vld [vmem:[%s19893_s1 + $0x3a60] sm:$0xff]  ;;  %v1938_v35 = vld [vmem:[%s19893_s1 + $0x3ad8] sm:$0xff] }
 0x3c8   :  { %11090 = vmatprep.subr.mxu0 %v1872_v36  ;;  %11125 = vmatprep.subr.mxu1 %v1904_v37  ;;  %v1955_v34 = vld [vmem:[%s19893_s1 + $0x3b60] sm:$0xff]  ;;  %v1970_v36 = vld [vmem:[%s19893_s1 + $0x3bd8] sm:$0xff] }
 0x3c9   :  { %11091 = vmatpush3.msra.mxu0 %v1856_v38  ;;  %11126 = vmatpush3.msra.mxu1 %v1888_v39  ;;  %v1922_v37 = vld [vmem:[%s19893_s1 + $0x3a58] sm:$0xff]  ;;  %v1937_v39 = vld [vmem:[%s19893_s1 + $0x3ad0] sm:$0xff] }
 0x3ca   :  { %11092 = vmatprep.subr.mxu0 %v1871_v40  ;;  %11127 = vmatprep.subr.mxu1 %v1903_v41  ;;  %v1954_v38 = vld [vmem:[%s19893_s1 + $0x3b58] sm:$0xff]  ;;  %v1969_v40 = vld [vmem:[%s19893_s1 + $0x3bd0] sm:$0xff] }
 0x3cb   :  { %11093 = vmatpush3.msra.mxu0 %v1855_v42  ;;  %11128 = vmatpush3.msra.mxu1 %v1887_v43  ;;  %v1921_v41 = vld [vmem:[%s19893_s1 + $0x3a50] sm:$0xff]  ;;  %v1936_v43 = vld [vmem:[%s19893_s1 + $0x3ac8] sm:$0xff] }
 0x3cc   :  { %11094 = vmatprep.subr.mxu0 %v1870_v44  ;;  %11129 = vmatprep.subr.mxu1 %v1902_v45  ;;  %v1953_v42 = vld [vmem:[%s19893_s1 + $0x3b50] sm:$0xff]  ;;  %v1968_v44 = vld [vmem:[%s19893_s1 + $0x3bc8] sm:$0xff] }
 0x3cd   :  { %11095 = vmatpush3.msra.mxu0 %v1854_v46  ;;  %11130 = vmatpush3.msra.mxu1 %v1886_v47  ;;  %v1920_v45 = vld [vmem:[%s19893_s1 + $0x3a48] sm:$0xff]  ;;  %v1935_v47 = vld [vmem:[%s19893_s1 + $0x3ac0] sm:$0xff] }
 0x3ce   :  { %11096 = vmatprep.subr.mxu0 %v1869_v48  ;;  %11131 = vmatprep.subr.mxu1 %v1901_v49  ;;  %v1952_v46 = vld [vmem:[%s19893_s1 + $0x3b48] sm:$0xff]  ;;  %v1967_v48 = vld [vmem:[%s19893_s1 + $0x3bc0] sm:$0xff] }
 0x3cf   :  { %11097 = vmatpush3.msra.mxu0 %v1853_v50  ;;  %11132 = vmatpush3.msra.mxu1 %v1885_v52  ;;  %v1919_v49 = vld [vmem:[%s19893_s1 + $0x3a40] sm:$0xff]  ;;  %v1934_v52 = vld [vmem:[%s19893_s1 + $0x3ab8] sm:$0xff] }
 0x3d0   :  { %11098 = vmatprep.subr.mxu0 %v1868_v53  ;;  %11133 = vmatprep.subr.mxu1 %v1900_v54  ;;  %v1951_v50 = vld [vmem:[%s19893_s1 + $0x3b40] sm:$0xff]  ;;  %v1966_v53 = vld [vmem:[%s19893_s1 + $0x3bb8] sm:$0xff] }
 0x3d1   :  { %11099 = vmatpush3.msra.mxu0 %v1852_v55  ;;  %11134 = vmatpush3.msra.mxu1 %v1884_v56  ;;  %v1918_v54 = vld [vmem:[%s19893_s1 + $0x3a38] sm:$0xff]  ;;  %v1933_v56 = vld [vmem:[%s19893_s1 + $0x3ab0] sm:$0xff] }
 0x3d2   :  { %11100 = vmatprep.subr.mxu0 %v1867_v58  ;;  %11135 = vmatprep.subr.mxu1 %v1899_v59  ;;  %v1950_v55 = vld [vmem:[%s19893_s1 + $0x3b38] sm:$0xff]  ;;  %v1917_v58 = vld [vmem:[%s19893_s1 + $0x3a30] sm:$0xff] }
 0x3d3   :  { %11101 = vmatpush3.msra.mxu0 %v1851_v60  ;;  %11136 = vmatpush3.msra.mxu1 %v1883_v61  ;;  %v1949_v59 = vld [vmem:[%s19893_s1 + $0x3b30] sm:$0xff]  ;;  %v1932_v60 = vld [vmem:[%s19893_s1 + $0x3aa8] sm:$0xff] }
 0x3d4   :  { %11102 = vmatprep.subr.mxu0 %v1866_v62  ;;  %11137 = vmatprep.subr.mxu1 %v1898_v63  ;;  %v1964_v61 = vld [vmem:[%s19893_s1 + $0x3ba8] sm:$0xff] }
 0x3d5   :  { %11103 = vmatpush3.msra.mxu0 %v1850_v1  ;;  %11138 = vmatpush3.msra.mxu1 %v1882_v2  ;;  %v1916_v62 = vld [vmem:[%s19893_s1 + $0x3a28] sm:$0xff]  ;;  %v1931_v1 = vld [vmem:[%s19893_s1 + $0x3aa0] sm:$0xff] }
 0x3d6   :  { %11104 = vmatprep.subr.mxu0 %v1865_v3  ;;  %11139 = vmatprep.subr.mxu1 %v1897_v4  ;;  %v1948_v63 = vld [vmem:[%s19893_s1 + $0x3b28] sm:$0xff]  ;;  %v1963_v2 = vld [vmem:[%s19893_s1 + $0x3ba0] sm:$0xff] }
 0x3d7   :  { %11105 = vmatpush3.msra.mxu0 %v1849_v6  ;;  %11140 = vmatpush3.msra.mxu1 %v1881_v7  ;;  %v1915_v3 = vld [vmem:[%s19893_s1 + $0x3a20] sm:$0xff]  ;;  %v1962_v6 = vld [vmem:[%s19893_s1 + $0x3b98] sm:$0xff]  ;;  %v3155_v7 = vcombine.high %v44_v0, %v44_v0 }
 0x3d8   :  { %11106 = vmatprep.subr.mxu0 %v1864_v8  ;;  %11141 = vmatprep.subr.mxu1 %v1896_v9  ;;  %v1947_v4 = vld [vmem:[%s19893_s1 + $0x3b20] sm:$0xff]  ;;  %v1914_v8 = vld [vmem:[%s19893_s1 + $0x3a18] sm:$0xff] }
 0x3d9   :  { %11107 = vmatpush3.msra.mxu0 %v1848_v11  ;;  %11142 = vmatpush3.msra.mxu1 %v1880_v12  ;;  %v1946_v9 = vld [vmem:[%s19893_s1 + $0x3b18] sm:$0xff]  ;;  %v1961_v11 = vld [vmem:[%s19893_s1 + $0x3b90] sm:$0xff]  ;;  %v3162_v12 = vrot.slane %v44_v0, %v12142_v51 }
 0x3da   :  { %11108 = vmatprep.subr.mxu0 %v1863_v13  ;;  %11143 = vmatprep.subr.mxu1 %v1895_v14  ;;  %v1913_v13 = vld [vmem:[%s19893_s1 + $0x3a10] sm:$0xff] }
 0x3db   :  { %11109 = vmatpush3.msra.mxu0 %v1847_v16  ;;  %7486 = vmatprep.mubr.f32.mxu0 %v3153_v15  ;;  %v1945_v14 = vld [vmem:[%s19893_s1 + $0x3b10] sm:$0xff]  ;;  %v1928_v15 = vld [vmem:[%s19893_s1 + $0x3a88] sm:$0xff] }
 0x3dc   :  { %11144 = vmatpush3.msra.mxu1 %v1879_v17  ;;  %7487 = vmatmul.mubr.f32.vlgmr.msra.gmra.mxu0 %v3145_v5  ;;  %v1930_v5 = vld [vmem:[%s19893_s1 + $0x3a98] sm:$0xff]  ;;  %v1960_v16 = vld [vmem:[%s19893_s1 + $0x3b88] sm:$0xff]  ;;  %v3169_v17 = vrot.slane %v3155_v7, %v12142_v51  ;;  %v2029_v0 = vld [vmem:[%s19893_s1 + $0x3db0] sm:$0xff] }
 0x3dd   :  { %7556 = vmatprep.mubr.f32.mxu1 %v3154_v18  ;;  %11148 = vmatprep.subr.mxu0 %v1942_v19  ;;  %v1912_v18 = vld [vmem:[%s19893_s1 + $0x3a08] sm:$0xff]  ;;  %v45_v7 = vld [vmem:[%s19892_s0 + $0xf0] sm:$0xff] }
 0x3de   :  { %11183 = vmatprep.subr.mxu1 %v1974_v20  ;;  %7557 = vmatmul.mubr.f32.vlgmr.msra.gmra.mxu1 %v3152_v10  ;;  %v1929_v10 = vld [vmem:[%s19893_s1 + $0x3a90] sm:$0xff]  ;;  %v1944_v19 = vld [vmem:[%s19893_s1 + $0x3b08] sm:$0xff]  ;;  %v1927_v20 = vld [vmem:[%s19893_s1 + $0x3a80] sm:$0xff] }
 0x3df   :  { %11149 = vmatpush3.msra.mxu0 %v1926_v21  ;;  %11184 = vmatpush3.msra.mxu1 %v1958_v22  ;;  %v1959_v21 = vld [vmem:[%s19893_s1 + $0x3b80] sm:$0xff]  ;;  %v3170_v22 = vcombine.high %v3162_v12, %v3162_v12 }
 0x3e0   :  { %11150 = vmatprep.subr.mxu0 %v1941_v23  ;;  %11185 = vmatprep.subr.mxu1 %v1973_v24  ;;  %v1911_v23 = vld [vmem:[%s19893_s1 + $0x3a00] sm:$0xff] }
 0x3e1   :  { %11151 = vmatpush3.msra.mxu0 %v1925_v25  ;;  %11186 = vmatpush3.msra.mxu1 %v1957_v26  ;;  %v1943_v24 = vld [vmem:[%s19893_s1 + $0x3b00] sm:$0xff]  ;;  %v3171_v25 = vcombine.high %v3169_v17, %v3169_v17  ;;  %v2006_v26 = vld [vmem:[%s19893_s1 + $0x3cf8] sm:$0xff] }
 0x3e2   :  { %11152 = vmatprep.subr.mxu0 %v1940_v27  ;;  %11187 = vmatprep.subr.mxu1 %v1972_v28  ;;  %v2038_v27 = vld [vmem:[%s19893_s1 + $0x3df8] sm:$0xff] }
 0x3e3   :  { %11153 = vmatpush3.msra.mxu0 %v1924_v29  ;;  %11188 = vmatpush3.msra.mxu1 %v1956_v30  ;;  %v1990_v28 = vld [vmem:[%s19893_s1 + $0x3c78] sm:$0xff]  ;;  %v2005_v30 = vld [vmem:[%s19893_s1 + $0x3cf0] sm:$0xff] }
 0x3e4   :  { %11154 = vmatprep.subr.mxu0 %v1939_v31  ;;  %11189 = vmatprep.subr.mxu1 %v1971_v32  ;;  %v2022_v29 = vld [vmem:[%s19893_s1 + $0x3d78] sm:$0xff]  ;;  %v2037_v31 = vld [vmem:[%s19893_s1 + $0x3df0] sm:$0xff] }
 0x3e5   :  { %11155 = vmatpush3.msra.mxu0 %v1923_v33  ;;  %11190 = vmatpush3.msra.mxu1 %v1955_v34  ;;  %v1989_v32 = vld [vmem:[%s19893_s1 + $0x3c70] sm:$0xff]  ;;  %v2004_v34 = vld [vmem:[%s19893_s1 + $0x3ce8] sm:$0xff] }
 0x3e6   :  { %11156 = vmatprep.subr.mxu0 %v1938_v35  ;;  %11191 = vmatprep.subr.mxu1 %v1970_v36  ;;  %v2021_v33 = vld [vmem:[%s19893_s1 + $0x3d70] sm:$0xff]  ;;  %v2036_v35 = vld [vmem:[%s19893_s1 + $0x3de8] sm:$0xff] }
 0x3e7   :  { %11157 = vmatpush3.msra.mxu0 %v1922_v37  ;;  %11192 = vmatpush3.msra.mxu1 %v1954_v38  ;;  %v1988_v36 = vld [vmem:[%s19893_s1 + $0x3c68] sm:$0xff]  ;;  %v2003_v38 = vld [vmem:[%s19893_s1 + $0x3ce0] sm:$0xff] }
 0x3e8   :  { %11158 = vmatprep.subr.mxu0 %v1937_v39  ;;  %11193 = vmatprep.subr.mxu1 %v1969_v40  ;;  %v2020_v37 = vld [vmem:[%s19893_s1 + $0x3d68] sm:$0xff]  ;;  %v2035_v39 = vld [vmem:[%s19893_s1 + $0x3de0] sm:$0xff] }
 0x3e9   :  { %11159 = vmatpush3.msra.mxu0 %v1921_v41  ;;  %11194 = vmatpush3.msra.mxu1 %v1953_v42  ;;  %v1987_v40 = vld [vmem:[%s19893_s1 + $0x3c60] sm:$0xff]  ;;  %v2002_v42 = vld [vmem:[%s19893_s1 + $0x3cd8] sm:$0xff] }
 0x3ea   :  { %11160 = vmatprep.subr.mxu0 %v1936_v43  ;;  %11195 = vmatprep.subr.mxu1 %v1968_v44  ;;  %v2019_v41 = vld [vmem:[%s19893_s1 + $0x3d60] sm:$0xff]  ;;  %v2034_v43 = vld [vmem:[%s19893_s1 + $0x3dd8] sm:$0xff] }
 0x3eb   :  { %11161 = vmatpush3.msra.mxu0 %v1920_v45  ;;  %11196 = vmatpush3.msra.mxu1 %v1952_v46  ;;  %v1986_v44 = vld [vmem:[%s19893_s1 + $0x3c58] sm:$0xff]  ;;  %v2001_v46 = vld [vmem:[%s19893_s1 + $0x3cd0] sm:$0xff] }
 0x3ec   :  { %11162 = vmatprep.subr.mxu0 %v1935_v47  ;;  %11197 = vmatprep.subr.mxu1 %v1967_v48  ;;  %v2018_v45 = vld [vmem:[%s19893_s1 + $0x3d58] sm:$0xff]  ;;  %v2033_v47 = vld [vmem:[%s19893_s1 + $0x3dd0] sm:$0xff] }
 0x3ed   :  { %11163 = vmatpush3.msra.mxu0 %v1919_v49  ;;  %11198 = vmatpush3.msra.mxu1 %v1951_v50  ;;  %v1985_v48 = vld [vmem:[%s19893_s1 + $0x3c50] sm:$0xff]  ;;  %v2000_v50 = vld [vmem:[%s19893_s1 + $0x3cc8] sm:$0xff] }
 0x3ee   :  { %11164 = vmatprep.subr.mxu0 %v1934_v52  ;;  %11199 = vmatprep.subr.mxu1 %v1966_v53  ;;  %v2017_v49 = vld [vmem:[%s19893_s1 + $0x3d50] sm:$0xff]  ;;  %v2032_v52 = vld [vmem:[%s19893_s1 + $0x3dc8] sm:$0xff] }
 0x3ef   :  { %11165 = vmatpush3.msra.mxu0 %v1918_v54  ;;  %11200 = vmatpush3.msra.mxu1 %v1950_v55  ;;  %v1984_v53 = vld [vmem:[%s19893_s1 + $0x3c48] sm:$0xff]  ;;  %v1999_v55 = vld [vmem:[%s19893_s1 + $0x3cc0] sm:$0xff] }
 0x3f0   :  { %11166 = vmatprep.subr.mxu0 %v1933_v56  ;;  %11201 = vmatprep.subr.mxu1 %v1965_v57  ;;  %v2016_v54 = vld [vmem:[%s19893_s1 + $0x3d48] sm:$0xff]  ;;  %v2031_v56 = vld [vmem:[%s19893_s1 + $0x3dc0] sm:$0xff] }
 0x3f1   :  { %11167 = vmatpush3.msra.mxu0 %v1917_v58  ;;  %11202 = vmatpush3.msra.mxu1 %v1949_v59  ;;  %v1983_v57 = vld [vmem:[%s19893_s1 + $0x3c40] sm:$0xff]  ;;  %v1998_v59 = vld [vmem:[%s19893_s1 + $0x3cb8] sm:$0xff] }
 0x3f2   :  { %11168 = vmatprep.subr.mxu0 %v1932_v60  ;;  %11203 = vmatprep.subr.mxu1 %v1964_v61  ;;  %v2015_v58 = vld [vmem:[%s19893_s1 + $0x3d40] sm:$0xff]  ;;  %v2030_v60 = vld [vmem:[%s19893_s1 + $0x3db8] sm:$0xff] }
 0x3f3   :  { %11169 = vmatpush3.msra.mxu0 %v1916_v62  ;;  %11204 = vmatpush3.msra.mxu1 %v1948_v63  ;;  %v1982_v61 = vld [vmem:[%s19893_s1 + $0x3c38] sm:$0xff]  ;;  %v1997_v63 = vld [vmem:[%s19893_s1 + $0x3cb0] sm:$0xff] }
 0x3f4   :  { %11170 = vmatprep.subr.mxu0 %v1931_v1  ;;  %11205 = vmatprep.subr.mxu1 %v1963_v2  ;;  %v2014_v62 = vld [vmem:[%s19893_s1 + $0x3d38] sm:$0xff]  ;;  %v1981_v1 = vld [vmem:[%s19893_s1 + $0x3c30] sm:$0xff] }
 0x3f5   :  { %11171 = vmatpush3.msra.mxu0 %v1915_v3  ;;  %11206 = vmatpush3.msra.mxu1 %v1947_v4  ;;  %v2013_v2 = vld [vmem:[%s19893_s1 + $0x3d30] sm:$0xff]  ;;  %v1996_v3 = vld [vmem:[%s19893_s1 + $0x3ca8] sm:$0xff] }
 0x3f6   :  { %11172 = vmatprep.subr.mxu0 %v1930_v5  ;;  %11207 = vmatprep.subr.mxu1 %v1962_v6  ;;  %v2028_v4 = vld [vmem:[%s19893_s1 + $0x3da8] sm:$0xff] }
 0x3f7   :  { %11173 = vmatpush3.msra.mxu0 %v1914_v8  ;;  %11208 = vmatpush3.msra.mxu1 %v1946_v9  ;;  %v1980_v5 = vld [vmem:[%s19893_s1 + $0x3c28] sm:$0xff]  ;;  %v1995_v8 = vld [vmem:[%s19893_s1 + $0x3ca0] sm:$0xff] }
 0x3f8   :  { %11174 = vmatprep.subr.mxu0 %v1929_v10  ;;  %11209 = vmatprep.subr.mxu1 %v1961_v11  ;;  %v2012_v6 = vld [vmem:[%s19893_s1 + $0x3d28] sm:$0xff]  ;;  %v2027_v9 = vld [vmem:[%s19893_s1 + $0x3da0] sm:$0xff] }
 0x3f9   :  { %11175 = vmatpush3.msra.mxu0 %v1913_v13  ;;  %11210 = vmatpush3.msra.mxu1 %v1945_v14  ;;  %v1979_v10 = vld [vmem:[%s19893_s1 + $0x3c20] sm:$0xff]  ;;  %v2026_v13 = vld [vmem:[%s19893_s1 + $0x3d98] sm:$0xff]  ;;  %v3172_v14 = vcombine.high %v45_v7, %v45_v7 }
 0x3fa   :  { %11176 = vmatprep.subr.mxu0 %v1928_v15  ;;  %11211 = vmatprep.subr.mxu1 %v1960_v16  ;;  %v2011_v11 = vld [vmem:[%s19893_s1 + $0x3d20] sm:$0xff]  ;;  %v1978_v15 = vld [vmem:[%s19893_s1 + $0x3c18] sm:$0xff] }
 0x3fb   :  { %11177 = vmatpush3.msra.mxu0 %v1912_v18  ;;  %11212 = vmatpush3.msra.mxu1 %v1944_v19  ;;  %v2010_v16 = vld [vmem:[%s19893_s1 + $0x3d18] sm:$0xff]  ;;  %v2025_v18 = vld [vmem:[%s19893_s1 + $0x3d90] sm:$0xff]  ;;  %v3179_v19 = vrot.slane %v45_v7, %v12142_v51 }
 0x3fc   :  { %11178 = vmatprep.subr.mxu0 %v1927_v20  ;;  %11213 = vmatprep.subr.mxu1 %v1959_v21  ;;  %v1977_v20 = vld [vmem:[%s19893_s1 + $0x3c10] sm:$0xff] }
 0x3fd   :  { %11179 = vmatpush3.msra.mxu0 %v1911_v23  ;;  %7626 = vmatprep.mubr.f32.mxu0 %v3170_v22  ;;  %v2009_v21 = vld [vmem:[%s19893_s1 + $0x3d10] sm:$0xff]  ;;  %v1992_v22 = vld [vmem:[%s19893_s1 + $0x3c88] sm:$0xff] }
 0x3fe   :  { %11214 = vmatpush3.msra.mxu1 %v1943_v24  ;;  %7627 = vmatmul.mubr.f32.vlgmr.msra.gmra.mxu0 %v3162_v12  ;;  %v1994_v12 = vld [vmem:[%s19893_s1 + $0x3c98] sm:$0xff]  ;;  %v2024_v23 = vld [vmem:[%s19893_s1 + $0x3d88] sm:$0xff]  ;;  %v3186_v24 = vrot.slane %v3172_v14, %v12142_v51  ;;  %v2093_v7 = vld [vmem:[%s19893_s1 + $0x3fb0] sm:$0xff] }
 0x3ff   :  { %7696 = vmatprep.mubr.f32.mxu1 %v3171_v25  ;;  %11218 = vmatprep.subr.mxu0 %v2006_v26  ;;  %v1976_v25 = vld [vmem:[%s19893_s1 + $0x3c08] sm:$0xff]  ;;  %v46_v14 = vld [vmem:[%s19892_s0 + $0xf8] sm:$0xff] }
 0x400   :  { %11253 = vmatprep.subr.mxu1 %v2038_v27  ;;  %7697 = vmatmul.mubr.f32.vlgmr.msra.gmra.mxu1 %v3169_v17  ;;  %v1993_v17 = vld [vmem:[%s19893_s1 + $0x3c90] sm:$0xff]  ;;  %v2008_v26 = vld [vmem:[%s19893_s1 + $0x3d08] sm:$0xff]  ;;  %v1991_v27 = vld [vmem:[%s19893_s1 + $0x3c80] sm:$0xff] }
 0x401   :  { %11219 = vmatpush3.msra.mxu0 %v1990_v28  ;;  %11254 = vmatpush3.msra.mxu1 %v2022_v29  ;;  %v2023_v28 = vld [vmem:[%s19893_s1 + $0x3d80] sm:$0xff]  ;;  %v3187_v29 = vcombine.high %v3179_v19, %v3179_v19 }
 0x402   :  { %11220 = vmatprep.subr.mxu0 %v2005_v30  ;;  %11255 = vmatprep.subr.mxu1 %v2037_v31  ;;  %v1975_v30 = vld [vmem:[%s19893_s1 + $0x3c00] sm:$0xff] }
 0x403   :  { %11221 = vmatpush3.msra.mxu0 %v1989_v32  ;;  %11256 = vmatpush3.msra.mxu1 %v2021_v33  ;;  %v2007_v31 = vld [vmem:[%s19893_s1 + $0x3d00] sm:$0xff]  ;;  %v3188_v32 = vcombine.high %v3186_v24, %v3186_v24  ;;  %v2070_v33 = vld [vmem:[%s19893_s1 + $0x3ef8] sm:$0xff] }
 0x404   :  { %11222 = vmatprep.subr.mxu0 %v2004_v34  ;;  %11257 = vmatprep.subr.mxu1 %v2036_v35  ;;  %v2102_v34 = vld [vmem:[%s19893_s1 + $0x3ff8] sm:$0xff] }
 0x405   :  { %11223 = vmatpush3.msra.mxu0 %v1988_v36  ;;  %11258 = vmatpush3.msra.mxu1 %v2020_v37  ;;  %v2054_v35 = vld [vmem:[%s19893_s1 + $0x3e78] sm:$0xff]  ;;  %v2069_v37 = vld [vmem:[%s19893_s1 + $0x3ef0] sm:$0xff] }
 0x406   :  { %11224 = vmatprep.subr.mxu0 %v2003_v38  ;;  %11259 = vmatprep.subr.mxu1 %v2035_v39  ;;  %v2086_v36 = vld [vmem:[%s19893_s1 + $0x3f78] sm:$0xff]  ;;  %v2101_v38 = vld [vmem:[%s19893_s1 + $0x3ff0] sm:$0xff] }
 0x407   :  { %11225 = vmatpush3.msra.mxu0 %v1987_v40  ;;  %11260 = vmatpush3.msra.mxu1 %v2019_v41  ;;  %v2053_v39 = vld [vmem:[%s19893_s1 + $0x3e70] sm:$0xff]  ;;  %v2068_v41 = vld [vmem:[%s19893_s1 + $0x3ee8] sm:$0xff] }
 0x408   :  { %11226 = vmatprep.subr.mxu0 %v2002_v42  ;;  %11261 = vmatprep.subr.mxu1 %v2034_v43  ;;  %v2085_v40 = vld [vmem:[%s19893_s1 + $0x3f70] sm:$0xff]  ;;  %v2100_v42 = vld [vmem:[%s19893_s1 + $0x3fe8] sm:$0xff] }
 0x409   :  { %11227 = vmatpush3.msra.mxu0 %v1986_v44  ;;  %11262 = vmatpush3.msra.mxu1 %v2018_v45  ;;  %v2052_v43 = vld [vmem:[%s19893_s1 + $0x3e68] sm:$0xff]  ;;  %v2067_v45 = vld [vmem:[%s19893_s1 + $0x3ee0] sm:$0xff] }
 0x40a   :  { %11228 = vmatprep.subr.mxu0 %v2001_v46  ;;  %11263 = vmatprep.subr.mxu1 %v2033_v47  ;;  %v2084_v44 = vld [vmem:[%s19893_s1 + $0x3f68] sm:$0xff]  ;;  %v2099_v46 = vld [vmem:[%s19893_s1 + $0x3fe0] sm:$0xff] }
 0x40b   :  { %11229 = vmatpush3.msra.mxu0 %v1985_v48  ;;  %11264 = vmatpush3.msra.mxu1 %v2017_v49  ;;  %v2051_v47 = vld [vmem:[%s19893_s1 + $0x3e60] sm:$0xff]  ;;  %v2066_v49 = vld [vmem:[%s19893_s1 + $0x3ed8] sm:$0xff] }
 0x40c   :  { %11230 = vmatprep.subr.mxu0 %v2000_v50  ;;  %11265 = vmatprep.subr.mxu1 %v2032_v52  ;;  %v2083_v48 = vld [vmem:[%s19893_s1 + $0x3f60] sm:$0xff]  ;;  %v2098_v50 = vld [vmem:[%s19893_s1 + $0x3fd8] sm:$0xff] }
 0x40d   :  { %11231 = vmatpush3.msra.mxu0 %v1984_v53  ;;  %11266 = vmatpush3.msra.mxu1 %v2016_v54  ;;  %v2050_v52 = vld [vmem:[%s19893_s1 + $0x3e58] sm:$0xff]  ;;  %v2065_v54 = vld [vmem:[%s19893_s1 + $0x3ed0] sm:$0xff] }
 0x40e   :  { %11232 = vmatprep.subr.mxu0 %v1999_v55  ;;  %11267 = vmatprep.subr.mxu1 %v2031_v56  ;;  %v2082_v53 = vld [vmem:[%s19893_s1 + $0x3f58] sm:$0xff]  ;;  %v2097_v55 = vld [vmem:[%s19893_s1 + $0x3fd0] sm:$0xff] }
 0x40f   :  { %11233 = vmatpush3.msra.mxu0 %v1983_v57  ;;  %11268 = vmatpush3.msra.mxu1 %v2015_v58  ;;  %v2049_v56 = vld [vmem:[%s19893_s1 + $0x3e50] sm:$0xff]  ;;  %v2064_v58 = vld [vmem:[%s19893_s1 + $0x3ec8] sm:$0xff] }
 0x410   :  { %11234 = vmatprep.subr.mxu0 %v1998_v59  ;;  %11269 = vmatprep.subr.mxu1 %v2030_v60  ;;  %v2081_v57 = vld [vmem:[%s19893_s1 + $0x3f50] sm:$0xff]  ;;  %v2096_v59 = vld [vmem:[%s19893_s1 + $0x3fc8] sm:$0xff] }
 0x411   :  { %11235 = vmatpush3.msra.mxu0 %v1982_v61  ;;  %11270 = vmatpush3.msra.mxu1 %v2014_v62  ;;  %v2048_v60 = vld [vmem:[%s19893_s1 + $0x3e48] sm:$0xff]  ;;  %v2063_v62 = vld [vmem:[%s19893_s1 + $0x3ec0] sm:$0xff] }
 0x412   :  { %11236 = vmatprep.subr.mxu0 %v1997_v63  ;;  %11271 = vmatprep.subr.mxu1 %v2029_v0  ;;  %v2080_v61 = vld [vmem:[%s19893_s1 + $0x3f48] sm:$0xff]  ;;  %v2095_v63 = vld [vmem:[%s19893_s1 + $0x3fc0] sm:$0xff] }
 0x413   :  { %11237 = vmatpush3.msra.mxu0 %v1981_v1  ;;  %11272 = vmatpush3.msra.mxu1 %v2013_v2  ;;  %v2047_v0 = vld [vmem:[%s19893_s1 + $0x3e40] sm:$0xff]  ;;  %v2062_v2 = vld [vmem:[%s19893_s1 + $0x3eb8] sm:$0xff] }
 0x414   :  { %11238 = vmatprep.subr.mxu0 %v1996_v3  ;;  %11273 = vmatprep.subr.mxu1 %v2028_v4  ;;  %v2079_v1 = vld [vmem:[%s19893_s1 + $0x3f40] sm:$0xff]  ;;  %v2094_v3 = vld [vmem:[%s19893_s1 + $0x3fb8] sm:$0xff] }
 0x415   :  { %11239 = vmatpush3.msra.mxu0 %v1980_v5  ;;  %11274 = vmatpush3.msra.mxu1 %v2012_v6  ;;  %v2046_v4 = vld [vmem:[%s19893_s1 + $0x3e38] sm:$0xff]  ;;  %v2061_v6 = vld [vmem:[%s19893_s1 + $0x3eb0] sm:$0xff] }
 0x416   :  { %11240 = vmatprep.subr.mxu0 %v1995_v8  ;;  %11275 = vmatprep.subr.mxu1 %v2027_v9  ;;  %v2078_v5 = vld [vmem:[%s19893_s1 + $0x3f38] sm:$0xff]  ;;  %v2045_v8 = vld [vmem:[%s19893_s1 + $0x3e30] sm:$0xff] }
 0x417   :  { %11241 = vmatpush3.msra.mxu0 %v1979_v10  ;;  %11276 = vmatpush3.msra.mxu1 %v2011_v11  ;;  %v2077_v9 = vld [vmem:[%s19893_s1 + $0x3f30] sm:$0xff]  ;;  %v2060_v10 = vld [vmem:[%s19893_s1 + $0x3ea8] sm:$0xff] }
 0x418   :  { %11242 = vmatprep.subr.mxu0 %v1994_v12  ;;  %11277 = vmatprep.subr.mxu1 %v2026_v13  ;;  %v2092_v11 = vld [vmem:[%s19893_s1 + $0x3fa8] sm:$0xff] }
 0x419   :  { %11243 = vmatpush3.msra.mxu0 %v1978_v15  ;;  %11278 = vmatpush3.msra.mxu1 %v2010_v16  ;;  %v2044_v12 = vld [vmem:[%s19893_s1 + $0x3e28] sm:$0xff]  ;;  %v2059_v15 = vld [vmem:[%s19893_s1 + $0x3ea0] sm:$0xff] }
 0x41a   :  { %11244 = vmatprep.subr.mxu0 %v1993_v17  ;;  %11279 = vmatprep.subr.mxu1 %v2025_v18  ;;  %v2076_v13 = vld [vmem:[%s19893_s1 + $0x3f28] sm:$0xff]  ;;  %v2091_v16 = vld [vmem:[%s19893_s1 + $0x3fa0] sm:$0xff] }
 0x41b   :  { %11245 = vmatpush3.msra.mxu0 %v1977_v20  ;;  %11280 = vmatpush3.msra.mxu1 %v2009_v21  ;;  %v2043_v17 = vld [vmem:[%s19893_s1 + $0x3e20] sm:$0xff]  ;;  %v2090_v20 = vld [vmem:[%s19893_s1 + $0x3f98] sm:$0xff]  ;;  %v3189_v21 = vcombine.high %v46_v14, %v46_v14 }
 0x41c   :  { %11246 = vmatprep.subr.mxu0 %v1992_v22  ;;  %11281 = vmatprep.subr.mxu1 %v2024_v23  ;;  %v2075_v18 = vld [vmem:[%s19893_s1 + $0x3f20] sm:$0xff]  ;;  %v2042_v22 = vld [vmem:[%s19893_s1 + $0x3e18] sm:$0xff] }
 0x41d   :  { %11247 = vmatpush3.msra.mxu0 %v1976_v25  ;;  %11282 = vmatpush3.msra.mxu1 %v2008_v26  ;;  %v2074_v23 = vld [vmem:[%s19893_s1 + $0x3f18] sm:$0xff]  ;;  %v2089_v25 = vld [vmem:[%s19893_s1 + $0x3f90] sm:$0xff]  ;;  %v3196_v26 = vrot.slane %v46_v14, %v12142_v51 }
 0x41e   :  { %11248 = vmatprep.subr.mxu0 %v1991_v27  ;;  %11283 = vmatprep.subr.mxu1 %v2023_v28  ;;  %v2041_v27 = vld [vmem:[%s19893_s1 + $0x3e10] sm:$0xff] }
 0x41f   :  { %11249 = vmatpush3.msra.mxu0 %v1975_v30  ;;  %7766 = vmatprep.mubr.f32.mxu0 %v3187_v29  ;;  %v2073_v28 = vld [vmem:[%s19893_s1 + $0x3f10] sm:$0xff]  ;;  %v2056_v29 = vld [vmem:[%s19893_s1 + $0x3e88] sm:$0xff] }
 0x420   :  { %11284 = vmatpush3.msra.mxu1 %v2007_v31  ;;  %7767 = vmatmul.mubr.f32.vlgmr.msra.gmra.mxu0 %v3179_v19  ;;  %v2058_v19 = vld [vmem:[%s19893_s1 + $0x3e98] sm:$0xff]  ;;  %v2088_v30 = vld [vmem:[%s19893_s1 + $0x3f88] sm:$0xff]  ;;  %v3203_v31 = vrot.slane %v3189_v21, %v12142_v51  ;;  %v2157_v14 = vld [vmem:[%s19893_s1 + $0x41b0] sm:$0xff] }
 0x421   :  { %7836 = vmatprep.mubr.f32.mxu1 %v3188_v32  ;;  %11288 = vmatprep.subr.mxu0 %v2070_v33  ;;  %v2040_v32 = vld [vmem:[%s19893_s1 + $0x3e08] sm:$0xff]  ;;  %v47_v21 = vld [vmem:[%s19892_s0 + $0x100] sm:$0xff] }
 0x422   :  { %11323 = vmatprep.subr.mxu1 %v2102_v34  ;;  %7837 = vmatmul.mubr.f32.vlgmr.msra.gmra.mxu1 %v3186_v24  ;;  %v2057_v24 = vld [vmem:[%s19893_s1 + $0x3e90] sm:$0xff]  ;;  %v2072_v33 = vld [vmem:[%s19893_s1 + $0x3f08] sm:$0xff]  ;;  %v2055_v34 = vld [vmem:[%s19893_s1 + $0x3e80] sm:$0xff] }
 0x423   :  { %11289 = vmatpush3.msra.mxu0 %v2054_v35  ;;  %11324 = vmatpush3.msra.mxu1 %v2086_v36  ;;  %v2087_v35 = vld [vmem:[%s19893_s1 + $0x3f80] sm:$0xff]  ;;  %v3204_v36 = vcombine.high %v3196_v26, %v3196_v26 }
 0x424   :  { %11290 = vmatprep.subr.mxu0 %v2069_v37  ;;  %11325 = vmatprep.subr.mxu1 %v2101_v38  ;;  %v2039_v37 = vld [vmem:[%s19893_s1 + $0x3e00] sm:$0xff] }
 0x425   :  { %11291 = vmatpush3.msra.mxu0 %v2053_v39  ;;  %11326 = vmatpush3.msra.mxu1 %v2085_v40  ;;  %v2071_v38 = vld [vmem:[%s19893_s1 + $0x3f00] sm:$0xff]  ;;  %v3205_v39 = vcombine.high %v3203_v31, %v3203_v31  ;;  %v2134_v40 = vld [vmem:[%s19893_s1 + $0x40f8] sm:$0xff] }
 0x426   :  { %11292 = vmatprep.subr.mxu0 %v2068_v41  ;;  %11327 = vmatprep.subr.mxu1 %v2100_v42  ;;  %v2166_v41 = vld [vmem:[%s19893_s1 + $0x41f8] sm:$0xff] }
 0x427   :  { %11293 = vmatpush3.msra.mxu0 %v2052_v43  ;;  %11328 = vmatpush3.msra.mxu1 %v2084_v44  ;;  %v2118_v42 = vld [vmem:[%s19893_s1 + $0x4078] sm:$0xff]  ;;  %v2133_v44 = vld [vmem:[%s19893_s1 + $0x40f0] sm:$0xff] }
 0x428   :  { %11294 = vmatprep.subr.mxu0 %v2067_v45  ;;  %11329 = vmatprep.subr.mxu1 %v2099_v46  ;;  %v2150_v43 = vld [vmem:[%s19893_s1 + $0x4178] sm:$0xff]  ;;  %v2165_v45 = vld [vmem:[%s19893_s1 + $0x41f0] sm:$0xff] }
 0x429   :  { %11295 = vmatpush3.msra.mxu0 %v2051_v47  ;;  %11330 = vmatpush3.msra.mxu1 %v2083_v48  ;;  %v2117_v46 = vld [vmem:[%s19893_s1 + $0x4070] sm:$0xff]  ;;  %v2132_v48 = vld [vmem:[%s19893_s1 + $0x40e8] sm:$0xff] }
 0x42a   :  { %11296 = vmatprep.subr.mxu0 %v2066_v49  ;;  %11331 = vmatprep.subr.mxu1 %v2098_v50  ;;  %v2149_v47 = vld [vmem:[%s19893_s1 + $0x4170] sm:$0xff]  ;;  %v2164_v49 = vld [vmem:[%s19893_s1 + $0x41e8] sm:$0xff] }
 0x42b   :  { %11297 = vmatpush3.msra.mxu0 %v2050_v52  ;;  %11332 = vmatpush3.msra.mxu1 %v2082_v53  ;;  %v2116_v50 = vld [vmem:[%s19893_s1 + $0x4068] sm:$0xff]  ;;  %v2131_v53 = vld [vmem:[%s19893_s1 + $0x40e0] sm:$0xff] }
 0x42c   :  { %11298 = vmatprep.subr.mxu0 %v2065_v54  ;;  %11333 = vmatprep.subr.mxu1 %v2097_v55  ;;  %v2148_v52 = vld [vmem:[%s19893_s1 + $0x4168] sm:$0xff]  ;;  %v2163_v54 = vld [vmem:[%s19893_s1 + $0x41e0] sm:$0xff] }
 0x42d   :  { %11299 = vmatpush3.msra.mxu0 %v2049_v56  ;;  %11334 = vmatpush3.msra.mxu1 %v2081_v57  ;;  %v2115_v55 = vld [vmem:[%s19893_s1 + $0x4060] sm:$0xff]  ;;  %v2130_v57 = vld [vmem:[%s19893_s1 + $0x40d8] sm:$0xff] }
 0x42e   :  { %11300 = vmatprep.subr.mxu0 %v2064_v58  ;;  %11335 = vmatprep.subr.mxu1 %v2096_v59  ;;  %v2147_v56 = vld [vmem:[%s19893_s1 + $0x4160] sm:$0xff]  ;;  %v2162_v58 = vld [vmem:[%s19893_s1 + $0x41d8] sm:$0xff] }
 0x42f   :  { %11301 = vmatpush3.msra.mxu0 %v2048_v60  ;;  %11336 = vmatpush3.msra.mxu1 %v2080_v61  ;;  %v2114_v59 = vld [vmem:[%s19893_s1 + $0x4058] sm:$0xff]  ;;  %v2129_v61 = vld [vmem:[%s19893_s1 + $0x40d0] sm:$0xff] }
 0x430   :  { %11302 = vmatprep.subr.mxu0 %v2063_v62  ;;  %11337 = vmatprep.subr.mxu1 %v2095_v63  ;;  %v2146_v60 = vld [vmem:[%s19893_s1 + $0x4158] sm:$0xff]  ;;  %v2161_v62 = vld [vmem:[%s19893_s1 + $0x41d0] sm:$0xff] }
 0x431   :  { %11303 = vmatpush3.msra.mxu0 %v2047_v0  ;;  %11338 = vmatpush3.msra.mxu1 %v2079_v1  ;;  %v2113_v63 = vld [vmem:[%s19893_s1 + $0x4050] sm:$0xff]  ;;  %v2128_v1 = vld [vmem:[%s19893_s1 + $0x40c8] sm:$0xff] }
 0x432   :  { %11304 = vmatprep.subr.mxu0 %v2062_v2  ;;  %11339 = vmatprep.subr.mxu1 %v2094_v3  ;;  %v2145_v0 = vld [vmem:[%s19893_s1 + $0x4150] sm:$0xff]  ;;  %v2160_v2 = vld [vmem:[%s19893_s1 + $0x41c8] sm:$0xff] }
 0x433   :  { %11305 = vmatpush3.msra.mxu0 %v2046_v4  ;;  %11340 = vmatpush3.msra.mxu1 %v2078_v5  ;;  %v2112_v3 = vld [vmem:[%s19893_s1 + $0x4048] sm:$0xff]  ;;  %v2127_v5 = vld [vmem:[%s19893_s1 + $0x40c0] sm:$0xff] }
 0x434   :  { %11306 = vmatprep.subr.mxu0 %v2061_v6  ;;  %11341 = vmatprep.subr.mxu1 %v2093_v7  ;;  %v2144_v4 = vld [vmem:[%s19893_s1 + $0x4148] sm:$0xff]  ;;  %v2159_v6 = vld [vmem:[%s19893_s1 + $0x41c0] sm:$0xff] }
 0x435   :  { %11307 = vmatpush3.msra.mxu0 %v2045_v8  ;;  %11342 = vmatpush3.msra.mxu1 %v2077_v9  ;;  %v2111_v7 = vld [vmem:[%s19893_s1 + $0x4040] sm:$0xff]  ;;  %v2126_v9 = vld [vmem:[%s19893_s1 + $0x40b8] sm:$0xff] }
 0x436   :  { %11308 = vmatprep.subr.mxu0 %v2060_v10  ;;  %11343 = vmatprep.subr.mxu1 %v2092_v11  ;;  %v2143_v8 = vld [vmem:[%s19893_s1 + $0x4140] sm:$0xff]  ;;  %v2158_v10 = vld [vmem:[%s19893_s1 + $0x41b8] sm:$0xff] }
 0x437   :  { %11309 = vmatpush3.msra.mxu0 %v2044_v12  ;;  %11344 = vmatpush3.msra.mxu1 %v2076_v13  ;;  %v2110_v11 = vld [vmem:[%s19893_s1 + $0x4038] sm:$0xff]  ;;  %v2125_v13 = vld [vmem:[%s19893_s1 + $0x40b0] sm:$0xff] }
 0x438   :  { %11310 = vmatprep.subr.mxu0 %v2059_v15  ;;  %11345 = vmatprep.subr.mxu1 %v2091_v16  ;;  %v2142_v12 = vld [vmem:[%s19893_s1 + $0x4138] sm:$0xff]  ;;  %v2109_v15 = vld [vmem:[%s19893_s1 + $0x4030] sm:$0xff] }
 0x439   :  { %11311 = vmatpush3.msra.mxu0 %v2043_v17  ;;  %11346 = vmatpush3.msra.mxu1 %v2075_v18  ;;  %v2141_v16 = vld [vmem:[%s19893_s1 + $0x4130] sm:$0xff]  ;;  %v2124_v17 = vld [vmem:[%s19893_s1 + $0x40a8] sm:$0xff] }
 0x43a   :  { %11312 = vmatprep.subr.mxu0 %v2058_v19  ;;  %11347 = vmatprep.subr.mxu1 %v2090_v20  ;;  %v2156_v18 = vld [vmem:[%s19893_s1 + $0x41a8] sm:$0xff] }
 0x43b   :  { %11313 = vmatpush3.msra.mxu0 %v2042_v22  ;;  %11348 = vmatpush3.msra.mxu1 %v2074_v23  ;;  %v2108_v19 = vld [vmem:[%s19893_s1 + $0x4028] sm:$0xff]  ;;  %v2123_v22 = vld [vmem:[%s19893_s1 + $0x40a0] sm:$0xff] }
 0x43c   :  { %11314 = vmatprep.subr.mxu0 %v2057_v24  ;;  %11349 = vmatprep.subr.mxu1 %v2089_v25  ;;  %v2140_v20 = vld [vmem:[%s19893_s1 + $0x4128] sm:$0xff]  ;;  %v2155_v23 = vld [vmem:[%s19893_s1 + $0x41a0] sm:$0xff] }
 0x43d   :  { %11315 = vmatpush3.msra.mxu0 %v2041_v27  ;;  %11350 = vmatpush3.msra.mxu1 %v2073_v28  ;;  %v2107_v24 = vld [vmem:[%s19893_s1 + $0x4020] sm:$0xff]  ;;  %v2154_v27 = vld [vmem:[%s19893_s1 + $0x4198] sm:$0xff]  ;;  %v3206_v28 = vcombine.high %v47_v21, %v47_v21 }
 0x43e   :  { %11316 = vmatprep.subr.mxu0 %v2056_v29  ;;  %11351 = vmatprep.subr.mxu1 %v2088_v30  ;;  %v2139_v25 = vld [vmem:[%s19893_s1 + $0x4120] sm:$0xff]  ;;  %v2106_v29 = vld [vmem:[%s19893_s1 + $0x4018] sm:$0xff] }
 0x43f   :  { %11317 = vmatpush3.msra.mxu0 %v2040_v32  ;;  %11352 = vmatpush3.msra.mxu1 %v2072_v33  ;;  %v2138_v30 = vld [vmem:[%s19893_s1 + $0x4118] sm:$0xff]  ;;  %v2153_v32 = vld [vmem:[%s19893_s1 + $0x4190] sm:$0xff]  ;;  %v3213_v33 = vrot.slane %v47_v21, %v12142_v51 }
 0x440   :  { %11318 = vmatprep.subr.mxu0 %v2055_v34  ;;  %11353 = vmatprep.subr.mxu1 %v2087_v35  ;;  %v2105_v34 = vld [vmem:[%s19893_s1 + $0x4010] sm:$0xff] }
 0x441   :  { %11319 = vmatpush3.msra.mxu0 %v2039_v37  ;;  %7906 = vmatprep.mubr.f32.mxu0 %v3204_v36  ;;  %v2137_v35 = vld [vmem:[%s19893_s1 + $0x4110] sm:$0xff]  ;;  %v2120_v36 = vld [vmem:[%s19893_s1 + $0x4088] sm:$0xff] }
 0x442   :  { %11354 = vmatpush3.msra.mxu1 %v2071_v38  ;;  %7907 = vmatmul.mubr.f32.vlgmr.msra.gmra.mxu0 %v3196_v26  ;;  %v2122_v26 = vld [vmem:[%s19893_s1 + $0x4098] sm:$0xff]  ;;  %v2152_v37 = vld [vmem:[%s19893_s1 + $0x4188] sm:$0xff]  ;;  %v3220_v38 = vrot.slane %v3206_v28, %v12142_v51  ;;  %v2221_v21 = vld [vmem:[%s19893_s1 + $0x43b0] sm:$0xff] }
 0x443   :  { %7976 = vmatprep.mubr.f32.mxu1 %v3205_v39  ;;  %11358 = vmatprep.subr.mxu0 %v2134_v40  ;;  %v2104_v39 = vld [vmem:[%s19893_s1 + $0x4008] sm:$0xff] }
 0x444   :  { %11393 = vmatprep.subr.mxu1 %v2166_v41  ;;  %7977 = vmatmul.mubr.f32.vlgmr.msra.gmra.mxu1 %v3203_v31  ;;  %v2121_v31 = vld [vmem:[%s19893_s1 + $0x4090] sm:$0xff]  ;;  %v2136_v40 = vld [vmem:[%s19893_s1 + $0x4108] sm:$0xff]  ;;  %v2119_v41 = vld [vmem:[%s19893_s1 + $0x4080] sm:$0xff] }
 0x445   :  { %11359 = vmatpush3.msra.mxu0 %v2118_v42  ;;  %11394 = vmatpush3.msra.mxu1 %v2150_v43  ;;  %v2151_v42 = vld [vmem:[%s19893_s1 + $0x4180] sm:$0xff]  ;;  %v3221_v43 = vcombine.high %v3213_v33, %v3213_v33  ;;  %v48_v28 = vld [vmem:[%s19892_s0 + $0x108] sm:$0xff] }
 0x446   :  { %11360 = vmatprep.subr.mxu0 %v2133_v44  ;;  %11395 = vmatprep.subr.mxu1 %v2165_v45  ;;  %v2103_v44 = vld [vmem:[%s19893_s1 + $0x4000] sm:$0xff] }
 0x447   :  { %11361 = vmatpush3.msra.mxu0 %v2117_v46  ;;  %11396 = vmatpush3.msra.mxu1 %v2149_v47  ;;  %v2135_v45 = vld [vmem:[%s19893_s1 + $0x4100] sm:$0xff]  ;;  %v3222_v46 = vcombine.high %v3220_v38, %v3220_v38  ;;  %v2198_v47 = vld [vmem:[%s19893_s1 + $0x42f8] sm:$0xff] }
 0x448   :  { %11362 = vmatprep.subr.mxu0 %v2132_v48  ;;  %11397 = vmatprep.subr.mxu1 %v2164_v49  ;;  %v2230_v48 = vld [vmem:[%s19893_s1 + $0x43f8] sm:$0xff] }
 0x449   :  { %11363 = vmatpush3.msra.mxu0 %v2116_v50  ;;  %11398 = vmatpush3.msra.mxu1 %v2148_v52  ;;  %v2182_v49 = vld [vmem:[%s19893_s1 + $0x4278] sm:$0xff]  ;;  %v2197_v52 = vld [vmem:[%s19893_s1 + $0x42f0] sm:$0xff] }
 0x44a   :  { %11364 = vmatprep.subr.mxu0 %v2131_v53  ;;  %11399 = vmatprep.subr.mxu1 %v2163_v54  ;;  %v2214_v50 = vld [vmem:[%s19893_s1 + $0x4378] sm:$0xff]  ;;  %v2229_v53 = vld [vmem:[%s19893_s1 + $0x43f0] sm:$0xff] }
 0x44b   :  { %11365 = vmatpush3.msra.mxu0 %v2115_v55  ;;  %11400 = vmatpush3.msra.mxu1 %v2147_v56  ;;  %v2181_v54 = vld [vmem:[%s19893_s1 + $0x4270] sm:$0xff]  ;;  %v2196_v56 = vld [vmem:[%s19893_s1 + $0x42e8] sm:$0xff] }
 0x44c   :  { %11366 = vmatprep.subr.mxu0 %v2130_v57  ;;  %11401 = vmatprep.subr.mxu1 %v2162_v58  ;;  %v2213_v55 = vld [vmem:[%s19893_s1 + $0x4370] sm:$0xff]  ;;  %v2228_v57 = vld [vmem:[%s19893_s1 + $0x43e8] sm:$0xff] }
 0x44d   :  { %11367 = vmatpush3.msra.mxu0 %v2114_v59  ;;  %11402 = vmatpush3.msra.mxu1 %v2146_v60  ;;  %v2180_v58 = vld [vmem:[%s19893_s1 + $0x4268] sm:$0xff]  ;;  %v2195_v60 = vld [vmem:[%s19893_s1 + $0x42e0] sm:$0xff] }
 0x44e   :  { %11368 = vmatprep.subr.mxu0 %v2129_v61  ;;  %11403 = vmatprep.subr.mxu1 %v2161_v62  ;;  %v2212_v59 = vld [vmem:[%s19893_s1 + $0x4368] sm:$0xff]  ;;  %v2227_v61 = vld [vmem:[%s19893_s1 + $0x43e0] sm:$0xff] }
 0x44f   :  { %11369 = vmatpush3.msra.mxu0 %v2113_v63  ;;  %11404 = vmatpush3.msra.mxu1 %v2145_v0  ;;  %v2179_v62 = vld [vmem:[%s19893_s1 + $0x4260] sm:$0xff]  ;;  %v2194_v0 = vld [vmem:[%s19893_s1 + $0x42d8] sm:$0xff] }
 0x450   :  { %11370 = vmatprep.subr.mxu0 %v2128_v1  ;;  %11405 = vmatprep.subr.mxu1 %v2160_v2  ;;  %v2211_v63 = vld [vmem:[%s19893_s1 + $0x4360] sm:$0xff]  ;;  %v2226_v1 = vld [vmem:[%s19893_s1 + $0x43d8] sm:$0xff] }
 0x451   :  { %11371 = vmatpush3.msra.mxu0 %v2112_v3  ;;  %11406 = vmatpush3.msra.mxu1 %v2144_v4  ;;  %v2178_v2 = vld [vmem:[%s19893_s1 + $0x4258] sm:$0xff]  ;;  %v2193_v4 = vld [vmem:[%s19893_s1 + $0x42d0] sm:$0xff] }
 0x452   :  { %11372 = vmatprep.subr.mxu0 %v2127_v5  ;;  %11407 = vmatprep.subr.mxu1 %v2159_v6  ;;  %v2210_v3 = vld [vmem:[%s19893_s1 + $0x4358] sm:$0xff]  ;;  %v2225_v5 = vld [vmem:[%s19893_s1 + $0x43d0] sm:$0xff] }
 0x453   :  { %11373 = vmatpush3.msra.mxu0 %v2111_v7  ;;  %11408 = vmatpush3.msra.mxu1 %v2143_v8  ;;  %v2177_v6 = vld [vmem:[%s19893_s1 + $0x4250] sm:$0xff]  ;;  %v2192_v8 = vld [vmem:[%s19893_s1 + $0x42c8] sm:$0xff] }
 0x454   :  { %11374 = vmatprep.subr.mxu0 %v2126_v9  ;;  %11409 = vmatprep.subr.mxu1 %v2158_v10  ;;  %v2209_v7 = vld [vmem:[%s19893_s1 + $0x4350] sm:$0xff]  ;;  %v2224_v9 = vld [vmem:[%s19893_s1 + $0x43c8] sm:$0xff] }
 0x455   :  { %11375 = vmatpush3.msra.mxu0 %v2110_v11  ;;  %11410 = vmatpush3.msra.mxu1 %v2142_v12  ;;  %v2176_v10 = vld [vmem:[%s19893_s1 + $0x4248] sm:$0xff]  ;;  %v2191_v12 = vld [vmem:[%s19893_s1 + $0x42c0] sm:$0xff] }
 0x456   :  { %11376 = vmatprep.subr.mxu0 %v2125_v13  ;;  %11411 = vmatprep.subr.mxu1 %v2157_v14  ;;  %v2208_v11 = vld [vmem:[%s19893_s1 + $0x4348] sm:$0xff]  ;;  %v2223_v13 = vld [vmem:[%s19893_s1 + $0x43c0] sm:$0xff] }
 0x457   :  { %11377 = vmatpush3.msra.mxu0 %v2109_v15  ;;  %11412 = vmatpush3.msra.mxu1 %v2141_v16  ;;  %v2175_v14 = vld [vmem:[%s19893_s1 + $0x4240] sm:$0xff]  ;;  %v2190_v16 = vld [vmem:[%s19893_s1 + $0x42b8] sm:$0xff] }
 0x458   :  { %11378 = vmatprep.subr.mxu0 %v2124_v17  ;;  %11413 = vmatprep.subr.mxu1 %v2156_v18  ;;  %v2207_v15 = vld [vmem:[%s19893_s1 + $0x4340] sm:$0xff]  ;;  %v2222_v17 = vld [vmem:[%s19893_s1 + $0x43b8] sm:$0xff] }
 0x459   :  { %11379 = vmatpush3.msra.mxu0 %v2108_v19  ;;  %11414 = vmatpush3.msra.mxu1 %v2140_v20  ;;  %v2174_v18 = vld [vmem:[%s19893_s1 + $0x4238] sm:$0xff]  ;;  %v2189_v20 = vld [vmem:[%s19893_s1 + $0x42b0] sm:$0xff] }
 0x45a   :  { %11380 = vmatprep.subr.mxu0 %v2123_v22  ;;  %11415 = vmatprep.subr.mxu1 %v2155_v23  ;;  %v2206_v19 = vld [vmem:[%s19893_s1 + $0x4338] sm:$0xff]  ;;  %v2173_v22 = vld [vmem:[%s19893_s1 + $0x4230] sm:$0xff] }
 0x45b   :  { %11381 = vmatpush3.msra.mxu0 %v2107_v24  ;;  %11416 = vmatpush3.msra.mxu1 %v2139_v25  ;;  %v2205_v23 = vld [vmem:[%s19893_s1 + $0x4330] sm:$0xff]  ;;  %v2188_v24 = vld [vmem:[%s19893_s1 + $0x42a8] sm:$0xff] }
 0x45c   :  { %11382 = vmatprep.subr.mxu0 %v2122_v26  ;;  %11417 = vmatprep.subr.mxu1 %v2154_v27  ;;  %v2220_v25 = vld [vmem:[%s19893_s1 + $0x43a8] sm:$0xff] }
 0x45d   :  { %11383 = vmatpush3.msra.mxu0 %v2106_v29  ;;  %11418 = vmatpush3.msra.mxu1 %v2138_v30  ;;  %v2172_v26 = vld [vmem:[%s19893_s1 + $0x4228] sm:$0xff]  ;;  %v2187_v29 = vld [vmem:[%s19893_s1 + $0x42a0] sm:$0xff] }
 0x45e   :  { %11384 = vmatprep.subr.mxu0 %v2121_v31  ;;  %11419 = vmatprep.subr.mxu1 %v2153_v32  ;;  %v2204_v27 = vld [vmem:[%s19893_s1 + $0x4328] sm:$0xff]  ;;  %v2219_v30 = vld [vmem:[%s19893_s1 + $0x43a0] sm:$0xff] }
 0x45f   :  { %11385 = vmatpush3.msra.mxu0 %v2105_v34  ;;  %11420 = vmatpush3.msra.mxu1 %v2137_v35  ;;  %v2171_v31 = vld [vmem:[%s19893_s1 + $0x4220] sm:$0xff]  ;;  %v2218_v34 = vld [vmem:[%s19893_s1 + $0x4398] sm:$0xff]  ;;  %v3223_v35 = vcombine.high %v48_v28, %v48_v28 }
 0x460   :  { %11386 = vmatprep.subr.mxu0 %v2120_v36  ;;  %11421 = vmatprep.subr.mxu1 %v2152_v37  ;;  %v2203_v32 = vld [vmem:[%s19893_s1 + $0x4320] sm:$0xff]  ;;  %v2170_v36 = vld [vmem:[%s19893_s1 + $0x4218] sm:$0xff] }
 0x461   :  { %11387 = vmatpush3.msra.mxu0 %v2104_v39  ;;  %11422 = vmatpush3.msra.mxu1 %v2136_v40  ;;  %v2202_v37 = vld [vmem:[%s19893_s1 + $0x4318] sm:$0xff]  ;;  %v2217_v39 = vld [vmem:[%s19893_s1 + $0x4390] sm:$0xff]  ;;  %v3230_v40 = vrot.slane %v48_v28, %v12142_v51 }
 0x462   :  { %11388 = vmatprep.subr.mxu0 %v2119_v41  ;;  %11423 = vmatprep.subr.mxu1 %v2151_v42  ;;  %v2169_v41 = vld [vmem:[%s19893_s1 + $0x4210] sm:$0xff] }
 0x463   :  { %11389 = vmatpush3.msra.mxu0 %v2103_v44  ;;  %8046 = vmatprep.mubr.f32.mxu0 %v3221_v43  ;;  %v2201_v42 = vld [vmem:[%s19893_s1 + $0x4310] sm:$0xff]  ;;  %v2184_v43 = vld [vmem:[%s19893_s1 + $0x4288] sm:$0xff] }
 0x464   :  { %11424 = vmatpush3.msra.mxu1 %v2135_v45  ;;  %8047 = vmatmul.mubr.f32.vlgmr.msra.gmra.mxu0 %v3213_v33  ;;  %v2186_v33 = vld [vmem:[%s19893_s1 + $0x4298] sm:$0xff]  ;;  %v2216_v44 = vld [vmem:[%s19893_s1 + $0x4388] sm:$0xff]  ;;  %v3237_v45 = vrot.slane %v3223_v35, %v12142_v51  ;;  %v2285_v28 = vld [vmem:[%s19893_s1 + $0x45b0] sm:$0xff] }
 0x465   :  { %8116 = vmatprep.mubr.f32.mxu1 %v3222_v46  ;;  %11428 = vmatprep.subr.mxu0 %v2198_v47  ;;  %v2168_v46 = vld [vmem:[%s19893_s1 + $0x4208] sm:$0xff]  ;;  %v49_v35 = vld [vmem:[%s19892_s0 + $0x110] sm:$0xff] }
 0x466   :  { %11463 = vmatprep.subr.mxu1 %v2230_v48  ;;  %8117 = vmatmul.mubr.f32.vlgmr.msra.gmra.mxu1 %v3220_v38  ;;  %v2185_v38 = vld [vmem:[%s19893_s1 + $0x4290] sm:$0xff]  ;;  %v2200_v47 = vld [vmem:[%s19893_s1 + $0x4308] sm:$0xff]  ;;  %v2183_v48 = vld [vmem:[%s19893_s1 + $0x4280] sm:$0xff] }
 0x467   :  { %11429 = vmatpush3.msra.mxu0 %v2182_v49  ;;  %11464 = vmatpush3.msra.mxu1 %v2214_v50  ;;  %v2215_v49 = vld [vmem:[%s19893_s1 + $0x4380] sm:$0xff]  ;;  %v3238_v50 = vcombine.high %v3230_v40, %v3230_v40 }
 0x468   :  { %11430 = vmatprep.subr.mxu0 %v2197_v52  ;;  %11465 = vmatprep.subr.mxu1 %v2229_v53  ;;  %v2167_v52 = vld [vmem:[%s19893_s1 + $0x4200] sm:$0xff] }
 0x469   :  { %11431 = vmatpush3.msra.mxu0 %v2181_v54  ;;  %11466 = vmatpush3.msra.mxu1 %v2213_v55  ;;  %v2199_v53 = vld [vmem:[%s19893_s1 + $0x4300] sm:$0xff]  ;;  %v3239_v54 = vcombine.high %v3237_v45, %v3237_v45  ;;  %v2262_v55 = vld [vmem:[%s19893_s1 + $0x44f8] sm:$0xff] }
 0x46a   :  { %11432 = vmatprep.subr.mxu0 %v2196_v56  ;;  %11467 = vmatprep.subr.mxu1 %v2228_v57  ;;  %v2294_v56 = vld [vmem:[%s19893_s1 + $0x45f8] sm:$0xff] }
 0x46b   :  { %11433 = vmatpush3.msra.mxu0 %v2180_v58  ;;  %11468 = vmatpush3.msra.mxu1 %v2212_v59  ;;  %v2246_v57 = vld [vmem:[%s19893_s1 + $0x4478] sm:$0xff]  ;;  %v2261_v59 = vld [vmem:[%s19893_s1 + $0x44f0] sm:$0xff] }
 0x46c   :  { %11434 = vmatprep.subr.mxu0 %v2195_v60  ;;  %11469 = vmatprep.subr.mxu1 %v2227_v61  ;;  %v2278_v58 = vld [vmem:[%s19893_s1 + $0x4578] sm:$0xff]  ;;  %v2293_v60 = vld [vmem:[%s19893_s1 + $0x45f0] sm:$0xff] }
 0x46d   :  { %11435 = vmatpush3.msra.mxu0 %v2179_v62  ;;  %11470 = vmatpush3.msra.mxu1 %v2211_v63  ;;  %v2245_v61 = vld [vmem:[%s19893_s1 + $0x4470] sm:$0xff]  ;;  %v2260_v63 = vld [vmem:[%s19893_s1 + $0x44e8] sm:$0xff] }
 0x46e   :  { %11436 = vmatprep.subr.mxu0 %v2194_v0  ;;  %11471 = vmatprep.subr.mxu1 %v2226_v1  ;;  %v2277_v62 = vld [vmem:[%s19893_s1 + $0x4570] sm:$0xff]  ;;  %v2292_v0 = vld [vmem:[%s19893_s1 + $0x45e8] sm:$0xff] }
 0x46f   :  { %11437 = vmatpush3.msra.mxu0 %v2178_v2  ;;  %11472 = vmatpush3.msra.mxu1 %v2210_v3  ;;  %v2244_v1 = vld [vmem:[%s19893_s1 + $0x4468] sm:$0xff]  ;;  %v2259_v3 = vld [vmem:[%s19893_s1 + $0x44e0] sm:$0xff] }
 0x470   :  { %11438 = vmatprep.subr.mxu0 %v2193_v4  ;;  %11473 = vmatprep.subr.mxu1 %v2225_v5  ;;  %v2276_v2 = vld [vmem:[%s19893_s1 + $0x4568] sm:$0xff]  ;;  %v2291_v4 = vld [vmem:[%s19893_s1 + $0x45e0] sm:$0xff] }
 0x471   :  { %11439 = vmatpush3.msra.mxu0 %v2177_v6  ;;  %11474 = vmatpush3.msra.mxu1 %v2209_v7  ;;  %v2243_v5 = vld [vmem:[%s19893_s1 + $0x4460] sm:$0xff]  ;;  %v2258_v7 = vld [vmem:[%s19893_s1 + $0x44d8] sm:$0xff] }
 0x472   :  { %11440 = vmatprep.subr.mxu0 %v2192_v8  ;;  %11475 = vmatprep.subr.mxu1 %v2224_v9  ;;  %v2275_v6 = vld [vmem:[%s19893_s1 + $0x4560] sm:$0xff]  ;;  %v2290_v8 = vld [vmem:[%s19893_s1 + $0x45d8] sm:$0xff] }
 0x473   :  { %11441 = vmatpush3.msra.mxu0 %v2176_v10  ;;  %11476 = vmatpush3.msra.mxu1 %v2208_v11  ;;  %v2242_v9 = vld [vmem:[%s19893_s1 + $0x4458] sm:$0xff]  ;;  %v2257_v11 = vld [vmem:[%s19893_s1 + $0x44d0] sm:$0xff] }
 0x474   :  { %11442 = vmatprep.subr.mxu0 %v2191_v12  ;;  %11477 = vmatprep.subr.mxu1 %v2223_v13  ;;  %v2274_v10 = vld [vmem:[%s19893_s1 + $0x4558] sm:$0xff]  ;;  %v2289_v12 = vld [vmem:[%s19893_s1 + $0x45d0] sm:$0xff] }
 0x475   :  { %11443 = vmatpush3.msra.mxu0 %v2175_v14  ;;  %11478 = vmatpush3.msra.mxu1 %v2207_v15  ;;  %v2241_v13 = vld [vmem:[%s19893_s1 + $0x4450] sm:$0xff]  ;;  %v2256_v15 = vld [vmem:[%s19893_s1 + $0x44c8] sm:$0xff] }
 0x476   :  { %11444 = vmatprep.subr.mxu0 %v2190_v16  ;;  %11479 = vmatprep.subr.mxu1 %v2222_v17  ;;  %v2273_v14 = vld [vmem:[%s19893_s1 + $0x4550] sm:$0xff]  ;;  %v2288_v16 = vld [vmem:[%s19893_s1 + $0x45c8] sm:$0xff] }
 0x477   :  { %11445 = vmatpush3.msra.mxu0 %v2174_v18  ;;  %11480 = vmatpush3.msra.mxu1 %v2206_v19  ;;  %v2240_v17 = vld [vmem:[%s19893_s1 + $0x4448] sm:$0xff]  ;;  %v2255_v19 = vld [vmem:[%s19893_s1 + $0x44c0] sm:$0xff] }
 0x478   :  { %11446 = vmatprep.subr.mxu0 %v2189_v20  ;;  %11481 = vmatprep.subr.mxu1 %v2221_v21  ;;  %v2272_v18 = vld [vmem:[%s19893_s1 + $0x4548] sm:$0xff]  ;;  %v2287_v20 = vld [vmem:[%s19893_s1 + $0x45c0] sm:$0xff] }
 0x479   :  { %11447 = vmatpush3.msra.mxu0 %v2173_v22  ;;  %11482 = vmatpush3.msra.mxu1 %v2205_v23  ;;  %v2239_v21 = vld [vmem:[%s19893_s1 + $0x4440] sm:$0xff]  ;;  %v2254_v23 = vld [vmem:[%s19893_s1 + $0x44b8] sm:$0xff] }
 0x47a   :  { %11448 = vmatprep.subr.mxu0 %v2188_v24  ;;  %11483 = vmatprep.subr.mxu1 %v2220_v25  ;;  %v2271_v22 = vld [vmem:[%s19893_s1 + $0x4540] sm:$0xff]  ;;  %v2286_v24 = vld [vmem:[%s19893_s1 + $0x45b8] sm:$0xff] }
 0x47b   :  { %11449 = vmatpush3.msra.mxu0 %v2172_v26  ;;  %11484 = vmatpush3.msra.mxu1 %v2204_v27  ;;  %v2238_v25 = vld [vmem:[%s19893_s1 + $0x4438] sm:$0xff]  ;;  %v2253_v27 = vld [vmem:[%s19893_s1 + $0x44b0] sm:$0xff] }
 0x47c   :  { %11450 = vmatprep.subr.mxu0 %v2187_v29  ;;  %11485 = vmatprep.subr.mxu1 %v2219_v30  ;;  %v2270_v26 = vld [vmem:[%s19893_s1 + $0x4538] sm:$0xff]  ;;  %v2237_v29 = vld [vmem:[%s19893_s1 + $0x4430] sm:$0xff] }
 0x47d   :  { %11451 = vmatpush3.msra.mxu0 %v2171_v31  ;;  %11486 = vmatpush3.msra.mxu1 %v2203_v32  ;;  %v2269_v30 = vld [vmem:[%s19893_s1 + $0x4530] sm:$0xff]  ;;  %v2252_v31 = vld [vmem:[%s19893_s1 + $0x44a8] sm:$0xff] }
 0x47e   :  { %11452 = vmatprep.subr.mxu0 %v2186_v33  ;;  %11487 = vmatprep.subr.mxu1 %v2218_v34  ;;  %v2284_v32 = vld [vmem:[%s19893_s1 + $0x45a8] sm:$0xff] }
 0x47f   :  { %11453 = vmatpush3.msra.mxu0 %v2170_v36  ;;  %11488 = vmatpush3.msra.mxu1 %v2202_v37  ;;  %v2236_v33 = vld [vmem:[%s19893_s1 + $0x4428] sm:$0xff]  ;;  %v2251_v36 = vld [vmem:[%s19893_s1 + $0x44a0] sm:$0xff] }
 0x480   :  { %11454 = vmatprep.subr.mxu0 %v2185_v38  ;;  %11489 = vmatprep.subr.mxu1 %v2217_v39  ;;  %v2268_v34 = vld [vmem:[%s19893_s1 + $0x4528] sm:$0xff]  ;;  %v2283_v37 = vld [vmem:[%s19893_s1 + $0x45a0] sm:$0xff] }
 0x481   :  { %11455 = vmatpush3.msra.mxu0 %v2169_v41  ;;  %11490 = vmatpush3.msra.mxu1 %v2201_v42  ;;  %v2235_v38 = vld [vmem:[%s19893_s1 + $0x4420] sm:$0xff]  ;;  %v2282_v41 = vld [vmem:[%s19893_s1 + $0x4598] sm:$0xff]  ;;  %v3240_v42 = vcombine.high %v49_v35, %v49_v35 }
 0x482   :  { %11456 = vmatprep.subr.mxu0 %v2184_v43  ;;  %11491 = vmatprep.subr.mxu1 %v2216_v44  ;;  %v2267_v39 = vld [vmem:[%s19893_s1 + $0x4520] sm:$0xff]  ;;  %v2234_v43 = vld [vmem:[%s19893_s1 + $0x4418] sm:$0xff] }
 0x483   :  { %11457 = vmatpush3.msra.mxu0 %v2168_v46  ;;  %11492 = vmatpush3.msra.mxu1 %v2200_v47  ;;  %v2266_v44 = vld [vmem:[%s19893_s1 + $0x4518] sm:$0xff]  ;;  %v2281_v46 = vld [vmem:[%s19893_s1 + $0x4590] sm:$0xff]  ;;  %v3247_v47 = vrot.slane %v49_v35, %v12142_v51 }
 0x484   :  { %11458 = vmatprep.subr.mxu0 %v2183_v48  ;;  %11493 = vmatprep.subr.mxu1 %v2215_v49  ;;  %v2233_v48 = vld [vmem:[%s19893_s1 + $0x4410] sm:$0xff] }
 0x485   :  { %11459 = vmatpush3.msra.mxu0 %v2167_v52  ;;  %8186 = vmatprep.mubr.f32.mxu0 %v3238_v50  ;;  %v2265_v49 = vld [vmem:[%s19893_s1 + $0x4510] sm:$0xff]  ;;  %v2248_v50 = vld [vmem:[%s19893_s1 + $0x4488] sm:$0xff] }
 0x486   :  { %11494 = vmatpush3.msra.mxu1 %v2199_v53  ;;  %8187 = vmatmul.mubr.f32.vlgmr.msra.gmra.mxu0 %v3230_v40  ;;  %v2250_v40 = vld [vmem:[%s19893_s1 + $0x4498] sm:$0xff]  ;;  %v2280_v52 = vld [vmem:[%s19893_s1 + $0x4588] sm:$0xff]  ;;  %v3254_v53 = vrot.slane %v3240_v42, %v12142_v51  ;;  %v2349_v35 = vld [vmem:[%s19893_s1 + $0x47b0] sm:$0xff] }
 0x487   :  { %8256 = vmatprep.mubr.f32.mxu1 %v3239_v54  ;;  %11498 = vmatprep.subr.mxu0 %v2262_v55  ;;  %v2232_v54 = vld [vmem:[%s19893_s1 + $0x4408] sm:$0xff]  ;;  %v50_v42 = vld [vmem:[%s19892_s0 + $0x118] sm:$0xff] }
 0x488   :  { %11533 = vmatprep.subr.mxu1 %v2294_v56  ;;  %8257 = vmatmul.mubr.f32.vlgmr.msra.gmra.mxu1 %v3237_v45  ;;  %v2249_v45 = vld [vmem:[%s19893_s1 + $0x4490] sm:$0xff]  ;;  %v2264_v55 = vld [vmem:[%s19893_s1 + $0x4508] sm:$0xff]  ;;  %v2247_v56 = vld [vmem:[%s19893_s1 + $0x4480] sm:$0xff] }
 0x489   :  { %11499 = vmatpush3.msra.mxu0 %v2246_v57  ;;  %11534 = vmatpush3.msra.mxu1 %v2278_v58  ;;  %v2279_v57 = vld [vmem:[%s19893_s1 + $0x4580] sm:$0xff]  ;;  %v3255_v58 = vcombine.high %v3247_v47, %v3247_v47 }
 0x48a   :  { %11500 = vmatprep.subr.mxu0 %v2261_v59  ;;  %11535 = vmatprep.subr.mxu1 %v2293_v60  ;;  %v2231_v59 = vld [vmem:[%s19893_s1 + $0x4400] sm:$0xff] }
 0x48b   :  { %11501 = vmatpush3.msra.mxu0 %v2245_v61  ;;  %11536 = vmatpush3.msra.mxu1 %v2277_v62  ;;  %v2263_v60 = vld [vmem:[%s19893_s1 + $0x4500] sm:$0xff]  ;;  %v3256_v61 = vcombine.high %v3254_v53, %v3254_v53  ;;  %v2326_v62 = vld [vmem:[%s19893_s1 + $0x46f8] sm:$0xff] }
 0x48c   :  { %11502 = vmatprep.subr.mxu0 %v2260_v63  ;;  %11537 = vmatprep.subr.mxu1 %v2292_v0  ;;  %v2358_v63 = vld [vmem:[%s19893_s1 + $0x47f8] sm:$0xff] }
 0x48d   :  { %11503 = vmatpush3.msra.mxu0 %v2244_v1  ;;  %11538 = vmatpush3.msra.mxu1 %v2276_v2  ;;  %v2310_v0 = vld [vmem:[%s19893_s1 + $0x4678] sm:$0xff]  ;;  %v2325_v2 = vld [vmem:[%s19893_s1 + $0x46f0] sm:$0xff] }
 0x48e   :  { %11504 = vmatprep.subr.mxu0 %v2259_v3  ;;  %11539 = vmatprep.subr.mxu1 %v2291_v4  ;;  %v2342_v1 = vld [vmem:[%s19893_s1 + $0x4778] sm:$0xff]  ;;  %v2357_v3 = vld [vmem:[%s19893_s1 + $0x47f0] sm:$0xff] }
 0x48f   :  { %11505 = vmatpush3.msra.mxu0 %v2243_v5  ;;  %11540 = vmatpush3.msra.mxu1 %v2275_v6  ;;  %v2309_v4 = vld [vmem:[%s19893_s1 + $0x4670] sm:$0xff]  ;;  %v2324_v6 = vld [vmem:[%s19893_s1 + $0x46e8] sm:$0xff] }
 0x490   :  { %11506 = vmatprep.subr.mxu0 %v2258_v7  ;;  %11541 = vmatprep.subr.mxu1 %v2290_v8  ;;  %v2341_v5 = vld [vmem:[%s19893_s1 + $0x4770] sm:$0xff]  ;;  %v2356_v7 = vld [vmem:[%s19893_s1 + $0x47e8] sm:$0xff] }
 0x491   :  { %11507 = vmatpush3.msra.mxu0 %v2242_v9  ;;  %11542 = vmatpush3.msra.mxu1 %v2274_v10  ;;  %v2308_v8 = vld [vmem:[%s19893_s1 + $0x4668] sm:$0xff]  ;;  %v2323_v10 = vld [vmem:[%s19893_s1 + $0x46e0] sm:$0xff] }
 0x492   :  { %11508 = vmatprep.subr.mxu0 %v2257_v11  ;;  %11543 = vmatprep.subr.mxu1 %v2289_v12  ;;  %v2340_v9 = vld [vmem:[%s19893_s1 + $0x4768] sm:$0xff]  ;;  %v2355_v11 = vld [vmem:[%s19893_s1 + $0x47e0] sm:$0xff] }
 0x493   :  { %11509 = vmatpush3.msra.mxu0 %v2241_v13  ;;  %11544 = vmatpush3.msra.mxu1 %v2273_v14  ;;  %v2307_v12 = vld [vmem:[%s19893_s1 + $0x4660] sm:$0xff]  ;;  %v2322_v14 = vld [vmem:[%s19893_s1 + $0x46d8] sm:$0xff] }
 0x494   :  { %11510 = vmatprep.subr.mxu0 %v2256_v15  ;;  %11545 = vmatprep.subr.mxu1 %v2288_v16  ;;  %v2339_v13 = vld [vmem:[%s19893_s1 + $0x4760] sm:$0xff]  ;;  %v2354_v15 = vld [vmem:[%s19893_s1 + $0x47d8] sm:$0xff] }
 0x495   :  { %11511 = vmatpush3.msra.mxu0 %v2240_v17  ;;  %11546 = vmatpush3.msra.mxu1 %v2272_v18  ;;  %v2306_v16 = vld [vmem:[%s19893_s1 + $0x4658] sm:$0xff]  ;;  %v2321_v18 = vld [vmem:[%s19893_s1 + $0x46d0] sm:$0xff] }
 0x496   :  { %11512 = vmatprep.subr.mxu0 %v2255_v19  ;;  %11547 = vmatprep.subr.mxu1 %v2287_v20  ;;  %v2338_v17 = vld [vmem:[%s19893_s1 + $0x4758] sm:$0xff]  ;;  %v2353_v19 = vld [vmem:[%s19893_s1 + $0x47d0] sm:$0xff] }
 0x497   :  { %11513 = vmatpush3.msra.mxu0 %v2239_v21  ;;  %11548 = vmatpush3.msra.mxu1 %v2271_v22  ;;  %v2305_v20 = vld [vmem:[%s19893_s1 + $0x4650] sm:$0xff]  ;;  %v2320_v22 = vld [vmem:[%s19893_s1 + $0x46c8] sm:$0xff] }
 0x498   :  { %11514 = vmatprep.subr.mxu0 %v2254_v23  ;;  %11549 = vmatprep.subr.mxu1 %v2286_v24  ;;  %v2337_v21 = vld [vmem:[%s19893_s1 + $0x4750] sm:$0xff]  ;;  %v2352_v23 = vld [vmem:[%s19893_s1 + $0x47c8] sm:$0xff] }
 0x499   :  { %11515 = vmatpush3.msra.mxu0 %v2238_v25  ;;  %11550 = vmatpush3.msra.mxu1 %v2270_v26  ;;  %v2304_v24 = vld [vmem:[%s19893_s1 + $0x4648] sm:$0xff]  ;;  %v2319_v26 = vld [vmem:[%s19893_s1 + $0x46c0] sm:$0xff] }
 0x49a   :  { %11516 = vmatprep.subr.mxu0 %v2253_v27  ;;  %11551 = vmatprep.subr.mxu1 %v2285_v28  ;;  %v2336_v25 = vld [vmem:[%s19893_s1 + $0x4748] sm:$0xff]  ;;  %v2351_v27 = vld [vmem:[%s19893_s1 + $0x47c0] sm:$0xff] }
 0x49b   :  { %11517 = vmatpush3.msra.mxu0 %v2237_v29  ;;  %11552 = vmatpush3.msra.mxu1 %v2269_v30  ;;  %v2303_v28 = vld [vmem:[%s19893_s1 + $0x4640] sm:$0xff]  ;;  %v2318_v30 = vld [vmem:[%s19893_s1 + $0x46b8] sm:$0xff] }
 0x49c   :  { %11518 = vmatprep.subr.mxu0 %v2252_v31  ;;  %11553 = vmatprep.subr.mxu1 %v2284_v32  ;;  %v2335_v29 = vld [vmem:[%s19893_s1 + $0x4740] sm:$0xff]  ;;  %v2350_v31 = vld [vmem:[%s19893_s1 + $0x47b8] sm:$0xff] }
 0x49d   :  { %11519 = vmatpush3.msra.mxu0 %v2236_v33  ;;  %11554 = vmatpush3.msra.mxu1 %v2268_v34  ;;  %v2302_v32 = vld [vmem:[%s19893_s1 + $0x4638] sm:$0xff]  ;;  %v2317_v34 = vld [vmem:[%s19893_s1 + $0x46b0] sm:$0xff] }
 0x49e   :  { %11520 = vmatprep.subr.mxu0 %v2251_v36  ;;  %11555 = vmatprep.subr.mxu1 %v2283_v37  ;;  %v2334_v33 = vld [vmem:[%s19893_s1 + $0x4738] sm:$0xff]  ;;  %v2301_v36 = vld [vmem:[%s19893_s1 + $0x4630] sm:$0xff] }
 0x49f   :  { %11521 = vmatpush3.msra.mxu0 %v2235_v38  ;;  %11556 = vmatpush3.msra.mxu1 %v2267_v39  ;;  %v2333_v37 = vld [vmem:[%s19893_s1 + $0x4730] sm:$0xff]  ;;  %v2316_v38 = vld [vmem:[%s19893_s1 + $0x46a8] sm:$0xff] }
 0x4a0   :  { %11522 = vmatprep.subr.mxu0 %v2250_v40  ;;  %11557 = vmatprep.subr.mxu1 %v2282_v41  ;;  %v2348_v39 = vld [vmem:[%s19893_s1 + $0x47a8] sm:$0xff] }
 0x4a1   :  { %11523 = vmatpush3.msra.mxu0 %v2234_v43  ;;  %11558 = vmatpush3.msra.mxu1 %v2266_v44  ;;  %v2300_v40 = vld [vmem:[%s19893_s1 + $0x4628] sm:$0xff]  ;;  %v2315_v43 = vld [vmem:[%s19893_s1 + $0x46a0] sm:$0xff] }
 0x4a2   :  { %11524 = vmatprep.subr.mxu0 %v2249_v45  ;;  %11559 = vmatprep.subr.mxu1 %v2281_v46  ;;  %v2332_v41 = vld [vmem:[%s19893_s1 + $0x4728] sm:$0xff]  ;;  %v2347_v44 = vld [vmem:[%s19893_s1 + $0x47a0] sm:$0xff] }
 0x4a3   :  { %11525 = vmatpush3.msra.mxu0 %v2233_v48  ;;  %11560 = vmatpush3.msra.mxu1 %v2265_v49  ;;  %v2299_v45 = vld [vmem:[%s19893_s1 + $0x4620] sm:$0xff]  ;;  %v2346_v48 = vld [vmem:[%s19893_s1 + $0x4798] sm:$0xff]  ;;  %v3257_v49 = vcombine.high %v50_v42, %v50_v42 }
 0x4a4   :  { %11526 = vmatprep.subr.mxu0 %v2248_v50  ;;  %11561 = vmatprep.subr.mxu1 %v2280_v52  ;;  %v2331_v46 = vld [vmem:[%s19893_s1 + $0x4720] sm:$0xff]  ;;  %v2298_v50 = vld [vmem:[%s19893_s1 + $0x4618] sm:$0xff] }
 0x4a5   :  { %11527 = vmatpush3.msra.mxu0 %v2232_v54  ;;  %11562 = vmatpush3.msra.mxu1 %v2264_v55  ;;  %v2330_v52 = vld [vmem:[%s19893_s1 + $0x4718] sm:$0xff]  ;;  %v2345_v54 = vld [vmem:[%s19893_s1 + $0x4790] sm:$0xff]  ;;  %v3264_v55 = vrot.slane %v50_v42, %v12142_v51 }
 0x4a6   :  { %11528 = vmatprep.subr.mxu0 %v2247_v56  ;;  %11563 = vmatprep.subr.mxu1 %v2279_v57  ;;  %v2297_v56 = vld [vmem:[%s19893_s1 + $0x4610] sm:$0xff] }
 0x4a7   :  { %11529 = vmatpush3.msra.mxu0 %v2231_v59  ;;  %8326 = vmatprep.mubr.f32.mxu0 %v3255_v58  ;;  %v2329_v57 = vld [vmem:[%s19893_s1 + $0x4710] sm:$0xff]  ;;  %v2312_v58 = vld [vmem:[%s19893_s1 + $0x4688] sm:$0xff] }
 0x4a8   :  { %11564 = vmatpush3.msra.mxu1 %v2263_v60  ;;  %8327 = vmatmul.mubr.f32.vlgmr.msra.gmra.mxu0 %v3247_v47  ;;  %v2314_v47 = vld [vmem:[%s19893_s1 + $0x4698] sm:$0xff]  ;;  %v2344_v59 = vld [vmem:[%s19893_s1 + $0x4788] sm:$0xff]  ;;  %v3271_v60 = vrot.slane %v3257_v49, %v12142_v51  ;;  %v2413_v42 = vld [vmem:[%s19893_s1 + $0x49b0] sm:$0xff] }
 0x4a9   :  { %8396 = vmatprep.mubr.f32.mxu1 %v3256_v61  ;;  %11568 = vmatprep.subr.mxu0 %v2326_v62  ;;  %v2296_v61 = vld [vmem:[%s19893_s1 + $0x4608] sm:$0xff]  ;;  %v51_v49 = vld [vmem:[%s19892_s0 + $0x120] sm:$0xff] }
 0x4aa   :  { %11603 = vmatprep.subr.mxu1 %v2358_v63  ;;  %8397 = vmatmul.mubr.f32.vlgmr.msra.gmra.mxu1 %v3254_v53  ;;  %v2313_v53 = vld [vmem:[%s19893_s1 + $0x4690] sm:$0xff]  ;;  %v2328_v62 = vld [vmem:[%s19893_s1 + $0x4708] sm:$0xff]  ;;  %v2311_v63 = vld [vmem:[%s19893_s1 + $0x4680] sm:$0xff] }
 0x4ab   :  { %11569 = vmatpush3.msra.mxu0 %v2310_v0  ;;  %11604 = vmatpush3.msra.mxu1 %v2342_v1  ;;  %v2343_v0 = vld [vmem:[%s19893_s1 + $0x4780] sm:$0xff]  ;;  %v3272_v1 = vcombine.high %v3264_v55, %v3264_v55 }
 0x4ac   :  { %11570 = vmatprep.subr.mxu0 %v2325_v2  ;;  %11605 = vmatprep.subr.mxu1 %v2357_v3  ;;  %v2295_v2 = vld [vmem:[%s19893_s1 + $0x4600] sm:$0xff] }
 0x4ad   :  { %11571 = vmatpush3.msra.mxu0 %v2309_v4  ;;  %11606 = vmatpush3.msra.mxu1 %v2341_v5  ;;  %v2327_v3 = vld [vmem:[%s19893_s1 + $0x4700] sm:$0xff]  ;;  %v3273_v4 = vcombine.high %v3271_v60, %v3271_v60  ;;  %v2390_v5 = vld [vmem:[%s19893_s1 + $0x48f8] sm:$0xff] }
 0x4ae   :  { %11572 = vmatprep.subr.mxu0 %v2324_v6  ;;  %11607 = vmatprep.subr.mxu1 %v2356_v7  ;;  %v2422_v6 = vld [vmem:[%s19893_s1 + $0x49f8] sm:$0xff] }
 0x4af   :  { %11573 = vmatpush3.msra.mxu0 %v2308_v8  ;;  %11608 = vmatpush3.msra.mxu1 %v2340_v9  ;;  %v2374_v7 = vld [vmem:[%s19893_s1 + $0x4878] sm:$0xff]  ;;  %v2389_v9 = vld [vmem:[%s19893_s1 + $0x48f0] sm:$0xff] }
 0x4b0   :  { %11574 = vmatprep.subr.mxu0 %v2323_v10  ;;  %11609 = vmatprep.subr.mxu1 %v2355_v11  ;;  %v2406_v8 = vld [vmem:[%s19893_s1 + $0x4978] sm:$0xff]  ;;  %v2421_v10 = vld [vmem:[%s19893_s1 + $0x49f0] sm:$0xff] }
 0x4b1   :  { %11575 = vmatpush3.msra.mxu0 %v2307_v12  ;;  %11610 = vmatpush3.msra.mxu1 %v2339_v13  ;;  %v2373_v11 = vld [vmem:[%s19893_s1 + $0x4870] sm:$0xff]  ;;  %v2388_v13 = vld [vmem:[%s19893_s1 + $0x48e8] sm:$0xff] }
 0x4b2   :  { %11576 = vmatprep.subr.mxu0 %v2322_v14  ;;  %11611 = vmatprep.subr.mxu1 %v2354_v15  ;;  %v2405_v12 = vld [vmem:[%s19893_s1 + $0x4970] sm:$0xff]  ;;  %v2420_v14 = vld [vmem:[%s19893_s1 + $0x49e8] sm:$0xff] }
 0x4b3   :  { %11577 = vmatpush3.msra.mxu0 %v2306_v16  ;;  %11612 = vmatpush3.msra.mxu1 %v2338_v17  ;;  %v2372_v15 = vld [vmem:[%s19893_s1 + $0x4868] sm:$0xff]  ;;  %v2387_v17 = vld [vmem:[%s19893_s1 + $0x48e0] sm:$0xff] }
 0x4b4   :  { %11578 = vmatprep.subr.mxu0 %v2321_v18  ;;  %11613 = vmatprep.subr.mxu1 %v2353_v19  ;;  %v2404_v16 = vld [vmem:[%s19893_s1 + $0x4968] sm:$0xff]  ;;  %v2419_v18 = vld [vmem:[%s19893_s1 + $0x49e0] sm:$0xff] }
 0x4b5   :  { %11579 = vmatpush3.msra.mxu0 %v2305_v20  ;;  %11614 = vmatpush3.msra.mxu1 %v2337_v21  ;;  %v2371_v19 = vld [vmem:[%s19893_s1 + $0x4860] sm:$0xff]  ;;  %v2386_v21 = vld [vmem:[%s19893_s1 + $0x48d8] sm:$0xff] }
 0x4b6   :  { %11580 = vmatprep.subr.mxu0 %v2320_v22  ;;  %11615 = vmatprep.subr.mxu1 %v2352_v23  ;;  %v2403_v20 = vld [vmem:[%s19893_s1 + $0x4960] sm:$0xff]  ;;  %v2418_v22 = vld [vmem:[%s19893_s1 + $0x49d8] sm:$0xff] }
 0x4b7   :  { %11581 = vmatpush3.msra.mxu0 %v2304_v24  ;;  %11616 = vmatpush3.msra.mxu1 %v2336_v25  ;;  %v2370_v23 = vld [vmem:[%s19893_s1 + $0x4858] sm:$0xff]  ;;  %v2385_v25 = vld [vmem:[%s19893_s1 + $0x48d0] sm:$0xff] }
 0x4b8   :  { %11582 = vmatprep.subr.mxu0 %v2319_v26  ;;  %11617 = vmatprep.subr.mxu1 %v2351_v27  ;;  %v2402_v24 = vld [vmem:[%s19893_s1 + $0x4958] sm:$0xff]  ;;  %v2417_v26 = vld [vmem:[%s19893_s1 + $0x49d0] sm:$0xff] }
 0x4b9   :  { %11583 = vmatpush3.msra.mxu0 %v2303_v28  ;;  %11618 = vmatpush3.msra.mxu1 %v2335_v29  ;;  %v2369_v27 = vld [vmem:[%s19893_s1 + $0x4850] sm:$0xff]  ;;  %v2384_v29 = vld [vmem:[%s19893_s1 + $0x48c8] sm:$0xff] }
 0x4ba   :  { %11584 = vmatprep.subr.mxu0 %v2318_v30  ;;  %11619 = vmatprep.subr.mxu1 %v2350_v31  ;;  %v2401_v28 = vld [vmem:[%s19893_s1 + $0x4950] sm:$0xff]  ;;  %v2416_v30 = vld [vmem:[%s19893_s1 + $0x49c8] sm:$0xff] }
 0x4bb   :  { %11585 = vmatpush3.msra.mxu0 %v2302_v32  ;;  %11620 = vmatpush3.msra.mxu1 %v2334_v33  ;;  %v2368_v31 = vld [vmem:[%s19893_s1 + $0x4848] sm:$0xff]  ;;  %v2383_v33 = vld [vmem:[%s19893_s1 + $0x48c0] sm:$0xff] }
 0x4bc   :  { %11586 = vmatprep.subr.mxu0 %v2317_v34  ;;  %11621 = vmatprep.subr.mxu1 %v2349_v35  ;;  %v2400_v32 = vld [vmem:[%s19893_s1 + $0x4948] sm:$0xff]  ;;  %v2415_v34 = vld [vmem:[%s19893_s1 + $0x49c0] sm:$0xff] }
 0x4bd   :  { %11587 = vmatpush3.msra.mxu0 %v2301_v36  ;;  %11622 = vmatpush3.msra.mxu1 %v2333_v37  ;;  %v2367_v35 = vld [vmem:[%s19893_s1 + $0x4840] sm:$0xff]  ;;  %v2382_v37 = vld [vmem:[%s19893_s1 + $0x48b8] sm:$0xff] }
 0x4be   :  { %11588 = vmatprep.subr.mxu0 %v2316_v38  ;;  %11623 = vmatprep.subr.mxu1 %v2348_v39  ;;  %v2399_v36 = vld [vmem:[%s19893_s1 + $0x4940] sm:$0xff]  ;;  %v2414_v38 = vld [vmem:[%s19893_s1 + $0x49b8] sm:$0xff] }
 0x4bf   :  { %11589 = vmatpush3.msra.mxu0 %v2300_v40  ;;  %11624 = vmatpush3.msra.mxu1 %v2332_v41  ;;  %v2366_v39 = vld [vmem:[%s19893_s1 + $0x4838] sm:$0xff]  ;;  %v2381_v41 = vld [vmem:[%s19893_s1 + $0x48b0] sm:$0xff] }
 0x4c0   :  { %11590 = vmatprep.subr.mxu0 %v2315_v43  ;;  %11625 = vmatprep.subr.mxu1 %v2347_v44  ;;  %v2398_v40 = vld [vmem:[%s19893_s1 + $0x4938] sm:$0xff]  ;;  %v2365_v43 = vld [vmem:[%s19893_s1 + $0x4830] sm:$0xff] }
 0x4c1   :  { %11591 = vmatpush3.msra.mxu0 %v2299_v45  ;;  %11626 = vmatpush3.msra.mxu1 %v2331_v46  ;;  %v2397_v44 = vld [vmem:[%s19893_s1 + $0x4930] sm:$0xff]  ;;  %v2380_v45 = vld [vmem:[%s19893_s1 + $0x48a8] sm:$0xff] }
 0x4c2   :  { %11592 = vmatprep.subr.mxu0 %v2314_v47  ;;  %11627 = vmatprep.subr.mxu1 %v2346_v48  ;;  %v2412_v46 = vld [vmem:[%s19893_s1 + $0x49a8] sm:$0xff] }
 0x4c3   :  { %11593 = vmatpush3.msra.mxu0 %v2298_v50  ;;  %11628 = vmatpush3.msra.mxu1 %v2330_v52  ;;  %v2364_v47 = vld [vmem:[%s19893_s1 + $0x4828] sm:$0xff]  ;;  %v2379_v50 = vld [vmem:[%s19893_s1 + $0x48a0] sm:$0xff] }
 0x4c4   :  { %11594 = vmatprep.subr.mxu0 %v2313_v53  ;;  %11629 = vmatprep.subr.mxu1 %v2345_v54  ;;  %v2396_v48 = vld [vmem:[%s19893_s1 + $0x4928] sm:$0xff]  ;;  %v2411_v52 = vld [vmem:[%s19893_s1 + $0x49a0] sm:$0xff] }
 0x4c5   :  { %11595 = vmatpush3.msra.mxu0 %v2297_v56  ;;  %11630 = vmatpush3.msra.mxu1 %v2329_v57  ;;  %v2363_v53 = vld [vmem:[%s19893_s1 + $0x4820] sm:$0xff]  ;;  %v2410_v56 = vld [vmem:[%s19893_s1 + $0x4998] sm:$0xff]  ;;  %v3274_v57 = vcombine.high %v51_v49, %v51_v49 }
 0x4c6   :  { %11596 = vmatprep.subr.mxu0 %v2312_v58  ;;  %11631 = vmatprep.subr.mxu1 %v2344_v59  ;;  %v2395_v54 = vld [vmem:[%s19893_s1 + $0x4920] sm:$0xff]  ;;  %v2362_v58 = vld [vmem:[%s19893_s1 + $0x4818] sm:$0xff] }
 0x4c7   :  { %11597 = vmatpush3.msra.mxu0 %v2296_v61  ;;  %11632 = vmatpush3.msra.mxu1 %v2328_v62  ;;  %v2394_v59 = vld [vmem:[%s19893_s1 + $0x4918] sm:$0xff]  ;;  %v2409_v61 = vld [vmem:[%s19893_s1 + $0x4990] sm:$0xff]  ;;  %v3281_v62 = vrot.slane %v51_v49, %v12142_v51 }
 0x4c8   :  { %11598 = vmatprep.subr.mxu0 %v2311_v63  ;;  %11633 = vmatprep.subr.mxu1 %v2343_v0  ;;  %v2361_v63 = vld [vmem:[%s19893_s1 + $0x4810] sm:$0xff] }
 0x4c9   :  { %11599 = vmatpush3.msra.mxu0 %v2295_v2  ;;  %8466 = vmatprep.mubr.f32.mxu0 %v3272_v1  ;;  %v2393_v0 = vld [vmem:[%s19893_s1 + $0x4910] sm:$0xff]  ;;  %v2376_v1 = vld [vmem:[%s19893_s1 + $0x4888] sm:$0xff] }
 0x4ca   :  { %11634 = vmatpush3.msra.mxu1 %v2327_v3  ;;  %8467 = vmatmul.mubr.f32.vlgmr.msra.gmra.mxu0 %v3264_v55  ;;  %v2378_v55 = vld [vmem:[%s19893_s1 + $0x4898] sm:$0xff]  ;;  %v2408_v2 = vld [vmem:[%s19893_s1 + $0x4988] sm:$0xff]  ;;  %v3288_v3 = vrot.slane %v3274_v57, %v12142_v51  ;;  %v2477_v49 = vld [vmem:[%s19893_s1 + $0x4bb0] sm:$0xff] }
 0x4cb   :  { %8536 = vmatprep.mubr.f32.mxu1 %v3273_v4  ;;  %11638 = vmatprep.subr.mxu0 %v2390_v5  ;;  %v2360_v4 = vld [vmem:[%s19893_s1 + $0x4808] sm:$0xff] }
 0x4cc   :  { %11673 = vmatprep.subr.mxu1 %v2422_v6  ;;  %8537 = vmatmul.mubr.f32.vlgmr.msra.gmra.mxu1 %v3271_v60  ;;  %v2377_v60 = vld [vmem:[%s19893_s1 + $0x4890] sm:$0xff]  ;;  %v2392_v5 = vld [vmem:[%s19893_s1 + $0x4908] sm:$0xff]  ;;  %v2375_v6 = vld [vmem:[%s19893_s1 + $0x4880] sm:$0xff] }
 0x4cd   :  { %11639 = vmatpush3.msra.mxu0 %v2374_v7  ;;  %11674 = vmatpush3.msra.mxu1 %v2406_v8  ;;  %v2407_v7 = vld [vmem:[%s19893_s1 + $0x4980] sm:$0xff]  ;;  %v3289_v8 = vcombine.high %v3281_v62, %v3281_v62  ;;  %v52_v57 = vld [vmem:[%s19892_s0 + $0x128] sm:$0xff] }
 0x4ce   :  { %11640 = vmatprep.subr.mxu0 %v2389_v9  ;;  %11675 = vmatprep.subr.mxu1 %v2421_v10  ;;  %v2359_v9 = vld [vmem:[%s19893_s1 + $0x4800] sm:$0xff] }
 0x4cf   :  { %11641 = vmatpush3.msra.mxu0 %v2373_v11  ;;  %11676 = vmatpush3.msra.mxu1 %v2405_v12  ;;  %v2391_v10 = vld [vmem:[%s19893_s1 + $0x4900] sm:$0xff]  ;;  %v3290_v11 = vcombine.high %v3288_v3, %v3288_v3  ;;  %v2454_v12 = vld [vmem:[%s19893_s1 + $0x4af8] sm:$0xff] }
 0x4d0   :  { %11642 = vmatprep.subr.mxu0 %v2388_v13  ;;  %11677 = vmatprep.subr.mxu1 %v2420_v14  ;;  %v2486_v13 = vld [vmem:[%s19893_s1 + $0x4bf8] sm:$0xff] }
 0x4d1   :  { %11643 = vmatpush3.msra.mxu0 %v2372_v15  ;;  %11678 = vmatpush3.msra.mxu1 %v2404_v16  ;;  %v2438_v14 = vld [vmem:[%s19893_s1 + $0x4a78] sm:$0xff]  ;;  %v2453_v16 = vld [vmem:[%s19893_s1 + $0x4af0] sm:$0xff] }
 0x4d2   :  { %11644 = vmatprep.subr.mxu0 %v2387_v17  ;;  %11679 = vmatprep.subr.mxu1 %v2419_v18  ;;  %v2470_v15 = vld [vmem:[%s19893_s1 + $0x4b78] sm:$0xff]  ;;  %v2485_v17 = vld [vmem:[%s19893_s1 + $0x4bf0] sm:$0xff] }
 0x4d3   :  { %11645 = vmatpush3.msra.mxu0 %v2371_v19  ;;  %11680 = vmatpush3.msra.mxu1 %v2403_v20  ;;  %v2437_v18 = vld [vmem:[%s19893_s1 + $0x4a70] sm:$0xff]  ;;  %v2452_v20 = vld [vmem:[%s19893_s1 + $0x4ae8] sm:$0xff] }
 0x4d4   :  { %11646 = vmatprep.subr.mxu0 %v2386_v21  ;;  %11681 = vmatprep.subr.mxu1 %v2418_v22  ;;  %v2469_v19 = vld [vmem:[%s19893_s1 + $0x4b70] sm:$0xff]  ;;  %v2484_v21 = vld [vmem:[%s19893_s1 + $0x4be8] sm:$0xff] }
 0x4d5   :  { %11647 = vmatpush3.msra.mxu0 %v2370_v23  ;;  %11682 = vmatpush3.msra.mxu1 %v2402_v24  ;;  %v2436_v22 = vld [vmem:[%s19893_s1 + $0x4a68] sm:$0xff]  ;;  %v2451_v24 = vld [vmem:[%s19893_s1 + $0x4ae0] sm:$0xff] }
 0x4d6   :  { %11648 = vmatprep.subr.mxu0 %v2385_v25  ;;  %11683 = vmatprep.subr.mxu1 %v2417_v26  ;;  %v2468_v23 = vld [vmem:[%s19893_s1 + $0x4b68] sm:$0xff]  ;;  %v2483_v25 = vld [vmem:[%s19893_s1 + $0x4be0] sm:$0xff] }
 0x4d7   :  { %11649 = vmatpush3.msra.mxu0 %v2369_v27  ;;  %11684 = vmatpush3.msra.mxu1 %v2401_v28  ;;  %v2435_v26 = vld [vmem:[%s19893_s1 + $0x4a60] sm:$0xff]  ;;  %v2450_v28 = vld [vmem:[%s19893_s1 + $0x4ad8] sm:$0xff] }
 0x4d8   :  { %11650 = vmatprep.subr.mxu0 %v2384_v29  ;;  %11685 = vmatprep.subr.mxu1 %v2416_v30  ;;  %v2467_v27 = vld [vmem:[%s19893_s1 + $0x4b60] sm:$0xff]  ;;  %v2482_v29 = vld [vmem:[%s19893_s1 + $0x4bd8] sm:$0xff] }
 0x4d9   :  { %11651 = vmatpush3.msra.mxu0 %v2368_v31  ;;  %11686 = vmatpush3.msra.mxu1 %v2400_v32  ;;  %v2434_v30 = vld [vmem:[%s19893_s1 + $0x4a58] sm:$0xff]  ;;  %v2449_v32 = vld [vmem:[%s19893_s1 + $0x4ad0] sm:$0xff] }
 0x4da   :  { %11652 = vmatprep.subr.mxu0 %v2383_v33  ;;  %11687 = vmatprep.subr.mxu1 %v2415_v34  ;;  %v2466_v31 = vld [vmem:[%s19893_s1 + $0x4b58] sm:$0xff]  ;;  %v2481_v33 = vld [vmem:[%s19893_s1 + $0x4bd0] sm:$0xff] }
 0x4db   :  { %11653 = vmatpush3.msra.mxu0 %v2367_v35  ;;  %11688 = vmatpush3.msra.mxu1 %v2399_v36  ;;  %v2433_v34 = vld [vmem:[%s19893_s1 + $0x4a50] sm:$0xff]  ;;  %v2448_v36 = vld [vmem:[%s19893_s1 + $0x4ac8] sm:$0xff] }
 0x4dc   :  { %11654 = vmatprep.subr.mxu0 %v2382_v37  ;;  %11689 = vmatprep.subr.mxu1 %v2414_v38  ;;  %v2465_v35 = vld [vmem:[%s19893_s1 + $0x4b50] sm:$0xff]  ;;  %v2480_v37 = vld [vmem:[%s19893_s1 + $0x4bc8] sm:$0xff] }
 0x4dd   :  { %11655 = vmatpush3.msra.mxu0 %v2366_v39  ;;  %11690 = vmatpush3.msra.mxu1 %v2398_v40  ;;  %v2432_v38 = vld [vmem:[%s19893_s1 + $0x4a48] sm:$0xff]  ;;  %v2447_v40 = vld [vmem:[%s19893_s1 + $0x4ac0] sm:$0xff] }
 0x4de   :  { %11656 = vmatprep.subr.mxu0 %v2381_v41  ;;  %11691 = vmatprep.subr.mxu1 %v2413_v42  ;;  %v2464_v39 = vld [vmem:[%s19893_s1 + $0x4b48] sm:$0xff]  ;;  %v2479_v41 = vld [vmem:[%s19893_s1 + $0x4bc0] sm:$0xff] }
 0x4df   :  { %11657 = vmatpush3.msra.mxu0 %v2365_v43  ;;  %11692 = vmatpush3.msra.mxu1 %v2397_v44  ;;  %v2431_v42 = vld [vmem:[%s19893_s1 + $0x4a40] sm:$0xff]  ;;  %v2446_v44 = vld [vmem:[%s19893_s1 + $0x4ab8] sm:$0xff] }
 0x4e0   :  { %11658 = vmatprep.subr.mxu0 %v2380_v45  ;;  %11693 = vmatprep.subr.mxu1 %v2412_v46  ;;  %v2463_v43 = vld [vmem:[%s19893_s1 + $0x4b40] sm:$0xff]  ;;  %v2478_v45 = vld [vmem:[%s19893_s1 + $0x4bb8] sm:$0xff] }
 0x4e1   :  { %11659 = vmatpush3.msra.mxu0 %v2364_v47  ;;  %11694 = vmatpush3.msra.mxu1 %v2396_v48  ;;  %v2430_v46 = vld [vmem:[%s19893_s1 + $0x4a38] sm:$0xff]  ;;  %v2445_v48 = vld [vmem:[%s19893_s1 + $0x4ab0] sm:$0xff] }
 0x4e2   :  { %11660 = vmatprep.subr.mxu0 %v2379_v50  ;;  %11695 = vmatprep.subr.mxu1 %v2411_v52  ;;  %v2462_v47 = vld [vmem:[%s19893_s1 + $0x4b38] sm:$0xff]  ;;  %v2429_v50 = vld [vmem:[%s19893_s1 + $0x4a30] sm:$0xff] }
 0x4e3   :  { %11661 = vmatpush3.msra.mxu0 %v2363_v53  ;;  %11696 = vmatpush3.msra.mxu1 %v2395_v54  ;;  %v2461_v52 = vld [vmem:[%s19893_s1 + $0x4b30] sm:$0xff]  ;;  %v2444_v53 = vld [vmem:[%s19893_s1 + $0x4aa8] sm:$0xff] }
 0x4e4   :  { %11662 = vmatprep.subr.mxu0 %v2378_v55  ;;  %11697 = vmatprep.subr.mxu1 %v2410_v56  ;;  %v2476_v54 = vld [vmem:[%s19893_s1 + $0x4ba8] sm:$0xff] }
 0x4e5   :  { %11663 = vmatpush3.msra.mxu0 %v2362_v58  ;;  %11698 = vmatpush3.msra.mxu1 %v2394_v59  ;;  %v2428_v55 = vld [vmem:[%s19893_s1 + $0x4a28] sm:$0xff]  ;;  %v2443_v58 = vld [vmem:[%s19893_s1 + $0x4aa0] sm:$0xff] }
 0x4e6   :  { %11664 = vmatprep.subr.mxu0 %v2377_v60  ;;  %11699 = vmatprep.subr.mxu1 %v2409_v61  ;;  %v2460_v56 = vld [vmem:[%s19893_s1 + $0x4b28] sm:$0xff]  ;;  %v2475_v59 = vld [vmem:[%s19893_s1 + $0x4ba0] sm:$0xff] }
 0x4e7   :  { %11665 = vmatpush3.msra.mxu0 %v2361_v63  ;;  %11700 = vmatpush3.msra.mxu1 %v2393_v0  ;;  %v2427_v60 = vld [vmem:[%s19893_s1 + $0x4a20] sm:$0xff]  ;;  %v2474_v63 = vld [vmem:[%s19893_s1 + $0x4b98] sm:$0xff]  ;;  %v3291_v0 = vcombine.high %v52_v57, %v52_v57 }
 0x4e8   :  { %11666 = vmatprep.subr.mxu0 %v2376_v1  ;;  %11701 = vmatprep.subr.mxu1 %v2408_v2  ;;  %v2459_v61 = vld [vmem:[%s19893_s1 + $0x4b20] sm:$0xff]  ;;  %v2426_v1 = vld [vmem:[%s19893_s1 + $0x4a18] sm:$0xff] }
 0x4e9   :  { %11667 = vmatpush3.msra.mxu0 %v2360_v4  ;;  %11702 = vmatpush3.msra.mxu1 %v2392_v5  ;;  %v2458_v2 = vld [vmem:[%s19893_s1 + $0x4b18] sm:$0xff]  ;;  %v2473_v4 = vld [vmem:[%s19893_s1 + $0x4b90] sm:$0xff]  ;;  %v3298_v5 = vrot.slane %v52_v57, %v12142_v51 }
 0x4ea   :  { %11668 = vmatprep.subr.mxu0 %v2375_v6  ;;  %11703 = vmatprep.subr.mxu1 %v2407_v7  ;;  %v2425_v6 = vld [vmem:[%s19893_s1 + $0x4a10] sm:$0xff] }
 0x4eb   :  { %11669 = vmatpush3.msra.mxu0 %v2359_v9  ;;  %8606 = vmatprep.mubr.f32.mxu0 %v3289_v8  ;;  %v2457_v7 = vld [vmem:[%s19893_s1 + $0x4b10] sm:$0xff]  ;;  %v2440_v8 = vld [vmem:[%s19893_s1 + $0x4a88] sm:$0xff] }
 0x4ec   :  { %11704 = vmatpush3.msra.mxu1 %v2391_v10  ;;  %8607 = vmatmul.mubr.f32.vlgmr.msra.gmra.mxu0 %v3281_v62  ;;  %v2442_v62 = vld [vmem:[%s19893_s1 + $0x4a98] sm:$0xff]  ;;  %v2472_v9 = vld [vmem:[%s19893_s1 + $0x4b88] sm:$0xff]  ;;  %v3305_v10 = vrot.slane %v3291_v0, %v12142_v51  ;;  %v2541_v57 = vld [vmem:[%s19893_s1 + $0x4db0] sm:$0xff] }
 0x4ed   :  { %8676 = vmatprep.mubr.f32.mxu1 %v3290_v11  ;;  %11708 = vmatprep.subr.mxu0 %v2454_v12  ;;  %v2424_v11 = vld [vmem:[%s19893_s1 + $0x4a08] sm:$0xff]  ;;  %v53_v0 = vld [vmem:[%s19892_s0 + $0x130] sm:$0xff] }
 0x4ee   :  { %11743 = vmatprep.subr.mxu1 %v2486_v13  ;;  %8677 = vmatmul.mubr.f32.vlgmr.msra.gmra.mxu1 %v3288_v3  ;;  %v2441_v3 = vld [vmem:[%s19893_s1 + $0x4a90] sm:$0xff]  ;;  %v2456_v12 = vld [vmem:[%s19893_s1 + $0x4b08] sm:$0xff]  ;;  %v2439_v13 = vld [vmem:[%s19893_s1 + $0x4a80] sm:$0xff] }
 0x4ef   :  { %11709 = vmatpush3.msra.mxu0 %v2438_v14  ;;  %11744 = vmatpush3.msra.mxu1 %v2470_v15  ;;  %v2471_v14 = vld [vmem:[%s19893_s1 + $0x4b80] sm:$0xff]  ;;  %v3306_v15 = vcombine.high %v3298_v5, %v3298_v5 }
 0x4f0   :  { %11710 = vmatprep.subr.mxu0 %v2453_v16  ;;  %11745 = vmatprep.subr.mxu1 %v2485_v17  ;;  %v2423_v16 = vld [vmem:[%s19893_s1 + $0x4a00] sm:$0xff] }
 0x4f1   :  { %11711 = vmatpush3.msra.mxu0 %v2437_v18  ;;  %11746 = vmatpush3.msra.mxu1 %v2469_v19  ;;  %v2455_v17 = vld [vmem:[%s19893_s1 + $0x4b00] sm:$0xff]  ;;  %v3307_v18 = vcombine.high %v3305_v10, %v3305_v10  ;;  %v2518_v19 = vld [vmem:[%s19893_s1 + $0x4cf8] sm:$0xff] }
 0x4f2   :  { %11712 = vmatprep.subr.mxu0 %v2452_v20  ;;  %11747 = vmatprep.subr.mxu1 %v2484_v21  ;;  %v2550_v20 = vld [vmem:[%s19893_s1 + $0x4df8] sm:$0xff] }
 0x4f3   :  { %11713 = vmatpush3.msra.mxu0 %v2436_v22  ;;  %11748 = vmatpush3.msra.mxu1 %v2468_v23  ;;  %v2502_v21 = vld [vmem:[%s19893_s1 + $0x4c78] sm:$0xff]  ;;  %v2517_v23 = vld [vmem:[%s19893_s1 + $0x4cf0] sm:$0xff] }
 0x4f4   :  { %11714 = vmatprep.subr.mxu0 %v2451_v24  ;;  %11749 = vmatprep.subr.mxu1 %v2483_v25  ;;  %v2534_v22 = vld [vmem:[%s19893_s1 + $0x4d78] sm:$0xff]  ;;  %v2549_v24 = vld [vmem:[%s19893_s1 + $0x4df0] sm:$0xff] }
 0x4f5   :  { %11715 = vmatpush3.msra.mxu0 %v2435_v26  ;;  %11750 = vmatpush3.msra.mxu1 %v2467_v27  ;;  %v2501_v25 = vld [vmem:[%s19893_s1 + $0x4c70] sm:$0xff]  ;;  %v2516_v27 = vld [vmem:[%s19893_s1 + $0x4ce8] sm:$0xff] }
 0x4f6   :  { %11716 = vmatprep.subr.mxu0 %v2450_v28  ;;  %11751 = vmatprep.subr.mxu1 %v2482_v29  ;;  %v2533_v26 = vld [vmem:[%s19893_s1 + $0x4d70] sm:$0xff]  ;;  %v2548_v28 = vld [vmem:[%s19893_s1 + $0x4de8] sm:$0xff] }
 0x4f7   :  { %11717 = vmatpush3.msra.mxu0 %v2434_v30  ;;  %11752 = vmatpush3.msra.mxu1 %v2466_v31  ;;  %v2500_v29 = vld [vmem:[%s19893_s1 + $0x4c68] sm:$0xff]  ;;  %v2515_v31 = vld [vmem:[%s19893_s1 + $0x4ce0] sm:$0xff] }
 0x4f8   :  { %11718 = vmatprep.subr.mxu0 %v2449_v32  ;;  %11753 = vmatprep.subr.mxu1 %v2481_v33  ;;  %v2532_v30 = vld [vmem:[%s19893_s1 + $0x4d68] sm:$0xff]  ;;  %v2547_v32 = vld [vmem:[%s19893_s1 + $0x4de0] sm:$0xff] }
 0x4f9   :  { %11719 = vmatpush3.msra.mxu0 %v2433_v34  ;;  %11754 = vmatpush3.msra.mxu1 %v2465_v35  ;;  %v2499_v33 = vld [vmem:[%s19893_s1 + $0x4c60] sm:$0xff]  ;;  %v2514_v35 = vld [vmem:[%s19893_s1 + $0x4cd8] sm:$0xff] }
 0x4fa   :  { %11720 = vmatprep.subr.mxu0 %v2448_v36  ;;  %11755 = vmatprep.subr.mxu1 %v2480_v37  ;;  %v2531_v34 = vld [vmem:[%s19893_s1 + $0x4d60] sm:$0xff]  ;;  %v2546_v36 = vld [vmem:[%s19893_s1 + $0x4dd8] sm:$0xff] }
 0x4fb   :  { %11721 = vmatpush3.msra.mxu0 %v2432_v38  ;;  %11756 = vmatpush3.msra.mxu1 %v2464_v39  ;;  %v2498_v37 = vld [vmem:[%s19893_s1 + $0x4c58] sm:$0xff]  ;;  %v2513_v39 = vld [vmem:[%s19893_s1 + $0x4cd0] sm:$0xff] }
 0x4fc   :  { %11722 = vmatprep.subr.mxu0 %v2447_v40  ;;  %11757 = vmatprep.subr.mxu1 %v2479_v41  ;;  %v2530_v38 = vld [vmem:[%s19893_s1 + $0x4d58] sm:$0xff]  ;;  %v2545_v40 = vld [vmem:[%s19893_s1 + $0x4dd0] sm:$0xff] }
 0x4fd   :  { %11723 = vmatpush3.msra.mxu0 %v2431_v42  ;;  %11758 = vmatpush3.msra.mxu1 %v2463_v43  ;;  %v2497_v41 = vld [vmem:[%s19893_s1 + $0x4c50] sm:$0xff]  ;;  %v2512_v43 = vld [vmem:[%s19893_s1 + $0x4cc8] sm:$0xff] }
 0x4fe   :  { %11724 = vmatprep.subr.mxu0 %v2446_v44  ;;  %11759 = vmatprep.subr.mxu1 %v2478_v45  ;;  %v2529_v42 = vld [vmem:[%s19893_s1 + $0x4d50] sm:$0xff]  ;;  %v2544_v44 = vld [vmem:[%s19893_s1 + $0x4dc8] sm:$0xff] }
 0x4ff   :  { %11725 = vmatpush3.msra.mxu0 %v2430_v46  ;;  %11760 = vmatpush3.msra.mxu1 %v2462_v47  ;;  %v2496_v45 = vld [vmem:[%s19893_s1 + $0x4c48] sm:$0xff]  ;;  %v2511_v47 = vld [vmem:[%s19893_s1 + $0x4cc0] sm:$0xff] }
 0x500   :  { %11726 = vmatprep.subr.mxu0 %v2445_v48  ;;  %11761 = vmatprep.subr.mxu1 %v2477_v49  ;;  %v2528_v46 = vld [vmem:[%s19893_s1 + $0x4d48] sm:$0xff]  ;;  %v2543_v48 = vld [vmem:[%s19893_s1 + $0x4dc0] sm:$0xff] }
 0x501   :  { %11727 = vmatpush3.msra.mxu0 %v2429_v50  ;;  %11762 = vmatpush3.msra.mxu1 %v2461_v52  ;;  %v2495_v49 = vld [vmem:[%s19893_s1 + $0x4c40] sm:$0xff]  ;;  %v2510_v52 = vld [vmem:[%s19893_s1 + $0x4cb8] sm:$0xff] }
 0x502   :  { %11728 = vmatprep.subr.mxu0 %v2444_v53  ;;  %11763 = vmatprep.subr.mxu1 %v2476_v54  ;;  %v2527_v50 = vld [vmem:[%s19893_s1 + $0x4d40] sm:$0xff]  ;;  %v2542_v53 = vld [vmem:[%s19893_s1 + $0x4db8] sm:$0xff] }
 0x503   :  { %11729 = vmatpush3.msra.mxu0 %v2428_v55  ;;  %11764 = vmatpush3.msra.mxu1 %v2460_v56  ;;  %v2494_v54 = vld [vmem:[%s19893_s1 + $0x4c38] sm:$0xff]  ;;  %v2509_v56 = vld [vmem:[%s19893_s1 + $0x4cb0] sm:$0xff] }
 0x504   :  { %11730 = vmatprep.subr.mxu0 %v2443_v58  ;;  %11765 = vmatprep.subr.mxu1 %v2475_v59  ;;  %v2526_v55 = vld [vmem:[%s19893_s1 + $0x4d38] sm:$0xff]  ;;  %v2493_v58 = vld [vmem:[%s19893_s1 + $0x4c30] sm:$0xff] }
 0x505   :  { %11731 = vmatpush3.msra.mxu0 %v2427_v60  ;;  %11766 = vmatpush3.msra.mxu1 %v2459_v61  ;;  %v2525_v59 = vld [vmem:[%s19893_s1 + $0x4d30] sm:$0xff]  ;;  %v2508_v60 = vld [vmem:[%s19893_s1 + $0x4ca8] sm:$0xff] }
 0x506   :  { %11732 = vmatprep.subr.mxu0 %v2442_v62  ;;  %11767 = vmatprep.subr.mxu1 %v2474_v63  ;;  %v2540_v61 = vld [vmem:[%s19893_s1 + $0x4da8] sm:$0xff] }
 0x507   :  { %11733 = vmatpush3.msra.mxu0 %v2426_v1  ;;  %11768 = vmatpush3.msra.mxu1 %v2458_v2  ;;  %v2492_v62 = vld [vmem:[%s19893_s1 + $0x4c28] sm:$0xff]  ;;  %v9150_v1 = vpop.f32.mrf.mxu0  ;;  %v2507_v2 = vld [vmem:[%s19893_s1 + $0x4ca0] sm:$0xff] }
 0x508   :  { %11734 = vmatprep.subr.mxu0 %v2441_v3  ;;  %11769 = vmatprep.subr.mxu1 %v2473_v4  ;;  %v2524_v63 = vld [vmem:[%s19893_s1 + $0x4d28] sm:$0xff]  ;;  %v2539_v3 = vld [vmem:[%s19893_s1 + $0x4da0] sm:$0xff] }
 0x509   :  { %11735 = vmatpush3.msra.mxu0 %v2425_v6  ;;  %11770 = vmatpush3.msra.mxu1 %v2457_v7  ;;  %v2491_v4 = vld [vmem:[%s19893_s1 + $0x4c20] sm:$0xff]  ;;  %v2506_v6 = vld [vmem:[%s19893_s1 + $0x4c98] sm:$0xff] }
 0x50a   :  { %11736 = vmatprep.subr.mxu0 %v2440_v8  ;;  %11771 = vmatprep.subr.mxu1 %v2472_v9  ;;  %v2538_v7 = vld [vmem:[%s19893_s1 + $0x4d98] sm:$0xff]  ;;  %v3308_v8 = vcombine.high %v53_v0, %v53_v0 }
 0x50b   :  { %11737 = vmatpush3.msra.mxu0 %v2424_v11  ;;  %11772 = vmatpush3.msra.mxu1 %v2456_v12  ;;  %v2490_v9 = vld [vmem:[%s19893_s1 + $0x4c18] sm:$0xff]  ;;  %v9185_v11 = vpop.f32.mrf.mxu1  ;;  %v9151_v12 = vpop.f32.mrf.mxu0 }
 0x50c   :  { %11738 = vmatprep.subr.mxu0 %v2439_v13  ;;  %11773 = vmatprep.subr.mxu1 %v2471_v14  ;;  %v2505_v13 = vld [vmem:[%s19893_s1 + $0x4c90] sm:$0xff] }
 0x50d   :  { %11739 = vmatpush3.msra.mxu0 %v2423_v16  ;;  %8746 = vmatprep.mubr.f32.mxu0 %v3306_v15  ;;  %v2537_v14 = vld [vmem:[%s19893_s1 + $0x4d90] sm:$0xff]  ;;  %v3315_v15 = vrot.slane %v53_v0, %v12142_v51 }
 0x50e   :  { %11774 = vmatpush3.msra.mxu1 %v2455_v17  ;;  %8747 = vmatmul.mubr.f32.vlgmr.msra.gmra.mxu0 %v3298_v5  ;;  %v2523_v5 = vld [vmem:[%s19893_s1 + $0x4d20] sm:$0xff]  ;;  %v2489_v16 = vld [vmem:[%s19893_s1 + $0x4c10] sm:$0xff] }
 0x50f   :  { %8816 = vmatprep.mubr.f32.mxu1 %v3307_v18  ;;  %11778 = vmatprep.subr.mxu0 %v2518_v19  ;;  %v2521_v17 = vld [vmem:[%s19893_s1 + $0x4d10] sm:$0xff]  ;;  %v9220_v18 = vpop.f32.mrf.mxu0  ;;  %v2504_v19 = vld [vmem:[%s19893_s1 + $0x4c88] sm:$0xff] }
 0x510   :  { %11813 = vmatprep.subr.mxu1 %v2550_v20  ;;  %8817 = vmatmul.mubr.f32.vlgmr.msra.gmra.mxu1 %v3305_v10  ;;  %v2522_v10 = vld [vmem:[%s19893_s1 + $0x4d18] sm:$0xff]  ;;  %v2536_v20 = vld [vmem:[%s19893_s1 + $0x4d88] sm:$0xff] }
 0x511   :  { %11779 = vmatpush3.msra.mxu0 %v2502_v21  ;;  %11814 = vmatpush3.msra.mxu1 %v2534_v22  ;;  %v3322_v21 = vrot.slane %v3308_v8, %v12142_v51  ;;  %v9152_v22 = vadd.f32 %v9151_v12, %v9150_v1  ;;  %v2578_v1 = vld [vmem:[%s19893_s1 + $0x4ed8] sm:$0xff]  ;;  %v2577_v8 = vld [vmem:[%s19893_s1 + $0x4ed0] sm:$0xff] }
 0x512   :  { %11780 = vmatprep.subr.mxu0 %v2517_v23  ;;  %11815 = vmatprep.subr.mxu1 %v2549_v24  ;;  %v2488_v23 = vld [vmem:[%s19893_s1 + $0x4c08] sm:$0xff]  ;;  %v2561_v12 = vld [vmem:[%s19893_s1 + $0x4e50] sm:$0xff] }
 0x513   :  { %11781 = vmatpush3.msra.mxu0 %v2501_v25  ;;  %11816 = vmatpush3.msra.mxu1 %v2533_v26  ;;  %v2520_v24 = vld [vmem:[%s19893_s1 + $0x4d08] sm:$0xff]  ;;  %v9117_v25 = vld [vmem:[%s19894_s2] ss:$0 sm:$0xff]  ;;  %v9186_v26 = vpop.f32.mrf.mxu1 }
 0x514   :  { %11782 = vmatprep.subr.mxu0 %v2516_v27  ;;  %11817 = vmatprep.subr.mxu1 %v2548_v28  ;;  %v2503_v27 = vld [vmem:[%s19893_s1 + $0x4c80] sm:$0xff] }
 0x515   :  { %11783 = vmatpush3.msra.mxu0 %v2500_v29  ;;  %11818 = vmatpush3.msra.mxu1 %v2532_v30  ;;  %v2535_v28 = vld [vmem:[%s19893_s1 + $0x4d80] sm:$0xff]  ;;  %v3323_v29 = vcombine.high %v3315_v15, %v3315_v15 }
 0x516   :  { %11784 = vmatprep.subr.mxu0 %v2515_v31  ;;  %11819 = vmatprep.subr.mxu1 %v2547_v32  ;;  %v2487_v30 = vld [vmem:[%s19893_s1 + $0x4c00] sm:$0xff]  ;;  %v9255_v31 = vpop.f32.mrf.mxu1  ;;  %v9221_v32 = vpop.f32.mrf.mxu0 }
 0x517   :  { %11785 = vmatpush3.msra.mxu0 %v2499_v33  ;;  %11820 = vmatpush3.msra.mxu1 %v2531_v34  ;;  %v2519_v33 = vld [vmem:[%s19893_s1 + $0x4d00] sm:$0xff]  ;;  %v3324_v34 = vcombine.high %v3322_v21, %v3322_v21 }
 0x518   :  { %11786 = vmatprep.subr.mxu0 %v2514_v35  ;;  %11821 = vmatprep.subr.mxu1 %v2546_v36  ;;  %v3569_v35 = vadd.f32 %v9152_v22, %v9117_v25  ;;  %v9187_v36 = vadd.f32 %v9186_v26, %v9185_v11  ;;  %v2607_v22 = vld [vmem:[%s19893_s1 + $0x4fc0] sm:$0xff] }
 0x519   :  { %11787 = vmatpush3.msra.mxu0 %v2498_v37  ;;  %11822 = vmatpush3.msra.mxu1 %v2530_v38  ;;  %v2582_v37 = vld [vmem:[%s19893_s1 + $0x4ef8] sm:$0xff]  ;;  %v9290_v38 = vpop.f32.mrf.mxu0  ;;  %v2591_v25 = vld [vmem:[%s19893_s1 + $0x4f40] sm:$0xff] }
 0x51a   :  { %11788 = vmatprep.subr.mxu0 %v2513_v39  ;;  %11823 = vmatprep.subr.mxu1 %v2545_v40  ;;  %v2614_v39 = vld [vmem:[%s19893_s1 + $0x4ff8] sm:$0xff]  ;;  %v9222_v40 = vadd.f32 %v9221_v32, %v9220_v18  ;;  %v2560_v18 = vld [vmem:[%s19893_s1 + $0x4e48] sm:$0xff] }
 0x51b   :  { %11789 = vmatpush3.msra.mxu0 %v2497_v41  ;;  %11824 = vmatpush3.msra.mxu1 %v2529_v42  ;;  %v2566_v41 = vld [vmem:[%s19893_s1 + $0x4e78] sm:$0xff] }
 0x51c   :  { %11790 = vmatprep.subr.mxu0 %v2512_v43  ;;  %11825 = vmatprep.subr.mxu1 %v2544_v44  ;;  %v2598_v42 = vld [vmem:[%s19893_s1 + $0x4f78] sm:$0xff]  ;;  %v9256_v43 = vpop.f32.mrf.mxu1  ;;  %v2581_v44 = vld [vmem:[%s19893_s1 + $0x4ef0] sm:$0xff] }
 0x51d   :  { %11791 = vmatpush3.msra.mxu0 %v2496_v45  ;;  %11826 = vmatpush3.msra.mxu1 %v2528_v46  ;;  %v2613_v45 = vld [vmem:[%s19893_s1 + $0x4ff0] sm:$0xff]  ;;  %v3639_v46 = vadd.f32 %v9187_v36, %v3569_v35  ;;  %v2558_v32 = vld [vmem:[%s19893_s1 + $0x4e38] sm:$0xff] }
 0x51e   :  { %11792 = vmatprep.subr.mxu0 %v2511_v47  ;;  %11827 = vmatprep.subr.mxu1 %v2543_v48  ;;  %v2565_v47 = vld [vmem:[%s19893_s1 + $0x4e70] sm:$0xff] }
 0x51f   :  { %11793 = vmatpush3.msra.mxu0 %v2495_v49  ;;  %11828 = vmatpush3.msra.mxu1 %v2527_v50  ;;  %v2597_v48 = vld [vmem:[%s19893_s1 + $0x4f70] sm:$0xff]  ;;  %v9325_v49 = vpop.f32.mrf.mxu1  ;;  %v9291_v50 = vpop.f32.mrf.mxu0 }
 0x520   :  { %11794 = vmatprep.subr.mxu0 %v2510_v52  ;;  %11829 = vmatprep.subr.mxu1 %v2542_v53  ;;  %v2580_v52 = vld [vmem:[%s19893_s1 + $0x4ee8] sm:$0xff]  ;;  %v2573_v35 = vld [vmem:[%s19893_s1 + $0x4eb0] sm:$0xff] }
 0x521   :  { %11795 = vmatpush3.msra.mxu0 %v2494_v54  ;;  %11830 = vmatpush3.msra.mxu1 %v2526_v55  ;;  %v2612_v53 = vld [vmem:[%s19893_s1 + $0x4fe8] sm:$0xff]  ;;  %v3709_v54 = vadd.f32 %v9222_v40, %v3639_v46  ;;  %v9257_v55 = vadd.f32 %v9256_v43, %v9255_v31  ;;  %v9326_v0 = vpop.f32.mrf.mxu1  ;;  %v2605_v36 = vld [vmem:[%s19893_s1 + $0x4fb0] sm:$0xff]  ;;  %v54_v43 = vld [vmem:[%s19892_s0 + $0x138] sm:$0xff] }
 0x522   :  { %11796 = vmatprep.subr.mxu0 %v2509_v56  ;;  %11831 = vmatprep.subr.mxu1 %v2541_v57  ;;  %v2564_v56 = vld [vmem:[%s19893_s1 + $0x4e68] sm:$0xff]  ;;  %v9327_v11 = vadd.f32 %v9326_v0, %v9325_v49  ;;  %v2571_v49 = vld [vmem:[%s19893_s1 + $0x4ea0] sm:$0xff]  ;;  %v2569_v0 = vld [vmem:[%s19893_s1 + $0x4e90] sm:$0xff] }
 0x523   :  { %11797 = vmatpush3.msra.mxu0 %v2493_v58  ;;  %11832 = vmatpush3.msra.mxu1 %v2525_v59  ;;  %v2596_v57 = vld [vmem:[%s19893_s1 + $0x4f68] sm:$0xff]  ;;  %v9360_v58 = vpop.f32.mrf.mxu0  ;;  %v2579_v59 = vld [vmem:[%s19893_s1 + $0x4ee0] sm:$0xff] }
 0x524   :  { %11798 = vmatprep.subr.mxu0 %v2508_v60  ;;  %11833 = vmatprep.subr.mxu1 %v2540_v61  ;;  %v2611_v60 = vld [vmem:[%s19893_s1 + $0x4fe0] sm:$0xff]  ;;  %v9292_v61 = vadd.f32 %v9291_v50, %v9290_v38  ;;  %v2557_v38 = vld [vmem:[%s19893_s1 + $0x4e30] sm:$0xff]  ;;  %v2588_v46 = vld [vmem:[%s19893_s1 + $0x4f28] sm:$0xff] }
 0x525   :  { %11799 = vmatpush3.msra.mxu0 %v2492_v62  ;;  %11834 = vmatpush3.msra.mxu1 %v2524_v63  ;;  %v2563_v62 = vld [vmem:[%s19893_s1 + $0x4e60] sm:$0xff] }
 0x526   :  { %11800 = vmatprep.subr.mxu0 %v2507_v2  ;;  %11835 = vmatprep.subr.mxu1 %v2539_v3  ;;  %v2595_v63 = vld [vmem:[%s19893_s1 + $0x4f60] sm:$0xff]  ;;  %v2610_v2 = vld [vmem:[%s19893_s1 + $0x4fd8] sm:$0xff]  ;;  %v3779_v3 = vadd.f32 %v9257_v55, %v3709_v54 }
 0x527   :  { %11801 = vmatpush3.msra.mxu0 %v2491_v4  ;;  %11836 = vmatpush3.msra.mxu1 %v2523_v5  ;;  %v2562_v4 = vld [vmem:[%s19893_s1 + $0x4e58] sm:$0xff]  ;;  %v2603_v50 = vld [vmem:[%s19893_s1 + $0x4fa0] sm:$0xff] }
 0x528   :  { %11802 = vmatprep.subr.mxu0 %v2506_v6  ;;  %11837 = vmatprep.subr.mxu1 %v2538_v7  ;;  %v2594_v5 = vld [vmem:[%s19893_s1 + $0x4f58] sm:$0xff]  ;;  %v9395_v6 = vpop.f32.mrf.mxu1  ;;  %v9361_v7 = vpop.f32.mrf.mxu0  ;;  %v2555_v54 = vld [vmem:[%s19893_s1 + $0x4e20] sm:$0xff] }
 0x529   :  { %11803 = vmatpush3.msra.mxu0 %v2490_v9  ;;  %11838 = vmatpush3.msra.mxu1 %v2522_v10  ;;  %v2609_v9 = vld [vmem:[%s19893_s1 + $0x4fd0] sm:$0xff]  ;;  %v3849_v10 = vadd.f32 %v9292_v61, %v3779_v3  ;;  %v2587_v55 = vld [vmem:[%s19893_s1 + $0x4f20] sm:$0xff]  ;;  %v2554_v61 = vld [vmem:[%s19893_s1 + $0x4e18] sm:$0xff] }
 0x52a   :  { %11804 = vmatprep.subr.mxu0 %v2505_v13  ;;  %11839 = vmatprep.subr.mxu1 %v2537_v14  ;;  %v2593_v13 = vld [vmem:[%s19893_s1 + $0x4f50] sm:$0xff]  ;;  %v9430_v14 = vpop.f32.mrf.mxu0 }
 0x52b   :  { %11805 = vmatpush3.msra.mxu0 %v2489_v16  ;;  %11840 = vmatpush3.msra.mxu1 %v2521_v17  ;;  %v2608_v16 = vld [vmem:[%s19893_s1 + $0x4fc8] sm:$0xff]  ;;  %v9362_v17 = vadd.f32 %v9361_v7, %v9360_v58  ;;  %v2570_v58 = vld [vmem:[%s19893_s1 + $0x4e98] sm:$0xff] }
 0x52c   :  { %11806 = vmatprep.subr.mxu0 %v2504_v19  ;;  %11841 = vmatprep.subr.mxu1 %v2536_v20  ;;  %v2592_v19 = vld [vmem:[%s19893_s1 + $0x4f48] sm:$0xff]  ;;  %v9396_v20 = vpop.f32.mrf.mxu1 }
 0x52d   :  { %11807 = vmatpush3.msra.mxu0 %v2488_v23  ;;  %11842 = vmatpush3.msra.mxu1 %v2520_v24  ;;  %v3919_v23 = vadd.f32 %v9327_v11, %v3849_v10  ;;  %v2559_v24 = vld [vmem:[%s19893_s1 + $0x4e40] sm:$0xff]  ;;  %v9397_v31 = vadd.f32 %v9396_v20, %v9395_v6  ;;  %v2600_v10 = vld [vmem:[%s19893_s1 + $0x4f88] sm:$0xff] }
 0x52e   :  { %11808 = vmatprep.subr.mxu0 %v2503_v27  ;;  %11843 = vmatprep.subr.mxu1 %v2535_v28  ;;  %v9465_v26 = vpop.f32.mrf.mxu1  ;;  %v9431_v27 = vpop.f32.mrf.mxu0  ;;  %v2574_v28 = vld [vmem:[%s19893_s1 + $0x4eb8] sm:$0xff] }
 0x52f   :  { %11809 = vmatpush3.msra.mxu0 %v2487_v30  ;;  %8886 = vmatprep.mubr.f32.mxu0 %v3323_v29  ;;  %v2606_v29 = vld [vmem:[%s19893_s1 + $0x4fb8] sm:$0xff]  ;;  %v3989_v30 = vadd.f32 %v9362_v17, %v3919_v23 }
 0x530   :  { %11844 = vmatpush3.msra.mxu1 %v2519_v33  ;;  %8887 = vmatmul.mubr.f32.vlgmr.msra.gmra.mxu0 %v3315_v15  ;;  %v2576_v15 = vld [vmem:[%s19893_s1 + $0x4ec8] sm:$0xff]  ;;  %v2590_v33 = vld [vmem:[%s19893_s1 + $0x4f38] sm:$0xff]  ;;  %v9466_v40 = vpop.f32.mrf.mxu1 }
 0x531   :  { %8956 = vmatprep.mubr.f32.mxu1 %v3324_v34  ;;  %11848 = vmatprep.subr.mxu0 %v2582_v37  ;;  %v9500_v34 = vpop.f32.mrf.mxu0  ;;  %v9432_v37 = vadd.f32 %v9431_v27, %v9430_v14 }
 0x532   :  { %11883 = vmatprep.subr.mxu1 %v2614_v39  ;;  %8957 = vmatmul.mubr.f32.vlgmr.msra.gmra.mxu1 %v3322_v21  ;;  %v2575_v21 = vld [vmem:[%s19893_s1 + $0x4ec0] sm:$0xff]  ;;  %v2589_v39 = vld [vmem:[%s19893_s1 + $0x4f30] sm:$0xff] }
 0x533   :  { %11849 = vmatpush3.msra.mxu0 %v2566_v41  ;;  %11884 = vmatpush3.msra.mxu1 %v2598_v42  ;;  %v2572_v41 = vld [vmem:[%s19893_s1 + $0x4ea8] sm:$0xff] }
 0x534   :  { %11850 = vmatprep.subr.mxu0 %v2581_v44  ;;  %11885 = vmatprep.subr.mxu1 %v2613_v45  ;;  %v2604_v42 = vld [vmem:[%s19893_s1 + $0x4fa8] sm:$0xff]  ;;  %v4059_v44 = vadd.f32 %v9397_v31, %v3989_v30 }
 0x535   :  { %11851 = vmatpush3.msra.mxu0 %v2565_v47  ;;  %11886 = vmatpush3.msra.mxu1 %v2597_v48  ;;  %v2556_v45 = vld [vmem:[%s19893_s1 + $0x4e28] sm:$0xff]  ;;  %v9535_v47 = vpop.f32.mrf.mxu1  ;;  %v9501_v48 = vpop.f32.mrf.mxu0 }
 0x536   :  { %11852 = vmatprep.subr.mxu0 %v2580_v52  ;;  %11887 = vmatprep.subr.mxu1 %v2612_v53  ;;  %v4129_v52 = vadd.f32 %v9432_v37, %v4059_v44  ;;  %v9467_v53 = vadd.f32 %v9466_v40, %v9465_v26 }
 0x537   :  { %11853 = vmatpush3.msra.mxu0 %v2564_v56  ;;  %11888 = vmatpush3.msra.mxu1 %v2596_v57  ;;  %v3325_v56 = vcombine.high %v54_v43, %v54_v43  ;;  %v9570_v57 = vpop.f32.mrf.mxu0 }
 0x538   :  { %11854 = vmatprep.subr.mxu0 %v2579_v59  ;;  %11889 = vmatprep.subr.mxu1 %v2611_v60  ;;  %v2602_v59 = vld [vmem:[%s19893_s1 + $0x4f98] sm:$0xff]  ;;  %v9502_v60 = vadd.f32 %v9501_v48, %v9500_v34  ;;  %v4199_v3 = vadd.f32 %v9467_v53, %v4129_v52 }
 0x539   :  { %11855 = vmatpush3.msra.mxu0 %v2563_v62  ;;  %11890 = vmatpush3.msra.mxu1 %v2595_v63  ;;  %v2586_v62 = vld [vmem:[%s19893_s1 + $0x4f18] sm:$0xff]  ;;  %v9536_v63 = vpop.f32.mrf.mxu1  ;;  %v3339_v6 = vrot.slane %v3325_v56, %v12142_v51 }
 0x53a   :  { %11856 = vmatprep.subr.mxu0 %v2578_v1  ;;  %11891 = vmatprep.subr.mxu1 %v2610_v2  ;;  %v2601_v1 = vld [vmem:[%s19893_s1 + $0x4f90] sm:$0xff]  ;;  %v3332_v2 = vrot.slane %v54_v43, %v12142_v51  ;;  %v4269_v11 = vadd.f32 %v9502_v60, %v4199_v3  ;;  %v2552_v51 = vld [vmem:[%s19893_s1 + $0x4e08] sm:$0xff] }
 0x53b   :  { %11857 = vmatpush3.msra.mxu0 %v2562_v4  ;;  %11892 = vmatpush3.msra.mxu1 %v2594_v5  ;;  %v2553_v4 = vld [vmem:[%s19893_s1 + $0x4e10] sm:$0xff]  ;;  %v9605_v7 = vpop.f32.mrf.mxu1  ;;  %v3341_v20 = vcombine.high %v3339_v6, %v3339_v6 }
 0x53c   :  { %11858 = vmatprep.subr.mxu0 %v2577_v8  ;;  %11893 = vmatprep.subr.mxu1 %v2609_v9  ;;  %v2585_v5 = vld [vmem:[%s19893_s1 + $0x4f10] sm:$0xff]  ;;  %v9571_v8 = vpop.f32.mrf.mxu0  ;;  %v2568_v9 = vld [vmem:[%s19893_s1 + $0x4e88] sm:$0xff]  ;;  %v3340_v17 = vcombine.high %v3332_v2, %v3332_v2 }
 0x53d   :  { %11859 = vmatpush3.msra.mxu0 %v2561_v12  ;;  %11894 = vmatpush3.msra.mxu1 %v2593_v13  ;;  %v9537_v12 = vadd.f32 %v9536_v63, %v9535_v47  ;;  %v2584_v13 = vld [vmem:[%s19893_s1 + $0x4f08] sm:$0xff] }
 0x53e   :  { %11860 = vmatprep.subr.mxu0 %v2576_v15  ;;  %11895 = vmatprep.subr.mxu1 %v2608_v16  ;;  %v9640_v14 = vpop.f32.mrf.mxu0  ;;  %v2567_v15 = vld [vmem:[%s19893_s1 + $0x4e80] sm:$0xff] }
 0x53f   :  { %11861 = vmatpush3.msra.mxu0 %v2560_v18  ;;  %11896 = vmatpush3.msra.mxu1 %v2592_v19  ;;  %v2599_v16 = vld [vmem:[%s19893_s1 + $0x4f80] sm:$0xff]  ;;  %v9572_v18 = vadd.f32 %v9571_v8, %v9570_v57  ;;  %v4339_v23 = vadd.f32 %v9537_v12, %v4269_v11 }
 0x540   :  { %11862 = vmatprep.subr.mxu0 %v2575_v21  ;;  %11897 = vmatprep.subr.mxu1 %v2607_v22  ;;  %v2551_v19 = vld [vmem:[%s19893_s1 + $0x4e00] sm:$0xff]  ;;  %v9606_v21 = vpop.f32.mrf.mxu1 }
 0x541   :  { %11863 = vmatpush3.msra.mxu0 %v2559_v24  ;;  %11898 = vmatpush3.msra.mxu1 %v2591_v25  ;;  %v2583_v22 = vld [vmem:[%s19893_s1 + $0x4f00] sm:$0xff]  ;;  %v9641_v25 = vpop.f32.mrf.mxu0  ;;  %v4409_v26 = vadd.f32 %v9572_v18, %v4339_v23  ;;  %v9607_v27 = vadd.f32 %v9606_v21, %v9605_v7  ;;  %s11983_s1 = smov [#allocation2]  }
 0x542   :  { %11864 = vmatprep.subr.mxu0 %v2574_v28  ;;  %11899 = vmatprep.subr.mxu1 %v2606_v29  ;;  %v9675_v24 = vpop.f32.mrf.mxu1  ;;  %v9642_v29 = vadd.f32 %v9641_v25, %v9640_v14  ;;  %s9109_s23 = sshll.u32 %s11983_s1, 4  ;;  %s9110_s23 = int_to_ptr.vmem [resolvable:$true] %s9109_s23 }
 0x543   :  { %11865 = vmatpush3.msra.mxu0 %v2558_v32  ;;  %11900 = vmatpush3.msra.mxu1 %v2590_v33  ;;  %v9710_v28 = vpop.f32.mrf.mxu0  ;;  %v4479_v31 = vadd.f32 %v9607_v27, %v4409_v26  ;;  %s11960_s24 = scalar_lea.vmem %s9110_s23, 32  ;;  %p11965_p1 = scmp.lt.s32.totalorder %s9110_s23, %s9110_s23 }
 0x544   :  { %11866 = vmatprep.subr.mxu0 %v2573_v35  ;;  %11901 = vmatprep.subr.mxu1 %v2605_v36  ;;  %v9676_v30 = vpop.f32.mrf.mxu1  ;;  %p11961_p0 = scmp.ne.s32.totalorder %s9110_s23, %s11960_s24  ;;  %p11966_p2 = scmp.lt.s32.totalorder %s11960_s24, %s11960_s24 }
 0x545   :  { %11867 = vmatpush3.msra.mxu0 %v2557_v38  ;;  %11902 = vmatpush3.msra.mxu1 %v2589_v39  ;;  %v9711_v33 = vpop.f32.mrf.mxu0  ;;  %v4549_v34 = vadd.f32 %v9642_v29, %v4479_v31  ;;  %v9677_v35 = vadd.f32 %v9676_v30, %v9675_v24 }
 0x546   :  { %11868 = vmatprep.subr.mxu0 %v2572_v41  ;;  %11903 = vmatprep.subr.mxu1 %v2604_v42  ;;  %v9745_v32 = vpop.f32.mrf.mxu1  ;;  %v9712_v37 = vadd.f32 %v9711_v33, %v9710_v28  ;;  %p11967_p3 = por %p11966_p2, %p11965_p1 }
 0x547   :  { %11869 = vmatpush3.msra.mxu0 %v2556_v45  ;;  %11904 = vmatpush3.msra.mxu1 %v2588_v46  ;;  %v9780_v36 = vpop.f32.mrf.mxu0  ;;  %v4619_v39 = vadd.f32 %v9677_v35, %v4549_v34 }
 0x548   :  { %11870 = vmatprep.subr.mxu0 %v2571_v49  ;;  %11905 = vmatprep.subr.mxu1 %v2603_v50  ;;  %v9746_v38 = vpop.f32.mrf.mxu1  ;;  %p11968_p4 = pnand %p11967_p3, %p11961_p0 }
 0x549   :  { %11871 = vmatpush3.msra.mxu0 %v2555_v54  ;;  %11906 = vmatpush3.msra.mxu1 %v2587_v55  ;;  %v9781_v41 = vpop.f32.mrf.mxu0  ;;  %v4689_v42 = vadd.f32 %v9712_v37, %v4619_v39  ;;  %v9747_v43 = vadd.f32 %v9746_v38, %v9745_v32 }
 0x54a   :  { %11872 = vmatprep.subr.mxu0 %v2570_v58  ;;  %11907 = vmatprep.subr.mxu1 %v2602_v59  ;;  %v9815_v40 = vpop.f32.mrf.mxu1  ;;  %v9782_v45 = vadd.f32 %v9781_v41, %v9780_v36 }
 0x54b   :  { %11873 = vmatpush3.msra.mxu0 %v2554_v61  ;;  %11908 = vmatpush3.msra.mxu1 %v2586_v62  ;;  %v9850_v44 = vpop.f32.mrf.mxu0  ;;  %v4759_v47 = vadd.f32 %v9747_v43, %v4689_v42 }
 0x54c   :  { %11874 = vmatprep.subr.mxu0 %v2569_v0  ;;  %11909 = vmatprep.subr.mxu1 %v2601_v1  ;;  %v9816_v46 = vpop.f32.mrf.mxu1 }
 0x54d   :  { %11875 = vmatpush3.msra.mxu0 %v2553_v4  ;;  %11910 = vmatpush3.msra.mxu1 %v2585_v5  ;;  %v9851_v49 = vpop.f32.mrf.mxu0  ;;  %v4829_v50 = vadd.f32 %v9782_v45, %v4759_v47  ;;  %v9817_v52 = vadd.f32 %v9816_v46, %v9815_v40 }
 0x54e   :  { %11876 = vmatprep.subr.mxu0 %v2568_v9  ;;  %11911 = vmatprep.subr.mxu1 %v2600_v10  ;;  %v9885_v48 = vpop.f32.mrf.mxu1  ;;  %v9852_v54 = vadd.f32 %v9851_v49, %v9850_v44 }
 0x54f   :  { %11877 = vmatpush3.msra.mxu0 %v2552_v51  ;;  %11912 = vmatpush3.msra.mxu1 %v2584_v13  ;;  %v9920_v53 = vpop.f32.mrf.mxu0  ;;  %v4899_v56 = vadd.f32 %v9817_v52, %v4829_v50 }
 0x550   :  { %11878 = vmatprep.subr.mxu0 %v2567_v15  ;;  %11913 = vmatprep.subr.mxu1 %v2599_v16  ;;  %v9886_v55 = vpop.f32.mrf.mxu1 }
 0x551   :  { %11879 = vmatpush3.msra.mxu0 %v2551_v19  ;;  %9026 = vmatprep.mubr.f32.mxu0 %v3340_v17  ;;  %v9921_v58 = vpop.f32.mrf.mxu0  ;;  %v4969_v59 = vadd.f32 %v9852_v54, %v4899_v56  ;;  %v9887_v60 = vadd.f32 %v9886_v55, %v9885_v48 }
 0x552   :  { %11914 = vmatpush3.msra.mxu1 %v2583_v22  ;;  %9096 = vmatprep.mubr.f32.mxu1 %v3341_v20  ;;  %v9955_v57 = vpop.f32.mrf.mxu1  ;;  %v9922_v62 = vadd.f32 %v9921_v58, %v9920_v53 }
 0x553   :  { %9027 = vmatmul.mubr.f32.vlgmr.msra.gmra.mxu0 %v3332_v2  ;;  %9097 = vmatmul.mubr.f32.vlgmr.msra.gmra.mxu1 %v3339_v6  ;;  %v9990_v61 = vpop.f32.mrf.mxu0  ;;  %v5039_v0 = vadd.f32 %v9887_v60, %v4969_v59 }
 0x554   :  { %v9956_v63 = vpop.f32.mrf.mxu1 }
 0x555   :  { %v9991_v2 = vpop.f32.mrf.mxu0  ;;  %v5109_v3 = vadd.f32 %v9922_v62, %v5039_v0  ;;  %v9957_v4 = vadd.f32 %v9956_v63, %v9955_v57 }
 0x556   :  { %v10025_v1 = vpop.f32.mrf.mxu1  ;;  %v9992_v6 = vadd.f32 %v9991_v2, %v9990_v61 }
 0x557   :  { %v10060_v5 = vpop.f32.mrf.mxu0  ;;  %v5179_v8 = vadd.f32 %v9957_v4, %v5109_v3 }
 0x558   :  { %v10026_v7 = vpop.f32.mrf.mxu1 }
 0x559   :  { %v10061_v10 = vpop.f32.mrf.mxu0  ;;  %v5249_v11 = vadd.f32 %v9992_v6, %v5179_v8  ;;  %v10027_v12 = vadd.f32 %v10026_v7, %v10025_v1 }
 0x55a   :  { %v10095_v9 = vpop.f32.mrf.mxu1  ;;  %v10062_v13 = vadd.f32 %v10061_v10, %v10060_v5 }
 0x55b   :  { %v10130_v51 = vpop.f32.mrf.mxu0  ;;  %v5319_v15 = vadd.f32 %v10027_v12, %v5249_v11 }
 0x55c   :  { %v10096_v14 = vpop.f32.mrf.mxu1 }
 0x55d   :  { %v10131_v17 = vpop.f32.mrf.mxu0  ;;  %v5389_v18 = vadd.f32 %v10062_v13, %v5319_v15  ;;  %v10097_v19 = vadd.f32 %v10096_v14, %v10095_v9 }
 0x55e   :  { %v10165_v16 = vpop.f32.mrf.mxu1  ;;  %v10132_v21 = vadd.f32 %v10131_v17, %v10130_v51 }
 0x55f   :  { %v10200_v20 = vpop.f32.mrf.mxu0  ;;  %v5459_v23 = vadd.f32 %v10097_v19, %v5389_v18 }
 0x560   :  { %v10166_v22 = vpop.f32.mrf.mxu1 }
 0x561   :  { %v10201_v25 = vpop.f32.mrf.mxu0  ;;  %v5529_v26 = vadd.f32 %v10132_v21, %v5459_v23  ;;  %v10167_v27 = vadd.f32 %v10166_v22, %v10165_v16 }
 0x562   :  { %v10235_v24 = vpop.f32.mrf.mxu1  ;;  %v10202_v29 = vadd.f32 %v10201_v25, %v10200_v20 }
 0x563   :  { %v10270_v28 = vpop.f32.mrf.mxu0  ;;  %v5599_v31 = vadd.f32 %v10167_v27, %v5529_v26 }
 0x564   :  { %v10236_v30 = vpop.f32.mrf.mxu1 }
 0x565   :  { %v10271_v33 = vpop.f32.mrf.mxu0  ;;  %v5669_v34 = vadd.f32 %v10202_v29, %v5599_v31  ;;  %v10237_v35 = vadd.f32 %v10236_v30, %v10235_v24 }
 0x566   :  { %v10305_v32 = vpop.f32.mrf.mxu1  ;;  %v10272_v37 = vadd.f32 %v10271_v33, %v10270_v28 }
 0x567   :  { %v10340_v36 = vpop.f32.mrf.mxu0  ;;  %v5739_v39 = vadd.f32 %v10237_v35, %v5669_v34 }
 0x568   :  { %v10306_v38 = vpop.f32.mrf.mxu1 }
 0x569   :  { %v10341_v41 = vpop.f32.mrf.mxu0  ;;  %v5809_v42 = vadd.f32 %v10272_v37, %v5739_v39  ;;  %v10307_v43 = vadd.f32 %v10306_v38, %v10305_v32 }
 0x56a   :  { %v10375_v40 = vpop.f32.mrf.mxu1  ;;  %v10342_v45 = vadd.f32 %v10341_v41, %v10340_v36 }
 0x56b   :  { %v10410_v44 = vpop.f32.mrf.mxu0  ;;  %v5879_v47 = vadd.f32 %v10307_v43, %v5809_v42 }
 0x56c   :  { %v10376_v46 = vpop.f32.mrf.mxu1 }
 0x56d   :  { %v10411_v49 = vpop.f32.mrf.mxu0  ;;  %v5949_v50 = vadd.f32 %v10342_v45, %v5879_v47  ;;  %v10377_v52 = vadd.f32 %v10376_v46, %v10375_v40 }
 0x56e   :  { %v10445_v48 = vpop.f32.mrf.mxu1  ;;  %v10412_v54 = vadd.f32 %v10411_v49, %v10410_v44 }
 0x56f   :  { %v10480_v53 = vpop.f32.mrf.mxu0  ;;  %v6019_v56 = vadd.f32 %v10377_v52, %v5949_v50 }
 0x570   :  { %v10446_v55 = vpop.f32.mrf.mxu1 }
 0x571   :  { %v10481_v58 = vpop.f32.mrf.mxu0  ;;  %v6089_v59 = vadd.f32 %v10412_v54, %v6019_v56  ;;  %v10447_v60 = vadd.f32 %v10446_v55, %v10445_v48 }
 0x572   :  { %v10515_v57 = vpop.f32.mrf.mxu1  ;;  %v10482_v62 = vadd.f32 %v10481_v58, %v10480_v53 }
 0x573   :  { %v10550_v61 = vpop.f32.mrf.mxu0  ;;  %v6159_v0 = vadd.f32 %v10447_v60, %v6089_v59 }
 0x574   :  { %v10516_v63 = vpop.f32.mrf.mxu1 }
 0x575   :  { %v10551_v2 = vpop.f32.mrf.mxu0  ;;  %v6229_v3 = vadd.f32 %v10482_v62, %v6159_v0  ;;  %v10517_v4 = vadd.f32 %v10516_v63, %v10515_v57 }
 0x576   :  { %v10585_v1 = vpop.f32.mrf.mxu1  ;;  %v10552_v6 = vadd.f32 %v10551_v2, %v10550_v61 }
 0x577   :  { %v10620_v5 = vpop.f32.mrf.mxu0  ;;  %v6299_v8 = vadd.f32 %v10517_v4, %v6229_v3 }
 0x578   :  { %v10586_v7 = vpop.f32.mrf.mxu1 }
 0x579   :  { %v10621_v10 = vpop.f32.mrf.mxu0  ;;  %v6369_v11 = vadd.f32 %v10552_v6, %v6299_v8  ;;  %v10587_v12 = vadd.f32 %v10586_v7, %v10585_v1 }
 0x57a   :  { %v10655_v9 = vpop.f32.mrf.mxu1  ;;  %v10622_v13 = vadd.f32 %v10621_v10, %v10620_v5 }
 0x57b   :  { %v10690_v51 = vpop.f32.mrf.mxu0  ;;  %v6439_v15 = vadd.f32 %v10587_v12, %v6369_v11 }
 0x57c   :  { %v10656_v14 = vpop.f32.mrf.mxu1 }
 0x57d   :  { %v10691_v17 = vpop.f32.mrf.mxu0  ;;  %v6509_v18 = vadd.f32 %v10622_v13, %v6439_v15  ;;  %v10657_v19 = vadd.f32 %v10656_v14, %v10655_v9 }
 0x57e   :  { %v10725_v16 = vpop.f32.mrf.mxu1  ;;  %v10692_v21 = vadd.f32 %v10691_v17, %v10690_v51 }
 0x57f   :  { %v10760_v20 = vpop.f32.mrf.mxu0  ;;  %v6579_v23 = vadd.f32 %v10657_v19, %v6509_v18 }
 0x580   :  { %v10726_v22 = vpop.f32.mrf.mxu1 }
 0x581   :  { %v10761_v25 = vpop.f32.mrf.mxu0  ;;  %v6649_v26 = vadd.f32 %v10692_v21, %v6579_v23  ;;  %v10727_v27 = vadd.f32 %v10726_v22, %v10725_v16 }
 0x582   :  { %v10795_v24 = vpop.f32.mrf.mxu1  ;;  %v10762_v29 = vadd.f32 %v10761_v25, %v10760_v20 }
 0x583   :  { %v10830_v28 = vpop.f32.mrf.mxu0  ;;  %v6719_v31 = vadd.f32 %v10727_v27, %v6649_v26 }
 0x584   :  { %v10796_v30 = vpop.f32.mrf.mxu1 }
 0x585   :  { %v10831_v33 = vpop.f32.mrf.mxu0  ;;  %v6789_v34 = vadd.f32 %v10762_v29, %v6719_v31  ;;  %v10797_v35 = vadd.f32 %v10796_v30, %v10795_v24 }
 0x586   :  { %v10865_v32 = vpop.f32.mrf.mxu1  ;;  %v10832_v37 = vadd.f32 %v10831_v33, %v10830_v28 }
 0x587   :  { %v10900_v36 = vpop.f32.mrf.mxu0  ;;  %v6859_v39 = vadd.f32 %v10797_v35, %v6789_v34 }
 0x588   :  { %v10866_v38 = vpop.f32.mrf.mxu1 }
 0x589   :  { %v10901_v41 = vpop.f32.mrf.mxu0  ;;  %v6929_v42 = vadd.f32 %v10832_v37, %v6859_v39  ;;  %v10867_v43 = vadd.f32 %v10866_v38, %v10865_v32 }
 0x58a   :  { %v10935_v40 = vpop.f32.mrf.mxu1  ;;  %v10902_v45 = vadd.f32 %v10901_v41, %v10900_v36 }
 0x58b   :  { %v10970_v44 = vpop.f32.mrf.mxu0  ;;  %v6999_v47 = vadd.f32 %v10867_v43, %v6929_v42 }
 0x58c   :  { %v10936_v46 = vpop.f32.mrf.mxu1 }
 0x58d   :  { %v10971_v49 = vpop.f32.mrf.mxu0  ;;  %v7069_v50 = vadd.f32 %v10902_v45, %v6999_v47  ;;  %v10937_v52 = vadd.f32 %v10936_v46, %v10935_v40 }
 0x58e   :  { %v11005_v48 = vpop.f32.mrf.mxu1  ;;  %v10972_v54 = vadd.f32 %v10971_v49, %v10970_v44 }
 0x58f   :  { %v11040_v53 = vpop.f32.mrf.mxu0  ;;  %v7139_v56 = vadd.f32 %v10937_v52, %v7069_v50 }
 0x590   :  { %v11006_v55 = vpop.f32.mrf.mxu1 }
 0x591   :  { %v11041_v58 = vpop.f32.mrf.mxu0  ;;  %v7209_v59 = vadd.f32 %v10972_v54, %v7139_v56  ;;  %v11007_v60 = vadd.f32 %v11006_v55, %v11005_v48 }
 0x592   :  { %v11075_v57 = vpop.f32.mrf.mxu1  ;;  %v11042_v62 = vadd.f32 %v11041_v58, %v11040_v53 }
 0x593   :  { %v11110_v61 = vpop.f32.mrf.mxu0  ;;  %v7279_v0 = vadd.f32 %v11007_v60, %v7209_v59 }
 0x594   :  { %v11076_v63 = vpop.f32.mrf.mxu1 }
 0x595   :  { %v11111_v2 = vpop.f32.mrf.mxu0  ;;  %v7349_v3 = vadd.f32 %v11042_v62, %v7279_v0  ;;  %v11077_v4 = vadd.f32 %v11076_v63, %v11075_v57 }
 0x596   :  { %v11145_v1 = vpop.f32.mrf.mxu1  ;;  %v11112_v6 = vadd.f32 %v11111_v2, %v11110_v61 }
 0x597   :  { %v11180_v5 = vpop.f32.mrf.mxu0  ;;  %v7419_v8 = vadd.f32 %v11077_v4, %v7349_v3 }
 0x598   :  { %v11146_v7 = vpop.f32.mrf.mxu1 }
 0x599   :  { %v11181_v10 = vpop.f32.mrf.mxu0  ;;  %v7489_v11 = vadd.f32 %v11112_v6, %v7419_v8  ;;  %v11147_v12 = vadd.f32 %v11146_v7, %v11145_v1 }
 0x59a   :  { %v11215_v9 = vpop.f32.mrf.mxu1  ;;  %v11182_v13 = vadd.f32 %v11181_v10, %v11180_v5 }
 0x59b   :  { %v11250_v51 = vpop.f32.mrf.mxu0  ;;  %v7559_v15 = vadd.f32 %v11147_v12, %v7489_v11 }
 0x59c   :  { %v11216_v14 = vpop.f32.mrf.mxu1 }
 0x59d   :  { %v11251_v17 = vpop.f32.mrf.mxu0  ;;  %v7629_v18 = vadd.f32 %v11182_v13, %v7559_v15  ;;  %v11217_v19 = vadd.f32 %v11216_v14, %v11215_v9 }
 0x59e   :  { %v11285_v16 = vpop.f32.mrf.mxu1  ;;  %v11252_v21 = vadd.f32 %v11251_v17, %v11250_v51 }
 0x59f   :  { %v11320_v20 = vpop.f32.mrf.mxu0  ;;  %v7699_v23 = vadd.f32 %v11217_v19, %v7629_v18 }
 0x5a0   :  { %v11286_v22 = vpop.f32.mrf.mxu1 }
 0x5a1   :  { %v11321_v25 = vpop.f32.mrf.mxu0  ;;  %v7769_v26 = vadd.f32 %v11252_v21, %v7699_v23  ;;  %v11287_v27 = vadd.f32 %v11286_v22, %v11285_v16 }
 0x5a2   :  { %v11355_v24 = vpop.f32.mrf.mxu1  ;;  %v11322_v29 = vadd.f32 %v11321_v25, %v11320_v20 }
 0x5a3   :  { %v11390_v28 = vpop.f32.mrf.mxu0  ;;  %v7839_v31 = vadd.f32 %v11287_v27, %v7769_v26 }
 0x5a4   :  { %v11356_v30 = vpop.f32.mrf.mxu1 }
 0x5a5   :  { %v11391_v33 = vpop.f32.mrf.mxu0  ;;  %v7909_v34 = vadd.f32 %v11322_v29, %v7839_v31  ;;  %v11357_v35 = vadd.f32 %v11356_v30, %v11355_v24 }
 0x5a6   :  { %v11425_v32 = vpop.f32.mrf.mxu1  ;;  %v11392_v37 = vadd.f32 %v11391_v33, %v11390_v28 }
 0x5a7   :  { %v11460_v36 = vpop.f32.mrf.mxu0  ;;  %v7979_v39 = vadd.f32 %v11357_v35, %v7909_v34 }
 0x5a8   :  { %v11426_v38 = vpop.f32.mrf.mxu1 }
 0x5a9   :  { %v11461_v41 = vpop.f32.mrf.mxu0  ;;  %v8049_v42 = vadd.f32 %v11392_v37, %v7979_v39  ;;  %v11427_v43 = vadd.f32 %v11426_v38, %v11425_v32 }
 0x5aa   :  { %v11495_v40 = vpop.f32.mrf.mxu1  ;;  %v11462_v45 = vadd.f32 %v11461_v41, %v11460_v36 }
 0x5ab   :  { %v11530_v44 = vpop.f32.mrf.mxu0  ;;  %v8119_v47 = vadd.f32 %v11427_v43, %v8049_v42 }
 0x5ac   :  { %v11496_v46 = vpop.f32.mrf.mxu1 }
 0x5ad   :  { %v11531_v49 = vpop.f32.mrf.mxu0  ;;  %v8189_v50 = vadd.f32 %v11462_v45, %v8119_v47  ;;  %v11497_v52 = vadd.f32 %v11496_v46, %v11495_v40 }
 0x5ae   :  { %v11565_v48 = vpop.f32.mrf.mxu1  ;;  %v11532_v54 = vadd.f32 %v11531_v49, %v11530_v44 }
 0x5af   :  { %v11600_v53 = vpop.f32.mrf.mxu0  ;;  %v8259_v56 = vadd.f32 %v11497_v52, %v8189_v50 }
 0x5b0   :  { %v11566_v55 = vpop.f32.mrf.mxu1 }
 0x5b1   :  { %v11601_v58 = vpop.f32.mrf.mxu0  ;;  %v8329_v59 = vadd.f32 %v11532_v54, %v8259_v56  ;;  %v11567_v60 = vadd.f32 %v11566_v55, %v11565_v48 }
 0x5b2   :  { %v11635_v57 = vpop.f32.mrf.mxu1  ;;  %v11602_v62 = vadd.f32 %v11601_v58, %v11600_v53 }
 0x5b3   :  { %v11670_v61 = vpop.f32.mrf.mxu0  ;;  %v8399_v0 = vadd.f32 %v11567_v60, %v8329_v59 }
 0x5b4   :  { %v11636_v63 = vpop.f32.mrf.mxu1 }
 0x5b5   :  { %v11671_v2 = vpop.f32.mrf.mxu0  ;;  %v8469_v3 = vadd.f32 %v11602_v62, %v8399_v0  ;;  %v11637_v4 = vadd.f32 %v11636_v63, %v11635_v57 }
 0x5b6   :  { %v11705_v1 = vpop.f32.mrf.mxu1  ;;  %v11672_v6 = vadd.f32 %v11671_v2, %v11670_v61 }
 0x5b7   :  { %v8539_v8 = vadd.f32 %v11637_v4, %v8469_v3 }
 0x5b8   :  { %v11706_v7 = vpop.f32.mrf.mxu1 }
 0x5b9   :  { %v8609_v11 = vadd.f32 %v11672_v6, %v8539_v8  ;;  %v11707_v12 = vadd.f32 %v11706_v7, %v11705_v1 }
 0x5bb   :  { %v8679_v15 = vadd.f32 %v11707_v12, %v8609_v11 }
 0x5ce   :  { %v11740_v5 = vpop.f32.mrf.mxu0 }
 0x5d0   :  { %v11775_v9 = vpop.f32.mrf.mxu1  ;;  %v11741_v10 = vpop.f32.mrf.mxu0 }
 0x5d1   :  { %v11742_v13 = vadd.f32 %v11741_v10, %v11740_v5 }
 0x5d2   :  { %v11776_v14 = vpop.f32.mrf.mxu1 }
 0x5d3   :  { %v8749_v18 = vadd.f32 %v11742_v13, %v8679_v15  ;;  %v11777_v19 = vadd.f32 %v11776_v14, %v11775_v9 }
 0x5d5   :  { %v8819_v22 = vadd.f32 %v11777_v19, %v8749_v18 }
 0x5f0   :  { %v11810_v51 = vpop.f32.mrf.mxu0 }
 0x5f2   :  { %v11845_v16 = vpop.f32.mrf.mxu1  ;;  %v11811_v17 = vpop.f32.mrf.mxu0 }
 0x5f3   :  { %v11812_v20 = vadd.f32 %v11811_v17, %v11810_v51 }
 0x5f4   :  { %v11846_v21 = vpop.f32.mrf.mxu1 }
 0x5f5   :  { %v8889_v23 = vadd.f32 %v11812_v20, %v8819_v22  ;;  %v11847_v24 = vadd.f32 %v11846_v21, %v11845_v16 }
 0x5f7   :  { %v8959_v29 = vadd.f32 %v11847_v24, %v8889_v23 }
 0x613   :  { %v11880_v25 = vpop.f32.mrf.mxu0  ;;  %v11915_v26 = vpop.f32.mrf.mxu1 }
 0x615   :  { %v11881_v27 = vpop.f32.mrf.mxu0  ;;  %v11916_v28 = vpop.f32.mrf.mxu1 }
 0x616   :  { %v11882_v30 = vadd.f32 %v11881_v27, %v11880_v25  ;;  %v11917_v32 = vadd.f32 %v11916_v28, %v11915_v26 }
 0x618   :  { %v9029_v31 = vadd.f32 %v11882_v30, %v8959_v29 }
 0x61a   :  { %v9099_v33 = vadd.f32 %v11917_v32, %v9029_v31 }
 0x61c   :  { %9102 = vst [vmem:[#allocation2] sm:$0x3] %v9099_v33 }
 0x61d   :  { %11971 = shalt.err (!%p11968_p4)
}
 0x61e   :  { %9112 = dma.vmem_to_hbm [thread:$0]  %s9110_s23, 32, %s19895_s3, [#allocation3]  }
 0x61f   :  { %11980 = dma.done.wait [#allocation3], 32  }
 0x620   :  { %11981 = vsyncadd [#allocation3], 4294967264 }
 0x621   :  { %9116 = vsyncpa [#allocation3], 1 }

</bundles_post_ra>
